<compile_context>
chip_gen: v6e
topology: v6e:2x2x1
jax: 0.10.0
libtpu: 0.0.40
codegen_flags: <defaults>
</compile_context>

<pallas_src>
import functools

import jax
import jax.numpy as jnp
from jax.experimental import pallas as pl
from jax.experimental.pallas import tpu as pltpu


def _round_up(x, m):
    return (x + m - 1) // m * m


def _encoder_kernel(x_ref, ws_ref, bs_ref, wg_ref, bg_ref, we_ref, be_ref,
                    k_ref, v_ref, buf_a, buf_b,
                    *, seq_len, tile_t, halo, dilations, mid_p, out_p):
    """Fused EncoderAny forward for one (batch, time-tile) grid point.

    x_ref : (T_total, Cin_p)        bf16  zero-padded input (full padded T, one batch)
    ws_ref: (Cin_p, mid_p)          bf16  start 1x1 conv weight
    bs_ref: (1, mid_p)              f32
    wg_ref: (L, 5*mid_p, 2*mid_p)   bf16  im2col GLU weights (A half | G half)
    bg_ref: (L, 1, 2*mid_p)         f32
    we_ref: (mid_p, 2*out_p)        bf16  end 1x1 conv weight (K half | V half)
    be_ref: (1, 2*out_p)            f32
    k_ref, v_ref: (tile_t, out_p)   f32   outputs
    buf_a, buf_b: (tile_t + 2*halo, mid_p) f32 ping-pong resident activations
    """
    t = pl.program_id(1)
    l_full = tile_t + 2 * halo
    base = pl.multiple_of(t * tile_t, 8)
    bufs = (buf_a, buf_b)

    def mask_rows(vals, row0, length):
        # Zero rows whose global time index is outside [0, seq_len): this is
        # exactly the per-layer zero "same" padding of the reference module.
        gi = jax.lax.broadcasted_iota(jnp.int32, (length, 1), 0) + (
            t * tile_t - halo + row0)
        return jnp.where((gi >= 0) & (gi < seq_len), vals, 0.0)

    # ---- start: 1x1 conv over the halo-extended tile (bf16 MXU, f32 acc) ----
    xs = x_ref[pl.ds(base, l_full), :]                      # (l_full, Cin_p) bf16
    h = jax.lax.dot_general(xs, ws_ref[...], (((1,), (0,)), ((), ())),
                            preferred_element_type=jnp.float32)
    buf_a[...] = mask_rows(h + bs_ref[...], 0, l_full)

    # ---- GLU stack: statically unrolled, activation resident in f32 VMEM ----
    off, l_cur = 0, l_full
    for i, d in enumerate(dilations):
        src, dst = bufs[i % 2], bufs[(i + 1) % 2]
        l_next = l_cur - 4 * d          # each side consumes its 2*d halo
        off_next = off + 2 * d
        # im2col: 5 dilated shifts side-by-side on the lane axis -> one matmul.
        col = jnp.concatenate(
            [src[off + k * d:off + k * d + l_next, :] for k in range(5)],
            axis=-1).astype(jnp.bfloat16)                   # (l_next, 5*mid_p)
        y = jax.lax.dot_general(col, wg_ref[i], (((1,), (0,)), ((), ())),
                                preferred_element_type=jnp.float32)
        y = y + bg_ref[i]
        a = y[:, :mid_p]                                    # 128-aligned split
        g = y[:, mid_p:]
        res = src[off_next:off_next + l_next, :]            # f32 residual path
        out = res + a * jax.nn.sigmoid(g)
        dst[off_next:off_next + l_next, :] = mask_rows(out, off_next, l_next)
        off, l_cur = off_next, l_next
    assert off == halo and l_cur == tile_t  # trace-time sanity

    # ---- end: 1x1 conv -> (K, V) as two lane-dense outputs ----
    hf = bufs[len(dilations) % 2][halo:halo + tile_t, :].astype(jnp.bfloat16)
    y = jax.lax.dot_general(hf, we_ref[...], (((1,), (0,)), ((), ())),
                            preferred_element_type=jnp.float32)
    y = y + be_ref[...]
    k_ref[...] = y[:, :out_p].astype(k_ref.dtype)
    v_ref[...] = y[:, out_p:].astype(v_ref.dtype)


def init_encoder_params(key, in_ch, out_ch, mid_ch, num_layers=8):
    """Parameter structure matching the PyTorch module (weights as (K, Cin, Cout))."""
    def conv_init(k, ksize, cin, cout):
        kw, kb = jax.random.split(k)
        scale = 1.0 / jnp.sqrt(jnp.float32(cin * ksize))
        w = jax.random.normal(kw, (ksize, cin, cout), jnp.float32) * scale
        b = jax.random.normal(kb, (cout,), jnp.float32) * 0.01
        return w, b

    keys = jax.random.split(key, num_layers + 2)
    return {
        "start": conv_init(keys[0], 1, in_ch, mid_ch),
        "glu": [conv_init(keys[1 + i], 5, mid_ch, 2 * mid_ch)
                for i in range(num_layers)],
        "end": conv_init(keys[-1], 1, mid_ch, 2 * out_ch),
    }


def _pack_params(params, in_ch, mid_ch, out_ch, num_layers, cin_p, mid_p, out_p):
    """Pad channels to 128 lanes, align GLU(A|G) / end(K|V) halves on 128-lane
    boundaries, and build tap-major im2col weight matrices (bf16)."""
    w0, b0 = params["start"]
    ws = jnp.zeros((cin_p, mid_p), jnp.bfloat16)
    ws = ws.at[:in_ch, :mid_ch].set(w0[0].astype(jnp.bfloat16))
    bs = jnp.zeros((1, mid_p), jnp.float32).at[0, :mid_ch].set(b0)

    wg = jnp.zeros((num_layers, 5 * mid_p, 2 * mid_p), jnp.bfloat16)
    bg = jnp.zeros((num_layers, 1, 2 * mid_p), jnp.float32)
    for i in range(num_layers):
        w, b = params["glu"][i]                 # (5, mid, 2*mid), (2*mid,)
        wbf = w.astype(jnp.bfloat16)
        for k in range(5):
            r = k * mid_p
            wg = wg.at[i, r:r + mid_ch, :mid_ch].set(wbf[k, :, :mid_ch])
            wg = wg.at[i, r:r + mid_ch, mid_p:mid_p + mid_ch].set(wbf[k, :, mid_ch:])
        bg = bg.at[i, 0, :mid_ch].set(b[:mid_ch])
        bg = bg.at[i, 0, mid_p:mid_p + mid_ch].set(b[mid_ch:])

    w2, b2 = params["end"]                      # (1, mid, 2*out), (2*out,)
    we = jnp.zeros((mid_p, 2 * out_p), jnp.bfloat16)
    we = we.at[:mid_ch, :out_ch].set(w2[0, :, :out_ch].astype(jnp.bfloat16))
    we = we.at[:mid_ch, out_p:out_p + out_ch].set(w2[0, :, out_ch:].astype(jnp.bfloat16))
    be = jnp.zeros((1, 2 * out_p), jnp.float32)
    be = be.at[0, :out_ch].set(b2[:out_ch])
    be = be.at[0, out_p:out_p + out_ch].set(b2[out_ch:])
    return ws, bs, wg, bg, we, be


def encoder_any_forward(x, params, out_ch, num_layers=8, tile_t_max=512):
    """x: (B, T, in_ch) -> (K, V), each (B, T, out_ch). Inference (no dropout)."""
    B, T, in_ch = x.shape
    mid_ch = params["start"][0].shape[2]
    dilations = tuple(3 ** (i % 4) for i in range(num_layers))
    halo = sum(2 * d for d in dilations)

    cin_p = _round_up(in_ch, 128)
    mid_p = _round_up(mid_ch, 128)
    out_p = _round_up(out_ch, 128)
    tile_t = min(_round_up(tile_t_max, 8), _round_up(T, 8))
    t_pad = _round_up(T, tile_t)
    t_total = t_pad + 2 * halo

    # One zero-pad of the small (in_ch-wide) input covers every layer's halo.
    xp = jnp.pad(x, ((0, 0), (halo, halo + (t_pad - T)), (0, cin_p - in_ch)))
    xp = xp.astype(jnp.bfloat16)

    # NOTE: in production pack once at model-load time, not per forward call.
    ws, bs, wg, bg, we, be = _pack_params(
        params, in_ch, mid_ch, out_ch, num_layers, cin_p, mid_p, out_p)

    kernel = functools.partial(
        _encoder_kernel, seq_len=T, tile_t=tile_t, halo=halo,
        dilations=dilations, mid_p=mid_p, out_p=out_p)

    ko, vo = pl.pallas_call(
        kernel,
        out_shape=(jax.ShapeDtypeStruct((B, t_pad, out_p), jnp.float32),
                   jax.ShapeDtypeStruct((B, t_pad, out_p), jnp.float32)),
        grid=(B, t_pad // tile_t),
        in_specs=[
            pl.BlockSpec((None, t_total, cin_p), lambda b, t: (b, 0, 0)),
            pl.BlockSpec(ws.shape, lambda b, t: (0, 0)),
            pl.BlockSpec(bs.shape, lambda b, t: (0, 0)),
            pl.BlockSpec(wg.shape, lambda b, t: (0, 0, 0)),
            pl.BlockSpec(bg.shape, lambda b, t: (0, 0, 0)),
            pl.BlockSpec(we.shape, lambda b, t: (0, 0)),
            pl.BlockSpec(be.shape, lambda b, t: (0, 0)),
        ],
        out_specs=[
            pl.BlockSpec((None, tile_t, out_p), lambda b, t: (b, t, 0)),
            pl.BlockSpec((None, tile_t, out_p), lambda b, t: (b, t, 0)),
        ],
        scratch_shapes=[
            pltpu.VMEM((tile_t + 2 * halo, mid_p), jnp.float32),
            pltpu.VMEM((tile_t + 2 * halo, mid_p), jnp.float32),
        ],
        compiler_params=pltpu.CompilerParams(
            dimension_semantics=("parallel", "parallel"),
            vmem_limit_bytes=48 * 1024 * 1024),
    )(xp, ws, bs, wg, bg, we, be)

    return ko[:, :T, :out_ch], vo[:, :T, :out_ch]


def _reference_forward(x, params, out_ch, num_layers):
    """Pure-JAX f32 reference with identical conv/GLU semantics."""
    def conv1d(h, w, b, d):
        K = w.shape[0]
        pad = (K - 1) // 2 * d
        hp = jnp.pad(h, ((0, 0), (pad, pad), (0, 0)))
        T = h.shape[1]
        acc = jnp.zeros(h.shape[:2] + (w.shape[2],), jnp.float32)
        for k in range(K):
            acc = acc + jnp.einsum("btc,co->bto", hp[:, k * d:k * d + T, :], w[k])
        return acc + b

    h = conv1d(x, *params["start"], 1)
    for i in range(num_layers):
        w, b = params["glu"][i]
        y = conv1d(h, w, b, 3 ** (i % 4))
        m = w.shape[2] // 2
        h = h + y[..., :m] * jax.nn.sigmoid(y[..., m:])
    y = conv1d(h, *params["end"], 1)
    return y[..., :out_ch], y[..., out_ch:]


if __name__ == "__main__":
    B, T = 2, 16
    in_ch, mid_ch, out_ch, num_layers = 4, 32, 8, 8

    key = jax.random.PRNGKey(0)
    k_x, k_p = jax.random.split(key)
    # PyTorch input would be (B, in_ch, T); we use channels-last (B, T, in_ch).
    x = jax.random.normal(k_x, (B, T, in_ch), jnp.float32)
    params = init_encoder_params(k_p, in_ch, out_ch, mid_ch, num_layers)

    K, V = encoder_any_forward(x, params, out_ch, num_layers)
    jax.block_until_ready((K, V))
    assert K.shape == (B, T, out_ch) and V.shape == (B, T, out_ch)

    # Sanity-check against a pure-JAX f32 reference (bf16-MXU tolerance).
    K_ref, V_ref = _reference_forward(x, params, out_ch, num_layers)
    err = float(jnp.maximum(jnp.max(jnp.abs(K - K_ref)), jnp.max(jnp.abs(V - V_ref))))
    scale = float(jnp.maximum(jnp.max(jnp.abs(K_ref)), jnp.max(jnp.abs(V_ref))))
    assert err <= 0.1 * scale + 0.1, f"mismatch: max_err={err} vs scale={scale}"

    print("KERNEL_OK")
</pallas_src>

<mosaic_0001>
module attributes {stable_mosaic.version = 11 : i64} {
  func.func @_encoder_kernel(%arg0: i32, %arg1: i32, %arg2: memref<1x336x128xbf16, #tpu.memory_space<vmem>>, %arg3: memref<128x128xbf16, #tpu.memory_space<vmem>>, %arg4: memref<1x128xf32, #tpu.memory_space<vmem>>, %arg5: memref<8x640x256xbf16, #tpu.memory_space<vmem>>, %arg6: memref<8x1x256xf32, #tpu.memory_space<vmem>>, %arg7: memref<128x256xbf16, #tpu.memory_space<vmem>>, %arg8: memref<1x256xf32, #tpu.memory_space<vmem>>, %arg9: memref<1x16x128xf32, #tpu.memory_space<vmem>>, %arg10: memref<1x16x128xf32, #tpu.memory_space<vmem>>, %arg11: memref<336x128xf32, #tpu.memory_space<vmem>>, %arg12: memref<336x128xf32, #tpu.memory_space<vmem>>) attributes {dimension_semantics = [#tpu.dimension_semantics<parallel>, #tpu.dimension_semantics<parallel>], iteration_bounds = array<i64: 2, 1>, scalar_prefetch = 0 : i64, scratch_operands = 2 : i64, tpu.core_type = #tpu.core_type<tc>, window_params = [{transform_indices = @transform_0, window_bounds = array<i64: 1, 336, 128>}, {pipeline_mode = #tpu.pipeline_mode<synchronous>, transform_indices = @transform_1, window_bounds = array<i64: 128, 128>}, {pipeline_mode = #tpu.pipeline_mode<synchronous>, transform_indices = @transform_2, window_bounds = array<i64: 1, 128>}, {pipeline_mode = #tpu.pipeline_mode<synchronous>, transform_indices = @transform_3, window_bounds = array<i64: 8, 640, 256>}, {pipeline_mode = #tpu.pipeline_mode<synchronous>, transform_indices = @transform_4, window_bounds = array<i64: 8, 1, 256>}, {pipeline_mode = #tpu.pipeline_mode<synchronous>, transform_indices = @transform_5, window_bounds = array<i64: 128, 256>}, {pipeline_mode = #tpu.pipeline_mode<synchronous>, transform_indices = @transform_6, window_bounds = array<i64: 1, 256>}, {transform_indices = @transform_7, window_bounds = array<i64: 1, 16, 128>}, {transform_indices = @transform_8, window_bounds = array<i64: 1, 16, 128>}]} {
    %c16_i32 = arith.constant 16 : i32
    %0 = arith.muli %arg1, %c16_i32 : i32
    %1 = tpu.assume_multiple %0, 8 : i32
    %c0 = arith.constant 0 : index
    %2 = arith.index_cast %1 : i32 to index
    %c0_0 = arith.constant 0 : index
    %3 = vector.load %arg2[%c0, %2, %c0_0] : memref<1x336x128xbf16, #tpu.memory_space<vmem>>, vector<1x336x128xbf16>
    %4 = vector.shape_cast %3 : vector<1x336x128xbf16> to vector<336x128xbf16>
    %c0_1 = arith.constant 0 : index
    %c0_2 = arith.constant 0 : index
    %5 = vector.load %arg3[%c0_1, %c0_2] : memref<128x128xbf16, #tpu.memory_space<vmem>>, vector<128x128xbf16>
    %cst = arith.constant dense<0.000000e+00> : vector<336x128xf32>
    %6 = tpu.matmul %4, %5, %cst {dimension_numbers = #tpu.dot_dimension_numbers<[1], [0], [0], [1], [0, 0, 1, 1], [], []>} : vector<336x128xbf16>, vector<128x128xbf16>, vector<336x128xf32> -> vector<336x128xf32>
    %c0_3 = arith.constant 0 : index
    %c0_4 = arith.constant 0 : index
    %7 = vector.load %arg4[%c0_3, %c0_4] : memref<1x128xf32, #tpu.memory_space<vmem>>, vector<1x128xf32>
    %8 = vector.broadcast %7 : vector<1x128xf32> to vector<336x128xf32>
    %9 = arith.addf %6, %8 : vector<336x128xf32>
    %10 = tpu.iota {dimensions = array<i32: 0>} : vector<336x1xi32>
    %c16_i32_5 = arith.constant 16 : i32
    %11 = arith.muli %arg1, %c16_i32_5 : i32
    %c160_i32 = arith.constant 160 : i32
    %12 = arith.subi %11, %c160_i32 : i32
    %c0_i32 = arith.constant 0 : i32
    %13 = arith.addi %12, %c0_i32 : i32
    %14 = vector.broadcast %13 : i32 to vector<336x1xi32>
    %15 = arith.addi %10, %14 : vector<336x1xi32>
    %c0_i32_6 = arith.constant 0 : i32
    %16 = vector.broadcast %c0_i32_6 : i32 to vector<336x1xi32>
    %17 = arith.cmpi sge, %15, %16 : vector<336x1xi32>
    %c16_i32_7 = arith.constant 16 : i32
    %18 = vector.broadcast %c16_i32_7 : i32 to vector<336x1xi32>
    %19 = arith.cmpi slt, %15, %18 : vector<336x1xi32>
    %20 = arith.andi %17, %19 : vector<336x1xi1>
    %cst_8 = arith.constant 0.000000e+00 : f32
    %21 = vector.shape_cast %20 : vector<336x1xi1> to vector<336x1xi1>
    %22 = vector.broadcast %21 : vector<336x1xi1> to vector<336x128xi1>
    %23 = vector.broadcast %cst_8 : f32 to vector<336x128xf32>
    %24 = arith.select %22, %9, %23 : vector<336x128xi1>, vector<336x128xf32>
    %c0_9 = arith.constant 0 : index
    %c0_10 = arith.constant 0 : index
    %25 = vector.load %arg11[%c0_9, %c0_10] : memref<336x128xf32, #tpu.memory_space<vmem>>, vector<336x128xf32>
    tpu.vector_store %arg11[%c0_9, %c0_10], %24 {strides = array<i32>} : memref<336x128xf32, #tpu.memory_space<vmem>>, vector<336x128xf32>,
    %c0_11 = arith.constant 0 : index
    %c0_12 = arith.constant 0 : index
    %26 = vector.load %arg11[%c0_11, %c0_12] : memref<336x128xf32, #tpu.memory_space<vmem>>, vector<332x128xf32>
    %c1 = arith.constant 1 : index
    %c0_13 = arith.constant 0 : index
    %27 = vector.load %arg11[%c1, %c0_13] : memref<336x128xf32, #tpu.memory_space<vmem>>, vector<332x128xf32>
    %c2 = arith.constant 2 : index
    %c0_14 = arith.constant 0 : index
    %28 = vector.load %arg11[%c2, %c0_14] : memref<336x128xf32, #tpu.memory_space<vmem>>, vector<332x128xf32>
    %c3 = arith.constant 3 : index
    %c0_15 = arith.constant 0 : index
    %29 = vector.load %arg11[%c3, %c0_15] : memref<336x128xf32, #tpu.memory_space<vmem>>, vector<332x128xf32>
    %c4 = arith.constant 4 : index
    %c0_16 = arith.constant 0 : index
    %30 = vector.load %arg11[%c4, %c0_16] : memref<336x128xf32, #tpu.memory_space<vmem>>, vector<332x128xf32>
    %31 = tpu.concatenate %26, %27, %28, %29, %30 in 1 : vector<332x128xf32>, vector<332x128xf32>, vector<332x128xf32>, vector<332x128xf32>, vector<332x128xf32> -> vector<332x640xf32>
    %32 = arith.truncf %31 : vector<332x640xf32> to vector<332x640xbf16>
    %c0_17 = arith.constant 0 : index
    %c0_18 = arith.constant 0 : index
    %c0_19 = arith.constant 0 : index
    %33 = vector.load %arg5[%c0_17, %c0_18, %c0_19] : memref<8x640x256xbf16, #tpu.memory_space<vmem>>, vector<1x640x256xbf16>
    %34 = vector.shape_cast %33 : vector<1x640x256xbf16> to vector<640x256xbf16>
    %cst_20 = arith.constant dense<0.000000e+00> : vector<332x256xf32>
    %35 = tpu.matmul %32, %34, %cst_20 {dimension_numbers = #tpu.dot_dimension_numbers<[1], [0], [0], [1], [0, 0, 1, 1], [], []>} : vector<332x640xbf16>, vector<640x256xbf16>, vector<332x256xf32> -> vector<332x256xf32>
    %c0_21 = arith.constant 0 : index
    %c0_22 = arith.constant 0 : index
    %c0_23 = arith.constant 0 : index
    %36 = vector.load %arg6[%c0_21, %c0_22, %c0_23] : memref<8x1x256xf32, #tpu.memory_space<vmem>>, vector<1x1x256xf32>
    %37 = vector.shape_cast %36 : vector<1x1x256xf32> to vector<1x256xf32>
    %38 = vector.broadcast %37 : vector<1x256xf32> to vector<332x256xf32>
    %39 = arith.addf %35, %38 : vector<332x256xf32>
    %40 = vector.extract_strided_slice %39 {offsets = [0, 0], sizes = [332, 128], strides = [1, 1]} : vector<332x256xf32> to vector<332x128xf32>
    %41 = vector.extract_strided_slice %39 {offsets = [0, 128], sizes = [332, 128], strides = [1, 1]} : vector<332x256xf32> to vector<332x128xf32>
    %c2_24 = arith.constant 2 : index
    %c0_25 = arith.constant 0 : index
    %42 = vector.load %arg11[%c2_24, %c0_25] : memref<336x128xf32, #tpu.memory_space<vmem>>, vector<332x128xf32>
    %43 = arith.negf %41 : vector<332x128xf32>
    %44 = math.exp %43 : vector<332x128xf32>
    %cst_26 = arith.constant 1.000000e+00 : f32
    %45 = vector.broadcast %cst_26 : f32 to vector<332x128xf32>
    %46 = arith.addf %45, %44 : vector<332x128xf32>
    %47 = arith.divf %45, %46 : vector<332x128xf32>
    %48 = arith.mulf %40, %47 : vector<332x128xf32>
    %49 = arith.addf %42, %48 : vector<332x128xf32>
    %50 = tpu.iota {dimensions = array<i32: 0>} : vector<332x1xi32>
    %c16_i32_27 = arith.constant 16 : i32
    %51 = arith.muli %arg1, %c16_i32_27 : i32
    %c160_i32_28 = arith.constant 160 : i32
    %52 = arith.subi %51, %c160_i32_28 : i32
    %c2_i32 = arith.constant 2 : i32
    %53 = arith.addi %52, %c2_i32 : i32
    %54 = vector.broadcast %53 : i32 to vector<332x1xi32>
    %55 = arith.addi %50, %54 : vector<332x1xi32>
    %c0_i32_29 = arith.constant 0 : i32
    %56 = vector.broadcast %c0_i32_29 : i32 to vector<332x1xi32>
    %57 = arith.cmpi sge, %55, %56 : vector<332x1xi32>
    %c16_i32_30 = arith.constant 16 : i32
    %58 = vector.broadcast %c16_i32_30 : i32 to vector<332x1xi32>
    %59 = arith.cmpi slt, %55, %58 : vector<332x1xi32>
    %60 = arith.andi %57, %59 : vector<332x1xi1>
    %cst_31 = arith.constant 0.000000e+00 : f32
    %61 = vector.shape_cast %60 : vector<332x1xi1> to vector<332x1xi1>
    %62 = vector.broadcast %61 : vector<332x1xi1> to vector<332x128xi1>
    %63 = vector.broadcast %cst_31 : f32 to vector<332x128xf32>
    %64 = arith.select %62, %49, %63 : vector<332x128xi1>, vector<332x128xf32>
    %c2_32 = arith.constant 2 : index
    %c0_33 = arith.constant 0 : index
    %65 = vector.load %arg12[%c2_32, %c0_33] : memref<336x128xf32, #tpu.memory_space<vmem>>, vector<332x128xf32>
    tpu.vector_store %arg12[%c2_32, %c0_33], %64 {strides = array<i32>} : memref<336x128xf32, #tpu.memory_space<vmem>>, vector<332x128xf32>,
    %c2_34 = arith.constant 2 : index
    %c0_35 = arith.constant 0 : index
    %66 = vector.load %arg12[%c2_34, %c0_35] : memref<336x128xf32, #tpu.memory_space<vmem>>, vector<320x128xf32>
    %c5 = arith.constant 5 : index
    %c0_36 = arith.constant 0 : index
    %67 = vector.load %arg12[%c5, %c0_36] : memref<336x128xf32, #tpu.memory_space<vmem>>, vector<320x128xf32>
    %c8 = arith.constant 8 : index
    %c0_37 = arith.constant 0 : index
    %68 = vector.load %arg12[%c8, %c0_37] : memref<336x128xf32, #tpu.memory_space<vmem>>, vector<320x128xf32>
    %c11 = arith.constant 11 : index
    %c0_38 = arith.constant 0 : index
    %69 = vector.load %arg12[%c11, %c0_38] : memref<336x128xf32, #tpu.memory_space<vmem>>, vector<320x128xf32>
    %c14 = arith.constant 14 : index
    %c0_39 = arith.constant 0 : index
    %70 = vector.load %arg12[%c14, %c0_39] : memref<336x128xf32, #tpu.memory_space<vmem>>, vector<320x128xf32>
    %71 = tpu.concatenate %66, %67, %68, %69, %70 in 1 : vector<320x128xf32>, vector<320x128xf32>, vector<320x128xf32>, vector<320x128xf32>, vector<320x128xf32> -> vector<320x640xf32>
    %72 = arith.truncf %71 : vector<320x640xf32> to vector<320x640xbf16>
    %c1_40 = arith.constant 1 : index
    %c0_41 = arith.constant 0 : index
    %c0_42 = arith.constant 0 : index
    %73 = vector.load %arg5[%c1_40, %c0_41, %c0_42] : memref<8x640x256xbf16, #tpu.memory_space<vmem>>, vector<1x640x256xbf16>
    %74 = vector.shape_cast %73 : vector<1x640x256xbf16> to vector<640x256xbf16>
    %cst_43 = arith.constant dense<0.000000e+00> : vector<320x256xf32>
    %75 = tpu.matmul %72, %74, %cst_43 {dimension_numbers = #tpu.dot_dimension_numbers<[1], [0], [0], [1], [0, 0, 1, 1], [], []>} : vector<320x640xbf16>, vector<640x256xbf16>, vector<320x256xf32> -> vector<320x256xf32>
    %c1_44 = arith.constant 1 : index
    %c0_45 = arith.constant 0 : index
    %c0_46 = arith.constant 0 : index
    %76 = vector.load %arg6[%c1_44, %c0_45, %c0_46] : memref<8x1x256xf32, #tpu.memory_space<vmem>>, vector<1x1x256xf32>
    %77 = vector.shape_cast %76 : vector<1x1x256xf32> to vector<1x256xf32>
    %78 = vector.broadcast %77 : vector<1x256xf32> to vector<320x256xf32>
    %79 = arith.addf %75, %78 : vector<320x256xf32>
    %80 = vector.extract_strided_slice %79 {offsets = [0, 0], sizes = [320, 128], strides = [1, 1]} : vector<320x256xf32> to vector<320x128xf32>
    %81 = vector.extract_strided_slice %79 {offsets = [0, 128], sizes = [320, 128], strides = [1, 1]} : vector<320x256xf32> to vector<320x128xf32>
    %c8_47 = arith.constant 8 : index
    %c0_48 = arith.constant 0 : index
    %82 = vector.load %arg12[%c8_47, %c0_48] : memref<336x128xf32, #tpu.memory_space<vmem>>, vector<320x128xf32>
    %83 = arith.negf %81 : vector<320x128xf32>
    %84 = math.exp %83 : vector<320x128xf32>
    %cst_49 = arith.constant 1.000000e+00 : f32
    %85 = vector.broadcast %cst_49 : f32 to vector<320x128xf32>
    %86 = arith.addf %85, %84 : vector<320x128xf32>
    %87 = arith.divf %85, %86 : vector<320x128xf32>
    %88 = arith.mulf %80, %87 : vector<320x128xf32>
    %89 = arith.addf %82, %88 : vector<320x128xf32>
    %90 = tpu.iota {dimensions = array<i32: 0>} : vector<320x1xi32>
    %c16_i32_50 = arith.constant 16 : i32
    %91 = arith.muli %arg1, %c16_i32_50 : i32
    %c160_i32_51 = arith.constant 160 : i32
    %92 = arith.subi %91, %c160_i32_51 : i32
    %c8_i32 = arith.constant 8 : i32
    %93 = arith.addi %92, %c8_i32 : i32
    %94 = vector.broadcast %93 : i32 to vector<320x1xi32>
    %95 = arith.addi %90, %94 : vector<320x1xi32>
    %c0_i32_52 = arith.constant 0 : i32
    %96 = vector.broadcast %c0_i32_52 : i32 to vector<320x1xi32>
    %97 = arith.cmpi sge, %95, %96 : vector<320x1xi32>
    %c16_i32_53 = arith.constant 16 : i32
    %98 = vector.broadcast %c16_i32_53 : i32 to vector<320x1xi32>
    %99 = arith.cmpi slt, %95, %98 : vector<320x1xi32>
    %100 = arith.andi %97, %99 : vector<320x1xi1>
    %cst_54 = arith.constant 0.000000e+00 : f32
    %101 = vector.shape_cast %100 : vector<320x1xi1> to vector<320x1xi1>
    %102 = vector.broadcast %101 : vector<320x1xi1> to vector<320x128xi1>
    %103 = vector.broadcast %cst_54 : f32 to vector<320x128xf32>
    %104 = arith.select %102, %89, %103 : vector<320x128xi1>, vector<320x128xf32>
    %c8_55 = arith.constant 8 : index
    %c0_56 = arith.constant 0 : index
    %105 = vector.load %arg11[%c8_55, %c0_56] : memref<336x128xf32, #tpu.memory_space<vmem>>, vector<320x128xf32>
    tpu.vector_store %arg11[%c8_55, %c0_56], %104 {strides = array<i32>} : memref<336x128xf32, #tpu.memory_space<vmem>>, vector<320x128xf32>,
    %c8_57 = arith.constant 8 : index
    %c0_58 = arith.constant 0 : index
    %106 = vector.load %arg11[%c8_57, %c0_58] : memref<336x128xf32, #tpu.memory_space<vmem>>, vector<284x128xf32>
    %c17 = arith.constant 17 : index
    %c0_59 = arith.constant 0 : index
    %107 = vector.load %arg11[%c17, %c0_59] : memref<336x128xf32, #tpu.memory_space<vmem>>, vector<284x128xf32>
    %c26 = arith.constant 26 : index
    %c0_60 = arith.constant 0 : index
    %108 = vector.load %arg11[%c26, %c0_60] : memref<336x128xf32, #tpu.memory_space<vmem>>, vector<284x128xf32>
    %c35 = arith.constant 35 : index
    %c0_61 = arith.constant 0 : index
    %109 = vector.load %arg11[%c35, %c0_61] : memref<336x128xf32, #tpu.memory_space<vmem>>, vector<284x128xf32>
    %c44 = arith.constant 44 : index
    %c0_62 = arith.constant 0 : index
    %110 = vector.load %arg11[%c44, %c0_62] : memref<336x128xf32, #tpu.memory_space<vmem>>, vector<284x128xf32>
    %111 = tpu.concatenate %106, %107, %108, %109, %110 in 1 : vector<284x128xf32>, vector<284x128xf32>, vector<284x128xf32>, vector<284x128xf32>, vector<284x128xf32> -> vector<284x640xf32>
    %112 = arith.truncf %111 : vector<284x640xf32> to vector<284x640xbf16>
    %c2_63 = arith.constant 2 : index
    %c0_64 = arith.constant 0 : index
    %c0_65 = arith.constant 0 : index
    %113 = vector.load %arg5[%c2_63, %c0_64, %c0_65] : memref<8x640x256xbf16, #tpu.memory_space<vmem>>, vector<1x640x256xbf16>
    %114 = vector.shape_cast %113 : vector<1x640x256xbf16> to vector<640x256xbf16>
    %cst_66 = arith.constant dense<0.000000e+00> : vector<284x256xf32>
    %115 = tpu.matmul %112, %114, %cst_66 {dimension_numbers = #tpu.dot_dimension_numbers<[1], [0], [0], [1], [0, 0, 1, 1], [], []>} : vector<284x640xbf16>, vector<640x256xbf16>, vector<284x256xf32> -> vector<284x256xf32>
    %c2_67 = arith.constant 2 : index
    %c0_68 = arith.constant 0 : index
    %c0_69 = arith.constant 0 : index
    %116 = vector.load %arg6[%c2_67, %c0_68, %c0_69] : memref<8x1x256xf32, #tpu.memory_space<vmem>>, vector<1x1x256xf32>
    %117 = vector.shape_cast %116 : vector<1x1x256xf32> to vector<1x256xf32>
    %118 = vector.broadcast %117 : vector<1x256xf32> to vector<284x256xf32>
    %119 = arith.addf %115, %118 : vector<284x256xf32>
    %120 = vector.extract_strided_slice %119 {offsets = [0, 0], sizes = [284, 128], strides = [1, 1]} : vector<284x256xf32> to vector<284x128xf32>
    %121 = vector.extract_strided_slice %119 {offsets = [0, 128], sizes = [284, 128], strides = [1, 1]} : vector<284x256xf32> to vector<284x128xf32>
    %c26_70 = arith.constant 26 : index
    %c0_71 = arith.constant 0 : index
    %122 = vector.load %arg11[%c26_70, %c0_71] : memref<336x128xf32, #tpu.memory_space<vmem>>, vector<284x128xf32>
    %123 = arith.negf %121 : vector<284x128xf32>
    %124 = math.exp %123 : vector<284x128xf32>
    %cst_72 = arith.constant 1.000000e+00 : f32
    %125 = vector.broadcast %cst_72 : f32 to vector<284x128xf32>
    %126 = arith.addf %125, %124 : vector<284x128xf32>
    %127 = arith.divf %125, %126 : vector<284x128xf32>
    %128 = arith.mulf %120, %127 : vector<284x128xf32>
    %129 = arith.addf %122, %128 : vector<284x128xf32>
    %130 = tpu.iota {dimensions = array<i32: 0>} : vector<284x1xi32>
    %c16_i32_73 = arith.constant 16 : i32
    %131 = arith.muli %arg1, %c16_i32_73 : i32
    %c160_i32_74 = arith.constant 160 : i32
    %132 = arith.subi %131, %c160_i32_74 : i32
    %c26_i32 = arith.constant 26 : i32
    %133 = arith.addi %132, %c26_i32 : i32
    %134 = vector.broadcast %133 : i32 to vector<284x1xi32>
    %135 = arith.addi %130, %134 : vector<284x1xi32>
    %c0_i32_75 = arith.constant 0 : i32
    %136 = vector.broadcast %c0_i32_75 : i32 to vector<284x1xi32>
    %137 = arith.cmpi sge, %135, %136 : vector<284x1xi32>
    %c16_i32_76 = arith.constant 16 : i32
    %138 = vector.broadcast %c16_i32_76 : i32 to vector<284x1xi32>
    %139 = arith.cmpi slt, %135, %138 : vector<284x1xi32>
    %140 = arith.andi %137, %139 : vector<284x1xi1>
    %cst_77 = arith.constant 0.000000e+00 : f32
    %141 = vector.shape_cast %140 : vector<284x1xi1> to vector<284x1xi1>
    %142 = vector.broadcast %141 : vector<284x1xi1> to vector<284x128xi1>
    %143 = vector.broadcast %cst_77 : f32 to vector<284x128xf32>
    %144 = arith.select %142, %129, %143 : vector<284x128xi1>, vector<284x128xf32>
    %c26_78 = arith.constant 26 : index
    %c0_79 = arith.constant 0 : index
    %145 = vector.load %arg12[%c26_78, %c0_79] : memref<336x128xf32, #tpu.memory_space<vmem>>, vector<284x128xf32>
    tpu.vector_store %arg12[%c26_78, %c0_79], %144 {strides = array<i32>} : memref<336x128xf32, #tpu.memory_space<vmem>>, vector<284x128xf32>,
    %c26_80 = arith.constant 26 : index
    %c0_81 = arith.constant 0 : index
    %146 = vector.load %arg12[%c26_80, %c0_81] : memref<336x128xf32, #tpu.memory_space<vmem>>, vector<176x128xf32>
    %c53 = arith.constant 53 : index
    %c0_82 = arith.constant 0 : index
    %147 = vector.load %arg12[%c53, %c0_82] : memref<336x128xf32, #tpu.memory_space<vmem>>, vector<176x128xf32>
    %c80 = arith.constant 80 : index
    %c0_83 = arith.constant 0 : index
    %148 = vector.load %arg12[%c80, %c0_83] : memref<336x128xf32, #tpu.memory_space<vmem>>, vector<176x128xf32>
    %c107 = arith.constant 107 : index
    %c0_84 = arith.constant 0 : index
    %149 = vector.load %arg12[%c107, %c0_84] : memref<336x128xf32, #tpu.memory_space<vmem>>, vector<176x128xf32>
    %c134 = arith.constant 134 : index
    %c0_85 = arith.constant 0 : index
    %150 = vector.load %arg12[%c134, %c0_85] : memref<336x128xf32, #tpu.memory_space<vmem>>, vector<176x128xf32>
    %151 = tpu.concatenate %146, %147, %148, %149, %150 in 1 : vector<176x128xf32>, vector<176x128xf32>, vector<176x128xf32>, vector<176x128xf32>, vector<176x128xf32> -> vector<176x640xf32>
    %152 = arith.truncf %151 : vector<176x640xf32> to vector<176x640xbf16>
    %c3_86 = arith.constant 3 : index
    %c0_87 = arith.constant 0 : index
    %c0_88 = arith.constant 0 : index
    %153 = vector.load %arg5[%c3_86, %c0_87, %c0_88] : memref<8x640x256xbf16, #tpu.memory_space<vmem>>, vector<1x640x256xbf16>
    %154 = vector.shape_cast %153 : vector<1x640x256xbf16> to vector<640x256xbf16>
    %cst_89 = arith.constant dense<0.000000e+00> : vector<176x256xf32>
    %155 = tpu.matmul %152, %154, %cst_89 {dimension_numbers = #tpu.dot_dimension_numbers<[1], [0], [0], [1], [0, 0, 1, 1], [], []>} : vector<176x640xbf16>, vector<640x256xbf16>, vector<176x256xf32> -> vector<176x256xf32>
    %c3_90 = arith.constant 3 : index
    %c0_91 = arith.constant 0 : index
    %c0_92 = arith.constant 0 : index
    %156 = vector.load %arg6[%c3_90, %c0_91, %c0_92] : memref<8x1x256xf32, #tpu.memory_space<vmem>>, vector<1x1x256xf32>
    %157 = vector.shape_cast %156 : vector<1x1x256xf32> to vector<1x256xf32>
    %158 = vector.broadcast %157 : vector<1x256xf32> to vector<176x256xf32>
    %159 = arith.addf %155, %158 : vector<176x256xf32>
    %160 = vector.extract_strided_slice %159 {offsets = [0, 0], sizes = [176, 128], strides = [1, 1]} : vector<176x256xf32> to vector<176x128xf32>
    %161 = vector.extract_strided_slice %159 {offsets = [0, 128], sizes = [176, 128], strides = [1, 1]} : vector<176x256xf32> to vector<176x128xf32>
    %c80_93 = arith.constant 80 : index
    %c0_94 = arith.constant 0 : index
    %162 = vector.load %arg12[%c80_93, %c0_94] : memref<336x128xf32, #tpu.memory_space<vmem>>, vector<176x128xf32>
    %163 = arith.negf %161 : vector<176x128xf32>
    %164 = math.exp %163 : vector<176x128xf32>
    %cst_95 = arith.constant 1.000000e+00 : f32
    %165 = vector.broadcast %cst_95 : f32 to vector<176x128xf32>
    %166 = arith.addf %165, %164 : vector<176x128xf32>
    %167 = arith.divf %165, %166 : vector<176x128xf32>
    %168 = arith.mulf %160, %167 : vector<176x128xf32>
    %169 = arith.addf %162, %168 : vector<176x128xf32>
    %170 = tpu.iota {dimensions = array<i32: 0>} : vector<176x1xi32>
    %c16_i32_96 = arith.constant 16 : i32
    %171 = arith.muli %arg1, %c16_i32_96 : i32
    %c160_i32_97 = arith.constant 160 : i32
    %172 = arith.subi %171, %c160_i32_97 : i32
    %c80_i32 = arith.constant 80 : i32
    %173 = arith.addi %172, %c80_i32 : i32
    %174 = vector.broadcast %173 : i32 to vector<176x1xi32>
    %175 = arith.addi %170, %174 : vector<176x1xi32>
    %c0_i32_98 = arith.constant 0 : i32
    %176 = vector.broadcast %c0_i32_98 : i32 to vector<176x1xi32>
    %177 = arith.cmpi sge, %175, %176 : vector<176x1xi32>
    %c16_i32_99 = arith.constant 16 : i32
    %178 = vector.broadcast %c16_i32_99 : i32 to vector<176x1xi32>
    %179 = arith.cmpi slt, %175, %178 : vector<176x1xi32>
    %180 = arith.andi %177, %179 : vector<176x1xi1>
    %cst_100 = arith.constant 0.000000e+00 : f32
    %181 = vector.shape_cast %180 : vector<176x1xi1> to vector<176x1xi1>
    %182 = vector.broadcast %181 : vector<176x1xi1> to vector<176x128xi1>
    %183 = vector.broadcast %cst_100 : f32 to vector<176x128xf32>
    %184 = arith.select %182, %169, %183 : vector<176x128xi1>, vector<176x128xf32>
    %c80_101 = arith.constant 80 : index
    %c0_102 = arith.constant 0 : index
    %185 = vector.load %arg11[%c80_101, %c0_102] : memref<336x128xf32, #tpu.memory_space<vmem>>, vector<176x128xf32>
    tpu.vector_store %arg11[%c80_101, %c0_102], %184 {strides = array<i32>} : memref<336x128xf32, #tpu.memory_space<vmem>>, vector<176x128xf32>,
    %c80_103 = arith.constant 80 : index
    %c0_104 = arith.constant 0 : index
    %186 = vector.load %arg11[%c80_103, %c0_104] : memref<336x128xf32, #tpu.memory_space<vmem>>, vector<172x128xf32>
    %c81 = arith.constant 81 : index
    %c0_105 = arith.constant 0 : index
    %187 = vector.load %arg11[%c81, %c0_105] : memref<336x128xf32, #tpu.memory_space<vmem>>, vector<172x128xf32>
    %c82 = arith.constant 82 : index
    %c0_106 = arith.constant 0 : index
    %188 = vector.load %arg11[%c82, %c0_106] : memref<336x128xf32, #tpu.memory_space<vmem>>, vector<172x128xf32>
    %c83 = arith.constant 83 : index
    %c0_107 = arith.constant 0 : index
    %189 = vector.load %arg11[%c83, %c0_107] : memref<336x128xf32, #tpu.memory_space<vmem>>, vector<172x128xf32>
    %c84 = arith.constant 84 : index
    %c0_108 = arith.constant 0 : index
    %190 = vector.load %arg11[%c84, %c0_108] : memref<336x128xf32, #tpu.memory_space<vmem>>, vector<172x128xf32>
    %191 = tpu.concatenate %186, %187, %188, %189, %190 in 1 : vector<172x128xf32>, vector<172x128xf32>, vector<172x128xf32>, vector<172x128xf32>, vector<172x128xf32> -> vector<172x640xf32>
    %192 = arith.truncf %191 : vector<172x640xf32> to vector<172x640xbf16>
    %c4_109 = arith.constant 4 : index
    %c0_110 = arith.constant 0 : index
    %c0_111 = arith.constant 0 : index
    %193 = vector.load %arg5[%c4_109, %c0_110, %c0_111] : memref<8x640x256xbf16, #tpu.memory_space<vmem>>, vector<1x640x256xbf16>
    %194 = vector.shape_cast %193 : vector<1x640x256xbf16> to vector<640x256xbf16>
    %cst_112 = arith.constant dense<0.000000e+00> : vector<172x256xf32>
    %195 = tpu.matmul %192, %194, %cst_112 {dimension_numbers = #tpu.dot_dimension_numbers<[1], [0], [0], [1], [0, 0, 1, 1], [], []>} : vector<172x640xbf16>, vector<640x256xbf16>, vector<172x256xf32> -> vector<172x256xf32>
    %c4_113 = arith.constant 4 : index
    %c0_114 = arith.constant 0 : index
    %c0_115 = arith.constant 0 : index
    %196 = vector.load %arg6[%c4_113, %c0_114, %c0_115] : memref<8x1x256xf32, #tpu.memory_space<vmem>>, vector<1x1x256xf32>
    %197 = vector.shape_cast %196 : vector<1x1x256xf32> to vector<1x256xf32>
    %198 = vector.broadcast %197 : vector<1x256xf32> to vector<172x256xf32>
    %199 = arith.addf %195, %198 : vector<172x256xf32>
    %200 = vector.extract_strided_slice %199 {offsets = [0, 0], sizes = [172, 128], strides = [1, 1]} : vector<172x256xf32> to vector<172x128xf32>
    %201 = vector.extract_strided_slice %199 {offsets = [0, 128], sizes = [172, 128], strides = [1, 1]} : vector<172x256xf32> to vector<172x128xf32>
    %c82_116 = arith.constant 82 : index
    %c0_117 = arith.constant 0 : index
    %202 = vector.load %arg11[%c82_116, %c0_117] : memref<336x128xf32, #tpu.memory_space<vmem>>, vector<172x128xf32>
    %203 = arith.negf %201 : vector<172x128xf32>
    %204 = math.exp %203 : vector<172x128xf32>
    %cst_118 = arith.constant 1.000000e+00 : f32
    %205 = vector.broadcast %cst_118 : f32 to vector<172x128xf32>
    %206 = arith.addf %205, %204 : vector<172x128xf32>
    %207 = arith.divf %205, %206 : vector<172x128xf32>
    %208 = arith.mulf %200, %207 : vector<172x128xf32>
    %209 = arith.addf %202, %208 : vector<172x128xf32>
    %210 = tpu.iota {dimensions = array<i32: 0>} : vector<172x1xi32>
    %c16_i32_119 = arith.constant 16 : i32
    %211 = arith.muli %arg1, %c16_i32_119 : i32
    %c160_i32_120 = arith.constant 160 : i32
    %212 = arith.subi %211, %c160_i32_120 : i32
    %c82_i32 = arith.constant 82 : i32
    %213 = arith.addi %212, %c82_i32 : i32
    %214 = vector.broadcast %213 : i32 to vector<172x1xi32>
    %215 = arith.addi %210, %214 : vector<172x1xi32>
    %c0_i32_121 = arith.constant 0 : i32
    %216 = vector.broadcast %c0_i32_121 : i32 to vector<172x1xi32>
    %217 = arith.cmpi sge, %215, %216 : vector<172x1xi32>
    %c16_i32_122 = arith.constant 16 : i32
    %218 = vector.broadcast %c16_i32_122 : i32 to vector<172x1xi32>
    %219 = arith.cmpi slt, %215, %218 : vector<172x1xi32>
    %220 = arith.andi %217, %219 : vector<172x1xi1>
    %cst_123 = arith.constant 0.000000e+00 : f32
    %221 = vector.shape_cast %220 : vector<172x1xi1> to vector<172x1xi1>
    %222 = vector.broadcast %221 : vector<172x1xi1> to vector<172x128xi1>
    %223 = vector.broadcast %cst_123 : f32 to vector<172x128xf32>
    %224 = arith.select %222, %209, %223 : vector<172x128xi1>, vector<172x128xf32>
    %c82_124 = arith.constant 82 : index
    %c0_125 = arith.constant 0 : index
    %225 = vector.load %arg12[%c82_124, %c0_125] : memref<336x128xf32, #tpu.memory_space<vmem>>, vector<172x128xf32>
    tpu.vector_store %arg12[%c82_124, %c0_125], %224 {strides = array<i32>} : memref<336x128xf32, #tpu.memory_space<vmem>>, vector<172x128xf32>,
    %c82_126 = arith.constant 82 : index
    %c0_127 = arith.constant 0 : index
    %226 = vector.load %arg12[%c82_126, %c0_127] : memref<336x128xf32, #tpu.memory_space<vmem>>, vector<160x128xf32>
    %c85 = arith.constant 85 : index
    %c0_128 = arith.constant 0 : index
    %227 = vector.load %arg12[%c85, %c0_128] : memref<336x128xf32, #tpu.memory_space<vmem>>, vector<160x128xf32>
    %c88 = arith.constant 88 : index
    %c0_129 = arith.constant 0 : index
    %228 = vector.load %arg12[%c88, %c0_129] : memref<336x128xf32, #tpu.memory_space<vmem>>, vector<160x128xf32>
    %c91 = arith.constant 91 : index
    %c0_130 = arith.constant 0 : index
    %229 = vector.load %arg12[%c91, %c0_130] : memref<336x128xf32, #tpu.memory_space<vmem>>, vector<160x128xf32>
    %c94 = arith.constant 94 : index
    %c0_131 = arith.constant 0 : index
    %230 = vector.load %arg12[%c94, %c0_131] : memref<336x128xf32, #tpu.memory_space<vmem>>, vector<160x128xf32>
    %231 = tpu.concatenate %226, %227, %228, %229, %230 in 1 : vector<160x128xf32>, vector<160x128xf32>, vector<160x128xf32>, vector<160x128xf32>, vector<160x128xf32> -> vector<160x640xf32>
    %232 = arith.truncf %231 : vector<160x640xf32> to vector<160x640xbf16>
    %c5_132 = arith.constant 5 : index
    %c0_133 = arith.constant 0 : index
    %c0_134 = arith.constant 0 : index
    %233 = vector.load %arg5[%c5_132, %c0_133, %c0_134] : memref<8x640x256xbf16, #tpu.memory_space<vmem>>, vector<1x640x256xbf16>
    %234 = vector.shape_cast %233 : vector<1x640x256xbf16> to vector<640x256xbf16>
    %cst_135 = arith.constant dense<0.000000e+00> : vector<160x256xf32>
    %235 = tpu.matmul %232, %234, %cst_135 {dimension_numbers = #tpu.dot_dimension_numbers<[1], [0], [0], [1], [0, 0, 1, 1], [], []>} : vector<160x640xbf16>, vector<640x256xbf16>, vector<160x256xf32> -> vector<160x256xf32>
    %c5_136 = arith.constant 5 : index
    %c0_137 = arith.constant 0 : index
    %c0_138 = arith.constant 0 : index
    %236 = vector.load %arg6[%c5_136, %c0_137, %c0_138] : memref<8x1x256xf32, #tpu.memory_space<vmem>>, vector<1x1x256xf32>
    %237 = vector.shape_cast %236 : vector<1x1x256xf32> to vector<1x256xf32>
    %238 = vector.broadcast %237 : vector<1x256xf32> to vector<160x256xf32>
    %239 = arith.addf %235, %238 : vector<160x256xf32>
    %240 = vector.extract_strided_slice %239 {offsets = [0, 0], sizes = [160, 128], strides = [1, 1]} : vector<160x256xf32> to vector<160x128xf32>
    %241 = vector.extract_strided_slice %239 {offsets = [0, 128], sizes = [160, 128], strides = [1, 1]} : vector<160x256xf32> to vector<160x128xf32>
    %c88_139 = arith.constant 88 : index
    %c0_140 = arith.constant 0 : index
    %242 = vector.load %arg12[%c88_139, %c0_140] : memref<336x128xf32, #tpu.memory_space<vmem>>, vector<160x128xf32>
    %243 = arith.negf %241 : vector<160x128xf32>
    %244 = math.exp %243 : vector<160x128xf32>
    %cst_141 = arith.constant 1.000000e+00 : f32
    %245 = vector.broadcast %cst_141 : f32 to vector<160x128xf32>
    %246 = arith.addf %245, %244 : vector<160x128xf32>
    %247 = arith.divf %245, %246 : vector<160x128xf32>
    %248 = arith.mulf %240, %247 : vector<160x128xf32>
    %249 = arith.addf %242, %248 : vector<160x128xf32>
    %250 = tpu.iota {dimensions = array<i32: 0>} : vector<160x1xi32>
    %c16_i32_142 = arith.constant 16 : i32
    %251 = arith.muli %arg1, %c16_i32_142 : i32
    %c160_i32_143 = arith.constant 160 : i32
    %252 = arith.subi %251, %c160_i32_143 : i32
    %c88_i32 = arith.constant 88 : i32
    %253 = arith.addi %252, %c88_i32 : i32
    %254 = vector.broadcast %253 : i32 to vector<160x1xi32>
    %255 = arith.addi %250, %254 : vector<160x1xi32>
    %c0_i32_144 = arith.constant 0 : i32
    %256 = vector.broadcast %c0_i32_144 : i32 to vector<160x1xi32>
    %257 = arith.cmpi sge, %255, %256 : vector<160x1xi32>
    %c16_i32_145 = arith.constant 16 : i32
    %258 = vector.broadcast %c16_i32_145 : i32 to vector<160x1xi32>
    %259 = arith.cmpi slt, %255, %258 : vector<160x1xi32>
    %260 = arith.andi %257, %259 : vector<160x1xi1>
    %cst_146 = arith.constant 0.000000e+00 : f32
    %261 = vector.shape_cast %260 : vector<160x1xi1> to vector<160x1xi1>
    %262 = vector.broadcast %261 : vector<160x1xi1> to vector<160x128xi1>
    %263 = vector.broadcast %cst_146 : f32 to vector<160x128xf32>
    %264 = arith.select %262, %249, %263 : vector<160x128xi1>, vector<160x128xf32>
    %c88_147 = arith.constant 88 : index
    %c0_148 = arith.constant 0 : index
    %265 = vector.load %arg11[%c88_147, %c0_148] : memref<336x128xf32, #tpu.memory_space<vmem>>, vector<160x128xf32>
    tpu.vector_store %arg11[%c88_147, %c0_148], %264 {strides = array<i32>} : memref<336x128xf32, #tpu.memory_space<vmem>>, vector<160x128xf32>,
    %c88_149 = arith.constant 88 : index
    %c0_150 = arith.constant 0 : index
    %266 = vector.load %arg11[%c88_149, %c0_150] : memref<336x128xf32, #tpu.memory_space<vmem>>, vector<124x128xf32>
    %c97 = arith.constant 97 : index
    %c0_151 = arith.constant 0 : index
    %267 = vector.load %arg11[%c97, %c0_151] : memref<336x128xf32, #tpu.memory_space<vmem>>, vector<124x128xf32>
    %c106 = arith.constant 106 : index
    %c0_152 = arith.constant 0 : index
    %268 = vector.load %arg11[%c106, %c0_152] : memref<336x128xf32, #tpu.memory_space<vmem>>, vector<124x128xf32>
    %c115 = arith.constant 115 : index
    %c0_153 = arith.constant 0 : index
    %269 = vector.load %arg11[%c115, %c0_153] : memref<336x128xf32, #tpu.memory_space<vmem>>, vector<124x128xf32>
    %c124 = arith.constant 124 : index
    %c0_154 = arith.constant 0 : index
    %270 = vector.load %arg11[%c124, %c0_154] : memref<336x128xf32, #tpu.memory_space<vmem>>, vector<124x128xf32>
    %271 = tpu.concatenate %266, %267, %268, %269, %270 in 1 : vector<124x128xf32>, vector<124x128xf32>, vector<124x128xf32>, vector<124x128xf32>, vector<124x128xf32> -> vector<124x640xf32>
    %272 = arith.truncf %271 : vector<124x640xf32> to vector<124x640xbf16>
    %c6 = arith.constant 6 : index
    %c0_155 = arith.constant 0 : index
    %c0_156 = arith.constant 0 : index
    %273 = vector.load %arg5[%c6, %c0_155, %c0_156] : memref<8x640x256xbf16, #tpu.memory_space<vmem>>, vector<1x640x256xbf16>
    %274 = vector.shape_cast %273 : vector<1x640x256xbf16> to vector<640x256xbf16>
    %cst_157 = arith.constant dense<0.000000e+00> : vector<124x256xf32>
    %275 = tpu.matmul %272, %274, %cst_157 {dimension_numbers = #tpu.dot_dimension_numbers<[1], [0], [0], [1], [0, 0, 1, 1], [], []>} : vector<124x640xbf16>, vector<640x256xbf16>, vector<124x256xf32> -> vector<124x256xf32>
    %c6_158 = arith.constant 6 : index
    %c0_159 = arith.constant 0 : index
    %c0_160 = arith.constant 0 : index
    %276 = vector.load %arg6[%c6_158, %c0_159, %c0_160] : memref<8x1x256xf32, #tpu.memory_space<vmem>>, vector<1x1x256xf32>
    %277 = vector.shape_cast %276 : vector<1x1x256xf32> to vector<1x256xf32>
    %278 = vector.broadcast %277 : vector<1x256xf32> to vector<124x256xf32>
    %279 = arith.addf %275, %278 : vector<124x256xf32>
    %280 = vector.extract_strided_slice %279 {offsets = [0, 0], sizes = [124, 128], strides = [1, 1]} : vector<124x256xf32> to vector<124x128xf32>
    %281 = vector.extract_strided_slice %279 {offsets = [0, 128], sizes = [124, 128], strides = [1, 1]} : vector<124x256xf32> to vector<124x128xf32>
    %c106_161 = arith.constant 106 : index
    %c0_162 = arith.constant 0 : index
    %282 = vector.load %arg11[%c106_161, %c0_162] : memref<336x128xf32, #tpu.memory_space<vmem>>, vector<124x128xf32>
    %283 = arith.negf %281 : vector<124x128xf32>
    %284 = math.exp %283 : vector<124x128xf32>
    %cst_163 = arith.constant 1.000000e+00 : f32
    %285 = vector.broadcast %cst_163 : f32 to vector<124x128xf32>
    %286 = arith.addf %285, %284 : vector<124x128xf32>
    %287 = arith.divf %285, %286 : vector<124x128xf32>
    %288 = arith.mulf %280, %287 : vector<124x128xf32>
    %289 = arith.addf %282, %288 : vector<124x128xf32>
    %290 = tpu.iota {dimensions = array<i32: 0>} : vector<124x1xi32>
    %c16_i32_164 = arith.constant 16 : i32
    %291 = arith.muli %arg1, %c16_i32_164 : i32
    %c160_i32_165 = arith.constant 160 : i32
    %292 = arith.subi %291, %c160_i32_165 : i32
    %c106_i32 = arith.constant 106 : i32
    %293 = arith.addi %292, %c106_i32 : i32
    %294 = vector.broadcast %293 : i32 to vector<124x1xi32>
    %295 = arith.addi %290, %294 : vector<124x1xi32>
    %c0_i32_166 = arith.constant 0 : i32
    %296 = vector.broadcast %c0_i32_166 : i32 to vector<124x1xi32>
    %297 = arith.cmpi sge, %295, %296 : vector<124x1xi32>
    %c16_i32_167 = arith.constant 16 : i32
    %298 = vector.broadcast %c16_i32_167 : i32 to vector<124x1xi32>
    %299 = arith.cmpi slt, %295, %298 : vector<124x1xi32>
    %300 = arith.andi %297, %299 : vector<124x1xi1>
    %cst_168 = arith.constant 0.000000e+00 : f32
    %301 = vector.shape_cast %300 : vector<124x1xi1> to vector<124x1xi1>
    %302 = vector.broadcast %301 : vector<124x1xi1> to vector<124x128xi1>
    %303 = vector.broadcast %cst_168 : f32 to vector<124x128xf32>
    %304 = arith.select %302, %289, %303 : vector<124x128xi1>, vector<124x128xf32>
    %c106_169 = arith.constant 106 : index
    %c0_170 = arith.constant 0 : index
    %305 = vector.load %arg12[%c106_169, %c0_170] : memref<336x128xf32, #tpu.memory_space<vmem>>, vector<124x128xf32>
    tpu.vector_store %arg12[%c106_169, %c0_170], %304 {strides = array<i32>} : memref<336x128xf32, #tpu.memory_space<vmem>>, vector<124x128xf32>,
    %c106_171 = arith.constant 106 : index
    %c0_172 = arith.constant 0 : index
    %306 = vector.load %arg12[%c106_171, %c0_172] : memref<336x128xf32, #tpu.memory_space<vmem>>, vector<16x128xf32>
    %c133 = arith.constant 133 : index
    %c0_173 = arith.constant 0 : index
    %307 = vector.load %arg12[%c133, %c0_173] : memref<336x128xf32, #tpu.memory_space<vmem>>, vector<16x128xf32>
    %c160 = arith.constant 160 : index
    %c0_174 = arith.constant 0 : index
    %308 = vector.load %arg12[%c160, %c0_174] : memref<336x128xf32, #tpu.memory_space<vmem>>, vector<16x128xf32>
    %c187 = arith.constant 187 : index
    %c0_175 = arith.constant 0 : index
    %309 = vector.load %arg12[%c187, %c0_175] : memref<336x128xf32, #tpu.memory_space<vmem>>, vector<16x128xf32>
    %c214 = arith.constant 214 : index
    %c0_176 = arith.constant 0 : index
    %310 = vector.load %arg12[%c214, %c0_176] : memref<336x128xf32, #tpu.memory_space<vmem>>, vector<16x128xf32>
    %311 = tpu.concatenate %306, %307, %308, %309, %310 in 1 : vector<16x128xf32>, vector<16x128xf32>, vector<16x128xf32>, vector<16x128xf32>, vector<16x128xf32> -> vector<16x640xf32>
    %312 = arith.truncf %311 : vector<16x640xf32> to vector<16x640xbf16>
    %c7 = arith.constant 7 : index
    %c0_177 = arith.constant 0 : index
    %c0_178 = arith.constant 0 : index
    %313 = vector.load %arg5[%c7, %c0_177, %c0_178] : memref<8x640x256xbf16, #tpu.memory_space<vmem>>, vector<1x640x256xbf16>
    %314 = vector.shape_cast %313 : vector<1x640x256xbf16> to vector<640x256xbf16>
    %cst_179 = arith.constant dense<0.000000e+00> : vector<16x256xf32>
    %315 = tpu.matmul %312, %314, %cst_179 {dimension_numbers = #tpu.dot_dimension_numbers<[1], [0], [0], [1], [0, 0, 1, 1], [], []>} : vector<16x640xbf16>, vector<640x256xbf16>, vector<16x256xf32> -> vector<16x256xf32>
    %c7_180 = arith.constant 7 : index
    %c0_181 = arith.constant 0 : index
    %c0_182 = arith.constant 0 : index
    %316 = vector.load %arg6[%c7_180, %c0_181, %c0_182] : memref<8x1x256xf32, #tpu.memory_space<vmem>>, vector<1x1x256xf32>
    %317 = vector.shape_cast %316 : vector<1x1x256xf32> to vector<1x256xf32>
    %318 = vector.broadcast %317 : vector<1x256xf32> to vector<16x256xf32>
    %319 = arith.addf %315, %318 : vector<16x256xf32>
    %320 = vector.extract_strided_slice %319 {offsets = [0, 0], sizes = [16, 128], strides = [1, 1]} : vector<16x256xf32> to vector<16x128xf32>
    %321 = vector.extract_strided_slice %319 {offsets = [0, 128], sizes = [16, 128], strides = [1, 1]} : vector<16x256xf32> to vector<16x128xf32>
    %c160_183 = arith.constant 160 : index
    %c0_184 = arith.constant 0 : index
    %322 = vector.load %arg12[%c160_183, %c0_184] : memref<336x128xf32, #tpu.memory_space<vmem>>, vector<16x128xf32>
    %323 = arith.negf %321 : vector<16x128xf32>
    %324 = math.exp %323 : vector<16x128xf32>
    %cst_185 = arith.constant 1.000000e+00 : f32
    %325 = vector.broadcast %cst_185 : f32 to vector<16x128xf32>
    %326 = arith.addf %325, %324 : vector<16x128xf32>
    %327 = arith.divf %325, %326 : vector<16x128xf32>
    %328 = arith.mulf %320, %327 : vector<16x128xf32>
    %329 = arith.addf %322, %328 : vector<16x128xf32>
    %330 = tpu.iota {dimensions = array<i32: 0>} : vector<16x1xi32>
    %c16_i32_186 = arith.constant 16 : i32
    %331 = arith.muli %arg1, %c16_i32_186 : i32
    %c160_i32_187 = arith.constant 160 : i32
    %332 = arith.subi %331, %c160_i32_187 : i32
    %c160_i32_188 = arith.constant 160 : i32
    %333 = arith.addi %332, %c160_i32_188 : i32
    %334 = vector.broadcast %333 : i32 to vector<16x1xi32>
    %335 = arith.addi %330, %334 : vector<16x1xi32>
    %c0_i32_189 = arith.constant 0 : i32
    %336 = vector.broadcast %c0_i32_189 : i32 to vector<16x1xi32>
    %337 = arith.cmpi sge, %335, %336 : vector<16x1xi32>
    %c16_i32_190 = arith.constant 16 : i32
    %338 = vector.broadcast %c16_i32_190 : i32 to vector<16x1xi32>
    %339 = arith.cmpi slt, %335, %338 : vector<16x1xi32>
    %340 = arith.andi %337, %339 : vector<16x1xi1>
    %cst_191 = arith.constant 0.000000e+00 : f32
    %341 = vector.shape_cast %340 : vector<16x1xi1> to vector<16x1xi1>
    %342 = vector.broadcast %341 : vector<16x1xi1> to vector<16x128xi1>
    %343 = vector.broadcast %cst_191 : f32 to vector<16x128xf32>
    %344 = arith.select %342, %329, %343 : vector<16x128xi1>, vector<16x128xf32>
    %c160_192 = arith.constant 160 : index
    %c0_193 = arith.constant 0 : index
    %345 = vector.load %arg11[%c160_192, %c0_193] : memref<336x128xf32, #tpu.memory_space<vmem>>, vector<16x128xf32>
    tpu.vector_store %arg11[%c160_192, %c0_193], %344 {strides = array<i32>} : memref<336x128xf32, #tpu.memory_space<vmem>>, vector<16x128xf32>,
    %c160_194 = arith.constant 160 : index
    %c0_195 = arith.constant 0 : index
    %346 = vector.load %arg11[%c160_194, %c0_195] : memref<336x128xf32, #tpu.memory_space<vmem>>, vector<16x128xf32>
    %347 = arith.truncf %346 : vector<16x128xf32> to vector<16x128xbf16>
    %c0_196 = arith.constant 0 : index
    %c0_197 = arith.constant 0 : index
    %348 = vector.load %arg7[%c0_196, %c0_197] : memref<128x256xbf16, #tpu.memory_space<vmem>>, vector<128x256xbf16>
    %cst_198 = arith.constant dense<0.000000e+00> : vector<16x256xf32>
    %349 = tpu.matmul %347, %348, %cst_198 {dimension_numbers = #tpu.dot_dimension_numbers<[1], [0], [0], [1], [0, 0, 1, 1], [], []>} : vector<16x128xbf16>, vector<128x256xbf16>, vector<16x256xf32> -> vector<16x256xf32>
    %c0_199 = arith.constant 0 : index
    %c0_200 = arith.constant 0 : index
    %350 = vector.load %arg8[%c0_199, %c0_200] : memref<1x256xf32, #tpu.memory_space<vmem>>, vector<1x256xf32>
    %351 = vector.broadcast %350 : vector<1x256xf32> to vector<16x256xf32>
    %352 = arith.addf %349, %351 : vector<16x256xf32>
    %353 = vector.extract_strided_slice %352 {offsets = [0, 0], sizes = [16, 128], strides = [1, 1]} : vector<16x256xf32> to vector<16x128xf32>
    %c0_201 = arith.constant 0 : index
    %c0_202 = arith.constant 0 : index
    %c0_203 = arith.constant 0 : index
    %354 = vector.load %arg9[%c0_201, %c0_202, %c0_203] : memref<1x16x128xf32, #tpu.memory_space<vmem>>, vector<1x16x128xf32>
    %355 = vector.shape_cast %354 : vector<1x16x128xf32> to vector<16x128xf32>
    %356 = vector.shape_cast %353 : vector<16x128xf32> to vector<1x16x128xf32>
    tpu.vector_store %arg9[%c0_201, %c0_202, %c0_203], %356 {strides = array<i32>} : memref<1x16x128xf32, #tpu.memory_space<vmem>>, vector<1x16x128xf32>,
    %357 = vector.extract_strided_slice %352 {offsets = [0, 128], sizes = [16, 128], strides = [1, 1]} : vector<16x256xf32> to vector<16x128xf32>
    %c0_204 = arith.constant 0 : index
    %c0_205 = arith.constant 0 : index
    %c0_206 = arith.constant 0 : index
    %358 = vector.load %arg10[%c0_204, %c0_205, %c0_206] : memref<1x16x128xf32, #tpu.memory_space<vmem>>, vector<1x16x128xf32>
    %359 = vector.shape_cast %358 : vector<1x16x128xf32> to vector<16x128xf32>
    %360 = vector.shape_cast %357 : vector<16x128xf32> to vector<1x16x128xf32>
    tpu.vector_store %arg10[%c0_204, %c0_205, %c0_206], %360 {strides = array<i32>} : memref<1x16x128xf32, #tpu.memory_space<vmem>>, vector<1x16x128xf32>,
    return
  }
  func.func @transform_0(%arg0: i32, %arg1: i32) -> (i32, i32, i32) {
    %c0_i32 = arith.constant 0 : i32
    %c0_i32_0 = arith.constant 0 : i32
    %c0_i32_1 = arith.constant 0 : i32
    return %arg0, %c0_i32, %c0_i32_0 : i32, i32, i32
  }
  func.func @transform_1(%arg0: i32, %arg1: i32) -> (i32, i32) {
    %c0_i32 = arith.constant 0 : i32
    %c0_i32_0 = arith.constant 0 : i32
    %c0_i32_1 = arith.constant 0 : i32
    return %c0_i32, %c0_i32_0 : i32, i32
  }
  func.func @transform_2(%arg0: i32, %arg1: i32) -> (i32, i32) {
    %c0_i32 = arith.constant 0 : i32
    %c0_i32_0 = arith.constant 0 : i32
    %c0_i32_1 = arith.constant 0 : i32
    return %c0_i32, %c0_i32_0 : i32, i32
  }
  func.func @transform_3(%arg0: i32, %arg1: i32) -> (i32, i32, i32) {
    %c0_i32 = arith.constant 0 : i32
    %c0_i32_0 = arith.constant 0 : i32
    %c0_i32_1 = arith.constant 0 : i32
    %c0_i32_2 = arith.constant 0 : i32
    return %c0_i32, %c0_i32_0, %c0_i32_1 : i32, i32, i32
  }
  func.func @transform_4(%arg0: i32, %arg1: i32) -> (i32, i32, i32) {
    %c0_i32 = arith.constant 0 : i32
    %c0_i32_0 = arith.constant 0 : i32
    %c0_i32_1 = arith.constant 0 : i32
    %c0_i32_2 = arith.constant 0 : i32
    return %c0_i32, %c0_i32_0, %c0_i32_1 : i32, i32, i32
  }
  func.func @transform_5(%arg0: i32, %arg1: i32) -> (i32, i32) {
    %c0_i32 = arith.constant 0 : i32
    %c0_i32_0 = arith.constant 0 : i32
    %c0_i32_1 = arith.constant 0 : i32
    return %c0_i32, %c0_i32_0 : i32, i32
  }
  func.func @transform_6(%arg0: i32, %arg1: i32) -> (i32, i32) {
    %c0_i32 = arith.constant 0 : i32
    %c0_i32_0 = arith.constant 0 : i32
    %c0_i32_1 = arith.constant 0 : i32
    return %c0_i32, %c0_i32_0 : i32, i32
  }
  func.func @transform_7(%arg0: i32, %arg1: i32) -> (i32, i32, i32) {
    %c0_i32 = arith.constant 0 : i32
    %c0_i32_0 = arith.constant 0 : i32
    return %arg0, %arg1, %c0_i32 : i32, i32, i32
  }
  func.func @transform_8(%arg0: i32, %arg1: i32) -> (i32, i32, i32) {
    %c0_i32 = arith.constant 0 : i32
    %c0_i32_0 = arith.constant 0 : i32
    return %arg0, %arg1, %c0_i32 : i32, i32, i32
  }
}

</mosaic_0001>

<bundles_post_ra>
// kernel: tpu_custom_call.1
= control target key start
LH: loop header
LB: loop body
LE: loop exit
PB: predicated region body
PF: predicated region fallthrough
CT: control target
= control target key end

     0   :  { %s18305_s0 = inlined_call_operand.hbm [shape: bf16[2,336,128], index: 0, kind: input, shape index: {}]   ;;  %s18306_s1 = inlined_call_operand.hbm [shape: bf16[128,128], index: 1, kind: input, shape index: {}]   ;;  %s18307_s2 = inlined_call_operand.hbm [shape: f32[1,128], index: 2, kind: input, shape index: {}]   ;;  %s18308_s3 = inlined_call_operand.hbm [shape: bf16[8,640,256], index: 3, kind: input, shape index: {}]   ;;  %s18309_s4 = inlined_call_operand.hbm [shape: f32[8,1,256], index: 4, kind: input, shape index: {}]   ;;  %s18310_s5 = inlined_call_operand.hbm [shape: bf16[128,256], index: 5, kind: input, shape index: {}]   ;;  %s18311_s6 = inlined_call_operand.hbm [shape: f32[1,256], index: 6, kind: input, shape index: {}]   ;;  %s18312_s7 = inlined_call_operand.hbm [shape: f32[2,16,128], index: 7, kind: output, shape index: {0}]   ;;  %s18313_s8 = inlined_call_operand.hbm [shape: f32[2,16,128], index: 8, kind: output, shape index: {1}]  }
   0x1   :  { %18319 = sst [smem:[#allocation25_spill]] %s18306_s1 }
   0x2   :  { %18320 = sst [smem:[#allocation26_spill]] %s18307_s2 }
   0x3   :  { %18321 = sst [smem:[#allocation27_spill]] %s18308_s3 }
   0x4   :  { %18322 = sst [smem:[#allocation28_spill]] %s18309_s4 }
   0x5   :  { %18323 = sst [smem:[#allocation29_spill]] %s18310_s5 }
   0x6   :  { %14 = vsyncpa [#allocation5], 0 }
   0x7   :  { %16 = vsyncpa [#allocation5 + $0x1], 0 }
   0x8   :  { %17 = vsyncpa [#allocation8], 0 }
   0x9   :  { %18 = vsyncpa [#allocation11], 0 }
   0xa   :  { %19 = vsyncpa [#allocation14], 0 }
   0xb   :  { %20 = vsyncpa [#allocation6], 0 }
   0xc   :  { %22 = vsyncpa [#allocation6 + $0x1], 0 }
   0xd   :  { %23 = vsyncpa [#allocation18], 0 }
   0xe   :  { %25 = vsyncpa [#allocation18 + $0x1], 0  ;;  %s16781_s27 = smov 0   ;;  %s16783_s28 = smov 0  }
   0xf   :  { %s16785_s29 = smov 0   ;;  %s16787_s30 = smov 0  }
  0x10   :  { %s16789_s9 = smov 0   ;;  %s16791_s10 = smov 0  }
  0x11 LB: > { %s14095_s11 = sadd.s32 4294967295, %s16712_s10   ;;  %p14097_p0 = scmp.ge.s32.totalorder %s16712_s10, 1  ;;  %s16712_s10 = sphi %s16791_s10, %s31_s10   ;;  %s16708_s9 = sphi %s16789_s9, %s18348_s9   ;;  %s16704_s30 = sphi %s16787_s30, %s18347_s30   ;;  %s16700_s29 = sphi %s16785_s29, %s18346_s29   ;;  %s16696_s28 = sphi %s16783_s28, %s18345_s28   ;;  %s16692_s27 = sphi %s16781_s27, %s18344_s27  }
  0x12   : > { %p16815_p1 = scmp.eq.s32.totalorder %s14095_s11, 0  ;;  %p256_p2 = scmp.lt.s32.totalorder %s16712_s10, 3 }
  0x13   : > { %s16714_s14 = smov [#allocation7]   ;;  %s16715_s17 = smov [#allocation10]  }
  0x14   : > { %s18324_s12 = scalar_select %p16815_p1, 1, 0 }
  0x15   : > { %p16820_p3 = pnand %p14097_p0, %p256_p2  ;;  %s268_s15 = sshll.u32 %s16714_s14, 4  ;;  %s269_s15 = int_to_ptr.vmem [resolvable:$true] %s268_s15 }
  0x16   : > { %s292_s18 = sshll.u32 %s16715_s17, 4  ;;  %s16417_s20 = scalar_lea.vmem %s269_s15, 1024  ;;  %s293_s18 = int_to_ptr.vmem [resolvable:$true] %s292_s18 }
  0x17   : > { %s18325_s13 = scalar_select %p16820_p3, 1, 0 }
  0x18   : > { %p15173_p4 = pneg %p16820_p3  ;;  %p16418_p8 = scmp.ne.s32.totalorder %s269_s15, %s16417_s20 }
  0x19   : > { %p16425_p11 = scmp.lt.s32.totalorder %s269_s15, %s269_s15  ;;  %p16426_p12 = scmp.lt.s32.totalorder %s16417_s20, %s16417_s20 }
  0x1a   : > { %p16829_p6 = pnand %p15173_p4, %p16815_p1 }
  0x1b   : > { %p16427_p13 = por %p16426_p12, %p16425_p11 }
  0x1c   : > { %p16835_p7 = pneg %p16829_p6 }
  0x1e   : > { %p16420_p9 = pnand %p16418_p8, %p16835_p7 }
  0x20   : > { %p16421_p10 = pneg %p16420_p9 }
  0x22   : > { %p16428_p0 = pnand %p16427_p13, %p16421_p10 }
  0x24   : > { %16431 = shalt.err (!%p16428_p0)
}
  0x25   : > { %s18314_s21 = smov 64   ;;  %s18315_s22 = smov 4  }
  0x26   : > { %s18328_s1 = sld [smem:[#allocation25_spill]]  ;;  %s16443_s25 = scalar_lea.vmem %s293_s18, 81920 }
  0x27   : > { %p16444_p2 = scmp.ne.s32.totalorder %s293_s18, %s16443_s25  ;;  %p16451_p9 = scmp.lt.s32.totalorder %s293_s18, %s293_s18 }
  0x28   : > { %p16452_p10 = scmp.lt.s32.totalorder %s16443_s25, %s16443_s25 }
  0x29   : > { %p16446_p4 = pnand %p16444_p2, %p16835_p7 }
  0x2a   : > { %p16453_p11 = por %p16452_p10, %p16451_p9 }
  0x2b   : > { %p16447_p8 = pneg %p16446_p4 }
  0x2c   : > { %15176 = dma.hbm_to_vmem [thread:$0]  (!%p16829_p6), %s18328_s1, 1024, %s269_s15, [#allocation8], %s18314_s21, %s18314_s21, %s18315_s22  }
  0x2d   : > { %p16454_p12 = pnand %p16453_p11, %p16447_p8 }
  0x2f   : > { %16457 = shalt.err (!%p16454_p12)
}
  0x30   : > { %s16718_s26 = smov 128   ;;  %s16719_s14 = smov 8  }
  0x31   : > { %s18329_s3 = sld [smem:[#allocation27_spill]]  ;;  %s16720_s15 = smov [#allocation13]  }
  0x32   : > { %s318_s23 = sshll.u32 %s16720_s15, 4  ;;  %s16721_s24 = smov [#allocation9]   ;;  %s319_s23 = int_to_ptr.vmem [resolvable:$true] %s318_s23 }
  0x33   : > { %s282_s21 = sshll.u32 %s16721_s24, 4  ;;  %s16469_s22 = scalar_lea.vmem %s319_s23, 2048  ;;  %s283_s21 = int_to_ptr.vmem [resolvable:$true] %s282_s21 }
  0x34   : > { %p16470_p13 = scmp.ne.s32.totalorder %s319_s23, %s16469_s22  ;;  %p16477_p4 = scmp.lt.s32.totalorder %s319_s23, %s319_s23 }
  0x35   : > { %p16478_p8 = scmp.lt.s32.totalorder %s16469_s22, %s16469_s22 }
  0x36   : > { %p16472_p0 = pnand %p16470_p13, %p16835_p7 }
  0x37   : > { %15182 = dma.hbm_to_vmem [thread:$0]  (!%p16829_p6), %s18329_s3, 81920, %s293_s18, [#allocation11], %s16718_s26, %s16718_s26, %s16719_s14  }
  0x38   : > { %p16473_p2 = pneg %p16472_p0  ;;  %p16479_p9 = por %p16478_p8, %p16477_p4 }
  0x3a   : > { %p16480_p10 = pnand %p16479_p9, %p16473_p2 }
  0x3c   : > { %16483 = shalt.err (!%p16480_p10)
}
  0x3d   : > { %s18330_s5 = sld [smem:[#allocation29_spill]]  ;;  %s16495_s17 = scalar_lea.vmem %s283_s21, 16 }
  0x3e   : > { %p16496_p11 = scmp.ne.s32.totalorder %s283_s21, %s16495_s17  ;;  %s16502_s20 = scalar_lea.vmem %s283_s21, 32 }
  0x3f   : > { %p16503_p13 = scmp.lt.s32.totalorder %s283_s21, %s283_s21  ;;  %p16504_p0 = scmp.lt.s32.totalorder %s16502_s20, %s16495_s17 }
  0x40   : > { %p16498_p12 = pnand %p16496_p11, %p16835_p7 }
  0x41   : > { %p16505_p3 = por %p16504_p0, %p16503_p13 }
  0x42   : > { %p16499_p5 = pneg %p16498_p12 }
  0x43   : > { %15188 = dma.hbm_to_vmem [thread:$0]  (!%p16829_p6), %s18330_s5, 2048, %s319_s23, [#allocation14], %s16718_s26, %s16718_s26, %s16719_s14  }
  0x44   : > { %p16506_p1 = pnand %p16505_p3, %p16499_p5 }
  0x46   : > { %16509 = shalt.err (!%p16506_p1)
}
  0x47   : > { %s18331_s2 = sld [smem:[#allocation26_spill]]  ;;  %s16722_s24 = smov [#allocation12]  }
  0x48   : > { %s305_s26 = sshll.u32 %s16722_s24, 4  ;;  %s306_s26 = int_to_ptr.vmem [resolvable:$true] %s305_s26 }
  0x49   : > { %s16521_s14 = scalar_lea.vmem %s306_s26, 256  ;;  %p16529_p9 = scmp.lt.s32.totalorder %s306_s26, %s306_s26 }
  0x4a   : > { %p16522_p2 = scmp.ne.s32.totalorder %s306_s26, %s16521_s14  ;;  %p16530_p10 = scmp.lt.s32.totalorder %s16521_s14, %s16521_s14 }
  0x4c   : > { %p16524_p4 = pnand %p16522_p2, %p16835_p7  ;;  %p16531_p11 = por %p16530_p10, %p16529_p9 }
  0x4d   : > { %15179 = dma.hbm_to_vmem [thread:$0]  (!%p16829_p6), %s18331_s2, 16, %s283_s21, [#allocation8]  }
  0x4e   : > { %p16525_p8 = pneg %p16524_p4 }
  0x50   : > { %p16532_p3 = pnand %p16531_p11, %p16525_p8 }
  0x52   : > { %16535 = shalt.err (!%p16532_p3)
}
  0x53   : > { %s16723_s23 = smov 32   ;;  %s16724_s25 = smov 2  }
  0x54   : > { %s18332_s4 = sld [smem:[#allocation28_spill]]  ;;  %s16725_s17 = smov [#allocation15]  }
  0x55   : > { %s332_s20 = sshll.u32 %s16725_s17, 4  ;;  %s333_s20 = int_to_ptr.vmem [resolvable:$true] %s332_s20 }
  0x56   : > { %s16547_s22 = scalar_lea.vmem %s333_s20, 32  ;;  %p16555_p13 = scmp.lt.s32.totalorder %s333_s20, %s333_s20 }
  0x57   : > { %p16548_p1 = scmp.ne.s32.totalorder %s333_s20, %s16547_s22  ;;  %p16556_p0 = scmp.lt.s32.totalorder %s16547_s22, %s16547_s22 }
  0x59   : > { %p16550_p5 = pnand %p16548_p1, %p16835_p7  ;;  %p16557_p2 = por %p16556_p0, %p16555_p13 }
  0x5a   : > { %15185 = dma.hbm_to_vmem [thread:$0]  (!%p16829_p6), %s18332_s4, 256, %s306_s26, [#allocation11], %s16723_s23, %s16723_s23, %s16724_s25  }
  0x5b   : > { %p16551_p12 = pneg %p16550_p5 }
  0x5d   : > { %p16558_p4 = pnand %p16557_p2, %p16551_p12 }
  0x5f   : > { %16561 = shalt.err (!%p16558_p4)
}
  0x60   : > { %15191 = dma.hbm_to_vmem [thread:$0]  (!%p16829_p6), %s18311_s6, 32, %s333_s20, [#allocation14]  }
  0x61   : > { %s14096_s19 = sadd.s32 4294967294, %s16712_s10   ;;  %s43_s26 = sadd.s32 1, %s16708_s9 }
  0x62   : > { %p45_p7 = scmp.ge.s32.totalorder %s43_s26, 2  ;;  %s50_s16 = sadd.s32 1, %s16700_s29 }
  0x63   : > { %p57_p8 = scmp.ne.s32.totalorder %s16700_s29, %s16696_s28  ;;  %p58_p9 = scmp.eq.s32.totalorder %s16712_s10, 0 }
  0x64   : > { %s18350_s26 = smov (%p45_p7, %s43_s26), 0  ;;  %p63_p11 = scmp.ne.s32.totalorder %s16696_s28, %s16692_s27 }
  0x65   : > { %p16892_p10 = por %p58_p9, %p57_p8  ;;  %s47_s23 = ssub.s32 %s16708_s9, %s18350_s26 }
  0x66   : > { %p215_p6 = scmp.eq.s32.totalorder %s14095_s11, 1  ;;  %p48_p3 = scmp.eq.s32.totalorder %s47_s23, 0 }
  0x67   : > { %p18334_p1 = scmp.ne.s32.totalorder %s18324_s12, 0  ;;  %p221_p13 = scmp.eq.s32.totalorder %s14096_s19, 1 }
  0x68   : > { %p16908_p12 = por %p215_p6, %p57_p8  ;;  %p15209_p2 = scmp.lt.s32.totalorder %s16712_s10, 2 }
  0x69   : > { %p16904_p5 = por %p18334_p1, %p63_p11  ;;  %p16915_p0 = por %p221_p13, %p63_p11 }
  0x6a   : > { %s16913_s21 = scalar_select %p48_p3, %s16700_s29, %s50_s16  }
  0x6b   : > { %s343_s20 = sand.u32 1, %s16700_s29   ;;  %s15141_s11 = smul.u32 2688, %s16708_s9 }
  0x6c   : > { %s15140_s22 = smul.u32 168, %s343_s20  ;;  %p16924_p4 = pnand %p15209_p2, %p16892_p10 }
  0x6d   : > { %s353_s19 = scalar_lea.hbm %s18305_s0, %s15141_s11  ;;  %s344_s2 = scalar_lea.sflag [#allocation5], %s343_s20 }
  0x6e   : > { %s347_s16 = scalar_lea.vmem [#allocation4], %s15140_s22  ;;  %p16564_p7 = pneg %p16924_p4 }
  0x6f   : > { %s354_s1 = sshll.u32 %s347_s16, 4  ;;  %s16726_s14 = smov [#allocation4]   ;;  %s355_s1 = int_to_ptr.vmem [resolvable:$true] %s354_s1 }
  0x70   : > { %s16575_s3 = scalar_lea.vmem %s355_s1, 2688  ;;  %s16580_s4 = sshll.u32 %s16726_s14, 4  ;;  %s16581_s4 = int_to_ptr.vmem [resolvable:$false] %s16580_s4 }
  0x71   : > { %p16576_p8 = scmp.ne.s32.totalorder %s355_s1, %s16575_s3  ;;  %s16582_s5 = scalar_lea.vmem %s16581_s4, 5376 }
  0x72   : > { %p16583_p10 = scmp.lt.s32.totalorder %s355_s1, %s16581_s4  ;;  %p16584_p6 = scmp.lt.s32.totalorder %s16582_s5, %s16575_s3 }
  0x73   : > { %p16578_p9 = pnand %p16576_p8, %p16564_p7 }
  0x74   : > { %p16585_p3 = por %p16584_p6, %p16583_p10 }
  0x75   : > { %p16579_p11 = pneg %p16578_p9 }
  0x77   : > { %p16586_p1 = pnand %p16585_p3, %p16579_p11 }
  0x79   : > { %16589 = shalt.err (!%p16586_p1)
}
  0x7a   : > { %s18339_s11 = smov 4   ;;  %s18340_s22 = smov 64  }
  0x7b   : > { %15195 = dma.hbm_to_vmem [thread:$0]  (!%p16924_p4), %s353_s19, 2688, %s355_s1, %s344_s2, %s18340_s22, %s18340_s22, %s18339_s11  }
  0x7c   : > { %p18341_p13 = scmp.ne.s32.totalorder %s18325_s13, 0 }
  0x7d   : > { %s16941_s20 = sand.u32 (!%p18341_p13), 1, %s16696_s28  }
  0x7e   : > { %366 = sbr.rel (%p18341_p13) target bundleno = 3465 (0xd89), region = 48  ;;  %s369_s3 = scalar_lea.sflag (!%p18341_p13), [#allocation5], %s16941_s20 }
  0x7f   : > { %s15142_s4 = smul.u32 (!%p18341_p13), 168, %s16941_s20 }
  0x81   : > { %s16945_s5 = scalar_lea.vmem (!%p18341_p13), [#allocation4], %s15142_s4 }
  0x83   : > { %16667 = dma.done.wait (%p16904_p5), %s369_s3, 2688  }
  0x84   : > { %16669 = vsyncadd (%p16904_p5), %s369_s3, 4294964608  ;;  %p18342_p2 = scmp.ne.s32.totalorder %s18324_s12, 0 }
  0x86   : > { %16671 = dma.done.wait (%p18342_p2), [#allocation8], 1040  }
  0x87   : > { %16673 = vsyncadd (%p18342_p2), [#allocation8], 4294966256 }
  0x88   : > { %16675 = dma.done.wait (%p18342_p2), [#allocation11], 82176  }
  0x89   : > { %16677 = vsyncadd (%p18342_p2), [#allocation11], 4294885120 }
  0x8a   : > { %16679 = dma.done.wait (%p18342_p2), [#allocation14], 2080  }
  0x8b   : > { %16681 = vsyncadd (%p18342_p2), [#allocation14], 4294965216  ;;  %v16727_v0 = vmov 0.0   ;;  %vm16728_vm0 = vmmov 0   ;;  %v15282_v1 = vld [vmem:[#allocation7 + $0x38] sm:$0xff]   ;;  %v15283_v2 = vld [vmem:[#allocation7 + $0x30] sm:$0xff]  }
  0x8c   : > { %15040 = vmatprep.subr.bf16.mxu0 %v16727_v0  ;;  %1221 = vst [vmem:[#allocation2] sm:$0xff] %v16727_v0  ;;  %1222 = vst [vmem:[#allocation2 + $0x8] sm:$0xff] %v16727_v0  ;;  %15056 = vmatprep.mubr.msk.bf16.mxu0 %vm16728_vm0, %v16727_v0  ;;  %v15284_v3 = vld [vmem:[#allocation7 + $0x28] sm:$0xff]   ;;  %v15285_v4 = vld [vmem:[#allocation7 + $0x20] sm:$0xff]   ;;  %vm16731_vm3 = vmmov 1   ;;  %s14113_s1 = sshll.u32 %s16941_s20, 4 }
  0x8d   : > { %1223 = vst [vmem:[#allocation2 + $0x10] sm:$0xff] %v16727_v0  ;;  %1224 = vst [vmem:[#allocation2 + $0x18] sm:$0xff] %v16727_v0  ;;  %15041 = vmatpush3.bf16.msra.mxu0 %v15282_v1  ;;  %v15286_v5 = vld [vmem:[#allocation7 + $0x18] sm:$0xff]   ;;  %v15287_v6 = vld [vmem:[#allocation7 + $0x10] sm:$0xff]   ;;  %s426_s2 = scalar_lea.vmem [#allocation16], %s14113_s1  ;;  %s15009_s13 = sshll.u32 %s16704_s30, 8 }
  0x8e   : > { %1225 = vst [vmem:[#allocation2 + $0x20] sm:$0xff] %v16727_v0  ;;  %1226 = vst [vmem:[#allocation2 + $0x28] sm:$0xff] %v16727_v0  ;;  %15042 = vmatprep.subr.bf16.mxu0 %v16727_v0  ;;  %v15288_v7 = vld [vmem:[#allocation7 + $0x8] sm:$0xff]   ;;  %v15303_v8 = vld [vmem:[#allocation10 + $0x74] ss:$8 sps:$4 sm:$0xff]   ;;  %s13899_s12 = sshll.u32 %s426_s2, 4  ;;  %s18221_s19 = scalar_lea.hbm %s18312_s7, %s15009_s13  ;;  %s18213_s12 = int_to_ptr.vmem [resolvable:$true] %s13899_s12 }
  0x8f   : > { %1227 = vst [vmem:[#allocation2 + $0x30] sm:$0xff] %v16727_v0  ;;  %1228 = vst [vmem:[#allocation2 + $0x38] sm:$0xff] %v16727_v0  ;;  %v15305_v9 = vld [vmem:[#allocation10 + $0x70] ss:$8 sps:$4 sm:$0xff]   ;;  %2070 = vmatprep.subr.bf16.mxu1 %v15303_v8  ;;  %v15306_v10 = vld [vmem:[#allocation10 + $0x64] ss:$8 sps:$4 sm:$0xff]   ;;  %s18229_s14 = scalar_lea.hbm %s18313_s8, %s15009_s13 }
  0x90   : > { %1229 = vst [vmem:[#allocation2 + $0x40] sm:$0xff] %v16727_v0  ;;  %1230 = vst [vmem:[#allocation2 + $0x48] sm:$0xff] %v16727_v0  ;;  %2071 = vmatpush1.bf16.msra.mxu1 %v15305_v9  ;;  %v15308_v11 = vld [vmem:[#allocation10 + $0x60] ss:$8 sps:$4 sm:$0xff]   ;;  %v15313_v13 = vld [vmem:[#allocation10 + $0x54] ss:$8 sps:$4 sm:$0xff]  }
  0x91   : > { %1231 = vst [vmem:[#allocation2 + $0x50] sm:$0xff] %v16727_v0  ;;  %1232 = vst [vmem:[#allocation2 + $0x58] sm:$0xff] %v16727_v0  ;;  %15043 = vmatpush3.bf16.msra.mxu0 %v15283_v2  ;;  %v15289_v12 = vld [vmem:[#allocation7] sm:$0xff]   ;;  %2072 = vmatprep.subr.bf16.mxu1 %v15306_v10  ;;  %v15315_v15 = vld [vmem:[#allocation10 + $0x50] ss:$8 sps:$4 sm:$0xff]   ;;  %s18215_s25 = scalar_lea.vmem [#allocation17], %s14113_s1 }
  0x92   : > { %1233 = vst [vmem:[#allocation2 + $0x60] sm:$0xff] %v16727_v0  ;;  %1234 = vst [vmem:[#allocation2 + $0x68] sm:$0xff] %v16727_v0  ;;  %15044 = vmatprep.subr.bf16.mxu0 %v16727_v0  ;;  %v15312_v14 = vld [vmem:[#allocation10 + $0x174] ss:$8 sps:$4 sm:$0xff]   ;;  %v15319_v17 = vld [vmem:[#allocation10 + $0x44] ss:$8 sps:$4 sm:$0xff]  }
  0x93   : > { %1235 = vst [vmem:[#allocation2 + $0x70] sm:$0xff] %v16727_v0  ;;  %1236 = vst [vmem:[#allocation2 + $0x78] sm:$0xff] %v16727_v0  ;;  %v15290_v16 = vld [vmem:[%s16945_s5] sm:$0xff]   ;;  %v15321_v20 = vld [vmem:[#allocation10 + $0x40] ss:$8 sps:$4 sm:$0xff]   ;;  %s13917_s15 = sshll.u32 %s18215_s25, 4  ;;  %s18224_s15 = int_to_ptr.vmem [resolvable:$true] %s13917_s15 }
  0x94   : > { %1237 = vst [vmem:[#allocation2 + $0x80] sm:$0xff] %v16727_v0  ;;  %1238 = vst [vmem:[#allocation2 + $0x88] sm:$0xff] %v16727_v0  ;;  %2073 = vmatpush1.bf16.msra.mxu1 %v15308_v11  ;;  %v15310_v18 = vld [vmem:[#allocation10 + $0x170] ss:$8 sps:$4 sm:$0xff]   ;;  %v15318_v19 = vld [vmem:[#allocation10 + $0x164] ss:$8 sps:$4 sm:$0xff]  }
  0x95   : > { %1239 = vst [vmem:[#allocation2 + $0x90] sm:$0xff] %v16727_v0  ;;  %1240 = vst [vmem:[#allocation2 + $0x98] sm:$0xff] %v16727_v0  ;;  %15045 = vmatpush3.bf16.msra.mxu0 %v15284_v3  ;;  %2074 = vmatprep.subr.bf16.mxu1 %v15313_v13  ;;  %v15326_v21 = vld [vmem:[#allocation10 + $0x34] ss:$8 sps:$4 sm:$0xff]   ;;  %v15316_v22 = vld [vmem:[#allocation10 + $0x160] ss:$8 sps:$4 sm:$0xff]  }
  0x96   : > { %1243 = vst [vmem:[#allocation2 + $0xb0] sm:$0xff] %v16727_v0  ;;  %1244 = vst [vmem:[#allocation2 + $0xb8] sm:$0xff] %v16727_v0  ;;  %15046 = vmatprep.subr.bf16.mxu0 %v16727_v0  ;;  %v15291_v23 = vld [vmem:[%s16945_s5 + $0x8] sm:$0xff]   ;;  %v15292_v33 = vld [vmem:[%s16945_s5 + $0x10] sm:$0xff]   ;;  %s13879_s11 = scalar_lea.sflag [#allocation6], %s16941_s20  ;;  %s16590_s22 = scalar_lea.vmem %s18213_s12, 256 }
  0x97   : > { %1245 = vst [vmem:[#allocation2 + $0xc0] sm:$0xff] %v16727_v0  ;;  %1246 = vst [vmem:[#allocation2 + $0xc8] sm:$0xff] %v16727_v0  ;;  %v15325_v24 = vld [vmem:[#allocation10 + $0x154] ss:$8 sps:$4 sm:$0xff]   ;;  %v15328_v25 = vld [vmem:[#allocation10 + $0x30] ss:$8 sps:$4 sm:$0xff]   ;;  %p16591_p5 = scmp.ne.s32.totalorder %s18213_s12, %s16590_s22 }
  0x98   : > { %1247 = vst [vmem:[#allocation2 + $0xd0] sm:$0xff] %v16727_v0  ;;  %1248 = vst [vmem:[#allocation2 + $0xd8] sm:$0xff] %v16727_v0  ;;  %2075 = vmatpush1.bf16.msra.mxu1 %v15315_v15  ;;  %v15332_v26 = vld [vmem:[#allocation10 + $0x24] ss:$8 sps:$4 sm:$0xff]   ;;  %v15323_v27 = vld [vmem:[#allocation10 + $0x150] ss:$8 sps:$4 sm:$0xff]  }
  0x99   : > { %1249 = vst [vmem:[#allocation2 + $0xe0] sm:$0xff] %v16727_v0  ;;  %1250 = vst [vmem:[#allocation2 + $0xe8] sm:$0xff] %v16727_v0  ;;  %15047 = vmatpush3.bf16.msra.mxu0 %v15285_v4  ;;  %2076 = vmatprep.subr.bf16.mxu1 %v15319_v17  ;;  %v15331_v28 = vld [vmem:[#allocation10 + $0x144] ss:$8 sps:$4 sm:$0xff]   ;;  %v15334_v29 = vld [vmem:[#allocation10 + $0x20] ss:$8 sps:$4 sm:$0xff]   ;;  %p16592_p4 = pnand %p16591_p5, %p16908_p12 }
  0x9a   : > { %1251 = vst [vmem:[#allocation2 + $0xf0] sm:$0xff] %v16727_v0  ;;  %1252 = vst [vmem:[#allocation2 + $0xf8] sm:$0xff] %v16727_v0  ;;  %15048 = vmatprep.subr.bf16.mxu0 %v16727_v0  ;;  %v15339_v30 = vld [vmem:[#allocation10 + $0x14] ss:$8 sps:$4 sm:$0xff]   ;;  %v15329_v31 = vld [vmem:[#allocation10 + $0x140] ss:$8 sps:$4 sm:$0xff]  }
  0x9b   : > { %1253 = vst [vmem:[#allocation2 + $0x100] sm:$0xff] %v16727_v0  ;;  %1254 = vst [vmem:[#allocation2 + $0x108] sm:$0xff] %v16727_v0  ;;  %v15338_v32 = vld [vmem:[#allocation10 + $0x134] ss:$8 sps:$4 sm:$0xff]   ;;  %v15341_v34 = vld [vmem:[#allocation10 + $0x10] ss:$8 sps:$4 sm:$0xff]   ;;  %p16593_p7 = pneg %p16592_p4 }
  0x9c   : > { %1255 = vst [vmem:[#allocation2 + $0x110] sm:$0xff] %v16727_v0  ;;  %1256 = vst [vmem:[#allocation2 + $0x118] sm:$0xff] %v16727_v0  ;;  %2077 = vmatpush1.bf16.msra.mxu1 %v15321_v20  ;;  %v15345_v35 = vld [vmem:[#allocation10 + $0x4] ss:$8 sps:$4 sm:$0xff]   ;;  %v15336_v36 = vld [vmem:[#allocation10 + $0x130] ss:$8 sps:$4 sm:$0xff]  }
  0x9d   : > { %1257 = vst [vmem:[#allocation2 + $0x120] sm:$0xff] %v16727_v0  ;;  %1258 = vst [vmem:[#allocation2 + $0x128] sm:$0xff] %v16727_v0  ;;  %15049 = vmatpush3.bf16.msra.mxu0 %v15286_v5  ;;  %2078 = vmatprep.subr.bf16.mxu1 %v15326_v21  ;;  %v15344_v37 = vld [vmem:[#allocation10 + $0x124] ss:$8 sps:$4 sm:$0xff]   ;;  %v15347_v38 = vld [vmem:[#allocation10] ss:$8 sps:$4 sm:$0xff]  }
  0x9e   : > { %1259 = vst [vmem:[#allocation2 + $0x130] sm:$0xff] %v16727_v0  ;;  %1260 = vst [vmem:[#allocation2 + $0x138] sm:$0xff] %v16727_v0  ;;  %15050 = vmatprep.subr.bf16.mxu0 %v16727_v0  ;;  %v15352_v39 = vld [vmem:[#allocation10 + $0xf4] ss:$8 sps:$4 sm:$0xff]   ;;  %v15342_v40 = vld [vmem:[#allocation10 + $0x120] ss:$8 sps:$4 sm:$0xff]  }
  0x9f   : > { %1261 = vst [vmem:[#allocation2 + $0x140] sm:$0xff] %v16727_v0  ;;  %1262 = vst [vmem:[#allocation2 + $0x148] sm:$0xff] %v16727_v0  ;;  %v15351_v41 = vld [vmem:[#allocation10 + $0x114] ss:$8 sps:$4 sm:$0xff]   ;;  %v15354_v42 = vld [vmem:[#allocation10 + $0xf0] ss:$8 sps:$4 sm:$0xff]  }
  0xa0   : > { %3431 = vst [vmem:[#allocation3 + $0x2] sm:$0xff] %v16727_v0  ;;  %3432 = vst [vmem:[#allocation3 + $0xa] sm:$0xff] %v16727_v0  ;;  %2079 = vmatpush1.bf16.msra.mxu1 %v15328_v25  ;;  %v15293_v43 = vld [vmem:[%s16945_s5 + $0x18] sm:$0xff]   ;;  %v15294_v52 = vld [vmem:[%s16945_s5 + $0x20] sm:$0xff]   ;;  %s16732_s4 = smov [#allocation16]  }
  0xa1   : > { %3433 = vst [vmem:[#allocation3 + $0x12] sm:$0xff] %v16727_v0  ;;  %3434 = vst [vmem:[#allocation3 + $0x1a] sm:$0xff] %v16727_v0  ;;  %15051 = vmatpush3.bf16.msra.mxu0 %v15287_v6  ;;  %2080 = vmatprep.subr.bf16.mxu1 %v15332_v26  ;;  %v15358_v44 = vld [vmem:[#allocation10 + $0xe4] ss:$8 sps:$4 sm:$0xff]   ;;  %v15349_v45 = vld [vmem:[#allocation10 + $0x110] ss:$8 sps:$4 sm:$0xff]  }
  0xa2   : > { %3435 = vst [vmem:[#allocation3 + $0x22] sm:$0xff] %v16727_v0  ;;  %3436 = vst [vmem:[#allocation3 + $0x2a] sm:$0xff] %v16727_v0  ;;  %15052 = vmatprep.subr.bf16.mxu0 %v16727_v0  ;;  %v15357_v46 = vld [vmem:[#allocation10 + $0x104] ss:$8 sps:$4 sm:$0xff]   ;;  %v15355_v47 = vld [vmem:[#allocation10 + $0x100] ss:$8 sps:$4 sm:$0xff]  }
  0xa3   : > { %3437 = vst [vmem:[#allocation3 + $0x32] sm:$0xff] %v16727_v0  ;;  %3438 = vst [vmem:[#allocation3 + $0x3a] sm:$0xff] %v16727_v0  ;;  %v15360_v48 = vld [vmem:[#allocation10 + $0xe0] ss:$8 sps:$4 sm:$0xff]   ;;  %v15364_v49 = vld [vmem:[#allocation10 + $0x1f4] ss:$8 sps:$4 sm:$0xff]  }
  0xa4   : > { %3439 = vst [vmem:[#allocation3 + $0x42] sm:$0xff] %v16727_v0  ;;  %3440 = vst [vmem:[#allocation3 + $0x4a] sm:$0xff] %v16727_v0  ;;  %2081 = vmatpush1.bf16.msra.mxu1 %v15334_v29  ;;  %v15365_v50 = vld [vmem:[#allocation10 + $0xd4] ss:$8 sps:$4 sm:$0xff]   ;;  %v15367_v51 = vld [vmem:[#allocation10 + $0xd0] ss:$8 sps:$4 sm:$0xff]  }
  0xa5   : > { %3441 = vst [vmem:[#allocation3 + $0x52] sm:$0xff] %v16727_v0  ;;  %3442 = vst [vmem:[#allocation3 + $0x5a] sm:$0xff] %v16727_v0  ;;  %15053 = vmatpush3.bf16.msra.mxu0 %v15288_v7  ;;  %2082 = vmatprep.subr.bf16.mxu1 %v15339_v30  ;;  %v15371_v53 = vld [vmem:[#allocation10 + $0xc4] ss:$8 sps:$4 sm:$0xff]   ;;  %v15362_v54 = vld [vmem:[#allocation10 + $0x1f0] ss:$8 sps:$4 sm:$0xff]  }
  0xa6   : > { %3443 = vst [vmem:[#allocation3 + $0x62] sm:$0xff] %v16727_v0  ;;  %3444 = vst [vmem:[#allocation3 + $0x6a] sm:$0xff] %v16727_v0  ;;  %15054 = vmatprep.subr.bf16.mxu0 %v16727_v0  ;;  %v15370_v55 = vld [vmem:[#allocation10 + $0x1e4] ss:$8 sps:$4 sm:$0xff]   ;;  %v15373_v56 = vld [vmem:[#allocation10 + $0xc0] ss:$8 sps:$4 sm:$0xff]  }
  0xa7   : > { %3445 = vst [vmem:[#allocation3 + $0x72] sm:$0xff] %v16727_v0  ;;  %3446 = vst [vmem:[#allocation3 + $0x7a] sm:$0xff] %v16727_v0  ;;  %v15368_v57 = vld [vmem:[#allocation10 + $0x1e0] ss:$8 sps:$4 sm:$0xff]   ;;  %v15377_v58 = vld [vmem:[#allocation10 + $0x1d4] ss:$8 sps:$4 sm:$0xff]  }
  0xa8   : > { %3447 = vst [vmem:[#allocation3 + $0x82] sm:$0xff] %v16727_v0  ;;  %3448 = vst [vmem:[#allocation3 + $0x8a] sm:$0xff] %v16727_v0  ;;  %2083 = vmatpush1.bf16.msra.mxu1 %v15341_v34  ;;  %v15295_v59 = vld [vmem:[%s16945_s5 + $0x28] sm:$0xff]   ;;  %v15296_v61 = vld [vmem:[%s16945_s5 + $0x30] sm:$0xff]   ;;  %s16594_s3 = sshll.u32 %s16732_s4, 4  ;;  %s16595_s3 = int_to_ptr.vmem [resolvable:$false] %s16594_s3 }
  0xa9   : > { %3449 = vst [vmem:[#allocation3 + $0x92] sm:$0xff] %v16727_v0  ;;  %3453 = vst [vmem:[#allocation3 + $0xb2] sm:$0xff] %v16727_v0  ;;  %15055 = vmatpush3.bf16.msra.mxu0 %v15289_v12  ;;  %2084 = vmatprep.subr.bf16.mxu1 %v15345_v35  ;;  %v15375_v60 = vld [vmem:[#allocation10 + $0x1d0] ss:$8 sps:$4 sm:$0xff]   ;;  %v15378_v1 = vld [vmem:[#allocation10 + $0xb4] ss:$8 sps:$4 sm:$0xff]   ;;  %p16597_p8 = scmp.lt.s32.totalorder %s18213_s12, %s16595_s3 }
  0xaa   : > { %3454 = vst [vmem:[#allocation3 + $0xba] sm:$0xff] %v16727_v0  ;;  %3455 = vst [vmem:[#allocation3 + $0xc2] sm:$0xff] %v16727_v0  ;;  %2313 = vmatprep.subr.bf16.mxu0 %v15312_v14  ;;  %v15297_v62 = vld [vmem:[%s16945_s5 + $0x38] sm:$0xff]   ;;  %v15298_v63 = vld [vmem:[%s16945_s5 + $0x40] sm:$0xff]  }
  0xab   : > { %3456 = vst [vmem:[#allocation3 + $0xca] sm:$0xff] %v16727_v0  ;;  %3457 = vst [vmem:[#allocation3 + $0xd2] sm:$0xff] %v16727_v0  ;;  %v15380_v2 = vld [vmem:[#allocation10 + $0xb0] ss:$8 sps:$4 sm:$0xff]   ;;  %v15383_v3 = vld [vmem:[#allocation10 + $0x1c4] ss:$8 sps:$4 sm:$0xff]  }
  0xac   : > { %3458 = vst [vmem:[#allocation3 + $0xda] sm:$0xff] %v16727_v0  ;;  %3459 = vst [vmem:[#allocation3 + $0xe2] sm:$0xff] %v16727_v0  ;;  %15057 = vmatmul.mubr.bf16.vlgmr.msra.gmra.mxu0 %v15290_v16  ;;  %2085 = vmatpush1.bf16.msra.mxu1 %v15347_v38  ;;  %v15381_v4 = vld [vmem:[#allocation10 + $0x1c0] ss:$8 sps:$4 sm:$0xff]   ;;  %v15384_v5 = vld [vmem:[#allocation10 + $0xa4] ss:$8 sps:$4 sm:$0xff]  }
  0xad   : > { %3460 = vst [vmem:[#allocation3 + $0xea] sm:$0xff] %v16727_v0  ;;  %3461 = vst [vmem:[#allocation3 + $0xf2] sm:$0xff] %v16727_v0  ;;  %15060 = vmatprep.mubr.msk.bf16.mxu0 %vm16728_vm0, %v16727_v0  ;;  %2314 = vmatpush1.bf16.msra.mxu0 %v15310_v18  ;;  %v15386_v6 = vld [vmem:[#allocation10 + $0xa0] ss:$8 sps:$4 sm:$0xff]   ;;  %v15390_v8 = vld [vmem:[#allocation10 + $0x1b4] ss:$8 sps:$4 sm:$0xff]  }
  0xae   : > { %3462 = vst [vmem:[#allocation3 + $0xfa] sm:$0xff] %v16727_v0  ;;  %3463 = vst [vmem:[#allocation3 + $0x102] sm:$0xff] %v16727_v0  ;;  %2315 = vmatprep.subr.bf16.mxu0 %v15318_v19  ;;  %2086 = vmatprep.subr.bf16.mxu1 %v15352_v39  ;;  %v15299_v7 = vld [vmem:[%s16945_s5 + $0x48] sm:$0xff]   ;;  %v15300_v16 = vld [vmem:[%s16945_s5 + $0x50] sm:$0xff]  }
  0xaf   : > { %3464 = vst [vmem:[#allocation3 + $0x10a] sm:$0xff] %v16727_v0  ;;  %3465 = vst [vmem:[#allocation3 + $0x112] sm:$0xff] %v16727_v0  ;;  %v15388_v9 = vld [vmem:[#allocation10 + $0x1b0] ss:$8 sps:$4 sm:$0xff]   ;;  %v15391_v10 = vld [vmem:[#allocation10 + $0x94] ss:$8 sps:$4 sm:$0xff]  }
  0xb0   : > { %3466 = vst [vmem:[#allocation3 + $0x11a] sm:$0xff] %v16727_v0  ;;  %3467 = vst [vmem:[#allocation3 + $0x122] sm:$0xff] %v16727_v0  ;;  %2087 = vmatpush2.bf16.msra.mxu1 %v15354_v42  ;;  %v15393_v11 = vld [vmem:[#allocation10 + $0x90] ss:$8 sps:$4 sm:$0xff]   ;;  %v15396_v12 = vld [vmem:[#allocation10 + $0x1a4] ss:$8 sps:$4 sm:$0xff]  }
  0xb1   : > { %3468 = vst [vmem:[#allocation3 + $0x12a] sm:$0xff] %v16727_v0  ;;  %3469 = vst [vmem:[#allocation3 + $0x132] sm:$0xff] %v16727_v0  ;;  %2316 = vmatpush1.bf16.msra.mxu0 %v15316_v22  ;;  %2088 = vmatprep.subr.bf16.mxu1 %v15358_v44  ;;  %v15394_v13 = vld [vmem:[#allocation10 + $0x1a0] ss:$8 sps:$4 sm:$0xff]   ;;  %v15397_v14 = vld [vmem:[#allocation10 + $0x84] ss:$8 sps:$4 sm:$0xff]  }
  0xb2   : > { %3470 = vst [vmem:[#allocation3 + $0x13a] sm:$0xff] %v16727_v0  ;;  %3471 = vst [vmem:[#allocation3 + $0x142] sm:$0xff] %v16727_v0  ;;  %2317 = vmatprep.subr.bf16.mxu0 %v15325_v24  ;;  %v15399_v15 = vld [vmem:[#allocation10 + $0x80] ss:$8 sps:$4 sm:$0xff]   ;;  %v15403_v17 = vld [vmem:[#allocation10 + $0x194] ss:$8 sps:$4 sm:$0xff]  }
  0xb3   : > { %3472 = vst [vmem:[#allocation3 + $0x14a] sm:$0xf] %v16727_v0  ;;  %v1305_v18 = vld [vmem:[#allocation2 + $0x1] sm:$0xff]  ;;  %v1306_v20 = vld [vmem:[#allocation2 + $0x9] sm:$0xff]  ;;  %v15404_v24 = vld [vmem:[#allocation10 + $0x180] ss:$8 sps:$4 sm:$0xff]  }
  0xb4   : > { %15061 = vmatmul.mubr.bf16.gmra.mxu0 %v15291_v23  ;;  %2089 = vmatpush2.bf16.msra.mxu1 %v15360_v48  ;;  %v15401_v19 = vld [vmem:[#allocation10 + $0x190] ss:$8 sps:$4 sm:$0xff]   ;;  %v1474_v21 = vpack.c.bf16 %v1306_v20, %v1305_v18  ;;  %v16729_v23 = vmov 0.0|0.0   ;;  %v1308_v29 = vld [vmem:[#allocation2 + $0x19] sm:$0xff] }
  0xb5   : > { %15064 = vmatprep.mubr.msk.bf16.mxu0 %vm16728_vm0, %v16727_v0  ;;  %2318 = vmatpush1.bf16.msra.mxu0 %v15323_v27  ;;  %v17083_v22 = vld [vmem:[#allocation2] sm:$0xff]  ;;  %v15309_v35 = vld [vmem:[%s16945_s5 + $0x68] sm:$0xff]  }
  0xb6   : > { %2319 = vmatprep.subr.bf16.mxu0 %v15331_v28  ;;  %2090 = vmatprep.subr.bf16.mxu1 %v15365_v50  ;;  %v15301_v25 = vld [vmem:[%s16945_s5 + $0x58] sm:$0xff]   ;;  %v1394_v18 = vld [vmem:[#allocation2 + $0x2b] sm:$0xff] }
  0xb7   : > { %2102 = vmatprep.mubr.bf16.mxu1 %v1474_v21  ;;  %v15407_v26 = vld [vmem:[#allocation10 + $0x270] ss:$8 sps:$4 sm:$0xff]   ;;  %v15409_v27 = vld [vmem:[#allocation10 + $0x274] ss:$8 sps:$4 sm:$0xff]   ;;  %v15410_v39 = vld [vmem:[#allocation10 + $0x260] ss:$8 sps:$4 sm:$0xff]  }
  0xb8   : > { %2091 = vmatpush2.bf16.msra.mxu1 %v15367_v51  ;;  %v1307_v28 = vld [vmem:[#allocation2 + $0x11] sm:$0xff]  ;;  %v1313_v42 = vld [vmem:[#allocation2 + $0x41] sm:$0xff]  ;;  %v1318_v51 = vld [vmem:[#allocation2 + $0x69] sm:$0xff] }
  0xb9   : > { %2320 = vmatpush1.bf16.msra.mxu0 %v15329_v31  ;;  %2092 = vmatprep.subr.bf16.mxu1 %v15371_v53  ;;  %v1479_v30 = vpack.c.bf16 %v1308_v29, %v1307_v28  ;;  %v15302_v31 = vld [vmem:[%s16945_s5 + $0x60] sm:$0xff]  }
  0xba   : > { %2321 = vmatprep.subr.bf16.mxu0 %v15338_v32  ;;  %v1309_v32 = vld [vmem:[#allocation2 + $0x21] sm:$0xff] }
  0xbb   : > { %v1317_v50 = vld [vmem:[#allocation2 + $0x61] sm:$0xff] }
  0xbc   : > { %15065 = vmatmul.mubr.bf16.gmra.mxu0 %v15292_v33  ;;  %2093 = vmatpush2.bf16.msra.mxu1 %v15373_v56  ;;  %v1310_v33 = vld [vmem:[#allocation2 + $0x29] sm:$0xff]  ;;  %v1319_v56 = vld [vmem:[#allocation2 + $0x71] sm:$0xff]  ;;  %v1354_v28 = vld [vmem:[#allocation2 + $0x3a] sm:$0xff] }
  0xbd   : > { %15068 = vmatprep.mubr.msk.bf16.mxu0 %vm16728_vm0, %v16727_v0  ;;  %2322 = vmatpush1.bf16.msra.mxu0 %v15336_v36  ;;  %v1484_v34 = vpack.c.bf16 %v1310_v33, %v1309_v32  ;;  %v1311_v36 = vld [vmem:[#allocation2 + $0x31] sm:$0xff]  ;;  %v15413_v53 = vld [vmem:[#allocation10 + $0x250] ss:$8 sps:$4 sm:$0xff]  }
  0xbe   : > { %2323 = vmatprep.subr.bf16.mxu0 %v15344_v37  ;;  %2094 = vmatprep.subr.bf16.mxu1 %v15378_v1  ;;  %v1312_v37 = vld [vmem:[#allocation2 + $0x39] sm:$0xff]  ;;  %v1351_v21 = vld [vmem:[#allocation2 + $0x22] sm:$0xff] }
  0xbf   : > { %v1489_v38 = vpack.c.bf16 %v1312_v37, %v1311_v36  ;;  %v15416_v1 = vld [vmem:[#allocation10 + $0x240] ss:$8 sps:$4 sm:$0xff]   ;;  %v1397_v29 = vld [vmem:[#allocation2 + $0x43] sm:$0xff] }
  0xc0   : > { %2095 = vmatpush2.bf16.msra.mxu1 %v15380_v2  ;;  %v15418_v2 = vld [vmem:[#allocation10 + $0x244] ss:$8 sps:$4 sm:$0xff]   ;;  %v15422_v33 = vld [vmem:[#allocation10 + $0x220] ss:$8 sps:$4 sm:$0xff]   ;;  %v1356_v36 = vld [vmem:[#allocation2 + $0x4a] sm:$0xff] }
  0xc1   : > { %2324 = vmatpush1.bf16.msra.mxu0 %v15342_v40  ;;  %2096 = vmatprep.subr.bf16.mxu1 %v15384_v5  ;;  %v15412_v40 = vld [vmem:[#allocation10 + $0x264] ss:$8 sps:$4 sm:$0xff]  }
  0xc2   : > { %2325 = vmatprep.subr.bf16.mxu0 %v15351_v41  ;;  %v15322_v41 = vld [vmem:[%s16945_s5 + $0x70] sm:$0xff]   ;;  %v15400_v5 = vld [vmem:[%s16945_s5 + $0xa0] sm:$0xff]  }
  0xc4   : > { %15069 = vmatmul.mubr.bf16.gmra.mxu0 %v15293_v43  ;;  %2097 = vmatpush2.bf16.msra.mxu1 %v15386_v6  ;;  %v1314_v43 = vld [vmem:[#allocation2 + $0x49] sm:$0xff] }
  0xc5   : > { %15072 = vmatprep.mubr.msk.bf16.mxu0 %vm16728_vm0, %v16727_v0  ;;  %2326 = vmatpush1.bf16.msra.mxu0 %v15349_v45  ;;  %v1494_v44 = vpack.c.bf16 %v1314_v43, %v1313_v42  ;;  %v15335_v45 = vld [vmem:[%s16945_s5 + $0x78] sm:$0xff]  }
  0xc6   : > { %2327 = vmatprep.subr.bf16.mxu0 %v15357_v46  ;;  %2098 = vmatprep.subr.bf16.mxu1 %v15391_v10  ;;  %v1315_v46 = vld [vmem:[#allocation2 + $0x51] sm:$0xff]  ;;  %v1392_v10 = vld [vmem:[#allocation2 + $0x1b] sm:$0xff] }
  0xc8   : > { %2099 = vmatpush2.bf16.msra.mxu1 %v15393_v11 }
  0xc9   : > { %2328 = vmatpush1.bf16.msra.mxu0 %v15355_v47  ;;  %2100 = vmatprep.subr.bf16.mxu1 %v15397_v14  ;;  %v1316_v47 = vld [vmem:[#allocation2 + $0x59] sm:$0xff]  ;;  %v15421_v14 = vld [vmem:[#allocation10 + $0x234] ss:$8 sps:$4 sm:$0xff]  }
  0xca   : > { %2329 = vmatprep.subr.bf16.mxu0 %v15364_v49  ;;  %v1499_v48 = vpack.c.bf16 %v1316_v47, %v1315_v46  ;;  %v15348_v49 = vld [vmem:[%s16945_s5 + $0x80] sm:$0xff]  }
  0xcb   : > { %v1358_v46 = vld [vmem:[#allocation2 + $0x5a] sm:$0xff] }
  0xcc   : > { %15073 = vmatmul.mubr.bf16.gmra.mxu0 %v15294_v52  ;;  %2101 = vmatpush2.bf16.msra.mxu1 %v15399_v15  ;;  %v1504_v52 = vpack.c.bf16 %v1318_v51, %v1317_v50  ;;  %v1349_v15 = vld [vmem:[#allocation2 + $0x12] sm:$0xff] }
  0xcd   : > { %15076 = vmatprep.mubr.msk.bf16.mxu0 %vm16728_vm0, %v16727_v0  ;;  %2330 = vmatpush2.bf16.msra.mxu0 %v15362_v54  ;;  %v15415_v54 = vld [vmem:[#allocation10 + $0x254] ss:$8 sps:$4 sm:$0xff]  }
  0xce   : > { %2331 = vmatprep.subr.bf16.mxu0 %v15370_v55  ;;  %2556 = vmatprep.subr.bf16.mxu1 %v15409_v27  ;;  %v15361_v55 = vld [vmem:[%s16945_s5 + $0x88] sm:$0xff]  }
  0xcf   : > { %2103 = vmatmul.mubr.bf16.vlgmr.msra.gmra.mxu1 %v16729_v23  ;;  %v1353_v27 = vld [vmem:[#allocation2 + $0x32] sm:$0xff] }
  0xd0   : > { %2557 = vmatpush1.bf16.msra.mxu1 %v15407_v26  ;;  %2112 = vmatprep.mubr.bf16.mxu1 %v1479_v30  ;;  %v1398_v30 = vld [vmem:[#allocation2 + $0x4b] sm:$0xff] }
  0xd1   : > { %2332 = vmatpush2.bf16.msra.mxu0 %v15368_v57  ;;  %2558 = vmatprep.subr.bf16.mxu1 %v15412_v40  ;;  %v1320_v57 = vld [vmem:[#allocation2 + $0x79] sm:$0xff]  ;;  %v1496_v32 = vpack.c.bf16 %v1398_v30, %v1397_v29 }
  0xd2   : > { %2333 = vmatprep.subr.bf16.mxu0 %v15377_v58  ;;  %v1509_v58 = vpack.c.bf16 %v1320_v57, %v1319_v56  ;;  %v15427_v56 = vld [vmem:[#allocation10 + $0x214] ss:$8 sps:$4 sm:$0xff]  }
  0xd3   : > { %v1359_v57 = vld [vmem:[#allocation2 + $0x62] sm:$0xff] }
  0xd4   : > { %15077 = vmatmul.mubr.bf16.gmra.mxu0 %v15295_v59  ;;  %2559 = vmatpush1.bf16.msra.mxu1 %v15410_v39  ;;  %v15374_v59 = vld [vmem:[%s16945_s5 + $0x90] sm:$0xff]  }
  0xd5   : > { %15080 = vmatprep.mubr.msk.bf16.mxu0 %vm16728_vm0, %v16727_v0  ;;  %2334 = vmatpush2.bf16.msra.mxu0 %v15375_v60  ;;  %v1321_v60 = vld [vmem:[#allocation2 + $0x81] sm:$0xff] }
  0xd6   : > { %2335 = vmatprep.subr.bf16.mxu0 %v15383_v3  ;;  %2560 = vmatprep.subr.bf16.mxu1 %v15415_v54  ;;  %v1389_v3 = vld [vmem:[#allocation2 + $0x3] sm:$0xff]  ;;  %v1400_v39 = vld [vmem:[#allocation2 + $0x5b] sm:$0xff] }
  0xd7   : > { %2113 = vmatmul.mubr.bf16.gmra.mxu1 %v16729_v23 }
  0xd8   : > { %2122 = vmatprep.mubr.bf16.mxu1 %v1484_v34  ;;  %2561 = vmatpush1.bf16.msra.mxu1 %v15413_v53  ;;  %v15424_v34 = vld [vmem:[#allocation10 + $0x224] ss:$8 sps:$4 sm:$0xff]  }
  0xd9   : > { %2336 = vmatpush2.bf16.msra.mxu0 %v15381_v4  ;;  %2562 = vmatprep.subr.bf16.mxu1 %v15418_v2  ;;  %v1390_v4 = vld [vmem:[#allocation2 + $0xb] sm:$0xff] }
  0xda   : > { %2337 = vmatprep.subr.bf16.mxu0 %v15390_v8  ;;  %v1476_v6 = vpack.c.bf16 %v1390_v4, %v1389_v3  ;;  %v1348_v8 = vld [vmem:[#allocation2 + $0xa] sm:$0xff]  ;;  %v1361_v4 = vld [vmem:[#allocation2 + $0x72] sm:$0xff] }
  0xdc   : > { %15081 = vmatmul.mubr.bf16.gmra.mxu0 %v15296_v61  ;;  %v1322_v61 = vld [vmem:[#allocation2 + $0x89] sm:$0xff]  ;;  %2563 = vmatpush1.bf16.msra.mxu1 %v15416_v1 }
  0xdd   : > { %15084 = vmatprep.mubr.msk.bf16.mxu0 %vm16728_vm0, %v16727_v0  ;;  %2338 = vmatpush2.bf16.msra.mxu0 %v15388_v9  ;;  %v1391_v9 = vld [vmem:[#allocation2 + $0x13] sm:$0xff] }
  0xde   : > { %2339 = vmatprep.subr.bf16.mxu0 %v15396_v12  ;;  %v1481_v12 = vpack.c.bf16 %v1392_v10, %v1391_v9  ;;  %2564 = vmatprep.subr.bf16.mxu1 %v15421_v14  ;;  %v1363_v14 = vld [vmem:[#allocation2 + $0x82] sm:$0xff] }
  0xdf   : > { %2123 = vmatmul.mubr.bf16.gmra.mxu1 %v16729_v23 }
  0xe0   : > { %2132 = vmatprep.mubr.bf16.mxu1 %v1489_v38  ;;  %v1399_v38 = vld [vmem:[#allocation2 + $0x53] sm:$0xff] }
  0xe1   : > { %2340 = vmatpush2.bf16.msra.mxu0 %v15394_v13  ;;  %v15419_v13 = vld [vmem:[#allocation10 + $0x230] ss:$8 sps:$4 sm:$0xff]   ;;  %v1501_v43 = vpack.c.bf16 %v1400_v39, %v1399_v38  ;;  %v17133_v39 = vld [vmem:[#allocation2 + $0x14] sm:$0xff] }
  0xe2   : > { %2341 = vmatprep.subr.bf16.mxu0 %v15403_v17  ;;  %v1393_v17 = vld [vmem:[#allocation2 + $0x23] sm:$0xff]  ;;  %2565 = vmatpush1.bf16.msra.mxu1 %v15419_v13 }
  0xe3   : > { %v1486_v20 = vpack.c.bf16 %v1394_v18, %v1393_v17  ;;  %2566 = vmatprep.subr.bf16.mxu1 %v15424_v34 }
  0xe4   : > { %15085 = vmatmul.mubr.bf16.gmra.mxu0 %v15297_v62  ;;  %v1514_v62 = vpack.c.bf16 %v1322_v61, %v1321_v60  ;;  %v1403_v60 = vld [vmem:[#allocation2 + $0x73] sm:$0xff]  ;;  %v1404_v61 = vld [vmem:[#allocation2 + $0x7b] sm:$0xff] }
  0xe5   : > { %15088 = vmatprep.mubr.msk.bf16.mxu0 %vm16728_vm0, %v16727_v0  ;;  %2342 = vmatpush2.bf16.msra.mxu0 %v15401_v19  ;;  %v1511_v2 = vpack.c.bf16 %v1404_v61, %v1403_v60 }
  0xe6   : > { %2567 = vmatpush1.bf16.msra.mxu1 %v15422_v33 }
  0xe7   : > { %2133 = vmatmul.mubr.bf16.gmra.mxu1 %v16729_v23  ;;  %2568 = vmatprep.subr.bf16.mxu1 %v15427_v56 }
  0xe8   : > { %2142 = vmatprep.mubr.bf16.mxu1 %v1494_v44 }
  0xec   : > { %15089 = vmatmul.mubr.bf16.gmra.mxu0 %v15298_v63  ;;  %v15387_v63 = vld [vmem:[%s16945_s5 + $0x98] sm:$0xff]   ;;  %s16596_s5 = scalar_lea.vmem %s16595_s3, 512 }
  0xed   : > { %15092 = vmatprep.mubr.msk.bf16.mxu0 %vm16728_vm0, %v16727_v0  ;;  %p16598_p9 = scmp.lt.s32.totalorder %s16596_s5, %s16590_s22 }
  0xef   : > { %2143 = vmatmul.mubr.bf16.gmra.mxu1 %v16729_v23  ;;  %p16599_p11 = por %p16598_p9, %p16597_p8 }
  0xf0   : > { %2152 = vmatprep.mubr.bf16.mxu1 %v1499_v48  ;;  %v1401_v48 = vld [vmem:[#allocation2 + $0x63] sm:$0xff] }
  0xf1   : > { %p16600_p10 = pnand %p16599_p11, %p16593_p7 }
  0xf4   : > { %15093 = vmatmul.mubr.bf16.gmra.mxu0 %v15299_v7  ;;  %v1347_v7 = vld [vmem:[#allocation2 + $0x2] sm:$0xff] }
  0xf5   : > { %15096 = vmatprep.mubr.msk.bf16.mxu0 %vm16728_vm0, %v16727_v0  ;;  %v15406_v0 = vld [vmem:[#allocation10 + $0x184] ss:$8 sps:$4 sm:$0xff]   ;;  %v1475_v11 = vpack.c.bf16 %v1348_v8, %v1347_v7  ;;  %v1405_v7 = vld [vmem:[#allocation2 + $0x83] sm:$0xff]  ;;  %v1406_v8 = vld [vmem:[#allocation2 + $0x8b] sm:$0xff] }
  0xf6   : > { %2343 = vmatprep.subr.bf16.mxu0 %v15406_v0  ;;  %v1352_v0 = vld [vmem:[#allocation2 + $0x2a] sm:$0xff] }
  0xf7   : > { %2344 = vmatpush2.bf16.msra.mxu0 %v15404_v24  ;;  %2153 = vmatmul.mubr.bf16.gmra.mxu1 %v16729_v23  ;;  %v1396_v24 = vld [vmem:[#allocation2 + $0x3b] sm:$0xff] }
  0xf8   : > { %2162 = vmatprep.mubr.bf16.mxu1 %v1504_v52 }
  0xfc   : > { %15097 = vmatmul.mubr.bf16.gmra.mxu0 %v15300_v16  ;;  %v1350_v16 = vld [vmem:[#allocation2 + $0x1a] sm:$0xff] }
  0xfd   : > { %15100 = vmatprep.mubr.msk.bf16.mxu0 %vm16728_vm0, %v17083_v22  ;;  %v1480_v19 = vpack.c.bf16 %v1350_v16, %v1349_v15  ;;  %v1364_v15 = vld [vmem:[#allocation2 + $0x8a] sm:$0xff] }
  0xff   : > { %2163 = vmatmul.mubr.bf16.gmra.mxu1 %v16729_v23 }
 0x100   : > { %2172 = vmatprep.mubr.bf16.mxu1 %v1509_v58  ;;  %v1360_v58 = vld [vmem:[#allocation2 + $0x6a] sm:$0xff] }
 0x101   : > { %v1505_v1 = vpack.c.bf16 %v1360_v58, %v1359_v57 }
 0x104   : > { %15101 = vmatmul.mubr.bf16.gmra.mxu0 %v15301_v25  ;;  %v1485_v25 = vpack.c.bf16 %v1352_v0, %v1351_v21  ;;  %v15428_v21 = vld [vmem:[#allocation10 + $0x200] ss:$8 sps:$4 sm:$0xff]   ;;  %v15430_v0 = vld [vmem:[#allocation10 + $0x204] ss:$8 sps:$4 sm:$0xff]  }
 0x105   : > { %15104 = vmatprep.mubr.msk.bf16.mxu0 %vm16728_vm0, %v17083_v22 }
 0x107   : > { %2173 = vmatmul.mubr.bf16.gmra.mxu1 %v16729_v23 }
 0x108   : > { %2182 = vmatprep.mubr.bf16.mxu1 %v1514_v62 }
 0x10c   : > { %15105 = vmatmul.mubr.bf16.gmra.mxu0 %v15302_v31  ;;  %v1490_v31 = vpack.c.bf16 %v1354_v28, %v1353_v27 }
 0x10d   : > { %15108 = vmatprep.mubr.msk.bf16.mxu0 %vm16728_vm0, %v17083_v22 }
 0x10f   : > { %2183 = vmatmul.mubr.bf16.gmra.mxu1 %v16729_v23 }
 0x114   : > { %15109 = vmatmul.mubr.bf16.gmra.mxu0 %v15309_v35  ;;  %v1355_v35 = vld [vmem:[#allocation2 + $0x42] sm:$0xff] }
 0x115   : > { %15112 = vmatprep.mubr.msk.bf16.mxu0 %vm16728_vm0, %v17083_v22  ;;  %v1495_v42 = vpack.c.bf16 %v1356_v36, %v1355_v35  ;;  %v17130_v35 = vld [vmem:[#allocation2] sm:$0xff] }
 0x11c   : > { %15113 = vmatmul.mubr.bf16.gmra.mxu0 %v15322_v41 }
 0x11d   : > { %15116 = vmatprep.mubr.msk.bf16.mxu0 %vm16728_vm0, %v17083_v22 }
 0x124   : > { %15117 = vmatmul.mubr.bf16.gmra.mxu0 %v15335_v45  ;;  %v1357_v45 = vld [vmem:[#allocation2 + $0x52] sm:$0xff] }
 0x125   : > { %15120 = vmatprep.mubr.msk.bf16.mxu0 %vm16728_vm0, %v17083_v22  ;;  %v1500_v52 = vpack.c.bf16 %v1358_v46, %v1357_v45  ;;  %v17141_v46 = vld [vmem:[#allocation2 + $0x24] sm:$0xff] }
 0x12c   : > { %15121 = vmatmul.mubr.bf16.gmra.mxu0 %v15348_v49  ;;  %v1402_v49 = vld [vmem:[#allocation2 + $0x6b] sm:$0xff] }
 0x12d   : > { %15124 = vmatprep.mubr.msk.bf16.mxu0 %vm16728_vm0, %v17083_v22  ;;  %v1506_v53 = vpack.c.bf16 %v1402_v49, %v1401_v48 }
 0x134   : > { %15125 = vmatmul.mubr.bf16.gmra.mxu0 %v15361_v55  ;;  %v15425_v55 = vld [vmem:[#allocation10 + $0x210] ss:$8 sps:$4 sm:$0xff]  }
 0x135   : > { %15128 = vmatprep.mubr.msk.bf16.mxu0 %vm16728_vm0, %v17083_v22  ;;  %2569 = vmatpush1.bf16.msra.mxu1 %v15425_v55  ;;  %v17151_v55 = vld [vmem:[#allocation2 + $0x3c] sm:$0xff] }
 0x136   : > { %2570 = vmatprep.subr.bf16.mxu1 %v15430_v0 }
 0x139   : > { %2571 = vmatpush1.bf16.msra.mxu1 %v15428_v21 }
 0x13c   : > { %15129 = vmatmul.mubr.bf16.gmra.mxu0 %v15374_v59 }
 0x13d   : > { %15132 = vmatprep.mubr.msk.bf16.mxu0 %vm16728_vm0, %v17083_v22 }
 0x144   : > { %15133 = vmatmul.mubr.bf16.gmra.mxu0 %v15387_v63 }
 0x145   : > { %15136 = vmatprep.mubr.msk.bf16.mxu0 %vm16728_vm0, %v17083_v22  ;;  %v1395_v22 = vld [vmem:[#allocation2 + $0x33] sm:$0xff] }
 0x146   : > { %v1491_v26 = vpack.c.bf16 %v1396_v24, %v1395_v22 }
 0x14c   : > { %15137 = vmatmul.mubr.bf16.gmra.mxu0 %v15400_v5  ;;  %v1362_v5 = vld [vmem:[#allocation2 + $0x7a] sm:$0xff] }
 0x14d   : > { %2345 = vmatprep.mubr.bf16.mxu0 %v1476_v6 }
 0x154   : > { %2346 = vmatmul.mubr.bf16.vlgmr.msra.gmra.mxu0 %v1475_v11  ;;  %v1510_v11 = vpack.c.bf16 %v1362_v5, %v1361_v4  ;;  %v17160_v4 = vld [vmem:[#allocation2 + $0x44] sm:$0xff]  ;;  %v17162_v5 = vld [vmem:[#allocation2 + $0x4c] sm:$0xff] }
 0x155   : > { %2355 = vmatprep.mubr.bf16.mxu0 %v1481_v12  ;;  %v1516_v12 = vpack.c.bf16 %v1406_v8, %v1405_v7  ;;  %v1407_v7 = vld [vmem:[#allocation2 + $0x93] sm:$0xff]  ;;  %5575 = vst [vmem:[#allocation2 + $0x40] sm:$0xff] %v17130_v35  ;;  %5576 = vst [vmem:[#allocation2 + $0x48] sm:$0xff] %v17130_v35 }
 0x156   : > { %v1365_v8 = vld [vmem:[#allocation2 + $0x92] sm:$0xff] }
 0x15c   : > { %2356 = vmatmul.mubr.bf16.gmra.mxu0 %v1480_v19  ;;  %v1515_v19 = vpack.c.bf16 %v1364_v15, %v1363_v14 }
 0x15d   : > { %2365 = vmatprep.mubr.bf16.mxu0 %v1486_v20 }
 0x164   : > { %2366 = vmatmul.mubr.bf16.gmra.mxu0 %v1485_v25 }
 0x165   : > { %2375 = vmatprep.mubr.bf16.mxu0 %v1491_v26 }
 0x16c   : > { %v715_v37 = vpop.f32.mrf.mxu0  ;;  %2376 = vmatmul.mubr.bf16.gmra.mxu0 %v1490_v31  ;;  %v17124_v31 = vld [vmem:[#allocation2 + $0x4] sm:$0xff] }
 0x16d   : > { %2385 = vmatprep.mubr.bf16.mxu0 %v1496_v32  ;;  %v17126_v32 = vld [vmem:[#allocation2 + $0xc] sm:$0xff] }
 0x16e   : > { %v15058_v40 = vpop.f32.mrf.mxu0  ;;  %v1477_v34 = vpack.c.bf16 %v17126_v32, %v17124_v31  ;;  %5568 = vst [vmem:[#allocation2 + $0x8] sm:$0xff] %v17130_v35  ;;  %5569 = vst [vmem:[#allocation2 + $0x10] sm:$0xff] %v17130_v35 }
 0x16f   : > { %v17135_v40 = vld [vmem:[#allocation2 + $0x1c] sm:$0xff] }
 0x170   : > { %v718_v41 = vpop.f32.mrf.mxu0  ;;  %5570 = vst [vmem:[#allocation2 + $0x18] sm:$0xff] %v17130_v35  ;;  %5571 = vst [vmem:[#allocation2 + $0x20] sm:$0xff] %v17130_v35 }
 0x172   : > { %v15059_v44 = vpop.f32.mrf.mxu0 }
 0x174   : > { %v723_v47 = vpop.f32.mrf.mxu0  ;;  %2386 = vmatmul.mubr.bf16.gmra.mxu0 %v1495_v42  ;;  %v1482_v42 = vpack.c.bf16 %v17135_v40, %v17133_v39  ;;  %v15449_v39 = vld [vmem:[#allocation10 + $0x290] ss:$8 sps:$4 sm:$0xff]   ;;  %v15451_v40 = vld [vmem:[#allocation10 + $0x294] ss:$8 sps:$4 sm:$0xff]  }
 0x175   : > { %2395 = vmatprep.mubr.bf16.mxu0 %v1501_v43  ;;  %v17143_v47 = vld [vmem:[#allocation2 + $0x2c] sm:$0xff] }
 0x176   : > { %v15062_v50 = vpop.f32.mrf.mxu0  ;;  %v1487_v49 = vpack.c.bf16 %v17143_v47, %v17141_v46  ;;  %5572 = vst [vmem:[#allocation2 + $0x28] sm:$0xff] %v17130_v35  ;;  %v1497_v46 = vpack.c.bf16 %v17162_v5, %v17160_v4  ;;  %v1369_v4 = vld [vmem:[#allocation2 + $0xb2] sm:$0xff]  ;;  %v1370_v5 = vld [vmem:[#allocation2 + $0xba] sm:$0xff] }
 0x178   : > { %v726_v51 = vpop.f32.mrf.mxu0 }
 0x17a   : > { %v15063_v54 = vpop.f32.mrf.mxu0 }
 0x17b   : > { %v17149_v54 = vld [vmem:[#allocation2 + $0x34] sm:$0xff] }
 0x17c   : > { %v731_v59 = vpop.f32.mrf.mxu0  ;;  %2396 = vmatmul.mubr.bf16.gmra.mxu0 %v1500_v52  ;;  %v1492_v57 = vpack.c.bf16 %v17151_v55, %v17149_v54  ;;  %5573 = vst [vmem:[#allocation2 + $0x30] sm:$0xff] %v17130_v35  ;;  %5574 = vst [vmem:[#allocation2 + $0x38] sm:$0xff] %v17130_v35 }
 0x17d   : > { %2405 = vmatprep.mubr.bf16.mxu0 %v1506_v53  ;;  %v14115_v53 = vld [vmem:[#allocation9] ss:$0 sm:$0xff] }
 0x17e   : > { %v15066_v62 = vpop.f32.mrf.mxu0 }
 0x180   : > { %v734_v63 = vpop.f32.mrf.mxu0 }
 0x182   : > { %v15067_v3 = vpop.f32.mrf.mxu0 }
 0x184   : > { %v739_v6 = vpop.f32.mrf.mxu0  ;;  %2406 = vmatmul.mubr.bf16.gmra.mxu0 %v1505_v1 }
 0x185   : > { %2415 = vmatprep.mubr.bf16.mxu0 %v1511_v2  ;;  %v1323_v6 = vld [vmem:[#allocation2 + $0x91] sm:$0xff] }
 0x186   : > { %v15070_v9 = vpop.f32.mrf.mxu0 }
 0x188   : > { %v742_v10 = vpop.f32.mrf.mxu0 }
 0x18a   : > { %v15071_v13 = vpop.f32.mrf.mxu0 }
 0x18c   : > { %v747_v16 = vpop.f32.mrf.mxu0  ;;  %2416 = vmatmul.mubr.bf16.gmra.mxu0 %v1510_v11 }
 0x18d   : > { %2425 = vmatprep.mubr.bf16.mxu0 %v1516_v12 }
 0x18e   : > { %v15074_v17 = vpop.f32.mrf.mxu0 }
 0x18f   : > { %v2104_v59 = vpop.f32.mrf.mxu1 }
 0x190   : > { %v750_v18 = vpop.f32.mrf.mxu0 }
 0x191   : > { %v2106_v61 = vpop.f32.mrf.mxu1 }
 0x192   : > { %v15075_v20 = vpop.f32.mrf.mxu0 }
 0x193   : > { %v2108_v1 = vpop.f32.mrf.mxu1 }
 0x194   : > { %v755_v22 = vpop.f32.mrf.mxu0  ;;  %2426 = vmatmul.mubr.bf16.gmra.mxu0 %v1515_v19  ;;  %v17169_v19 = vld [vmem:[#allocation2 + $0x94] sm:$0xff]  ;;  %v17187_v1 = vld [vmem:[#allocation2 + $0x6c] sm:$0xff] }
 0x195   : > { %v2110_v3 = vpop.f32.mrf.mxu1 }
 0x196   : > { %v15078_v24 = vpop.f32.mrf.mxu0  ;;  %v1330_v3 = vld [vmem:[#allocation2 + $0xc9] sm:$0xff] }
 0x197   : > { %v2114_v10 = vpop.f32.mrf.mxu1 }
 0x198   : > { %v758_v25 = vpop.f32.mrf.mxu0 }
 0x199   : > { %v2116_v18 = vpop.f32.mrf.mxu1 }
 0x19a   : > { %v15079_v26 = vpop.f32.mrf.mxu0 }
 0x19b   : > { %v2118_v0 = vpop.f32.mrf.mxu1 }
 0x19c   : > { %v763_v27 = vpop.f32.mrf.mxu0 }
 0x19e   : > { %v15082_v28 = vpop.f32.mrf.mxu0 }
 0x1a0   : > { %v766_v29 = vpop.f32.mrf.mxu0 }
 0x1a1   : > { %v1327_v29 = vld [vmem:[#allocation2 + $0xb1] sm:$0xff] }
 0x1a2   : > { %v15083_v30 = vpop.f32.mrf.mxu0 }
 0x1a3   : > { %v2120_v30 = vpop.f32.mrf.mxu1 }
 0x1a4   : > { %v771_v33 = vpop.f32.mrf.mxu0  ;;  %v17201_v30 = vld [vmem:[#allocation2 + $0x8c] sm:$0xff] }
 0x1a5   : > { %5585 = vst [vmem:[#allocation2 + $0x90] sm:$0xff] %v17130_v35 }
 0x1a6   : > { %v15086_v36 = vpop.f32.mrf.mxu0 }
 0x1a7   : > { %v1328_v36 = vld [vmem:[#allocation2 + $0xb9] sm:$0xff] }
 0x1a8   : > { %v774_v37 = vpop.f32.mrf.mxu0 }
 0x1aa   : > { %v15087_v38 = vpop.f32.mrf.mxu0 }
 0x1ab   : > { %v17175_v38 = vld [vmem:[#allocation2 + $0x54] sm:$0xff] }
 0x1ac   : > { %v779_v41 = vpop.f32.mrf.mxu0  ;;  %5577 = vst [vmem:[#allocation2 + $0x50] sm:$0xff] %v17130_v35 }
 0x1ad   : > { %v17177_v41 = vld [vmem:[#allocation2 + $0x5c] sm:$0xff] }
 0x1ae   : > { %v15090_v43 = vpop.f32.mrf.mxu0  ;;  %5578 = vst [vmem:[#allocation2 + $0x58] sm:$0xff] %v17130_v35  ;;  %v1502_v54 = vpack.c.bf16 %v17177_v41, %v17175_v38 }
 0x1b0   : > { %v782_v44 = vpop.f32.mrf.mxu0 }
 0x1b2   : > { %v15091_v45 = vpop.f32.mrf.mxu0 }
 0x1b3   : > { %v2124_v45 = vpop.f32.mrf.mxu1 }
 0x1b4   : > { %v787_v48 = vpop.f32.mrf.mxu0 }
 0x1b6   : > { %v15094_v50 = vpop.f32.mrf.mxu0 }
 0x1b7   : > { %v1529_v50 = vpack.c.bf16 %v1328_v36, %v1327_v29  ;;  %v17199_v29 = vld [vmem:[#allocation2 + $0x84] sm:$0xff] }
 0x1b8   : > { %v790_v51 = vpop.f32.mrf.mxu0  ;;  %v1334_v36 = vld [vmem:[#allocation2 + $0xe9] sm:$0xff]  ;;  %5584 = vst [vmem:[#allocation2 + $0x88] sm:$0xff] %v17130_v35 }
 0x1b9   : > { %v2126_v51 = vpop.f32.mrf.mxu1 }
 0x1ba   : > { %v15095_v52 = vpop.f32.mrf.mxu0 }
 0x1bb   : > { %v2128_v59 = vpop.f32.mrf.mxu1 }
 0x1bc   : > { %v795_v56 = vpop.f32.mrf.mxu0  ;;  %v1335_v59 = vld [vmem:[#allocation2 + $0xf1] sm:$0xff] }
 0x1bd   : > { %v17157_v58 = vadd.f32 %v14115_v53, %v795_v56  ;;  %v2130_v61 = vpop.f32.mrf.mxu1 }
 0x1be   : > { %v15098_v60 = vpop.f32.mrf.mxu0 }
 0x1bf   : > { %1241 = vst [vmem:[#allocation2 + $0xa0] sm:$0xff] %v17157_v58 }
 0x1c0   : > { %v798_v62 = vpop.f32.mrf.mxu0 }
 0x1c1   : > { %v799_v63 = vadd.f32 %v14115_v53, %v798_v62  ;;  %v17185_v62 = vld [vmem:[#allocation2 + $0x64] sm:$0xff] }
 0x1c2   : > { %v15099_v2 = vpop.f32.mrf.mxu0  ;;  %5579 = vst [vmem:[#allocation2 + $0x60] sm:$0xff] %v17130_v35  ;;  %5580 = vst [vmem:[#allocation2 + $0x68] sm:$0xff] %v17130_v35  ;;  %v1507_v38 = vpack.c.bf16 %v17187_v1, %v17185_v62  ;;  %v15458_v62 = vld [vmem:[#allocation10 + $0x360] ss:$8 sps:$4 sm:$0xff]   ;;  %v15460_v1 = vld [vmem:[#allocation10 + $0x364] ss:$8 sps:$4 sm:$0xff]  }
 0x1c3   : > { %1242 = vst [vmem:[#allocation2 + $0xa8] sm:$0xff] %v799_v63  ;;  %v1523_v52 = vpack.c.bf16 %v799_v63, %v17157_v58  ;;  %v1329_v2 = vld [vmem:[#allocation2 + $0xc1] sm:$0xff]  ;;  %v2134_v58 = vpop.f32.mrf.mxu1 }
 0x1c4   : > { %v803_v9 = vpop.f32.mrf.mxu0 }
 0x1c6   : > { %v1324_v11 = vld [vmem:[#allocation2 + $0x99] sm:$0xff]  ;;  %v15102_v14 = vpop.f32.mrf.mxu0 }
 0x1c7   : > { %v1408_v12 = vld [vmem:[#allocation2 + $0x9b] sm:$0xff]  ;;  %v1519_v15 = vpack.c.bf16 %v1324_v11, %v1323_v6 }
 0x1c8   : > { %v17166_v13 = vld [vmem:[#allocation2 + $0x9a] sm:$0xff]  ;;  %v1521_v16 = vpack.c.bf16 %v1408_v12, %v1407_v7  ;;  %v806_v21 = vpop.f32.mrf.mxu0  ;;  %v1534_v7 = vpack.c.bf16 %v1330_v3, %v1329_v2 }
 0x1c9   : > { %v1520_v17 = vpack.c.bf16 %v17166_v13, %v1365_v8  ;;  %v17171_v20 = vld [vmem:[#allocation2 + $0x9c] sm:$0xff]  ;;  %2192 = vmatprep.mubr.bf16.mxu1 %v1519_v15  ;;  %v2136_v8 = vpop.f32.mrf.mxu1  ;;  %v17192_v14 = vld [vmem:[#allocation2 + $0x74] sm:$0xff] }
 0x1ca   : > { %5586 = vst [vmem:[#allocation2 + $0x98] sm:$0xff] %v17130_v35  ;;  %2435 = vmatprep.mubr.bf16.mxu0 %v1521_v16  ;;  %2193 = vmatmul.mubr.bf16.gmra.mxu1 %v16729_v23  ;;  %v1325_v22 = vld [vmem:[#allocation2 + $0xa1] sm:$0xff]  ;;  %v1326_v24 = vld [vmem:[#allocation2 + $0xa9] sm:$0xff]  ;;  %v15103_v26 = vpop.f32.mrf.mxu0  ;;  %v1331_v16 = vld [vmem:[#allocation2 + $0xd1] sm:$0xff] }
 0x1cb   : > { %2436 = vmatmul.mubr.bf16.gmra.mxu0 %v1520_v17  ;;  %v1409_v25 = vld [vmem:[#allocation2 + $0xa3] sm:$0xff]  ;;  %v1524_v27 = vpack.c.bf16 %v1326_v24, %v1325_v22  ;;  %v1410_v28 = vld [vmem:[#allocation2 + $0xab] sm:$0xff]  ;;  %v2138_v10 = vpop.f32.mrf.mxu1  ;;  %v1332_v17 = vld [vmem:[#allocation2 + $0xd9] sm:$0xff]  ;;  %5581 = vst [vmem:[#allocation2 + $0x70] sm:$0xff] %v17130_v35 }
 0x1cc   : > { %v1526_v33 = vpack.c.bf16 %v1410_v28, %v1409_v25  ;;  %v811_v37 = vpop.f32.mrf.mxu0  ;;  %v1367_v43 = vld [vmem:[#allocation2 + $0xa2] sm:$0xff]  ;;  %v17179_v44 = vld [vmem:[#allocation2 + $0xaa] sm:$0xff]  ;;  %v1539_v22 = vpack.c.bf16 %v1332_v17, %v1331_v16 }
 0x1cd   : > { %2202 = vmatprep.mubr.bf16.mxu1 %v1524_v27  ;;  %v1525_v53 = vpack.c.bf16 %v17179_v44, %v1367_v43  ;;  %v2140_v12 = vpop.f32.mrf.mxu1  ;;  %v17194_v15 = vld [vmem:[#allocation2 + $0x7c] sm:$0xff] }
 0x1ce   : > { %2445 = vmatprep.mubr.bf16.mxu0 %v1526_v33  ;;  %v15106_v48 = vpop.f32.mrf.mxu0  ;;  %5582 = vst [vmem:[#allocation2 + $0x78] sm:$0xff] %v17130_v35  ;;  %v1333_v33 = vld [vmem:[#allocation2 + $0xe1] sm:$0xff]  ;;  %5583 = vst [vmem:[#allocation2 + $0x80] sm:$0xff] %v17130_v35 }
 0x1cf   : > { %v2144_v21 = vpop.f32.mrf.mxu1  ;;  %v1544_v48 = vpack.c.bf16 %v1334_v36, %v1333_v33  ;;  %v1337_v10 = vld [vmem:[#allocation2 + $0x101] sm:$0xff]  ;;  %v1339_v33 = vld [vmem:[#allocation2 + $0x111] sm:$0xff]  ;;  %v1340_v36 = vld [vmem:[#allocation2 + $0x119] sm:$0xff] }
 0x1d0   : > { %v814_v56 = vpop.f32.mrf.mxu0 }
 0x1d1   : > { %v2146_v24 = vpop.f32.mrf.mxu1 }
 0x1d2   : > { %2203 = vmatmul.mubr.bf16.gmra.mxu1 %v1523_v52  ;;  %v15107_v60 = vpop.f32.mrf.mxu0 }
 0x1d3   : > { %2446 = vmatmul.mubr.bf16.gmra.mxu0 %v1525_v53  ;;  %2212 = vmatprep.mubr.bf16.mxu1 %v1529_v50  ;;  %v2148_v26 = vpop.f32.mrf.mxu1  ;;  %v1336_v60 = vld [vmem:[#allocation2 + $0xf9] sm:$0xff] }
 0x1d4   : > { %v819_v6 = vpop.f32.mrf.mxu0  ;;  %v15433_v26 = vld [vmem:[#allocation10 + $0x2f4] ss:$8 sps:$4 sm:$0xff]  }
 0x1d5   : > { %v2150_v28 = vpop.f32.mrf.mxu1  ;;  %v1549_v6 = vpack.c.bf16 %v1336_v60, %v1335_v59  ;;  %4267 = vmatprep.subr.bf16.mxu0 %v15433_v26  ;;  %v1341_v60 = vld [vmem:[#allocation2 + $0x121] sm:$0xff] }
 0x1d6   : > { %v15110_v63 = vpop.f32.mrf.mxu0  ;;  %v15436_v28 = vld [vmem:[#allocation10 + $0x2e4] ss:$8 sps:$4 sm:$0xff]  }
 0x1d7   : > { %v2154_v43 = vpop.f32.mrf.mxu1 }
 0x1d8   : > { %v822_v9 = vpop.f32.mrf.mxu0 }
 0x1d9   : > { %v2156_v50 = vpop.f32.mrf.mxu1 }
 0x1da   : > { %2213 = vmatmul.mubr.bf16.gmra.mxu1 %v16729_v23  ;;  %v15111_v11 = vpop.f32.mrf.mxu0  ;;  %v1559_v50 = vpack.c.bf16 %v1340_v36, %v1339_v33  ;;  %v15440_v36 = vld [vmem:[#allocation10 + $0x2c0] ss:$8 sps:$4 sm:$0xff]  }
 0x1db   : > { %2222 = vmatprep.mubr.bf16.mxu1 %v1534_v7  ;;  %v2158_v52 = vpop.f32.mrf.mxu1  ;;  %v1338_v11 = vld [vmem:[#allocation2 + $0x109] sm:$0xff] }
 0x1dc   : > { %v827_v18 = vpop.f32.mrf.mxu0 }
 0x1dd   : > { %v2160_v56 = vpop.f32.mrf.mxu1  ;;  %v1554_v18 = vpack.c.bf16 %v1338_v11, %v1337_v10 }
 0x1de   : > { %v15114_v0 = vpop.f32.mrf.mxu0 }
 0x1df   : > { %v2164_v2 = vpop.f32.mrf.mxu1 }
 0x1e0   : > { %v830_v25 = vpop.f32.mrf.mxu0 }
 0x1e1   : > { %v2166_v58 = vpop.f32.mrf.mxu1  ;;  %v15431_v25 = vld [vmem:[#allocation10 + $0x2f0] ss:$8 sps:$4 sm:$0xff]  }
 0x1e2   : > { %2223 = vmatmul.mubr.bf16.gmra.mxu1 %v16729_v23  ;;  %v15115_v27 = vpop.f32.mrf.mxu0  ;;  %4268 = vmatpush1.bf16.msra.mxu0 %v15431_v25 }
 0x1e3   : > { %2232 = vmatprep.mubr.bf16.mxu1 %v1539_v22  ;;  %v2168_v7 = vpop.f32.mrf.mxu1  ;;  %4269 = vmatprep.subr.bf16.mxu0 %v15436_v28  ;;  %v1304_v28 = vld [vmem:[#allocation2 + $0x148] sm:$0xf] }
 0x1e4   : > { %v835_v37 = vpop.f32.mrf.mxu0  ;;  %v1343_v7 = vld [vmem:[#allocation2 + $0x131] sm:$0xff] }
 0x1e5   : > { %v2170_v9 = vpop.f32.mrf.mxu1 }
 0x1e6   : > { %v15118_v45 = vpop.f32.mrf.mxu0 }
 0x1e7   : > { %v2174_v16 = vpop.f32.mrf.mxu1  ;;  %v15434_v45 = vld [vmem:[#allocation10 + $0x2e0] ss:$8 sps:$4 sm:$0xff]  }
 0x1e8   : > { %v838_v51 = vpop.f32.mrf.mxu0  ;;  %4270 = vmatpush1.bf16.msra.mxu0 %v15434_v45 }
 0x1e9   : > { %v2176_v21 = vpop.f32.mrf.mxu1 }
 0x1ea   : > { %2233 = vmatmul.mubr.bf16.gmra.mxu1 %v16729_v23  ;;  %v15119_v53 = vpop.f32.mrf.mxu0 }
 0x1eb   : > { %2242 = vmatprep.mubr.bf16.mxu1 %v1544_v48  ;;  %v2178_v22 = vpop.f32.mrf.mxu1 }
 0x1ec   : > { %v843_v61 = vpop.f32.mrf.mxu0  ;;  %v15439_v22 = vld [vmem:[#allocation10 + $0x2d4] ss:$8 sps:$4 sm:$0xff]  }
 0x1ed   : > { %v2180_v27 = vpop.f32.mrf.mxu1  ;;  %v1342_v61 = vld [vmem:[#allocation2 + $0x129] sm:$0xff]  ;;  %4271 = vmatprep.subr.bf16.mxu0 %v15439_v22 }
 0x1ee   : > { %v15122_v3 = vpop.f32.mrf.mxu0 }
 0x1ef   : > { %v2184_v43 = vpop.f32.mrf.mxu1 }
 0x1f0   : > { %v846_v63 = vpop.f32.mrf.mxu0  ;;  %v1573_v43 = vpack.c.bf16 %v1304_v28, %v17130_v35 }
 0x1f1   : > { %v2186_v51 = vpop.f32.mrf.mxu1 }
 0x1f2   : > { %2243 = vmatmul.mubr.bf16.gmra.mxu1 %v16729_v23  ;;  %v15123_v8 = vpop.f32.mrf.mxu0  ;;  %v16730_v51 = vmov 0  }
 0x1f3   : > { %2252 = vmatprep.mubr.bf16.mxu1 %v1549_v6  ;;  %v2188_v53 = vpop.f32.mrf.mxu1  ;;  %v1564_v6 = vpack.c.bf16 %v1342_v61, %v1341_v60  ;;  %v1344_v8 = vld [vmem:[#allocation2 + $0x139] sm:$0xff] }
 0x1f4   : > { %v851_v12 = vpop.f32.mrf.mxu0  ;;  %v1569_v11 = vpack.c.bf16 %v1344_v8, %v1343_v7 }
 0x1f5   : > { %v2190_v59 = vpop.f32.mrf.mxu1 }
 0x1f6   : > { %v15126_v17 = vpop.f32.mrf.mxu0 }
 0x1f7   : > { %v1345_v17 = vld [vmem:[#allocation2 + $0x141] sm:$0xff] }
 0x1f8   : > { %v854_v0 = vpop.f32.mrf.mxu0 }
 0x1f9   : > { %v15437_v0 = vld [vmem:[#allocation10 + $0x2d0] ss:$8 sps:$4 sm:$0xff]  }
 0x1fa   : > { %2253 = vmatmul.mubr.bf16.gmra.mxu1 %v16729_v23  ;;  %v15127_v24 = vpop.f32.mrf.mxu0  ;;  %4272 = vmatpush1.bf16.msra.mxu0 %v15437_v0 }
 0x1fb   : > { %2262 = vmatprep.mubr.bf16.mxu1 %v1554_v18  ;;  %v1346_v18 = vld [vmem:[#allocation2 + $0x149] sm:$0xf] }
 0x1fc   : > { %v859_v37 = vpop.f32.mrf.mxu0  ;;  %v1574_v25 = vpack.c.bf16 %v1346_v18, %v1345_v17 }
 0x1fd   : > { %v15442_v37 = vld [vmem:[#allocation10 + $0x2c4] ss:$8 sps:$4 sm:$0xff]  }
 0x1fe   : > { %v15130_v48 = vpop.f32.mrf.mxu0  ;;  %4273 = vmatprep.subr.bf16.mxu0 %v15442_v37 }
 0x1ff   : > { %4274 = vmatpush1.bf16.msra.mxu0 %v15440_v36  ;;  %v1414_v36 = vld [vmem:[#allocation2 + $0xcb] sm:$0xff] }
 0x200   : > { %v862_v52 = vpop.f32.mrf.mxu0 }
 0x202   : > { %2263 = vmatmul.mubr.bf16.gmra.mxu1 %v16729_v23  ;;  %v15131_v56 = vpop.f32.mrf.mxu0 }
 0x203   : > { %2272 = vmatprep.mubr.bf16.mxu1 %v1559_v50  ;;  %v15445_v56 = vld [vmem:[#allocation10 + $0x2b4] ss:$8 sps:$4 sm:$0xff]  }
 0x204   : > { %v867_v2 = vpop.f32.mrf.mxu0  ;;  %4275 = vmatprep.subr.bf16.mxu0 %v15445_v56  ;;  %v17243_v56 = vld [vmem:[#allocation2 + $0xbc] sm:$0xff] }
 0x206   : > { %v15134_v3 = vpop.f32.mrf.mxu0 }
 0x208   : > { %v870_v58 = vpop.f32.mrf.mxu0 }
 0x209   : > { %v15446_v58 = vld [vmem:[#allocation10 + $0x2a0] ss:$8 sps:$4 sm:$0xff]  }
 0x20a   : > { %2273 = vmatmul.mubr.bf16.gmra.mxu1 %v16729_v23  ;;  %v15135_v63 = vpop.f32.mrf.mxu0 }
 0x20b   : > { %2282 = vmatprep.mubr.bf16.mxu1 %v1564_v6  ;;  %v15448_v63 = vld [vmem:[#allocation10 + $0x2a4] ss:$8 sps:$4 sm:$0xff]  }
 0x20c   : > { %v875_v9 = vpop.f32.mrf.mxu0 }
 0x20e   : > { %v15138_v10 = vpop.f32.mrf.mxu0 }
 0x210   : > { %v878_v12 = vpop.f32.mrf.mxu0 }
 0x211   : > { %v15454_v12 = vld [vmem:[#allocation10 + $0x284] ss:$8 sps:$4 sm:$0xff]  }
 0x212   : > { %2283 = vmatmul.mubr.bf16.gmra.mxu1 %v16729_v23  ;;  %v15139_v16 = vpop.f32.mrf.mxu0 }
 0x213   : > { %2292 = vmatprep.mubr.bf16.mxu1 %v1569_v11 }
 0x214   : > { %v2347_v21 = vpop.f32.mrf.mxu0 }
 0x215   : > { %v1412_v21 = vld [vmem:[#allocation2 + $0xbb] sm:$0xff] }
 0x216   : > { %v2349_v24 = vpop.f32.mrf.mxu0 }
 0x217   : > { %v1530_v24 = vpack.c.bf16 %v1370_v5, %v1369_v4  ;;  %v1421_v4 = vld [vmem:[#allocation2 + $0x103] sm:$0xff]  ;;  %v1422_v5 = vld [vmem:[#allocation2 + $0x10b] sm:$0xff] }
 0x218   : > { %v2351_v26 = vpop.f32.mrf.mxu0 }
 0x219   : > { %v15457_v26 = vld [vmem:[#allocation10 + $0x374] ss:$8 sps:$4 sm:$0xff]  }
 0x21a   : > { %2293 = vmatmul.mubr.bf16.gmra.mxu1 %v16729_v23  ;;  %v2353_v27 = vpop.f32.mrf.mxu0  ;;  %v15443_v23 = vld [vmem:[#allocation10 + $0x2b0] ss:$8 sps:$4 sm:$0xff]  }
 0x21b   : > { %2302 = vmatprep.mubr.bf16.mxu1 %v1574_v25  ;;  %4276 = vmatpush1.bf16.msra.mxu0 %v15443_v23  ;;  %v15455_v25 = vld [vmem:[#allocation10 + $0x370] ss:$8 sps:$4 sm:$0xff]   ;;  %v17241_v23 = vld [vmem:[#allocation2 + $0xb4] sm:$0xff] }
 0x21c   : > { %v2357_v33 = vpop.f32.mrf.mxu0  ;;  %4277 = vmatprep.subr.bf16.mxu0 %v15448_v63  ;;  %v17250_v63 = vld [vmem:[#allocation2 + $0xc4] sm:$0xff] }
 0x21d   : > { %v1413_v33 = vld [vmem:[#allocation2 + $0xc3] sm:$0xff] }
 0x21e   : > { %v2359_v45 = vpop.f32.mrf.mxu0  ;;  %v1536_v37 = vpack.c.bf16 %v1414_v36, %v1413_v33  ;;  %v17276_v33 = vld [vmem:[#allocation2 + $0xf4] sm:$0xff]  ;;  %v17278_v36 = vld [vmem:[#allocation2 + $0xfc] sm:$0xff] }
 0x21f   : > { %4278 = vmatpush1.bf16.msra.mxu0 %v15446_v58  ;;  %v1371_v45 = vld [vmem:[#allocation2 + $0xc2] sm:$0xff] }
 0x220   : > { %v2361_v48 = vpop.f32.mrf.mxu0  ;;  %4279 = vmatprep.subr.bf16.mxu0 %v15451_v40  ;;  %5591 = vst [vmem:[#allocation2 + $0xc0] sm:$0xff] %v17130_v35  ;;  %v1376_v40 = vld [vmem:[#allocation2 + $0xea] sm:$0xff] }
 0x221   : > { %v1372_v48 = vld [vmem:[#allocation2 + $0xca] sm:$0xff] }
 0x222   : > { %2303 = vmatmul.mubr.bf16.gmra.mxu1 %v1573_v43  ;;  %v2363_v50 = vpop.f32.mrf.mxu0 }
 0x223   : > { %2588 = vmatprep.mubr.bf16.mxu1 %v16730_v51  ;;  %4280 = vmatpush1.bf16.msra.mxu0 %v15449_v39  ;;  %v1535_v50 = vpack.c.bf16 %v1372_v48, %v1371_v45  ;;  %v1375_v39 = vld [vmem:[#allocation2 + $0xe2] sm:$0xff] }
 0x224   : > { %v2367_v52 = vpop.f32.mrf.mxu0  ;;  %4281 = vmatprep.subr.bf16.mxu0 %v15454_v12  ;;  %v1377_v12 = vld [vmem:[#allocation2 + $0xf2] sm:$0xff]  ;;  %v15484_v45 = vld [vmem:[#allocation10 + $0x3b4] ss:$8 sps:$4 sm:$0xff]   ;;  %v15482_v48 = vld [vmem:[#allocation10 + $0x3b0] ss:$8 sps:$4 sm:$0xff]  }
 0x225   : > { %v17239_v52 = vld [vmem:[#allocation2 + $0xac] sm:$0xff] }
 0x226   : > { %v2369_v53 = vpop.f32.mrf.mxu0 }
 0x228   : > { %v2371_v59 = vpop.f32.mrf.mxu0 }
 0x229   : > { %v1512_v59 = vpack.c.bf16 %v17194_v15, %v17192_v14  ;;  %v1517_v14 = vpack.c.bf16 %v17201_v30, %v17199_v29  ;;  %v15461_v15 = vld [vmem:[#allocation10 + $0x350] ss:$8 sps:$4 sm:$0xff]   ;;  %v15466_v29 = vld [vmem:[#allocation10 + $0x3f4] ss:$8 sps:$4 sm:$0xff]   ;;  %v1419_v30 = vld [vmem:[#allocation2 + $0xf3] sm:$0xff] }
 0x22a   : > { %2589 = vmatmul.mubr.bf16.vlgmr.msra.gmra.mxu1 %v1477_v34  ;;  %v2373_v60 = vpop.f32.mrf.mxu0  ;;  %4500 = vmatprep.subr.bf16.mxu1 %v15466_v29  ;;  %v1383_v29 = vld [vmem:[#allocation2 + $0x122] sm:$0xff] }
 0x22b   : > { %2598 = vmatprep.mubr.bf16.mxu1 %v16730_v51  ;;  %v1415_v60 = vld [vmem:[#allocation2 + $0xd3] sm:$0xff] }
 0x22c   : > { %v2377_v61 = vpop.f32.mrf.mxu0 }
 0x22d   : > { %v1416_v61 = vld [vmem:[#allocation2 + $0xdb] sm:$0xff] }
 0x22e   : > { %v2379_v2 = vpop.f32.mrf.mxu0 }
 0x22f   : > { %v1541_v2 = vpack.c.bf16 %v1416_v61, %v1415_v60  ;;  %v1381_v60 = vld [vmem:[#allocation2 + $0x112] sm:$0xff]  ;;  %v1382_v61 = vld [vmem:[#allocation2 + $0x11a] sm:$0xff] }
 0x230   : > { %v2381_v3 = vpop.f32.mrf.mxu0 }
 0x231   : > { %v1373_v3 = vld [vmem:[#allocation2 + $0xd2] sm:$0xff] }
 0x232   : > { %2599 = vmatmul.mubr.bf16.gmra.mxu1 %v1482_v42  ;;  %v2383_v6 = vpop.f32.mrf.mxu0 }
 0x233   : > { %2608 = vmatprep.mubr.bf16.mxu1 %v16730_v51  ;;  %v1374_v6 = vld [vmem:[#allocation2 + $0xda] sm:$0xff] }
 0x234   : > { %v2387_v7 = vpop.f32.mrf.mxu0  ;;  %v1540_v58 = vpack.c.bf16 %v1374_v6, %v1373_v3  ;;  %v1560_v3 = vpack.c.bf16 %v1382_v61, %v1381_v60  ;;  %v17285_v6 = vld [vmem:[#allocation2 + $0x104] sm:$0xff] }
 0x235   : > { %v17252_v7 = vld [vmem:[#allocation2 + $0xcc] sm:$0xff] }
 0x236   : > { %v2389_v31 = vpop.f32.mrf.mxu0  ;;  %5592 = vst [vmem:[#allocation2 + $0xc8] sm:$0xff] %v17130_v35  ;;  %v15506_v60 = vld [vmem:[#allocation10 + $0x450] ss:$8 sps:$4 sm:$0xff]  }
 0x237   : > { %v15463_v31 = vld [vmem:[#allocation10 + $0x354] ss:$8 sps:$4 sm:$0xff]  }
 0x238   : > { %v2391_v32 = vpop.f32.mrf.mxu0 }
 0x239   : > { %v1417_v32 = vld [vmem:[#allocation2 + $0xe3] sm:$0xff] }
 0x23a   : > { %2609 = vmatmul.mubr.bf16.gmra.mxu1 %v1487_v49  ;;  %v2393_v34 = vpop.f32.mrf.mxu0  ;;  %v15452_v49 = vld [vmem:[#allocation10 + $0x280] ss:$8 sps:$4 sm:$0xff]  }
 0x23b   : > { %2618 = vmatprep.mubr.bf16.mxu1 %v16730_v51  ;;  %4282 = vmatpush1.bf16.msra.mxu0 %v15452_v49  ;;  %v1418_v34 = vld [vmem:[#allocation2 + $0xeb] sm:$0xff]  ;;  %v15469_v49 = vld [vmem:[#allocation10 + $0x3e4] ss:$8 sps:$4 sm:$0xff]  }
 0x23c   : > { %v2397_v8 = vpop.f32.mrf.mxu0  ;;  %4283 = vmatprep.subr.bf16.mxu0 %v15457_v26  ;;  %v1379_v26 = vld [vmem:[#allocation2 + $0x102] sm:$0xff] }
 0x23d   : > { %v1546_v8 = vpack.c.bf16 %v1418_v34, %v1417_v32  ;;  %v15493_v32 = vld [vmem:[#allocation10 + $0x324] ss:$8 sps:$4 sm:$0xff]   ;;  %v1425_v34 = vld [vmem:[#allocation2 + $0x123] sm:$0xff] }
 0x23e   : > { %v2399_v42 = vpop.f32.mrf.mxu0 }
 0x23f   : > { %4284 = vmatpush2.bf16.msra.mxu0 %v15455_v25  ;;  %v1545_v42 = vpack.c.bf16 %v1376_v40, %v1375_v39  ;;  %v15478_v25 = vld [vmem:[#allocation10 + $0x3c4] ss:$8 sps:$4 sm:$0xff]   ;;  %v1426_v40 = vld [vmem:[#allocation2 + $0x12b] sm:$0xff] }
 0x240   : > { %v2401_v9 = vpop.f32.mrf.mxu0  ;;  %4285 = vmatprep.subr.bf16.mxu0 %v15460_v1 }
 0x241   : > { %v17259_v9 = vld [vmem:[#allocation2 + $0xd4] sm:$0xff] }
 0x242   : > { %2619 = vmatmul.mubr.bf16.gmra.mxu1 %v1492_v57  ;;  %v2403_v10 = vpop.f32.mrf.mxu0  ;;  %v1411_v57 = vld [vmem:[#allocation2 + $0xb3] sm:$0xff]  ;;  %5593 = vst [vmem:[#allocation2 + $0xd0] sm:$0xff] %v17130_v35 }
 0x243   : > { %2628 = vmatprep.mubr.bf16.mxu1 %v16730_v51  ;;  %v1531_v0 = vpack.c.bf16 %v1412_v21, %v1411_v57  ;;  %5589 = vst [vmem:[#allocation2 + $0xb0] sm:$0xff] %v17130_v35  ;;  %5590 = vst [vmem:[#allocation2 + $0xb8] sm:$0xff] %v17130_v35  ;;  %4286 = vmatpush2.bf16.msra.mxu0 %v15458_v62  ;;  %v17261_v10 = vld [vmem:[#allocation2 + $0xdc] sm:$0xff]  ;;  %v17268_v21 = vld [vmem:[#allocation2 + $0xe4] sm:$0xff]  ;;  %v882_v62 = vlaneseq }
 0x244   : > { %v2407_v11 = vpop.f32.mrf.mxu0  ;;  %4287 = vmatprep.subr.bf16.mxu0 %v15463_v31  ;;  %5594 = vst [vmem:[#allocation2 + $0xd8] sm:$0xff] %v17130_v35  ;;  %v15472_v57 = vld [vmem:[#allocation10 + $0x344] ss:$8 sps:$4 sm:$0xff]   ;;  %5595 = vst [vmem:[#allocation2 + $0xe0] sm:$0xff] %v17130_v35  ;;  %v15491_v31 = vld [vmem:[#allocation10 + $0x320] ss:$8 sps:$4 sm:$0xff]  }
 0x245   : > { %2455 = vmatprep.mubr.bf16.mxu0 %v1531_v0  ;;  %v15464_v11 = vld [vmem:[#allocation10 + $0x3f0] ss:$8 sps:$4 sm:$0xff]  }
 0x246   : > { %v2409_v47 = vpop.f32.mrf.mxu0  ;;  %2456 = vmatmul.mubr.bf16.gmra.mxu0 %v1530_v24  ;;  %4501 = vmatpush1.bf16.msra.mxu1 %v15464_v11  ;;  %v17270_v0 = vld [vmem:[#allocation2 + $0xec] sm:$0xff]  ;;  %v1556_v24 = vpack.c.bf16 %v1422_v5, %v1421_v4  ;;  %v1428_v4 = vld [vmem:[#allocation2 + $0x13b] sm:$0xff] }
 0x247   : > { %2465 = vmatprep.mubr.bf16.mxu0 %v1536_v37  ;;  %4288 = vmatpush2.bf16.msra.mxu0 %v15461_v15  ;;  %5596 = vst [vmem:[#allocation2 + $0xe8] sm:$0xff] %v17130_v35  ;;  %v15479_v37 = vld [vmem:[#allocation10 + $0x330] ss:$8 sps:$4 sm:$0xff]   ;;  %5597 = vst [vmem:[#allocation2 + $0xf0] sm:$0xff] %v17130_v35  ;;  %v1537_v15 = vpack.c.bf16 %v17252_v7, %v17250_v63  ;;  %v15494_v11 = vld [vmem:[#allocation10 + $0x380] ss:$8 sps:$4 sm:$0xff]  }
 0x248   : > { %v2411_v16 = vpop.f32.mrf.mxu0  ;;  %4502 = vmatprep.subr.bf16.mxu1 %v15469_v49  ;;  %4289 = vmatprep.subr.bf16.mxu0 %v15472_v57  ;;  %v17303_v49 = vld [vmem:[#allocation2 + $0x11c] sm:$0xff] }
 0x249   : > { %v1378_v16 = vld [vmem:[#allocation2 + $0xfa] sm:$0xff] }
 0x24a   : > { %2629 = vmatmul.mubr.bf16.gmra.mxu1 %v1497_v46  ;;  %v2413_v17 = vpop.f32.mrf.mxu0  ;;  %v1420_v46 = vld [vmem:[#allocation2 + $0xfb] sm:$0xff] }
 0x24b   : > { %2638 = vmatprep.mubr.bf16.mxu1 %v16730_v51  ;;  %v1551_v47 = vpack.c.bf16 %v1420_v46, %v1419_v30  ;;  %v1522_v17 = vpack.c.bf16 %v17171_v20, %v17169_v19  ;;  %v15475_v19 = vld [vmem:[#allocation10 + $0x3d4] ss:$8 sps:$4 sm:$0xff]   ;;  %v15473_v20 = vld [vmem:[#allocation10 + $0x3d0] ss:$8 sps:$4 sm:$0xff]   ;;  %5598 = vst [vmem:[#allocation2 + $0xf8] sm:$0xff] %v17130_v35  ;;  %5599 = vst [vmem:[#allocation2 + $0x100] sm:$0xff] %v17130_v35 }
 0x24c   : > { %v2417_v18 = vpop.f32.mrf.mxu0  ;;  %v1384_v30 = vld [vmem:[#allocation2 + $0x12a] sm:$0xff] }
 0x24d   : > { %v15467_v18 = vld [vmem:[#allocation10 + $0x3e0] ss:$8 sps:$4 sm:$0xff]   ;;  %v1565_v46 = vpack.c.bf16 %v1384_v30, %v1383_v29 }
 0x24e   : > { %v2419_v55 = vpop.f32.mrf.mxu0  ;;  %2466 = vmatmul.mubr.bf16.gmra.mxu0 %v1535_v50  ;;  %4503 = vmatpush1.bf16.msra.mxu1 %v15467_v18  ;;  %v1532_v50 = vpack.c.bf16 %v17243_v56, %v17241_v23  ;;  %v15490_v23 = vld [vmem:[#allocation10 + $0x394] ss:$8 sps:$4 sm:$0xff]   ;;  %v15488_v56 = vld [vmem:[#allocation10 + $0x390] ss:$8 sps:$4 sm:$0xff]  }
 0x24f   : > { %2475 = vmatprep.mubr.bf16.mxu0 %v1541_v2  ;;  %v15470_v55 = vld [vmem:[#allocation10 + $0x340] ss:$8 sps:$4 sm:$0xff]   ;;  %4504 = vmatprep.subr.bf16.mxu1 %v15475_v19 }
 0x250   : > { %v2421_v22 = vpop.f32.mrf.mxu0  ;;  %4290 = vmatpush2.bf16.msra.mxu0 %v15470_v55  ;;  %v15485_v2 = vld [vmem:[#allocation10 + $0x3a0] ss:$8 sps:$4 sm:$0xff]   ;;  %v15497_v55 = vld [vmem:[#allocation10 + $0x470] ss:$8 sps:$4 sm:$0xff]  }
 0x251   : > { %v1451_v22 = vld [vmem:[#allocation2 + $0xa4] sm:$0xff] }
 0x252   : > { %2639 = vmatmul.mubr.bf16.gmra.mxu1 %v1502_v54  ;;  %v2423_v27 = vpop.f32.mrf.mxu0  ;;  %v1550_v54 = vpack.c.bf16 %v1378_v16, %v1377_v12  ;;  %v17308_v16 = vld [vmem:[#allocation2] sm:$0xff] }
 0x253   : > { %2648 = vmatprep.mubr.bf16.mxu1 %v16730_v51  ;;  %v1380_v27 = vld [vmem:[#allocation2 + $0x10a] sm:$0xff]  ;;  %4505 = vmatpush1.bf16.msra.mxu1 %v15473_v20  ;;  %v1542_v20 = vpack.c.bf16 %v17261_v10, %v17259_v9 }
 0x254   : > { %v2427_v28 = vpop.f32.mrf.mxu0  ;;  %4506 = vmatprep.subr.bf16.mxu1 %v15478_v25  ;;  %v15502_v25 = vld [vmem:[#allocation10 + $0x464] ss:$8 sps:$4 sm:$0xff]  }
 0x255   : > { %v1527_v28 = vpack.c.bf16 %v17239_v52, %v1451_v22  ;;  %v1423_v52 = vld [vmem:[#allocation2 + $0x113] sm:$0xff] }
 0x256   : > { %v2429_v41 = vpop.f32.mrf.mxu0  ;;  %2476 = vmatmul.mubr.bf16.gmra.mxu0 %v1540_v58  ;;  %v17287_v58 = vld [vmem:[#allocation2 + $0x10c] sm:$0xff] }
 0x257   : > { %2485 = vmatprep.mubr.bf16.mxu0 %v1546_v8  ;;  %v1555_v41 = vpack.c.bf16 %v1380_v27, %v1379_v26  ;;  %5600 = vst [vmem:[#allocation2 + $0x108] sm:$0xff] %v17130_v35  ;;  %v17296_v8 = vld [vmem:[#allocation12] sm:$0x3]  ;;  %v1566_v35 = vpack.c.bf16 %v1426_v40, %v1425_v34  ;;  %v1386_v27 = vld [vmem:[#allocation2 + $0x13a] sm:$0xff]  ;;  %v1387_v34 = vld [vmem:[#allocation2 + $0x142] sm:$0xff] }
 0x258   : > { %v2431_v43 = vpop.f32.mrf.mxu0  ;;  %v1427_v22 = vld [vmem:[#allocation2 + $0x133] sm:$0xff]  ;;  %v1388_v40 = vld [vmem:[#allocation2 + $0x14a] sm:$0xf] }
 0x259   : > { %v15481_v43 = vld [vmem:[#allocation10 + $0x334] ss:$8 sps:$4 sm:$0xff]   ;;  %v1385_v26 = vld [vmem:[#allocation2 + $0x132] sm:$0xff]  ;;  %v1575_v29 = vpack.c.bf16 %v1388_v40, %v1387_v34 }
 0x25a   : > { %2649 = vmatmul.mubr.bf16.gmra.mxu1 %v1507_v38  ;;  %v2433_v53 = vpop.f32.mrf.mxu0  ;;  %v15476_v38 = vld [vmem:[#allocation10 + $0x3c0] ss:$8 sps:$4 sm:$0xff]   ;;  %4291 = vmatprep.subr.bf16.mxu0 %v15481_v43  ;;  %v15503_v43 = vld [vmem:[#allocation10 + $0x310] ss:$8 sps:$4 sm:$0xff]  }
 0x25b   : > { %2658 = vmatprep.mubr.bf16.mxu1 %v16730_v51  ;;  %4507 = vmatpush1.bf16.msra.mxu1 %v15476_v38  ;;  %v1424_v53 = vld [vmem:[#allocation2 + $0x11b] sm:$0xff] }
 0x25c   : > { %4508 = vmatprep.subr.bf16.mxu1 %v15484_v45  ;;  %4292 = vmatpush2.bf16.msra.mxu0 %v15479_v37  ;;  %v1561_v1 = vpack.c.bf16 %v1424_v53, %v1423_v52  ;;  %v1570_v37 = vpack.c.bf16 %v1386_v27, %v1385_v26  ;;  %v15505_v45 = vld [vmem:[#allocation10 + $0x314] ss:$8 sps:$4 sm:$0xff]   ;;  %v15521_v27 = vld [vmem:[#allocation10 + $0x410] ss:$8 sps:$4 sm:$0xff]  }
 0x25d   : > { %4293 = vmatprep.subr.bf16.mxu0 %v15493_v32  ;;  %v17322_v52 = vld [vmem:[#allocation2 + $0x12c] sm:$0xff]  ;;  %v15511_v32 = vld [vmem:[#allocation10 + $0x444] ss:$8 sps:$4 sm:$0xff]   ;;  %v17352_v26 = vld [vmem:[#allocation2 + $0x144] sm:$0xff] }
 0x25e   : > { %2486 = vmatmul.mubr.bf16.gmra.mxu0 %v1545_v42  ;;  %v15496_v42 = vld [vmem:[#allocation10 + $0x384] ss:$8 sps:$4 sm:$0xff]  }
 0x25f   : > { %2495 = vmatprep.mubr.bf16.mxu0 %v1551_v47  ;;  %4509 = vmatpush1.bf16.msra.mxu1 %v15482_v48  ;;  %v17301_v47 = vld [vmem:[#allocation2 + $0x114] sm:$0xff] }
 0x260   : > { %4294 = vmatpush2.bf16.msra.mxu0 %v15491_v31  ;;  %5601 = vst [vmem:[#allocation2 + $0x110] sm:$0xff] %v17308_v16  ;;  %5602 = vst [vmem:[#allocation2 + $0x118] sm:$0xff] %v17308_v16 }
 0x261   : > { %4295 = vmatprep.subr.bf16.mxu0 %v15505_v45  ;;  %v1557_v45 = vpack.c.bf16 %v17287_v58, %v17285_v6  ;;  %v1562_v58 = vpack.c.bf16 %v17303_v49, %v17301_v47 }
 0x262   : > { %2659 = vmatmul.mubr.bf16.gmra.mxu1 %v1512_v59  ;;  %v15487_v59 = vld [vmem:[#allocation10 + $0x3a4] ss:$8 sps:$4 sm:$0xff]  }
 0x263   : > { %2668 = vmatprep.mubr.bf16.mxu1 %v16730_v51  ;;  %4510 = vmatprep.subr.bf16.mxu1 %v15487_v59 }
 0x264   : > { %4511 = vmatpush1.bf16.msra.mxu1 %v15485_v2  ;;  %4296 = vmatpush2.bf16.msra.mxu0 %v15503_v43 }
 0x265   : > { %4512 = vmatprep.subr.bf16.mxu1 %v15490_v23  ;;  %v1429_v23 = vld [vmem:[#allocation2 + $0x143] sm:$0xff] }
 0x266   : > { %2496 = vmatmul.mubr.bf16.gmra.mxu0 %v1550_v54 }
 0x267   : > { %2505 = vmatprep.mubr.bf16.mxu0 %v1556_v24  ;;  %v1571_v24 = vpack.c.bf16 %v1428_v4, %v1427_v22  ;;  %v15520_v22 = vld [vmem:[#allocation10 + $0x424] ss:$8 sps:$4 sm:$0xff]  }
 0x268   : > { %4513 = vmatpush1.bf16.msra.mxu1 %v15488_v56  ;;  %v1430_v56 = vld [vmem:[#allocation2 + $0x14b] sm:$0xf] }
 0x269   : > { %4514 = vmatprep.subr.bf16.mxu1 %v15496_v42  ;;  %v1576_v31 = vpack.c.bf16 %v1430_v56, %v1429_v23  ;;  %v3517_v56 = vld [vmem:[#allocation3 + $0x25] sm:$0xff] }
 0x26a   : > { %2669 = vmatmul.mubr.bf16.gmra.mxu1 %v1517_v14  ;;  %v17289_v14 = vshrl.u32 %v882_v62, 7  ;;  %v15508_v62 = vld [vmem:[#allocation10 + $0x454] ss:$8 sps:$4 sm:$0xff]  }
 0x26b   : > { %2678 = vmatprep.mubr.bf16.mxu1 %v16730_v51 }
 0x26c   : > { %v17299_v39 = vsub.s32 0, %v17289_v14  ;;  %4515 = vmatpush1.bf16.msra.mxu1 %v15494_v11  ;;  %v15509_v11 = vld [vmem:[#allocation10 + $0x440] ss:$8 sps:$4 sm:$0xff]  }
 0x26e   : > { %2506 = vmatmul.mubr.bf16.gmra.mxu0 %v1555_v41  ;;  %v1663_v12 = vrot.slane %v17296_v8, %v17299_v39  ;;  %v15500_v41 = vld [vmem:[#allocation10 + $0x460] ss:$8 sps:$4 sm:$0xff]  }
 0x26f   : > { %2515 = vmatprep.mubr.bf16.mxu0 %v1561_v1 }
 0x272   : > { %2679 = vmatmul.mubr.bf16.gmra.mxu1 %v1522_v17  ;;  %v15499_v17 = vld [vmem:[#allocation10 + $0x474] ss:$8 sps:$4 sm:$0xff]  }
 0x273   : > { %2688 = vmatprep.mubr.bf16.mxu1 %v16730_v51  ;;  %4516 = vmatprep.subr.bf16.mxu1 %v15499_v17 }
 0x274   : > { %4517 = vmatpush2.bf16.msra.mxu1 %v15497_v55  ;;  %v1552_v55 = vpack.c.bf16 %v17278_v36, %v17276_v33  ;;  %v15523_v33 = vld [vmem:[#allocation10 + $0x414] ss:$8 sps:$4 sm:$0xff]  }
 0x275   : > { %4518 = vmatprep.subr.bf16.mxu1 %v15502_v25 }
 0x276   : > { %2516 = vmatmul.mubr.bf16.gmra.mxu0 %v1560_v3  ;;  %v1547_v3 = vpack.c.bf16 %v17270_v0, %v17268_v21  ;;  %v17339_v21 = vld [vmem:[#allocation2 + $0x134] sm:$0xff]  ;;  %v17341_v0 = vld [vmem:[#allocation2 + $0x13c] sm:$0xff] }
 0x277   : > { %2525 = vmatprep.mubr.bf16.mxu0 %v1566_v35  ;;  %5605 = vst [vmem:[#allocation2 + $0x130] sm:$0xff] %v17308_v16  ;;  %5606 = vst [vmem:[#allocation2 + $0x138] sm:$0xff] %v17308_v16 }
 0x278   : > { %4519 = vmatpush2.bf16.msra.mxu1 %v15500_v41  ;;  %5607 = vst [vmem:[#allocation2 + $0x140] sm:$0xff] %v17308_v16  ;;  %v15524_v41 = vld [vmem:[#allocation10 + $0x4f0] ss:$8 sps:$4 sm:$0xff]  }
 0x279   : > { %4520 = vmatprep.subr.bf16.mxu1 %v15508_v62  ;;  %v15529_v62 = vld [vmem:[#allocation10 + $0x404] ss:$8 sps:$4 sm:$0xff]  }
 0x27a   : > { %2689 = vmatmul.mubr.bf16.gmra.mxu1 %v1527_v28 }
 0x27b   : > { %2698 = vmatprep.mubr.bf16.mxu1 %v16730_v51 }
 0x27c   : > { %4521 = vmatpush2.bf16.msra.mxu1 %v15506_v60 }
 0x27d   : > { %4522 = vmatprep.subr.bf16.mxu1 %v15511_v32 }
 0x27e   : > { %2526 = vmatmul.mubr.bf16.gmra.mxu0 %v1565_v46 }
 0x27f   : > { %2535 = vmatprep.mubr.bf16.mxu0 %v1571_v24  ;;  %v17350_v24 = vpack.c.bf16 %v17308_v16, %v17308_v16 }
 0x280   : > { %4523 = vmatpush2.bf16.msra.mxu1 %v15509_v11 }
 0x282   : > { %2699 = vmatmul.mubr.bf16.gmra.mxu1 %v1532_v50  ;;  %v17320_v50 = vld [vmem:[#allocation2 + $0x124] sm:$0xff] }
 0x283   : > { %2708 = vmatprep.mubr.bf16.mxu1 %v16730_v51  ;;  %5603 = vst [vmem:[#allocation2 + $0x120] sm:$0xff] %v17308_v16  ;;  %5604 = vst [vmem:[#allocation2 + $0x128] sm:$0xff] %v17308_v16  ;;  %v1567_v11 = vpack.c.bf16 %v17322_v52, %v17320_v50 }
 0x286   : > { %2536 = vmatmul.mubr.bf16.gmra.mxu0 %v1570_v37  ;;  %v15526_v37 = vld [vmem:[#allocation10 + $0x4f4] ss:$8 sps:$4 sm:$0xff]  }
 0x287   : > { %2545 = vmatprep.mubr.bf16.mxu0 %v1576_v31 }
 0x28a   : > { %v2194_v63 = vpop.f32.mrf.mxu1  ;;  %2709 = vmatmul.mubr.bf16.gmra.mxu1 %v1537_v15 }
 0x28b   : > { %v2437_v7 = vpop.f32.mrf.mxu0  ;;  %2718 = vmatprep.mubr.bf16.mxu1 %v16730_v51  ;;  %v15512_v63 = vld [vmem:[#allocation10 + $0x300] ss:$8 sps:$4 sm:$0xff]  }
 0x28c   : > { %v2196_v18 = vpop.f32.mrf.mxu1  ;;  %v15514_v7 = vld [vmem:[#allocation10 + $0x304] ss:$8 sps:$4 sm:$0xff]  }
 0x28d   : > { %v2439_v54 = vpop.f32.mrf.mxu0  ;;  %v15515_v18 = vld [vmem:[#allocation10 + $0x430] ss:$8 sps:$4 sm:$0xff]   ;;  %4297 = vmatprep.subr.bf16.mxu0 %v15514_v7 }
 0x28e   : > { %v2198_v57 = vpop.f32.mrf.mxu1  ;;  %2546 = vmatmul.mubr.bf16.gmra.mxu0 %v1575_v29  ;;  %v3519_v29 = vld [vmem:[#allocation3 + $0x35] sm:$0xff] }
 0x28f   : > { %v2441_v19 = vpop.f32.mrf.mxu0  ;;  %v2199_v5 = vadd.f32 %v2198_v57, %v1663_v12  ;;  %4298 = vmatpush2.bf16.msra.mxu0 %v15512_v63  ;;  %v3513_v57 = vld [vmem:[#allocation3 + $0x5] sm:$0xff] }
 0x290   : > { %v17314_v28 = vpop.f32.mrf.mxu1  ;;  %4733 = vmatprep.subr.bf16.mxu0 %v15526_v37  ;;  %v3554_v37 = vld [vmem:[#allocation3 + $0x10] sm:$0xff] }
 0x291   : > { %v17316_v38 = vpop.f32.mrf.mxu0  ;;  %v17318_v48 = vadd.f32 %v2441_v19, %v2199_v5  ;;  %v3514_v19 = vld [vmem:[#allocation3 + $0xd] sm:$0xff] }
 0x292   : > { %v2204_v9 = vpop.f32.mrf.mxu1  ;;  %2719 = vmatmul.mubr.bf16.gmra.mxu1 %v1542_v20  ;;  %v3674_v20 = vpack.c.bf16 %v3514_v19, %v3513_v57  ;;  %v15518_v5 = vld [vmem:[#allocation10 + $0x420] ss:$8 sps:$4 sm:$0xff]   ;;  %v1472_v57 = vld [vmem:[#allocation2 + $0x14c] sm:$0xf] }
 0x293   : > { %v2447_v10 = vpop.f32.mrf.mxu0  ;;  %v2205_v53 = vadd.f32 %v2204_v9, %v1663_v12  ;;  %2728 = vmatprep.mubr.bf16.mxu1 %v16730_v51  ;;  %v3515_v9 = vld [vmem:[#allocation3 + $0x15] sm:$0xff] }
 0x294   : > { %v17327_v1 = vpop.f32.mrf.mxu1  ;;  %4299 = vmatprep.mubr.bf16.mxu0 %v3674_v20  ;;  %v3593_v20 = vld [vmem:[#allocation3 + $0xb] sm:$0xff] }
 0x295   : > { %v17329_v59 = vpop.f32.mrf.mxu0  ;;  %v17331_v61 = vadd.f32 %v2447_v10, %v2205_v53  ;;  %v3516_v10 = vld [vmem:[#allocation3 + $0x1d] sm:$0xff] }
 0x296   : > { %v2208_v2 = vpop.f32.mrf.mxu1  ;;  %4300 = vmatmul.mubr.bf16.vlgmr.msra.gmra.mxu0 %v17350_v24  ;;  %v3679_v53 = vpack.c.bf16 %v3516_v10, %v3515_v9  ;;  %v3596_v9 = vld [vmem:[#allocation3 + $0x23] sm:$0xff] }
 0x297   : > { %v2209_v15 = vadd.f32 %v2208_v2, %v1663_v12  ;;  %v2451_v42 = vpop.f32.mrf.mxu0  ;;  %v15517_v12 = vld [vmem:[#allocation10 + $0x434] ss:$8 sps:$4 sm:$0xff]   ;;  %4734 = vmatpush1.bf16.msra.mxu0 %v15524_v41  ;;  %v15527_v2 = vld [vmem:[#allocation10 + $0x400] ss:$8 sps:$4 sm:$0xff]  }
 0x298   : > { %v17335_v35 = vpop.f32.mrf.mxu1  ;;  %4524 = vmatprep.subr.bf16.mxu1 %v15517_v12  ;;  %4309 = vmatprep.mubr.bf16.mxu0 %v3679_v53  ;;  %v3553_v41 = vld [vmem:[#allocation3 + $0x8] sm:$0xff] }
 0x299   : > { %v17337_v30 = vadd.f32 %v2451_v42, %v2209_v15  ;;  %4525 = vmatpush2.bf16.msra.mxu1 %v15515_v18  ;;  %v3518_v15 = vld [vmem:[#allocation3 + $0x2d] sm:$0xff]  ;;  %v3521_v18 = vld [vmem:[#allocation3 + $0x45] sm:$0xff]  ;;  %v3675_v53 = vpack.c.bf16 %v3554_v37, %v3553_v41 }
 0x29a   : > { %v2214_v46 = vpop.f32.mrf.mxu1  ;;  %2729 = vmatmul.mubr.bf16.gmra.mxu1 %v1547_v3  ;;  %4526 = vmatprep.subr.bf16.mxu1 %v15520_v22  ;;  %v3684_v31 = vpack.c.bf16 %v3518_v15, %v3517_v56  ;;  %v3594_v22 = vld [vmem:[#allocation3 + $0x13] sm:$0xff]  ;;  %v3597_v15 = vld [vmem:[#allocation3 + $0x2b] sm:$0xff] }
 0x29b   : > { %2738 = vmatprep.mubr.bf16.mxu1 %v16730_v51  ;;  %v3520_v46 = vld [vmem:[#allocation3 + $0x3d] sm:$0xff] }
 0x29c   : > { %v2216_v17 = vpop.f32.mrf.mxu1  ;;  %v3689_v47 = vpack.c.bf16 %v3520_v46, %v3519_v29 }
 0x29d   : > { %4527 = vmatpush2.bf16.msra.mxu1 %v15518_v5  ;;  %v1572_v17 = vpack.c.bf16 %v17341_v0, %v17339_v21  ;;  %v1577_v5 = vpack.c.bf16 %v1472_v57, %v17352_v26  ;;  %v3523_v21 = vld [vmem:[#allocation3 + $0x55] sm:$0xff]  ;;  %v3524_v0 = vld [vmem:[#allocation3 + $0x5d] sm:$0xff]  ;;  %v3525_v26 = vld [vmem:[#allocation3 + $0x65] sm:$0xff] }
 0x29e   : > { %v2218_v54 = vpop.f32.mrf.mxu1  ;;  %4528 = vmatprep.subr.bf16.mxu1 %v15523_v33  ;;  %4310 = vmatmul.mubr.bf16.gmra.mxu0 %v17350_v24 }
 0x29f   : > { %4319 = vmatprep.mubr.bf16.mxu0 %v3684_v31  ;;  %v3522_v54 = vld [vmem:[#allocation3 + $0x4d] sm:$0xff] }
 0x2a0   : > { %v2220_v4 = vpop.f32.mrf.mxu1  ;;  %v3694_v50 = vpack.c.bf16 %v3522_v54, %v3521_v18  ;;  %v3598_v31 = vld [vmem:[#allocation3 + $0x33] sm:$0xff] }
 0x2a1   : > { %4529 = vmatpush2.bf16.msra.mxu1 %v15521_v27 }
 0x2a2   : > { %v2224_v25 = vpop.f32.mrf.mxu1  ;;  %2739 = vmatmul.mubr.bf16.gmra.mxu1 %v1552_v55  ;;  %4530 = vmatprep.subr.bf16.mxu1 %v15529_v62 }
 0x2a3   : > { %2748 = vmatprep.mubr.bf16.mxu1 %v16730_v51  ;;  %v3676_v25 = vpack.c.bf16 %v3594_v22, %v3593_v20  ;;  %v15532_v20 = vld [vmem:[#allocation10 + $0x4e4] ss:$8 sps:$4 sm:$0xff]  }
 0x2a4   : > { %v2226_v36 = vpop.f32.mrf.mxu1  ;;  %4735 = vmatprep.subr.bf16.mxu0 %v15532_v20 }
 0x2a5   : > { %4531 = vmatpush2.bf16.msra.mxu1 %v15527_v2  ;;  %v3699_v36 = vpack.c.bf16 %v3524_v0, %v3523_v21  ;;  %v3601_v0 = vld [vmem:[#allocation3 + $0x4b] sm:$0xff] }
 0x2a6   : > { %v2228_v43 = vpop.f32.mrf.mxu1  ;;  %4320 = vmatmul.mubr.bf16.gmra.mxu0 %v17350_v24 }
 0x2a7   : > { %4329 = vmatprep.mubr.bf16.mxu0 %v3689_v47  ;;  %v3557_v47 = vld [vmem:[#allocation3 + $0x28] sm:$0xff] }
 0x2a8   : > { %v2230_v60 = vpop.f32.mrf.mxu1 }
 0x2a9   : > { %v3526_v60 = vld [vmem:[#allocation3 + $0x6d] sm:$0xff] }
 0x2aa   : > { %v2234_v3 = vpop.f32.mrf.mxu1  ;;  %2749 = vmatmul.mubr.bf16.gmra.mxu1 %v1557_v45  ;;  %v3595_v45 = vld [vmem:[#allocation3 + $0x1b] sm:$0xff] }
 0x2ab   : > { %2758 = vmatprep.mubr.bf16.mxu1 %v16730_v51  ;;  %v3681_v62 = vpack.c.bf16 %v3596_v9, %v3595_v45  ;;  %v3704_v3 = vpack.c.bf16 %v3526_v60, %v3525_v26  ;;  %v15535_v45 = vld [vmem:[#allocation10 + $0x4d4] ss:$8 sps:$4 sm:$0xff]   ;;  %v15538_v9 = vld [vmem:[#allocation10 + $0x4c4] ss:$8 sps:$4 sm:$0xff]   ;;  %v15536_v26 = vld [vmem:[#allocation10 + $0x4c0] ss:$8 sps:$4 sm:$0xff]  }
 0x2ac   : > { %v2236_v23 = vpop.f32.mrf.mxu1 }
 0x2ae   : > { %v2238_v6 = vpop.f32.mrf.mxu1  ;;  %4330 = vmatmul.mubr.bf16.gmra.mxu0 %v17350_v24 }
 0x2af   : > { %4339 = vmatprep.mubr.bf16.mxu0 %v3694_v50  ;;  %v3555_v6 = vld [vmem:[#allocation3 + $0x18] sm:$0xff]  ;;  %v3529_v50 = vld [vmem:[#allocation3 + $0x85] sm:$0xff] }
 0x2b0   : > { %v2240_v32 = vpop.f32.mrf.mxu1 }
 0x2b2   : > { %v2244_v34 = vpop.f32.mrf.mxu1  ;;  %2759 = vmatmul.mubr.bf16.gmra.mxu1 %v1562_v58  ;;  %v3556_v58 = vld [vmem:[#allocation3 + $0x20] sm:$0xff] }
 0x2b3   : > { %2768 = vmatprep.mubr.bf16.mxu1 %v16730_v51  ;;  %v3680_v34 = vpack.c.bf16 %v3556_v58, %v3555_v6 }
 0x2b4   : > { %v2246_v40 = vpop.f32.mrf.mxu1 }
 0x2b5   : > { %v3686_v40 = vpack.c.bf16 %v3598_v31, %v3597_v15  ;;  %v3563_v31 = vld [vmem:[#allocation3 + $0x58] sm:$0xff] }
 0x2b6   : > { %v2248_v42 = vpop.f32.mrf.mxu1  ;;  %4340 = vmatmul.mubr.bf16.gmra.mxu0 %v17350_v24 }
 0x2b7   : > { %4349 = vmatprep.mubr.bf16.mxu0 %v3699_v36  ;;  %v3527_v42 = vld [vmem:[#allocation3 + $0x75] sm:$0xff] }
 0x2b8   : > { %v2250_v63 = vpop.f32.mrf.mxu1 }
 0x2ba   : > { %v2254_v49 = vpop.f32.mrf.mxu1  ;;  %2769 = vmatmul.mubr.bf16.gmra.mxu1 %v1567_v11  ;;  %v3528_v11 = vld [vmem:[#allocation3 + $0x7d] sm:$0xff] }
 0x2bb   : > { %2778 = vmatprep.mubr.bf16.mxu1 %v16730_v51  ;;  %v3709_v46 = vpack.c.bf16 %v3528_v11, %v3527_v42  ;;  %v3558_v49 = vld [vmem:[#allocation3 + $0x30] sm:$0xff] }
 0x2bc   : > { %v2256_v7 = vpop.f32.mrf.mxu1  ;;  %v3685_v54 = vpack.c.bf16 %v3558_v49, %v3557_v47  ;;  %v3606_v42 = vld [vmem:[#allocation3 + $0x73] sm:$0xff] }
 0x2bd   : > { %v15539_v11 = vld [vmem:[#allocation10 + $0x4b0] ss:$8 sps:$4 sm:$0xff]  }
 0x2be   : > { %v2258_v12 = vpop.f32.mrf.mxu1  ;;  %4350 = vmatmul.mubr.bf16.gmra.mxu0 %v17350_v24 }
 0x2bf   : > { %4359 = vmatprep.mubr.bf16.mxu0 %v3704_v3  ;;  %v3599_v12 = vld [vmem:[#allocation3 + $0x3b] sm:$0xff]  ;;  %v3604_v3 = vld [vmem:[#allocation3 + $0x63] sm:$0xff] }
 0x2c0   : > { %v2260_v55 = vpop.f32.mrf.mxu1 }
 0x2c2   : > { %v2264_v52 = vpop.f32.mrf.mxu1  ;;  %2779 = vmatmul.mubr.bf16.gmra.mxu1 %v1572_v17  ;;  %v3600_v17 = vld [vmem:[#allocation3 + $0x43] sm:$0xff] }
 0x2c3   : > { %2788 = vmatprep.mubr.bf16.mxu1 %v16730_v51  ;;  %v3691_v55 = vpack.c.bf16 %v3600_v17, %v3599_v12  ;;  %v3530_v52 = vld [vmem:[#allocation3 + $0x8d] sm:$0xff] }
 0x2c4   : > { %v2266_v19 = vpop.f32.mrf.mxu1  ;;  %v3714_v22 = vpack.c.bf16 %v3530_v52, %v3529_v50  ;;  %v3565_v12 = vld [vmem:[#allocation3 + $0x68] sm:$0xff]  ;;  %v3566_v17 = vld [vmem:[#allocation3 + $0x70] sm:$0xff] }
 0x2c5   : > { %v15530_v19 = vld [vmem:[#allocation10 + $0x4e0] ss:$8 sps:$4 sm:$0xff]   ;;  %v3705_v52 = vpack.c.bf16 %v3566_v17, %v3565_v12 }
 0x2c6   : > { %v2268_v4 = vpop.f32.mrf.mxu1  ;;  %4360 = vmatmul.mubr.bf16.gmra.mxu0 %v17350_v24 }
 0x2c7   : > { %4369 = vmatprep.mubr.bf16.mxu0 %v3709_v46  ;;  %4736 = vmatpush1.bf16.msra.mxu0 %v15530_v19 }
 0x2c8   : > { %v2270_v33 = vpop.f32.mrf.mxu1  ;;  %4737 = vmatprep.subr.bf16.mxu0 %v15535_v45  ;;  %v17378_v45 = vpop.f32.mrf.mxu0 }
 0x2c9   : > { %v3602_v33 = vld [vmem:[#allocation3 + $0x53] sm:$0xff] }
 0x2ca   : > { %v2274_v27 = vpop.f32.mrf.mxu1  ;;  %2789 = vmatmul.mubr.bf16.gmra.mxu1 %v1577_v5  ;;  %v3559_v5 = vld [vmem:[#allocation3 + $0x38] sm:$0xff]  ;;  %v3696_v41 = vpack.c.bf16 %v3602_v33, %v3601_v0  ;;  %v15542_v0 = vld [vmem:[#allocation10 + $0x4a0] ss:$8 sps:$4 sm:$0xff]   ;;  %v15544_v33 = vld [vmem:[#allocation10 + $0x4a4] ss:$8 sps:$4 sm:$0xff]  }
 0x2cb   : > { %4532 = vmatprep.mubr.bf16.mxu1 %v3676_v25  ;;  %v3560_v25 = vld [vmem:[#allocation3 + $0x40] sm:$0xff] }
 0x2cc   : > { %v2276_v43 = vpop.f32.mrf.mxu1  ;;  %v3690_v27 = vpack.c.bf16 %v3560_v25, %v3559_v5 }
 0x2cd   : > { %v15533_v43 = vld [vmem:[#allocation10 + $0x4d0] ss:$8 sps:$4 sm:$0xff]  }
 0x2ce   : > { %v2278_v10 = vpop.f32.mrf.mxu1  ;;  %4370 = vmatmul.mubr.bf16.gmra.mxu0 %v17350_v24 }
 0x2cf   : > { %4379 = vmatprep.mubr.bf16.mxu0 %v3714_v22  ;;  %4738 = vmatpush1.bf16.msra.mxu0 %v15533_v43  ;;  %v3567_v22 = vld [vmem:[#allocation3 + $0x78] sm:$0xff] }
 0x2d0   : > { %v2280_v2 = vpop.f32.mrf.mxu1  ;;  %4739 = vmatprep.subr.bf16.mxu0 %v15538_v9 }
 0x2d1   : > { %v3603_v2 = vld [vmem:[#allocation3 + $0x5b] sm:$0xff] }
 0x2d2   : > { %v2284_v23 = vpop.f32.mrf.mxu1  ;;  %4533 = vmatmul.mubr.bf16.vlgmr.msra.gmra.mxu1 %v3675_v53  ;;  %v3561_v53 = vld [vmem:[#allocation3 + $0x48] sm:$0xff]  ;;  %v3701_v58 = vpack.c.bf16 %v3604_v3, %v3603_v2  ;;  %v15545_v2 = vld [vmem:[#allocation10 + $0x490] ss:$8 sps:$4 sm:$0xff]   ;;  %v15547_v3 = vld [vmem:[#allocation10 + $0x494] ss:$8 sps:$4 sm:$0xff]  }
 0x2d3   : > { %4542 = vmatprep.mubr.bf16.mxu1 %v3681_v62  ;;  %v3562_v62 = vld [vmem:[#allocation3 + $0x50] sm:$0xff]  ;;  %4740 = vmatpush1.bf16.msra.mxu0 %v15536_v26 }
 0x2d4   : > { %v2286_v56 = vpop.f32.mrf.mxu1  ;;  %v3695_v6 = vpack.c.bf16 %v3562_v62, %v3561_v53 }
 0x2d6   : > { %v2288_v32 = vpop.f32.mrf.mxu1  ;;  %4380 = vmatmul.mubr.bf16.gmra.mxu0 %v17350_v24 }
 0x2d7   : > { %v3564_v32 = vld [vmem:[#allocation3 + $0x60] sm:$0xff] }
 0x2d8   : > { %v2290_v29 = vpop.f32.mrf.mxu1 }
 0x2d9   : > { %v15541_v29 = vld [vmem:[#allocation10 + $0x4b4] ss:$8 sps:$4 sm:$0xff]  }
 0x2da   : > { %v2294_v63 = vpop.f32.mrf.mxu1  ;;  %4543 = vmatmul.mubr.bf16.gmra.mxu1 %v3680_v34  ;;  %v3605_v34 = vld [vmem:[#allocation3 + $0x6b] sm:$0xff]  ;;  %4741 = vmatprep.subr.bf16.mxu0 %v15541_v29 }
 0x2db   : > { %4552 = vmatprep.mubr.bf16.mxu1 %v3686_v40  ;;  %v3700_v63 = vpack.c.bf16 %v3564_v32, %v3563_v31  ;;  %v3706_v47 = vpack.c.bf16 %v3606_v42, %v3605_v34  ;;  %4742 = vmatpush1.bf16.msra.mxu0 %v15539_v11 }
 0x2dc   : > { %v2296_v7 = vpop.f32.mrf.mxu1  ;;  %4743 = vmatprep.subr.bf16.mxu0 %v15544_v33 }
 0x2de   : > { %v2298_v18 = vpop.f32.mrf.mxu1 }
 0x2df   : > { %4744 = vmatpush1.bf16.msra.mxu0 %v15542_v0 }
 0x2e0   : > { %v2300_v57 = vpop.f32.mrf.mxu1  ;;  %4745 = vmatprep.subr.bf16.mxu0 %v15547_v3 }
 0x2e2   : > { %v2304_v4 = vpop.f32.mrf.mxu1  ;;  %4553 = vmatmul.mubr.bf16.gmra.mxu1 %v3685_v54  ;;  %v3607_v54 = vld [vmem:[#allocation3 + $0x7b] sm:$0xff] }
 0x2e3   : > { %4562 = vmatprep.mubr.bf16.mxu1 %v3691_v55  ;;  %v3608_v55 = vld [vmem:[#allocation3 + $0x83] sm:$0xff]  ;;  %4746 = vmatpush1.bf16.msra.mxu0 %v15545_v2 }
 0x2e4   : > { %v2306_v21 = vpop.f32.mrf.mxu1  ;;  %v3711_v57 = vpack.c.bf16 %v3608_v55, %v3607_v54  ;;  %v3568_v4 = vld [vmem:[#allocation3 + $0x80] sm:$0xff] }
 0x2e5   : > { %v3710_v21 = vpack.c.bf16 %v3568_v4, %v3567_v22 }
 0x2e6   : > { %v2308_v36 = vpop.f32.mrf.mxu1 }
 0x2e8   : > { %v2310_v37 = vpop.f32.mrf.mxu1 }
 0x2ea   : > { %v2590_v10 = vpop.f32.mrf.mxu1  ;;  %4563 = vmatmul.mubr.bf16.gmra.mxu1 %v3690_v27 }
 0x2eb   : > { %4572 = vmatprep.mubr.bf16.mxu1 %v3696_v41 }
 0x2ec   : > { %v2592_v60 = vpop.f32.mrf.mxu1 }
 0x2ee   : > { %v2594_v23 = vpop.f32.mrf.mxu1 }
 0x2f0   : > { %v2596_v56 = vpop.f32.mrf.mxu1 }
 0x2f2   : > { %v2600_v15 = vpop.f32.mrf.mxu1  ;;  %4573 = vmatmul.mubr.bf16.gmra.mxu1 %v3695_v6 }
 0x2f3   : > { %4582 = vmatprep.mubr.bf16.mxu1 %v3701_v58 }
 0x2f4   : > { %v2602_v40 = vpop.f32.mrf.mxu1 }
 0x2f6   : > { %v2604_v46 = vpop.f32.mrf.mxu1 }
 0x2f8   : > { %v2606_v49 = vpop.f32.mrf.mxu1 }
 0x2fa   : > { %v2610_v7 = vpop.f32.mrf.mxu1  ;;  %4583 = vmatmul.mubr.bf16.gmra.mxu1 %v3700_v63 }
 0x2fb   : > { %4592 = vmatprep.mubr.bf16.mxu1 %v3706_v47 }
 0x2fc   : > { %v2612_v18 = vpop.f32.mrf.mxu1 }
 0x2fd   : > { %v17381_v18 = vsub.s32 1, %v17289_v14 }
 0x2fe   : > { %v2614_v50 = vpop.f32.mrf.mxu1 }
 0x300   : > { %v2616_v19 = vpop.f32.mrf.mxu1 }
 0x301   : > { %v15550_v19 = vld [vmem:[#allocation10 + $0x484] ss:$8 sps:$4 sm:$0xff]  }
 0x302   : > { %v2620_v20 = vpop.f32.mrf.mxu1  ;;  %4593 = vmatmul.mubr.bf16.gmra.mxu1 %v3705_v52  ;;  %4747 = vmatprep.subr.bf16.mxu0 %v15550_v19 }
 0x303   : > { %4602 = vmatprep.mubr.bf16.mxu1 %v3711_v57  ;;  %v15548_v57 = vld [vmem:[#allocation10 + $0x480] ss:$8 sps:$4 sm:$0xff]   ;;  %v1667_v20 = vrot.slane %v17296_v8, %v17381_v18 }
 0x304   : > { %v2622_v5 = vpop.f32.mrf.mxu1  ;;  %4748 = vmatpush1.bf16.msra.mxu0 %v15548_v57 }
 0x306   : > { %v2624_v25 = vpop.f32.mrf.mxu1  ;;  %v2457_v10 = vpop.f32.mrf.mxu0 }
 0x308   : > { %v2626_v36 = vpop.f32.mrf.mxu1  ;;  %v2459_v62 = vpop.f32.mrf.mxu0 }
 0x30a   : > { %v2630_v27 = vpop.f32.mrf.mxu1  ;;  %4603 = vmatmul.mubr.bf16.gmra.mxu1 %v3710_v21  ;;  %v2461_v60 = vpop.f32.mrf.mxu0  ;;  %v2201_v21 = vadd.f32 %v17314_v28, %v1667_v20 }
 0x30c   : > { %v2632_v41 = vpop.f32.mrf.mxu1  ;;  %v2463_v6 = vpop.f32.mrf.mxu0 }
 0x30d   : > { %v2444_v41 = vadd.f32 %v17316_v38, %v2201_v21 }
 0x30e   : > { %v2634_v37 = vpop.f32.mrf.mxu1  ;;  %v2467_v56 = vpop.f32.mrf.mxu0 }
 0x30f   : > { %v2207_v37 = vadd.f32 %v17327_v1, %v1667_v20 }
 0x310   : > { %v2636_v43 = vpop.f32.mrf.mxu1  ;;  %v2469_v31 = vpop.f32.mrf.mxu0 }
 0x311   : > { %v2450_v62 = vadd.f32 %v17329_v59, %v2207_v37  ;;  %v902_v37 = vadd.s32 152, %v17289_v14 }
 0x312   : > { %v2640_v9 = vpop.f32.mrf.mxu1  ;;  %v2471_v34 = vpop.f32.mrf.mxu0 }
 0x314   : > { %v2642_v53 = vpop.f32.mrf.mxu1  ;;  %v2473_v42 = vpop.f32.mrf.mxu0 }
 0x316   : > { %v2644_v26 = vpop.f32.mrf.mxu1  ;;  %v2477_v29 = vpop.f32.mrf.mxu0 }
 0x317   : > { %v2211_v26 = vadd.f32 %v17335_v35, %v1667_v20  ;;  %v17397_v29 = vld [vmem:[#allocation3 + $0x16] sm:$0xff] }
 0x318   : > { %v2646_v23 = vpop.f32.mrf.mxu1  ;;  %v2479_v63 = vpop.f32.mrf.mxu0 }
 0x319   : > { %v2454_v38 = vadd.f32 %v17378_v45, %v2211_v26  ;;  %v17401_v63 = vld [vmem:[#allocation3 + $0x26] sm:$0xff] }
 0x31a   : > { %v2650_v58 = vpop.f32.mrf.mxu1  ;;  %v2481_v49 = vpop.f32.mrf.mxu0  ;;  %v17418_v26 = vld [vmem:[#allocation3 + $0x46] sm:$0xff] }
 0x31c   : > { %v2652_v15 = vpop.f32.mrf.mxu1  ;;  %v2483_v12 = vpop.f32.mrf.mxu0 }
 0x31e   : > { %v2654_v32 = vpop.f32.mrf.mxu1  ;;  %v2487_v54 = vpop.f32.mrf.mxu0 }
 0x320   : > { %v2656_v40 = vpop.f32.mrf.mxu1  ;;  %v2489_v50 = vpop.f32.mrf.mxu0 }
 0x322   : > { %v2660_v11 = vpop.f32.mrf.mxu1  ;;  %v2491_v22 = vpop.f32.mrf.mxu0 }
 0x323   : > { %v17407_v22 = vld [vmem:[#allocation3 + $0x2e] sm:$0xff] }
 0x324   : > { %v2662_v46 = vpop.f32.mrf.mxu1  ;;  %v2493_v5 = vpop.f32.mrf.mxu0  ;;  %7555 = vst [vmem:[#allocation3 + $0x2a] sm:$0xff] %v17308_v16 }
 0x325   : > { %v17399_v46 = vld [vmem:[#allocation3 + $0x1e] sm:$0xff] }
 0x326   : > { %v2664_v47 = vpop.f32.mrf.mxu1  ;;  %v2497_v0 = vpop.f32.mrf.mxu0  ;;  %7553 = vst [vmem:[#allocation3 + $0x1a] sm:$0xff] %v17308_v16  ;;  %7554 = vst [vmem:[#allocation3 + $0x22] sm:$0xff] %v17308_v16 }
 0x327   : > { %v3682_v47 = vpack.c.bf16 %v17401_v63, %v17399_v46  ;;  %v15569_v46 = vld [vmem:[#allocation10 + $0x510] ss:$8 sps:$4 sm:$0xff]   ;;  %v15571_v63 = vld [vmem:[#allocation10 + $0x514] ss:$8 sps:$4 sm:$0xff]  }
 0x328   : > { %v2666_v7 = vpop.f32.mrf.mxu1  ;;  %v2499_v36 = vpop.f32.mrf.mxu0 }
 0x32a   : > { %v2670_v17 = vpop.f32.mrf.mxu1  ;;  %v2501_v43 = vpop.f32.mrf.mxu0 }
 0x32c   : > { %v2672_v55 = vpop.f32.mrf.mxu1  ;;  %v2503_v10 = vpop.f32.mrf.mxu0 }
 0x32e   : > { %v2674_v52 = vpop.f32.mrf.mxu1  ;;  %v2507_v60 = vpop.f32.mrf.mxu0 }
 0x330   : > { %v2676_v4 = vpop.f32.mrf.mxu1  ;;  %v2509_v23 = vpop.f32.mrf.mxu0 }
 0x331   : > { %v17409_v4 = vld [vmem:[#allocation3 + $0x36] sm:$0xff] }
 0x332   : > { %v2680_v25 = vpop.f32.mrf.mxu1  ;;  %v2511_v58 = vpop.f32.mrf.mxu0  ;;  %7556 = vst [vmem:[#allocation3 + $0x32] sm:$0xff] %v17308_v16 }
 0x333   : > { %v3687_v25 = vpack.c.bf16 %v17409_v4, %v17407_v22  ;;  %v15572_v4 = vld [vmem:[#allocation10 + $0x500] ss:$8 sps:$4 sm:$0xff]  }
 0x334   : > { %v2682_v33 = vpop.f32.mrf.mxu1  ;;  %v2513_v31 = vpop.f32.mrf.mxu0 }
 0x336   : > { %v17386_v27 = vpop.f32.mrf.mxu1  ;;  %v2517_v34 = vpop.f32.mrf.mxu0 }
 0x338   : > { %v2686_v9 = vpop.f32.mrf.mxu1  ;;  %v2519_v40 = vpop.f32.mrf.mxu0 }
 0x339   : > { %v2687_v8 = vadd.f32 %v2686_v9, %v2444_v41 }
 0x33a   : > { %v17390_v53 = vpop.f32.mrf.mxu1  ;;  %v2521_v11 = vpop.f32.mrf.mxu0 }
 0x33b   : > { %v14244_v28 = vmul.f32 -1.442695, %v2687_v8  ;;  %v17435_v11 = vld [vmem:[#allocation3 + $0x4e] sm:$0xff] }
 0x33c   : > { %v2692_v2 = vpop.f32.mrf.mxu1  ;;  %v2523_v49 = vpop.f32.mrf.mxu0  ;;  %7559 = vst [vmem:[#allocation3 + $0x4a] sm:$0xff] %v17308_v16 }
 0x33d   : > { %16295 = vpow2.f32 %v14244_v28  ;;  %v2693_v3 = vadd.f32 %v2692_v2, %v2450_v62  ;;  %v17416_v62 = vld [vmem:[#allocation3 + $0x3e] sm:$0xff]  ;;  %v17420_v28 = vadd.s32 4294967138, %v902_v37 }
 0x33e   : > { %v17394_v6 = vpop.f32.mrf.mxu1  ;;  %v2527_v54 = vpop.f32.mrf.mxu0  ;;  %v3692_v2 = vpack.c.bf16 %v17418_v26, %v17416_v62  ;;  %7557 = vst [vmem:[#allocation3 + $0x3a] sm:$0xff] %v17308_v16  ;;  %7558 = vst [vmem:[#allocation3 + $0x42] sm:$0xff] %v17308_v16  ;;  %v15575_v26 = vld [vmem:[#allocation10 + $0x5f0] ss:$8 sps:$4 sm:$0xff]  }
 0x33f   : > { %v14245_v1 = vmul.f32 -1.442695, %v2693_v3  ;;  %v2685_v3 = vadd.f32 %v17386_v27, %v17318_v48  ;;  %vm3198_vm1 = vcmp.ge.s32.totalorder %v17420_v28, 0 }
 0x340   : > { %v2696_v56 = vpop.f32.mrf.mxu1  ;;  %v2529_v50 = vpop.f32.mrf.mxu0  ;;  %vm16388_vm4 = vmpackc.low %vm3198_vm1, %vm16731_vm3 }
 0x341   : > { %16297 = vpow2.f32 %v14245_v1  ;;  %v2697_v15 = vadd.f32 %v2696_v56, %v2454_v38 }
 0x342   : > { %v2700_v32 = vpop.f32.mrf.mxu1  ;;  %v2531_v20 = vpop.f32.mrf.mxu0 }
 0x343   : > { %v14246_v59 = vmul.f32 -1.442695, %v2697_v15  ;;  %v904_v15 = vadd.s32 168, %v17289_v14 }
 0x344   : > { %v2702_v35 = vpop.f32.mrf.mxu1  ;;  %v2533_v21 = vpop.f32.mrf.mxu0 }
 0x345   : > { %16299 = vpow2.f32 %v14246_v59  ;;  %v2691_v59 = vadd.f32 %v17390_v53, %v17331_v61  ;;  %v17439_v49 = vadd.s32 4294967138, %v904_v15  ;;  %v2695_v53 = vadd.f32 %v17394_v6, %v17337_v30 }
 0x346   : > { %v2704_v42 = vpop.f32.mrf.mxu1  ;;  %v2537_v41 = vpop.f32.mrf.mxu0 }
 0x347   : > { %vm3242_vm2 = vcmp.lt.s32.totalorder %v17439_v49, 16 }
 0x348   : > { %v2706_v45 = vpop.f32.mrf.mxu1  ;;  %v2539_v9 = vpop.f32.mrf.mxu0  ;;  %vm16391_vm5 = vmpackc.low %vm3242_vm2, %vm16731_vm3 }
 0x349   : > { %v17437_v45 = vld [vmem:[#allocation3 + $0x56] sm:$0xff] }
 0x34a   : > { %v16296_v7 = vpop.eup %16295  ;;  %v2710_v12 = vpop.f32.mrf.mxu1  ;;  %7560 = vst [vmem:[#allocation3 + $0x52] sm:$0xff] %v17308_v16 }
 0x34b   : > { %v2944_v17 = vadd.f32 1.0, %v16296_v7  ;;  %v2541_v10 = vpop.f32.mrf.mxu0 }
 0x34c   : > { %v2712_v55 = vpop.f32.mrf.mxu1  ;;  %v17457_v10 = vld [vmem:[#allocation3 + $0x5e] sm:$0xff] }
 0x34d   : > { %16301 = vrcp.f32 %v2944_v17  ;;  %v2543_v23 = vpop.f32.mrf.mxu0  ;;  %7561 = vst [vmem:[#allocation3 + $0x5a] sm:$0xff] %v17308_v16 }
 0x34e   : > { %v16298_v52 = vpop.eup %16297  ;;  %v2714_v57 = vpop.f32.mrf.mxu1 }
 0x34f   : > { %v2945_v19 = vadd.f32 1.0, %v16298_v52  ;;  %v2547_v56 = vpop.f32.mrf.mxu0  ;;  %v3569_v52 = vld [vmem:[#allocation3 + $0x88] sm:$0xff]  ;;  %v3570_v57 = vld [vmem:[#allocation3 + $0x90] sm:$0xff] }
 0x350   : > { %v2716_v5 = vpop.f32.mrf.mxu1 }
 0x351   : > { %16303 = vrcp.f32 %v2945_v19  ;;  %v2549_v34 = vpop.f32.mrf.mxu0  ;;  %v3609_v5 = vld [vmem:[#allocation3 + $0x8b] sm:$0xff] }
 0x352   : > { %v16300_v0 = vpop.eup %16299  ;;  %v2720_v33 = vpop.f32.mrf.mxu1 }
 0x353   : > { %v2946_v36 = vadd.f32 1.0, %v16300_v0  ;;  %v2551_v42 = vpop.f32.mrf.mxu0  ;;  %v17452_v33 = vld [vmem:[#allocation3 + $0x8e] sm:$0xff] }
 0x354   : > { %v2722_v43 = vpop.f32.mrf.mxu1 }
 0x355   : > { %16305 = vrcp.f32 %v2946_v36  ;;  %v2553_v12 = vpop.f32.mrf.mxu0  ;;  %v3715_v36 = vpack.c.bf16 %v3570_v57, %v3569_v52  ;;  %v17470_v52 = vld [vmem:[#allocation3 + $0x6e] sm:$0xff] }
 0x356   : > { %v2724_v8 = vpop.f32.mrf.mxu1 }
 0x357   : > { %v4301_v50 = vpop.f32.mrf.mxu0 }
 0x358   : > { %v2726_v60 = vpop.f32.mrf.mxu1 }
 0x359   : > { %v4303_v21 = vpop.f32.mrf.mxu0 }
 0x35a   : > { %v16302_v38 = vpop.eup %16301  ;;  %v2730_v1 = vpop.f32.mrf.mxu1 }
 0x35b   : > { %v3070_v58 = vmul.f32 %v16302_v38, %v2685_v3  ;;  %v4305_v43 = vpop.f32.mrf.mxu0 }
 0x35c   : > { %v2732_v31 = vpop.f32.mrf.mxu1 }
 0x35d   : > { %v3112_v32 = vadd.f32 %v3070_v58, %v17166_v13  ;;  %v16378_v13 = vld [vmem:[#allocation2 + $0xa2] sm:$0xff]  ;;  %v4307_v3 = vpop.f32.mrf.mxu0 }
 0x35e   : > { %v16304_v35 = vpop.eup %16303  ;;  %v2734_v40 = vpop.f32.mrf.mxu1  ;;  %v3537_v3 = vld [vmem:[#allocation3 + $0xc5] sm:$0xff] }
 0x35f   : > { %v3408_v48 = vsel %vm3198_vm1, %v3112_v32, 0.0  ;;  %v3071_v27 = vmul.f32 %v16304_v35, %v2691_v59  ;;  %v4311_v58 = vpop.f32.mrf.mxu0  ;;  %v16389_v31 = vpack.c.bf16 %v3112_v32, %v17308_v16  ;;  %v3614_v35 = vld [vmem:[#allocation3 + $0xb3] sm:$0xff] }
 0x360   : > { %3450 = vst [vmem:[#allocation3 + $0x9a] sm:$0xff] %v3408_v48  ;;  %v2736_v7 = vpop.f32.mrf.mxu1 }
 0x361   : > { %v17443_v61 = vadd.f32 %v16378_v13, %v3071_v27  ;;  %v4313_v15 = vpop.f32.mrf.mxu0 }
 0x362   : > { %v16306_v17 = vpop.eup %16305  ;;  %v2740_v54 = vpop.f32.mrf.mxu1 }
 0x363   : > { %3451 = vst [vmem:[#allocation3 + $0xa2] sm:$0xff] %v17443_v61  ;;  %v3072_v55 = vmul.f32 %v16306_v17, %v2695_v53  ;;  %v4315_v7 = vpop.f32.mrf.mxu0  ;;  %v3535_v17 = vld [vmem:[#allocation3 + $0xb5] sm:$0xff]  ;;  %v3536_v54 = vld [vmem:[#allocation3 + $0xbd] sm:$0xff] }
 0x364   : > { %v2742_v19 = vpop.f32.mrf.mxu1 }
 0x365   : > { %v17450_v20 = vadd.f32 %v3072_v55, %v17179_v44  ;;  %v17459_v44 = vld [vmem:[#allocation3 + $0x66] sm:$0xff]  ;;  %v4317_v28 = vpop.f32.mrf.mxu0  ;;  %v17474_v19 = vld [vmem:[#allocation2] sm:$0xff] }
 0x366   : > { %v2744_v0 = vpop.f32.mrf.mxu1  ;;  %7562 = vst [vmem:[#allocation3 + $0x62] sm:$0xff] %v17308_v16  ;;  %7563 = vst [vmem:[#allocation3 + $0x6a] sm:$0xff] %v17474_v19  ;;  %v3702_v22 = vpack.c.bf16 %v17459_v44, %v17457_v10 }
 0x367   : > { %v3410_v30 = vsel %vm3242_vm2, %v17450_v20, 0.0  ;;  %v3610_v6 = vld [vmem:[#allocation3 + $0x93] sm:$0xff]  ;;  %v4321_v21 = vpop.f32.mrf.mxu0 }
 0x368   : > { %v3531_v41 = vld [vmem:[#allocation3 + $0x95] sm:$0xff]  ;;  %3452 = vst [vmem:[#allocation3 + $0xaa] sm:$0xff] %v3410_v30  ;;  %v3716_v9 = vpack.c.bf16 %v3610_v6, %v3609_v5  ;;  %v2746_v8 = vpop.f32.mrf.mxu1  ;;  %v3729_v5 = vpack.c.bf16 %v3536_v54, %v3535_v17  ;;  %v16392_v6 = vpack.c.bf16 %v17450_v20, %v17443_v61  ;;  %v3541_v54 = vld [vmem:[#allocation3 + $0xe5] sm:$0xff] }
 0x369   : > { %v3571_v37 = vld [vmem:[#allocation3 + $0x98] sm:$0xff]  ;;  %v4323_v30 = vpop.f32.mrf.mxu0  ;;  %v17485_v8 = vld [vmem:[#allocation3 + $0x86] sm:$0xff] }
 0x36a   : > { %v17461_v60 = vld [vmem:[#allocation3 + $0x96] sm:$0xff]  ;;  %4612 = vmatprep.mubr.bf16.mxu1 %v3716_v9  ;;  %v2750_v38 = vpop.f32.mrf.mxu1  ;;  %v3572_v34 = vld [vmem:[#allocation3 + $0xa0] sm:$0xff]  ;;  %7567 = vst [vmem:[#allocation3 + $0x8a] sm:$0xff] %v17474_v19 }
 0x36b   : > { %7568 = vst [vmem:[#allocation3 + $0x92] sm:$0xff] %v17308_v16  ;;  %v3532_v23 = vld [vmem:[#allocation3 + $0x9d] sm:$0xff]  ;;  %4613 = vmatmul.mubr.bf16.gmra.mxu1 %v3715_v36  ;;  %v3720_v50 = vpack.c.bf16 %v3572_v34, %v3571_v37  ;;  %v4325_v43 = vpop.f32.mrf.mxu0  ;;  %v3539_v34 = vld [vmem:[#allocation3 + $0xd5] sm:$0xff] }
 0x36c   : > { %v3719_v1 = vpack.c.bf16 %v3532_v23, %v3531_v41  ;;  %v2752_v56 = vpop.f32.mrf.mxu1  ;;  %v3611_v59 = vld [vmem:[#allocation3 + $0x9b] sm:$0xff]  ;;  %v3538_v23 = vld [vmem:[#allocation3 + $0xcd] sm:$0xff] }
 0x36d   : > { %v17472_v16 = vld [vmem:[#allocation3 + $0x76] sm:$0xff]  ;;  %v17483_v9 = vld [vmem:[#allocation3 + $0x7e] sm:$0xff]  ;;  %v4327_v61 = vpop.f32.mrf.mxu0 }
 0x36e   : > { %4389 = vmatprep.mubr.bf16.mxu0 %v3719_v1  ;;  %v2754_v40 = vpop.f32.mrf.mxu1  ;;  %7564 = vst [vmem:[#allocation3 + $0x72] sm:$0xff] %v17474_v19  ;;  %7565 = vst [vmem:[#allocation3 + $0x7a] sm:$0xff] %v17474_v19  ;;  %v3734_v1 = vpack.c.bf16 %v3538_v23, %v3537_v3  ;;  %v3707_v62 = vpack.c.bf16 %v17472_v16, %v17470_v52  ;;  %v3712_v52 = vpack.c.bf16 %v17485_v8, %v17483_v9  ;;  %v3617_v16 = vld [vmem:[#allocation3 + $0xcb] sm:$0xff]  ;;  %v17533_v9 = vld [vmem:[#allocation3 + $0xbe] sm:$0xff] }
 0x36f   : > { %16390 = vmatmul.mubr.msk.bf16.gmra.mxu0 %vm16388_vm4, %v16389_v31  ;;  %v3533_v48 = vld [vmem:[#allocation3 + $0xa5] sm:$0xff]  ;;  %v3534_v27 = vld [vmem:[#allocation3 + $0xad] sm:$0xff]  ;;  %7566 = vst [vmem:[#allocation3 + $0x82] sm:$0xff] %v17474_v19  ;;  %v4331_v58 = vpop.f32.mrf.mxu0 }
 0x370   : > { %v3612_v42 = vld [vmem:[#allocation3 + $0xa3] sm:$0xff]  ;;  %v3724_v13 = vpack.c.bf16 %v3534_v27, %v3533_v48  ;;  %v3613_v12 = vld [vmem:[#allocation3 + $0xab] sm:$0xff]  ;;  %v2756_v55 = vpop.f32.mrf.mxu1  ;;  %v15553_v58 = vld [vmem:[#allocation10 + $0x574] ss:$8 sps:$4 sm:$0xff]  }
 0x371   : > { %v3721_v53 = vpack.c.bf16 %v3612_v42, %v3611_v59  ;;  %v3726_v32 = vpack.c.bf16 %v3614_v35, %v3613_v12  ;;  %v3573_v36 = vld [vmem:[#allocation3 + $0xa8] sm:$0xff]  ;;  %v3574_v41 = vld [vmem:[#allocation3 + $0xb0] sm:$0xff]  ;;  %v4333_v15 = vpop.f32.mrf.mxu0  ;;  %v3540_v35 = vld [vmem:[#allocation3 + $0xdd] sm:$0xff]  ;;  %6372 = vmatprep.subr.bf16.mxu1 %v15553_v58 }
 0x372   : > { %4399 = vmatprep.mubr.bf16.mxu0 %v3724_v13  ;;  %v2760_v57 = vpop.f32.mrf.mxu1  ;;  %v3725_v49 = vpack.c.bf16 %v3574_v41, %v3573_v36  ;;  %v3739_v42 = vpack.c.bf16 %v3540_v35, %v3539_v34  ;;  %v3542_v55 = vld [vmem:[#allocation3 + $0xed] sm:$0xff]  ;;  %v3543_v36 = vld [vmem:[#allocation3 + $0xf5] sm:$0xff]  ;;  %v3544_v41 = vld [vmem:[#allocation3 + $0xfd] sm:$0xff] }
 0x373   : > { %4622 = vmatprep.mubr.bf16.mxu1 %v3721_v53  ;;  %v4335_v59 = vpop.f32.mrf.mxu0  ;;  %v3744_v57 = vpack.c.bf16 %v3542_v55, %v3541_v54  ;;  %v3749_v23 = vpack.c.bf16 %v3544_v41, %v3543_v36  ;;  %v3545_v15 = vld [vmem:[#allocation3 + $0x105] sm:$0xff]  ;;  %v17525_v44 = vld [vmem:[#allocation3 + $0xae] sm:$0xff] }
 0x374   : > { %4623 = vmatmul.mubr.bf16.gmra.mxu1 %v3720_v50  ;;  %v2762_v0 = vpop.f32.mrf.mxu1  ;;  %v17535_v8 = vld [vmem:[#allocation3 + $0xc6] sm:$0xff] }
 0x375   : > { %4632 = vmatprep.mubr.bf16.mxu1 %v3726_v32  ;;  %v4337_v48 = vpop.f32.mrf.mxu0 }
 0x376   : > { %v2764_v37 = vpop.f32.mrf.mxu1 }
 0x377   : > { %16393 = vmatmul.mubr.msk.bf16.gmra.mxu0 %vm16391_vm5, %v16392_v6  ;;  %v4341_v7 = vpop.f32.mrf.mxu0 }
 0x378   : > { %4409 = vmatprep.mubr.bf16.mxu0 %v3729_v5  ;;  %v2766_v38 = vpop.f32.mrf.mxu1 }
 0x379   : > { %v4343_v53 = vpop.f32.mrf.mxu0 }
 0x37a   : > { %v2770_v20 = vpop.f32.mrf.mxu1  ;;  %v3547_v53 = vld [vmem:[#allocation3 + $0x115] sm:$0xff] }
 0x37b   : > { %v4345_v17 = vpop.f32.mrf.mxu0 }
 0x37c   : > { %4633 = vmatmul.mubr.bf16.gmra.mxu1 %v3725_v49  ;;  %v2772_v56 = vpop.f32.mrf.mxu1 }
 0x37d   : > { %v4347_v28 = vpop.f32.mrf.mxu0 }
 0x37e   : > { %v2774_v31 = vpop.f32.mrf.mxu1 }
 0x37f   : > { %4410 = vmatmul.mubr.bf16.gmra.mxu0 %v17350_v24  ;;  %v4351_v5 = vpop.f32.mrf.mxu0  ;;  %v3546_v31 = vld [vmem:[#allocation3 + $0x10d] sm:$0xff] }
 0x380   : > { %4419 = vmatprep.mubr.bf16.mxu0 %v3734_v1  ;;  %v2776_v40 = vpop.f32.mrf.mxu1  ;;  %v15551_v1 = vld [vmem:[#allocation10 + $0x570] ss:$8 sps:$4 sm:$0xff]  }
 0x381   : > { %v4353_v0 = vpop.f32.mrf.mxu0  ;;  %6373 = vmatpush1.bf16.msra.mxu1 %v15551_v1  ;;  %v3754_v40 = vpack.c.bf16 %v3546_v31, %v3545_v15 }
 0x382   : > { %v2780_v27 = vpop.f32.mrf.mxu1  ;;  %v3550_v0 = vld [vmem:[#allocation3 + $0x12d] sm:$0xff] }
 0x383   : > { %v4355_v6 = vpop.f32.mrf.mxu0 }
 0x384   : > { %v2782_v13 = vpop.f32.mrf.mxu1 }
 0x385   : > { %v4357_v43 = vpop.f32.mrf.mxu0 }
 0x386   : > { %v2784_v12 = vpop.f32.mrf.mxu1 }
 0x387   : > { %4420 = vmatmul.mubr.bf16.gmra.mxu0 %v17350_v24  ;;  %v4361_v38 = vpop.f32.mrf.mxu0  ;;  %v3548_v12 = vld [vmem:[#allocation3 + $0x11d] sm:$0xff] }
 0x388   : > { %4429 = vmatprep.mubr.bf16.mxu0 %v3739_v42  ;;  %v2786_v50 = vpop.f32.mrf.mxu1  ;;  %v15556_v38 = vld [vmem:[#allocation10 + $0x564] ss:$8 sps:$4 sm:$0xff]  }
 0x389   : > { %v4363_v61 = vpop.f32.mrf.mxu0  ;;  %v3759_v50 = vpack.c.bf16 %v3548_v12, %v3547_v53  ;;  %6374 = vmatprep.subr.bf16.mxu1 %v15556_v38  ;;  %v15560_v53 = vld [vmem:[#allocation10 + $0x540] ss:$8 sps:$4 sm:$0xff]   ;;  %v15562_v12 = vld [vmem:[#allocation10 + $0x544] ss:$8 sps:$4 sm:$0xff]  }
 0x38a   : > { %v2790_v32 = vpop.f32.mrf.mxu1  ;;  %v3552_v61 = vld [vmem:[#allocation3 + $0x13d] sm:$0xff]  ;;  %v3578_v38 = vld [vmem:[#allocation3 + $0xd0] sm:$0xff] }
 0x38b   : > { %v4365_v56 = vpop.f32.mrf.mxu0 }
 0x38c   : > { %v2792_v21 = vpop.f32.mrf.mxu1 }
 0x38d   : > { %v4367_v34 = vpop.f32.mrf.mxu0  ;;  %v3549_v21 = vld [vmem:[#allocation3 + $0x125] sm:$0xff] }
 0x38e   : > { %v2794_v30 = vpop.f32.mrf.mxu1  ;;  %v3764_v41 = vpack.c.bf16 %v3550_v0, %v3549_v21  ;;  %v15557_v34 = vld [vmem:[#allocation10 + $0x550] ss:$8 sps:$4 sm:$0xff]   ;;  %v15568_v21 = vld [vmem:[#allocation10 + $0x524] ss:$8 sps:$4 sm:$0xff]  }
 0x38f   : > { %4430 = vmatmul.mubr.bf16.gmra.mxu0 %v17350_v24  ;;  %v4371_v48 = vpop.f32.mrf.mxu0  ;;  %v17523_v0 = vld [vmem:[#allocation3 + $0xb6] sm:$0xff] }
 0x390   : > { %4439 = vmatprep.mubr.bf16.mxu0 %v3744_v57  ;;  %v2796_v37 = vpop.f32.mrf.mxu1 }
 0x391   : > { %v4373_v42 = vpop.f32.mrf.mxu0 }
 0x392   : > { %v4534_v3 = vpop.f32.mrf.mxu1 }
 0x393   : > { %v4375_v13 = vpop.f32.mrf.mxu0 }
 0x394   : > { %v4536_v49 = vpop.f32.mrf.mxu1 }
 0x395   : > { %v4377_v54 = vpop.f32.mrf.mxu0  ;;  %v3551_v49 = vld [vmem:[#allocation3 + $0x135] sm:$0xff] }
 0x396   : > { %v4538_v20 = vpop.f32.mrf.mxu1  ;;  %v3769_v58 = vpack.c.bf16 %v3552_v61, %v3551_v49  ;;  %v3717_v61 = vpack.c.bf16 %v17461_v60, %v17452_v33  ;;  %v3652_v33 = vld [vmem:[#allocation3 + $0xa6] sm:$0xff]  ;;  %v3651_v60 = vld [vmem:[#allocation3 + $0x9e] sm:$0xff] }
 0x397   : > { %4440 = vmatmul.mubr.bf16.gmra.mxu0 %v17350_v24  ;;  %v4381_v32 = vpop.f32.mrf.mxu0 }
 0x398   : > { %4449 = vmatprep.mubr.bf16.mxu0 %v3749_v23  ;;  %v4540_v59 = vpop.f32.mrf.mxu1  ;;  %v15554_v23 = vld [vmem:[#allocation10 + $0x560] ss:$8 sps:$4 sm:$0xff]   ;;  %v15565_v32 = vld [vmem:[#allocation10 + $0x534] ss:$8 sps:$4 sm:$0xff]  }
 0x399   : > { %v4383_v5 = vpop.f32.mrf.mxu0  ;;  %6375 = vmatpush1.bf16.msra.mxu1 %v15554_v23  ;;  %v3577_v23 = vld [vmem:[#allocation3 + $0xc8] sm:$0xff] }
 0x39a   : > { %v4544_v35 = vpop.f32.mrf.mxu1  ;;  %v15566_v5 = vld [vmem:[#allocation10 + $0x520] ss:$8 sps:$4 sm:$0xff]   ;;  %v3735_v49 = vpack.c.bf16 %v3578_v38, %v3577_v23 }
 0x39b   : > { %v4385_v6 = vpop.f32.mrf.mxu0  ;;  %v15559_v35 = vld [vmem:[#allocation10 + $0x554] ss:$8 sps:$4 sm:$0xff]   ;;  %v15605_v23 = vld [vmem:[#allocation10 + $0x620] ss:$8 sps:$4 sm:$0xff]  }
 0x39c   : > { %v4546_v27 = vpop.f32.mrf.mxu1  ;;  %6376 = vmatprep.subr.bf16.mxu1 %v15559_v35  ;;  %v3576_v6 = vld [vmem:[#allocation3 + $0xc0] sm:$0xff]  ;;  %v3722_v35 = vpack.c.bf16 %v3652_v33, %v3651_v60 }
 0x39d   : > { %v4387_v37 = vpop.f32.mrf.mxu0  ;;  %6377 = vmatpush1.bf16.msra.mxu1 %v15557_v34  ;;  %v3633_v27 = vld [vmem:[#allocation3 + $0xe] sm:$0xff]  ;;  %v15583_v34 = vld [vmem:[#allocation10 + $0x5d4] ss:$8 sps:$4 sm:$0xff]  }
 0x39e   : > { %v4548_v7 = vpop.f32.mrf.mxu1  ;;  %6378 = vmatprep.subr.bf16.mxu1 %v15562_v12  ;;  %v15578_v37 = vld [vmem:[#allocation10 + $0x5e0] ss:$8 sps:$4 sm:$0xff]   ;;  %v15616_v33 = vld [vmem:[#allocation10 + $0x604] ss:$8 sps:$4 sm:$0xff]  }
 0x39f   : > { %4450 = vmatmul.mubr.bf16.gmra.mxu0 %v17350_v24  ;;  %v3677_v7 = vpack.c.bf16 %v17397_v29, %v3633_v27  ;;  %v15584_v27 = vld [vmem:[#allocation10 + $0x670] ss:$8 sps:$4 sm:$0xff]   ;;  %v3581_v12 = vld [vmem:[#allocation3 + $0xe8] sm:$0xff]  ;;  %v17567_v38 = vld [vmem:[#allocation3 + $0xfe] sm:$0xff] }
 0x3a0   : > { %4459 = vmatprep.mubr.bf16.mxu0 %v3754_v40  ;;  %v4550_v17 = vpop.f32.mrf.mxu1 }
 0x3a1   : > { %6379 = vmatpush1.bf16.msra.mxu1 %v15560_v53 }
 0x3a2   : > { %v4554_v55 = vpop.f32.mrf.mxu1  ;;  %6380 = vmatprep.subr.bf16.mxu1 %v15565_v32  ;;  %v3727_v32 = vpack.c.bf16 %v17523_v0, %v17525_v44  ;;  %v17558_v0 = vld [vmem:[#allocation3 + $0xee] sm:$0xff] }
 0x3a3   : > { %v15602_v44 = vld [vmem:[#allocation10 + $0x630] ss:$8 sps:$4 sm:$0xff]  }
 0x3a4   : > { %v4556_v28 = vpop.f32.mrf.mxu1 }
 0x3a5   : > { %v15563_v28 = vld [vmem:[#allocation10 + $0x530] ss:$8 sps:$4 sm:$0xff]  }
 0x3a6   : > { %v4558_v57 = vpop.f32.mrf.mxu1  ;;  %6381 = vmatpush1.bf16.msra.mxu1 %v15563_v28  ;;  %v15592_v28 = vld [vmem:[#allocation10 + $0x5c4] ss:$8 sps:$4 sm:$0xff]  }
 0x3a7   : > { %4460 = vmatmul.mubr.bf16.gmra.mxu0 %v17350_v24  ;;  %6382 = vmatprep.subr.bf16.mxu1 %v15568_v21  ;;  %v15595_v21 = vld [vmem:[#allocation10 + $0x654] ss:$8 sps:$4 sm:$0xff]  }
 0x3a8   : > { %4469 = vmatprep.mubr.bf16.mxu0 %v3759_v50  ;;  %v4560_v30 = vpop.f32.mrf.mxu1 }
 0x3a9   : > { %v3575_v30 = vld [vmem:[#allocation3 + $0xb8] sm:$0xff] }
 0x3aa   : > { %v4564_v36 = vpop.f32.mrf.mxu1  ;;  %6383 = vmatpush1.bf16.msra.mxu1 %v15566_v5  ;;  %7572 = vst [vmem:[#allocation3 + $0xb2] sm:$0xff] %v17474_v19  ;;  %v15593_v5 = vld [vmem:[#allocation10 + $0x650] ss:$8 sps:$4 sm:$0xff]  }
 0x3ab   : > { %6384 = vmatprep.subr.bf16.mxu1 %v15571_v63  ;;  %v3730_v36 = vpack.c.bf16 %v3576_v6, %v3575_v30  ;;  %v3624_v63 = vld [vmem:[#allocation3 + $0x103] sm:$0xff]  ;;  %v15604_v30 = vld [vmem:[#allocation10 + $0x634] ss:$8 sps:$4 sm:$0xff]   ;;  %v3625_v6 = vld [vmem:[#allocation3 + $0x10b] sm:$0xff] }
 0x3ac   : > { %v4566_v43 = vpop.f32.mrf.mxu1 }
 0x3ae   : > { %v4568_v3 = vpop.f32.mrf.mxu1  ;;  %6385 = vmatpush1.bf16.msra.mxu1 %v15569_v46  ;;  %v3623_v46 = vld [vmem:[#allocation3 + $0xfb] sm:$0xff] }
 0x3af   : > { %4470 = vmatmul.mubr.bf16.gmra.mxu0 %v17350_v24  ;;  %v15580_v3 = vld [vmem:[#allocation10 + $0x5e4] ss:$8 sps:$4 sm:$0xff]  }
 0x3b0   : > { %4479 = vmatprep.mubr.bf16.mxu0 %v3764_v41  ;;  %v4570_v20 = vpop.f32.mrf.mxu1  ;;  %v3618_v41 = vld [vmem:[#allocation3 + $0xd3] sm:$0xff] }
 0x3b1   : > { %v3736_v43 = vpack.c.bf16 %v3618_v41, %v3617_v16  ;;  %v3619_v20 = vld [vmem:[#allocation3 + $0xdb] sm:$0xff]  ;;  %v3585_v16 = vld [vmem:[#allocation3 + $0x108] sm:$0xff]  ;;  %v3586_v41 = vld [vmem:[#allocation3 + $0x110] sm:$0xff] }
 0x3b2   : > { %v4574_v1 = vpop.f32.mrf.mxu1 }
 0x3b3   : > { %v3620_v1 = vld [vmem:[#allocation3 + $0xe3] sm:$0xff] }
 0x3b4   : > { %v4576_v56 = vpop.f32.mrf.mxu1 }
 0x3b5   : > { %v3580_v56 = vld [vmem:[#allocation3 + $0xe0] sm:$0xff] }
 0x3b6   : > { %v4578_v15 = vpop.f32.mrf.mxu1 }
 0x3b7   : > { %4480 = vmatmul.mubr.bf16.gmra.mxu0 %v17350_v24  ;;  %v3741_v15 = vpack.c.bf16 %v3620_v1, %v3619_v20  ;;  %v3628_v20 = vld [vmem:[#allocation3 + $0x123] sm:$0xff] }
 0x3b8   : > { %4489 = vmatprep.mubr.bf16.mxu0 %v3769_v58  ;;  %v4580_v31 = vpop.f32.mrf.mxu1  ;;  %v3579_v58 = vld [vmem:[#allocation3 + $0xd8] sm:$0xff] }
 0x3b9   : > { %v3740_v31 = vpack.c.bf16 %v3580_v56, %v3579_v58  ;;  %v15611_v58 = vld [vmem:[#allocation10 + $0x5a0] ss:$8 sps:$4 sm:$0xff]   ;;  %v15613_v56 = vld [vmem:[#allocation10 + $0x5a4] ss:$8 sps:$4 sm:$0xff]  }
 0x3ba   : > { %v4584_v59 = vpop.f32.mrf.mxu1 }
 0x3bb   : > { %v15581_v59 = vld [vmem:[#allocation10 + $0x5d0] ss:$8 sps:$4 sm:$0xff]  }
 0x3bc   : > { %v4586_v40 = vpop.f32.mrf.mxu1 }
 0x3bd   : > { %v17540_v40 = vld [vmem:[#allocation3 + $0xce] sm:$0xff] }
 0x3be   : > { %v4588_v48 = vpop.f32.mrf.mxu1 }
 0x3bf   : > { %4490 = vmatmul.mubr.bf16.gmra.mxu0 %v17350_v24  ;;  %v17542_v48 = vld [vmem:[#allocation3 + $0xd6] sm:$0xff] }
 0x3c0   : > { %4765 = vmatprep.mubr.bf16.mxu0 %v16730_v51  ;;  %v4590_v42 = vpop.f32.mrf.mxu1  ;;  %7576 = vst [vmem:[#allocation3 + $0xd2] sm:$0xff] %v17474_v19 }
 0x3c1   : > { %v15586_v42 = vld [vmem:[#allocation10 + $0x674] ss:$8 sps:$4 sm:$0xff]  }
 0x3c2   : > { %v4594_v13 = vpop.f32.mrf.mxu1  ;;  %6585 = vmatprep.subr.bf16.mxu0 %v15586_v42  ;;  %v17576_v42 = vld [vmem:[#allocation3 + $0x10e] sm:$0xff] }
 0x3c3   : > { %v3622_v13 = vld [vmem:[#allocation3 + $0xf3] sm:$0xff] }
 0x3c4   : > { %v4596_v17 = vpop.f32.mrf.mxu1 }
 0x3c5   : > { %v3582_v17 = vld [vmem:[#allocation3 + $0xf0] sm:$0xff] }
 0x3c6   : > { %v4598_v54 = vpop.f32.mrf.mxu1 }
 0x3c7   : > { %4766 = vmatmul.mubr.bf16.vlgmr.msra.gmra.mxu0 %v3677_v7  ;;  %v3621_v7 = vld [vmem:[#allocation3 + $0xeb] sm:$0xff]  ;;  %v3745_v54 = vpack.c.bf16 %v3582_v17, %v3581_v12  ;;  %v15619_v12 = vld [vmem:[#allocation10 + $0x6f4] ss:$8 sps:$4 sm:$0xff]  }
 0x3c8   : > { %4775 = vmatprep.mubr.bf16.mxu0 %v16730_v51  ;;  %v4600_v55 = vpop.f32.mrf.mxu1  ;;  %v3746_v53 = vpack.c.bf16 %v3622_v13, %v3621_v7  ;;  %6586 = vmatpush1.bf16.msra.mxu0 %v15584_v27  ;;  %v17578_v7 = vld [vmem:[#allocation3 + $0x116] sm:$0xff]  ;;  %v3629_v17 = vld [vmem:[#allocation3 + $0x12b] sm:$0xff] }
 0x3c9   : > { %v15589_v55 = vld [vmem:[#allocation10 + $0x664] ss:$8 sps:$4 sm:$0xff]   ;;  %v15617_v13 = vld [vmem:[#allocation10 + $0x6f0] ss:$8 sps:$4 sm:$0xff]  }
 0x3ca   : > { %v4604_v50 = vpop.f32.mrf.mxu1  ;;  %6587 = vmatprep.subr.bf16.mxu0 %v15589_v55 }
 0x3cb   : > { %v15590_v50 = vld [vmem:[#allocation10 + $0x5c0] ss:$8 sps:$4 sm:$0xff]  }
 0x3cc   : > { %v4606_v24 = vpop.f32.mrf.mxu1 }
 0x3cd   : > { %v15587_v24 = vld [vmem:[#allocation10 + $0x660] ss:$8 sps:$4 sm:$0xff]  }
 0x3ce   : > { %v4608_v29 = vpop.f32.mrf.mxu1  ;;  %6588 = vmatpush1.bf16.msra.mxu0 %v15587_v24  ;;  %v3589_v24 = vld [vmem:[#allocation3 + $0x128] sm:$0xff] }
 0x3cf   : > { %4776 = vmatmul.mubr.bf16.gmra.mxu0 %v3682_v47  ;;  %v3697_v47 = vpack.c.bf16 %v17437_v45, %v17435_v11  ;;  %v3615_v11 = vld [vmem:[#allocation3 + $0xbb] sm:$0xff]  ;;  %v3616_v45 = vld [vmem:[#allocation3 + $0xc3] sm:$0xff]  ;;  %6589 = vmatprep.subr.bf16.mxu0 %v15595_v21 }
 0x3d0   : > { %4785 = vmatprep.mubr.bf16.mxu0 %v16730_v51  ;;  %v4610_v57 = vpop.f32.mrf.mxu1  ;;  %v3731_v10 = vpack.c.bf16 %v3616_v45, %v3615_v11  ;;  %7573 = vst [vmem:[#allocation3 + $0xba] sm:$0xff] %v17474_v19  ;;  %7574 = vst [vmem:[#allocation3 + $0xc2] sm:$0xff] %v17474_v19  ;;  %v17549_v29 = vld [vmem:[#allocation3 + $0xde] sm:$0xff]  ;;  %v15599_v11 = vld [vmem:[#allocation10 + $0x5b0] ss:$8 sps:$4 sm:$0xff]  }
 0x3d1   : > { %7575 = vst [vmem:[#allocation3 + $0xca] sm:$0xff] %v17474_v19  ;;  %v17551_v57 = vld [vmem:[#allocation3 + $0xe6] sm:$0xff]  ;;  %7577 = vst [vmem:[#allocation3 + $0xda] sm:$0xff] %v17474_v19  ;;  %v15601_v45 = vld [vmem:[#allocation10 + $0x5b4] ss:$8 sps:$4 sm:$0xff]  }
 0x3d2   : > { %4642 = vmatprep.mubr.bf16.mxu1 %v3731_v10  ;;  %7578 = vst [vmem:[#allocation3 + $0xe2] sm:$0xff] %v17474_v19  ;;  %6590 = vmatpush1.bf16.msra.mxu0 %v15593_v5  ;;  %v17560_v10 = vld [vmem:[#allocation3 + $0xf6] sm:$0xff]  ;;  %7579 = vst [vmem:[#allocation3 + $0xea] sm:$0xff] %v17474_v19 }
 0x3d3   : > { %4643 = vmatmul.mubr.bf16.gmra.mxu1 %v3730_v36  ;;  %v3626_v36 = vld [vmem:[#allocation3 + $0x113] sm:$0xff] }
 0x3d4   : > { %4652 = vmatprep.mubr.bf16.mxu1 %v3736_v43  ;;  %v3737_v43 = vpack.c.bf16 %v17542_v48, %v17540_v40  ;;  %v3855_v48 = vld [vmem:[#allocation12 + $0x2] sm:$0x3]  ;;  %v15622_v5 = vld [vmem:[#allocation10 + $0x594] ss:$8 sps:$4 sm:$0xff]  }
 0x3d5   : > { %v3860_v21 = vrot.slane %v3855_v48, %v17299_v39 }
 0x3d7   : > { %4786 = vmatmul.mubr.bf16.gmra.mxu0 %v3687_v25  ;;  %v15574_v25 = vld [vmem:[#allocation10 + $0x504] ss:$8 sps:$4 sm:$0xff]  }
 0x3d8   : > { %4795 = vmatprep.mubr.bf16.mxu0 %v16730_v51  ;;  %6386 = vmatprep.subr.bf16.mxu1 %v15574_v25 }
 0x3d9   : > { %6387 = vmatpush1.bf16.msra.mxu1 %v15572_v4  ;;  %v3584_v4 = vld [vmem:[#allocation3 + $0x100] sm:$0xff] }
 0x3db   : > { %4653 = vmatmul.mubr.bf16.gmra.mxu1 %v3735_v49  ;;  %v17569_v49 = vld [vmem:[#allocation3 + $0x106] sm:$0xff] }
 0x3dc   : > { %4662 = vmatprep.mubr.bf16.mxu1 %v3741_v15  ;;  %7582 = vst [vmem:[#allocation3 + $0x102] sm:$0xff] %v17474_v19  ;;  %v3587_v15 = vld [vmem:[#allocation3 + $0x118] sm:$0xff]  ;;  %7583 = vst [vmem:[#allocation3 + $0x10a] sm:$0xff] %v17474_v19 }
 0x3dd   : > { %7584 = vst [vmem:[#allocation3 + $0x112] sm:$0xff] %v17474_v19 }
 0x3df   : > { %4796 = vmatmul.mubr.bf16.gmra.mxu0 %v3692_v2  ;;  %v15577_v2 = vld [vmem:[#allocation10 + $0x5f4] ss:$8 sps:$4 sm:$0xff]  }
 0x3e0   : > { %4805 = vmatprep.mubr.bf16.mxu0 %v16730_v51  ;;  %6388 = vmatprep.subr.bf16.mxu1 %v15577_v2  ;;  %v15596_v2 = vld [vmem:[#allocation10 + $0x640] ss:$8 sps:$4 sm:$0xff]  }
 0x3e1   : > { %6389 = vmatpush2.bf16.msra.mxu1 %v15575_v26  ;;  %v15598_v26 = vld [vmem:[#allocation10 + $0x644] ss:$8 sps:$4 sm:$0xff]  }
 0x3e2   : > { %6390 = vmatprep.subr.bf16.mxu1 %v15580_v3  ;;  %6591 = vmatprep.subr.bf16.mxu0 %v15598_v26  ;;  %v15607_v3 = vld [vmem:[#allocation10 + $0x624] ss:$8 sps:$4 sm:$0xff]  }
 0x3e3   : > { %4663 = vmatmul.mubr.bf16.gmra.mxu1 %v3740_v31  ;;  %6592 = vmatpush1.bf16.msra.mxu0 %v15596_v2  ;;  %v3588_v31 = vld [vmem:[#allocation3 + $0x120] sm:$0xff] }
 0x3e4   : > { %4672 = vmatprep.mubr.bf16.mxu1 %v3746_v53  ;;  %6593 = vmatprep.subr.bf16.mxu0 %v15604_v30  ;;  %v3631_v30 = vld [vmem:[#allocation3 + $0x13b] sm:$0xff] }
 0x3e5   : > { %6391 = vmatpush2.bf16.msra.mxu1 %v15578_v37  ;;  %v3755_v37 = vpack.c.bf16 %v3586_v41, %v3585_v16  ;;  %v3591_v41 = vld [vmem:[#allocation3 + $0x138] sm:$0xff] }
 0x3e6   : > { %6392 = vmatprep.subr.bf16.mxu1 %v15583_v34  ;;  %v3760_v34 = vpack.c.bf16 %v3588_v31, %v3587_v15  ;;  %v15634_v15 = vld [vmem:[#allocation10 + $0x584] ss:$8 sps:$4 sm:$0xff]  }
 0x3e7   : > { %4806 = vmatmul.mubr.bf16.gmra.mxu0 %v3697_v47  ;;  %v3751_v47 = vpack.c.bf16 %v3624_v63, %v3623_v46  ;;  %v3747_v63 = vpack.c.bf16 %v17560_v10, %v17558_v0  ;;  %v15626_v0 = vld [vmem:[#allocation10 + $0x6d0] ss:$8 sps:$4 sm:$0xff]  }
 0x3e8   : > { %4815 = vmatprep.mubr.bf16.mxu0 %v16730_v51  ;;  %6594 = vmatpush1.bf16.msra.mxu0 %v15602_v44  ;;  %v15628_v44 = vld [vmem:[#allocation10 + $0x6d4] ss:$8 sps:$4 sm:$0xff]  }
 0x3e9   : > { %6393 = vmatpush2.bf16.msra.mxu1 %v15581_v59  ;;  %6595 = vmatprep.subr.bf16.mxu0 %v15607_v3  ;;  %v3742_v59 = vpack.c.bf16 %v17551_v57, %v17549_v29  ;;  %v15620_v57 = vld [vmem:[#allocation10 + $0x590] ss:$8 sps:$4 sm:$0xff]  }
 0x3ea   : > { %6394 = vmatprep.subr.bf16.mxu1 %v15592_v28  ;;  %v3590_v28 = vld [vmem:[#allocation3 + $0x130] sm:$0xff] }
 0x3eb   : > { %4673 = vmatmul.mubr.bf16.gmra.mxu1 %v3745_v54  ;;  %v3630_v54 = vld [vmem:[#allocation3 + $0x133] sm:$0xff]  ;;  %v3765_v29 = vpack.c.bf16 %v3590_v28, %v3589_v24  ;;  %v15640_v24 = vld [vmem:[#allocation10 + $0x6a4] ss:$8 sps:$4 sm:$0xff]   ;;  %v15638_v28 = vld [vmem:[#allocation10 + $0x6a0] ss:$8 sps:$4 sm:$0xff]  }
 0x3ec   : > { %4682 = vmatprep.mubr.bf16.mxu1 %v3751_v47  ;;  %6596 = vmatpush1.bf16.msra.mxu0 %v15605_v23  ;;  %v15625_v47 = vld [vmem:[#allocation10 + $0x6e4] ss:$8 sps:$4 sm:$0xff]   ;;  %v17600_v23 = vrot.slane %v3855_v48, %v17381_v18  ;;  %v15637_v48 = vld [vmem:[#allocation10 + $0x6b4] ss:$8 sps:$4 sm:$0xff]  }
 0x3ed   : > { %6395 = vmatpush2.bf16.msra.mxu1 %v15590_v50  ;;  %v3766_v50 = vpack.c.bf16 %v3630_v54, %v3629_v17  ;;  %v17616_v17 = vpack.c.bf16 %v17474_v19, %v17474_v19 }
 0x3ee   : > { %6396 = vmatprep.subr.bf16.mxu1 %v15601_v45  ;;  %v17590_v45 = vld [vmem:[#allocation3 + $0x126] sm:$0xff] }
 0x3ef   : > { %4816 = vmatmul.mubr.bf16.gmra.mxu0 %v3702_v22  ;;  %v3583_v22 = vld [vmem:[#allocation3 + $0xf8] sm:$0xff] }
 0x3f0   : > { %4825 = vmatprep.mubr.bf16.mxu0 %v16730_v51  ;;  %v3750_v25 = vpack.c.bf16 %v3584_v4, %v3583_v22  ;;  %7580 = vst [vmem:[#allocation3 + $0xf2] sm:$0xff] %v17474_v19  ;;  %7581 = vst [vmem:[#allocation3 + $0xfa] sm:$0xff] %v17474_v19  ;;  %v15623_v4 = vld [vmem:[#allocation10 + $0x6e0] ss:$8 sps:$4 sm:$0xff]  }
 0x3f1   : > { %6397 = vmatpush2.bf16.msra.mxu1 %v15599_v11  ;;  %v17588_v11 = vld [vmem:[#allocation3 + $0x11e] sm:$0xff] }
 0x3f2   : > { %6398 = vmatprep.subr.bf16.mxu1 %v15613_v56  ;;  %v15629_v56 = vld [vmem:[#allocation10 + $0x6c0] ss:$8 sps:$4 sm:$0xff]  }
 0x3f3   : > { %4683 = vmatmul.mubr.bf16.gmra.mxu1 %v3750_v25 }
 0x3f5   : > { %6399 = vmatpush2.bf16.msra.mxu1 %v15611_v58 }
 0x3f6   : > { %6400 = vmatprep.subr.bf16.mxu1 %v15622_v5 }
 0x3f7   : > { %4826 = vmatmul.mubr.bf16.gmra.mxu0 %v3707_v62  ;;  %v3732_v62 = vpack.c.bf16 %v17535_v8, %v17533_v9  ;;  %v15610_v9 = vld [vmem:[#allocation10 + $0x614] ss:$8 sps:$4 sm:$0xff]  }
 0x3f8   : > { %4835 = vmatprep.mubr.bf16.mxu0 %v16730_v51  ;;  %v3627_v8 = vld [vmem:[#allocation3 + $0x11b] sm:$0xff]  ;;  %6597 = vmatprep.subr.bf16.mxu0 %v15610_v9 }
 0x3f9   : > { %v3761_v1 = vpack.c.bf16 %v3628_v20, %v3627_v8  ;;  %6401 = vmatpush2.bf16.msra.mxu1 %v15620_v57  ;;  %7585 = vst [vmem:[#allocation3 + $0x11a] sm:$0xff] %v17474_v19  ;;  %7586 = vst [vmem:[#allocation3 + $0x122] sm:$0xff] %v17474_v19  ;;  %v3752_v8 = vpack.c.bf16 %v17569_v49, %v17567_v38  ;;  %v15631_v20 = vld [vmem:[#allocation10 + $0x6c4] ss:$8 sps:$4 sm:$0xff]   ;;  %v15635_v49 = vld [vmem:[#allocation10 + $0x6b0] ss:$8 sps:$4 sm:$0xff]  }
 0x3fa   : > { %6402 = vmatprep.subr.bf16.mxu1 %v15634_v15  ;;  %v17609_v38 = vld [vmem:[#allocation3 + $0x12e] sm:$0xff]  ;;  %v15643_v57 = vld [vmem:[#allocation10 + $0x774] ss:$8 sps:$4 sm:$0xff]  }
 0x3fb   : > { %7588 = vst [vmem:[#allocation3 + $0x132] sm:$0xf] %v17474_v19  ;;  %7587 = vst [vmem:[#allocation3 + $0x12a] sm:$0xff] %v17474_v19  ;;  %v15644_v19 = vld [vmem:[#allocation10 + $0x690] ss:$8 sps:$4 sm:$0xff]  }
 0x3ff   : > { %4836 = vmatmul.mubr.bf16.gmra.mxu0 %v3712_v52  ;;  %v3756_v52 = vpack.c.bf16 %v3626_v36, %v3625_v6  ;;  %v3632_v6 = vld [vmem:[#allocation3 + $0x143] sm:$0xff] }
 0x400   : > { %4845 = vmatprep.mubr.bf16.mxu0 %v16730_v51  ;;  %v3771_v16 = vpack.c.bf16 %v3632_v6, %v3631_v30 }
 0x401   : > { %4692 = vmatprep.mubr.bf16.mxu1 %v3756_v52 }
 0x402   : > { %4693 = vmatmul.mubr.bf16.gmra.mxu1 %v3755_v37  ;;  %v3592_v37 = vld [vmem:[#allocation3 + $0x140] sm:$0xff] }
 0x403   : > { %4702 = vmatprep.mubr.bf16.mxu1 %v3761_v1  ;;  %v3770_v3 = vpack.c.bf16 %v3592_v37, %v3591_v41  ;;  %v15632_v1 = vld [vmem:[#allocation10 + $0x580] ss:$8 sps:$4 sm:$0xff]  }
 0x404   : > { %6403 = vmatpush2.bf16.msra.mxu1 %v15632_v1  ;;  %v3671_v41 = vld [vmem:[#allocation3 + $0x13e] sm:$0xff]  ;;  %v3672_v37 = vld [vmem:[#allocation3 + $0x146] sm:$0xff] }
 0x405   : > { %6798 = vmatprep.subr.bf16.mxu1 %v15643_v57 }
 0x407   : > { %4846 = vmatmul.mubr.bf16.gmra.mxu0 %v3717_v61  ;;  %v15608_v61 = vld [vmem:[#allocation10 + $0x610] ss:$8 sps:$4 sm:$0xff]  }
 0x408   : > { %4855 = vmatprep.mubr.bf16.mxu0 %v16730_v51  ;;  %6598 = vmatpush1.bf16.msra.mxu0 %v15608_v61 }
 0x409   : > { %6599 = vmatprep.subr.bf16.mxu0 %v15616_v33 }
 0x40a   : > { %4703 = vmatmul.mubr.bf16.gmra.mxu1 %v3760_v34 }
 0x40b   : > { %4712 = vmatprep.mubr.bf16.mxu1 %v3766_v50  ;;  %v3757_v50 = vpack.c.bf16 %v17578_v7, %v17576_v42  ;;  %v5647_v42 = vld [vmem:[#allocation2 + $0x29] sm:$0xff] }
 0x40f   : > { %4856 = vmatmul.mubr.bf16.gmra.mxu0 %v3722_v35  ;;  %v15614_v35 = vld [vmem:[#allocation10 + $0x600] ss:$8 sps:$4 sm:$0xff]  }
 0x410   : > { %4865 = vmatprep.mubr.bf16.mxu0 %v16730_v51  ;;  %6600 = vmatpush1.bf16.msra.mxu0 %v15614_v35 }
 0x411   : > { %6601 = vmatprep.subr.bf16.mxu0 %v15619_v12 }
 0x412   : > { %4713 = vmatmul.mubr.bf16.gmra.mxu1 %v3765_v29  ;;  %v15641_v29 = vld [vmem:[#allocation10 + $0x770] ss:$8 sps:$4 sm:$0xff]  }
 0x413   : > { %4722 = vmatprep.mubr.bf16.mxu1 %v3771_v16 }
 0x414   : > { %6602 = vmatpush2.bf16.msra.mxu0 %v15617_v13  ;;  %v5645_v13 = vld [vmem:[#allocation2 + $0x19] sm:$0xff] }
 0x415   : > { %6603 = vmatprep.subr.bf16.mxu0 %v15625_v47 }
 0x417   : > { %4866 = vmatmul.mubr.bf16.gmra.mxu0 %v3727_v32 }
 0x418   : > { %4875 = vmatprep.mubr.bf16.mxu0 %v16730_v51  ;;  %6604 = vmatpush2.bf16.msra.mxu0 %v15623_v4  ;;  %v15649_v4 = vld [vmem:[#allocation10 + $0x684] ss:$8 sps:$4 sm:$0xff]  }
 0x419   : > { %6605 = vmatprep.subr.bf16.mxu0 %v15628_v44  ;;  %v5649_v44 = vld [vmem:[#allocation2 + $0x39] sm:$0xff] }
 0x41a   : > { %4723 = vmatmul.mubr.bf16.gmra.mxu1 %v3770_v3  ;;  %v5650_v3 = vld [vmem:[#allocation2 + $0x41] sm:$0xff] }
 0x41c   : > { %6606 = vmatpush2.bf16.msra.mxu0 %v15626_v0  ;;  %v5648_v0 = vld [vmem:[#allocation2 + $0x31] sm:$0xff] }
 0x41d   : > { %6607 = vmatprep.subr.bf16.mxu0 %v15631_v20  ;;  %v5799_v6 = vpack.c.bf16 %v5649_v44, %v5648_v0  ;;  %v5717_v20 = vld [vmem:[#allocation2 + $0x2b] sm:$0xff]  ;;  %v5722_v0 = vld [vmem:[#allocation2 + $0x53] sm:$0xff] }
 0x41f   : > { %4876 = vmatmul.mubr.bf16.gmra.mxu0 %v3732_v62 }
 0x420   : > { %4885 = vmatprep.mubr.bf16.mxu0 %v16730_v51  ;;  %6608 = vmatpush2.bf16.msra.mxu0 %v15629_v56  ;;  %v3772_v56 = vpack.c.bf16 %v3672_v37, %v3671_v41  ;;  %v5687_v41 = vld [vmem:[#allocation2 + $0x52] sm:$0xff]  ;;  %v5658_v37 = vld [vmem:[#allocation2 + $0x81] sm:$0xff] }
 0x421   : > { %6609 = vmatprep.subr.bf16.mxu0 %v15637_v48  ;;  %v5718_v48 = vld [vmem:[#allocation2 + $0x33] sm:$0xff] }
 0x424   : > { %6610 = vmatpush2.bf16.msra.mxu0 %v15635_v49  ;;  %v5653_v49 = vld [vmem:[#allocation2 + $0x59] sm:$0xff] }
 0x425   : > { %6611 = vmatprep.subr.bf16.mxu0 %v15640_v24  ;;  %v5682_v24 = vld [vmem:[#allocation2 + $0x2a] sm:$0xff] }
 0x427   : > { %4886 = vmatmul.mubr.bf16.gmra.mxu0 %v3737_v43 }
 0x428   : > { %4895 = vmatprep.mubr.bf16.mxu0 %v16730_v51  ;;  %6612 = vmatpush2.bf16.msra.mxu0 %v15638_v28  ;;  %v5683_v28 = vld [vmem:[#allocation2 + $0x32] sm:$0xff] }
 0x42b   : > { %v4614_v60 = vpop.f32.mrf.mxu1 }
 0x42d   : > { %v4616_v40 = vpop.f32.mrf.mxu1 }
 0x42f   : > { %v4391_v27 = vpop.f32.mrf.mxu0  ;;  %4896 = vmatmul.mubr.bf16.gmra.mxu0 %v3742_v59  ;;  %v4618_v53 = vpop.f32.mrf.mxu1 }
 0x430   : > { %4905 = vmatprep.mubr.bf16.mxu0 %v16730_v51  ;;  %v5644_v27 = vld [vmem:[#allocation2 + $0x11] sm:$0xff] }
 0x431   : > { %v4393_v55 = vpop.f32.mrf.mxu0  ;;  %v4620_v32 = vpop.f32.mrf.mxu1  ;;  %v5789_v12 = vpack.c.bf16 %v5645_v13, %v5644_v27  ;;  %v5719_v27 = vld [vmem:[#allocation2 + $0x3b] sm:$0xff] }
 0x433   : > { %v4395_v46 = vpop.f32.mrf.mxu0  ;;  %6404 = vmatprep.mubr.bf16.mxu1 %v5789_v12 }
 0x434   : > { %v4624_v22 = vpop.f32.mrf.mxu1  ;;  %v4396_v26 = vadd.f32 %v4395_v46, %v3860_v21  ;;  %6405 = vmatmul.mubr.bf16.vlgmr.msra.gmra.mxu1 %v17616_v17  ;;  %v5646_v46 = vld [vmem:[#allocation2 + $0x21] sm:$0xff] }
 0x435   : > { %v17586_v25 = vpop.f32.mrf.mxu0  ;;  %6799 = vmatpush1.bf16.msra.mxu1 %v15641_v29  ;;  %v3762_v22 = vpack.c.bf16 %v17590_v45, %v17588_v11  ;;  %v5655_v29 = vld [vmem:[#allocation2 + $0x69] sm:$0xff] }
 0x436   : > { %v4626_v62 = vpop.f32.mrf.mxu1 }
 0x437   : > { %v4401_v2 = vpop.f32.mrf.mxu0  ;;  %4906 = vmatmul.mubr.bf16.gmra.mxu0 %v3747_v63  ;;  %v5794_v63 = vpack.c.bf16 %v5647_v42, %v5646_v46  ;;  %v15647_v62 = vld [vmem:[#allocation10 + $0x680] ss:$8 sps:$4 sm:$0xff]   ;;  %v5795_v42 = vpack.c.bf16 %v5683_v28, %v5682_v24 }
 0x438   : > { %v4628_v10 = vpop.f32.mrf.mxu1  ;;  %4915 = vmatprep.mubr.bf16.mxu0 %v16730_v51  ;;  %v4402_v61 = vadd.f32 %v4401_v2, %v3860_v21  ;;  %v15646_v21 = vld [vmem:[#allocation10 + $0x694] ss:$8 sps:$4 sm:$0xff]  }
 0x439   : > { %v17595_v36 = vadd.f32 %v4628_v10, %v4396_v26  ;;  %v4403_v52 = vpop.f32.mrf.mxu0  ;;  %6613 = vmatprep.subr.bf16.mxu0 %v15646_v21  ;;  %6414 = vmatprep.mubr.bf16.mxu1 %v5794_v63  ;;  %v3670_v10 = vld [vmem:[#allocation3 + $0x136] sm:$0xff] }
 0x43a   : > { %v17597_v43 = vpop.f32.mrf.mxu1  ;;  %v4404_v31 = vadd.f32 %v4403_v52, %v17600_v23  ;;  %6614 = vmatpush2.bf16.msra.mxu0 %v15644_v19  ;;  %v3767_v11 = vpack.c.bf16 %v3670_v10, %v17609_v38  ;;  %v5652_v38 = vld [vmem:[#allocation2 + $0x51] sm:$0xff]  ;;  %v5723_v10 = vld [vmem:[#allocation2 + $0x5b] sm:$0xff] }
 0x43b   : > { %v4405_v9 = vpop.f32.mrf.mxu0  ;;  %6615 = vmatprep.subr.bf16.mxu0 %v15649_v4  ;;  %v5809_v13 = vpack.c.bf16 %v5653_v49, %v5652_v38  ;;  %v5721_v19 = vld [vmem:[#allocation2 + $0x4b] sm:$0xff]  ;;  %v5685_v4 = vld [vmem:[#allocation2 + $0x42] sm:$0xff] }
 0x43c   : > { %v4634_v58 = vpop.f32.mrf.mxu1  ;;  %6415 = vmatmul.mubr.bf16.gmra.mxu1 %v17616_v17  ;;  %v15653_v38 = vld [vmem:[#allocation10 + $0x750] ss:$8 sps:$4 sm:$0xff]   ;;  %v15655_v49 = vld [vmem:[#allocation10 + $0x754] ss:$8 sps:$4 sm:$0xff]  }
 0x43d   : > { %v17605_v59 = vadd.f32 %v4634_v58, %v4402_v61  ;;  %v4407_v34 = vpop.f32.mrf.mxu0  ;;  %6424 = vmatprep.mubr.bf16.mxu1 %v5799_v6  ;;  %v5651_v61 = vld [vmem:[#allocation2 + $0x49] sm:$0xff] }
 0x43e   : > { %v4636_v33 = vpop.f32.mrf.mxu1  ;;  %6616 = vmatpush2.bf16.msra.mxu0 %v15647_v62  ;;  %v5804_v1 = vpack.c.bf16 %v5651_v61, %v5650_v3  ;;  %v5656_v62 = vld [vmem:[#allocation2 + $0x71] sm:$0xff]  ;;  %v5659_v3 = vld [vmem:[#allocation2 + $0x89] sm:$0xff] }
 0x43f   : > { %v17607_v60 = vadd.f32 %v4636_v33, %v4404_v31  ;;  %v4411_v35 = vpop.f32.mrf.mxu0  ;;  %4916 = vmatmul.mubr.bf16.gmra.mxu0 %v3752_v8  ;;  %v5716_v8 = vld [vmem:[#allocation2 + $0x23] sm:$0xff]  ;;  %v5680_v33 = vld [vmem:[#allocation2 + $0x1a] sm:$0xff] }
 0x440   : > { %v4638_v40 = vpop.f32.mrf.mxu1  ;;  %4925 = vmatprep.mubr.bf16.mxu0 %v16730_v51  ;;  %v5791_v15 = vpack.c.bf16 %v5717_v20, %v5716_v8  ;;  %v5681_v35 = vld [vmem:[#allocation2 + $0x22] sm:$0xff]  ;;  %v5725_v8 = vld [vmem:[#allocation2 + $0x6b] sm:$0xff]  ;;  %v5824_v20 = vpack.c.bf16 %v5659_v3, %v5658_v37 }
 0x441   : > { %v4413_v53 = vpop.f32.mrf.mxu0  ;;  %v5790_v12 = vpack.c.bf16 %v5681_v35, %v5680_v33  ;;  %v5688_v35 = vld [vmem:[#allocation2 + $0x5a] sm:$0xff] }
 0x442   : > { %v4640_v54 = vpop.f32.mrf.mxu1 }
 0x443   : > { %v4415_v55 = vpop.f32.mrf.mxu0  ;;  %v5796_v54 = vpack.c.bf16 %v5719_v27, %v5718_v48  ;;  %v5726_v27 = vld [vmem:[#allocation2 + $0x73] sm:$0xff] }
 0x444   : > { %6425 = vmatmul.mubr.bf16.gmra.mxu1 %v17616_v17 }
 0x445   : > { %v4417_v32 = vpop.f32.mrf.mxu0  ;;  %6434 = vmatprep.mubr.bf16.mxu1 %v5804_v1 }
 0x446   : > { %v5654_v32 = vld [vmem:[#allocation2 + $0x61] sm:$0xff] }
 0x447   : > { %v4421_v5 = vpop.f32.mrf.mxu0  ;;  %4926 = vmatmul.mubr.bf16.gmra.mxu0 %v3757_v50  ;;  %v5814_v21 = vpack.c.bf16 %v5655_v29, %v5654_v32  ;;  %v5690_v32 = vld [vmem:[#allocation2 + $0x6a] sm:$0xff]  ;;  %v5691_v29 = vld [vmem:[#allocation2 + $0x72] sm:$0xff] }
 0x448   : > { %4935 = vmatprep.mubr.bf16.mxu0 %v16730_v51  ;;  %v5720_v5 = vld [vmem:[#allocation2 + $0x43] sm:$0xff] }
 0x449   : > { %v4423_v7 = vpop.f32.mrf.mxu0 }
 0x44a   : > { %v5801_v7 = vpack.c.bf16 %v5721_v19, %v5720_v5  ;;  %v5728_v5 = vld [vmem:[#allocation2 + $0x83] sm:$0xff]  ;;  %v5729_v19 = vld [vmem:[#allocation2 + $0x8b] sm:$0xff] }
 0x44b   : > { %v4425_v47 = vpop.f32.mrf.mxu0 }
 0x44c   : > { %6435 = vmatmul.mubr.bf16.gmra.mxu1 %v17616_v17 }
 0x44d   : > { %v4427_v26 = vpop.f32.mrf.mxu0  ;;  %6444 = vmatprep.mubr.bf16.mxu1 %v5809_v13  ;;  %v5727_v13 = vld [vmem:[#allocation2 + $0x7b] sm:$0xff] }
 0x44e   : > { %v5657_v26 = vld [vmem:[#allocation2 + $0x79] sm:$0xff] }
 0x44f   : > { %v4431_v2 = vpop.f32.mrf.mxu0  ;;  %4936 = vmatmul.mubr.bf16.gmra.mxu0 %v3762_v22  ;;  %v5684_v22 = vld [vmem:[#allocation2 + $0x3a] sm:$0xff]  ;;  %v5819_v44 = vpack.c.bf16 %v5657_v26, %v5656_v62  ;;  %v5693_v62 = vld [vmem:[#allocation2 + $0x82] sm:$0xff] }
 0x450   : > { %4945 = vmatprep.mubr.bf16.mxu0 %v16730_v51  ;;  %v5800_v6 = vpack.c.bf16 %v5685_v4, %v5684_v22  ;;  %v5692_v4 = vld [vmem:[#allocation2 + $0x7a] sm:$0xff] }
 0x451   : > { %v4433_v30 = vpop.f32.mrf.mxu0 }
 0x453   : > { %v4435_v52 = vpop.f32.mrf.mxu0 }
 0x454   : > { %6445 = vmatmul.mubr.bf16.gmra.mxu1 %v17616_v17  ;;  %v5806_v52 = vpack.c.bf16 %v5723_v10, %v5722_v0  ;;  %v5820_v0 = vpack.c.bf16 %v5693_v62, %v5692_v4  ;;  %v4398_v4 = vadd.f32 %v17586_v25, %v17600_v23 }
 0x455   : > { %v4437_v45 = vpop.f32.mrf.mxu0  ;;  %6454 = vmatprep.mubr.bf16.mxu1 %v5814_v21 }
 0x457   : > { %v4441_v16 = vpop.f32.mrf.mxu0  ;;  %4946 = vmatmul.mubr.bf16.gmra.mxu0 %v3767_v11 }
 0x458   : > { %4955 = vmatprep.mubr.bf16.mxu0 %v16730_v51  ;;  %v5686_v16 = vld [vmem:[#allocation2 + $0x4a] sm:$0xff] }
 0x459   : > { %v4443_v9 = vpop.f32.mrf.mxu0 }
 0x45a   : > { %v5724_v9 = vld [vmem:[#allocation2 + $0x63] sm:$0xff] }
 0x45b   : > { %v4445_v58 = vpop.f32.mrf.mxu0 }
 0x45c   : > { %6455 = vmatmul.mubr.bf16.gmra.mxu1 %v17616_v17  ;;  %v5805_v58 = vpack.c.bf16 %v5687_v41, %v5686_v16  ;;  %v15664_v16 = vld [vmem:[#allocation10 + $0x724] ss:$8 sps:$4 sm:$0xff]  }
 0x45d   : > { %v4447_v31 = vpop.f32.mrf.mxu0  ;;  %6464 = vmatprep.mubr.bf16.mxu1 %v5819_v44 }
 0x45e   : > { %v5811_v31 = vpack.c.bf16 %v5725_v8, %v5724_v9 }
 0x45f   : > { %v4451_v34 = vpop.f32.mrf.mxu0  ;;  %4956 = vmatmul.mubr.bf16.gmra.mxu0 %v3772_v56  ;;  %v15650_v56 = vld [vmem:[#allocation10 + $0x760] ss:$8 sps:$4 sm:$0xff]  }
 0x460   : > { %6617 = vmatprep.mubr.bf16.mxu0 %v5791_v15  ;;  %v15652_v15 = vld [vmem:[#allocation10 + $0x764] ss:$8 sps:$4 sm:$0xff]  }
 0x461   : > { %v4453_v40 = vpop.f32.mrf.mxu0  ;;  %6800 = vmatprep.subr.bf16.mxu1 %v15652_v15 }
 0x462   : > { %6801 = vmatpush1.bf16.msra.mxu1 %v15650_v56  ;;  %v5689_v40 = vld [vmem:[#allocation2 + $0x62] sm:$0xff] }
 0x463   : > { %v4455_v53 = vpop.f32.mrf.mxu0  ;;  %6802 = vmatprep.subr.bf16.mxu1 %v15655_v49  ;;  %v15667_v56 = vld [vmem:[#allocation10 + $0x714] ss:$8 sps:$4 sm:$0xff]  }
 0x464   : > { %6465 = vmatmul.mubr.bf16.gmra.mxu1 %v17616_v17  ;;  %v15658_v53 = vld [vmem:[#allocation10 + $0x744] ss:$8 sps:$4 sm:$0xff]  }
 0x465   : > { %v4457_v55 = vpop.f32.mrf.mxu0  ;;  %6474 = vmatprep.mubr.bf16.mxu1 %v5824_v20 }
 0x466   : > { %6803 = vmatpush1.bf16.msra.mxu1 %v15653_v38  ;;  %v15656_v55 = vld [vmem:[#allocation10 + $0x740] ss:$8 sps:$4 sm:$0xff]  }
 0x467   : > { %v4461_v50 = vpop.f32.mrf.mxu0  ;;  %6618 = vmatmul.mubr.bf16.vlgmr.msra.gmra.mxu0 %v5790_v12  ;;  %6804 = vmatprep.subr.bf16.mxu1 %v15658_v53  ;;  %v15670_v53 = vld [vmem:[#allocation10 + $0x704] ss:$8 sps:$4 sm:$0xff]  }
 0x468   : > { %6627 = vmatprep.mubr.bf16.mxu0 %v5796_v54  ;;  %v5810_v54 = vpack.c.bf16 %v5689_v40, %v5688_v35  ;;  %v5816_v50 = vpack.c.bf16 %v5727_v13, %v5726_v27  ;;  %v15668_v13 = vld [vmem:[#allocation10 + $0x700] ss:$8 sps:$4 sm:$0xff]  }
 0x469   : > { %v4463_v57 = vpop.f32.mrf.mxu0 }
 0x46a   : > { %6805 = vmatpush1.bf16.msra.mxu1 %v15656_v55 }
 0x46b   : > { %v4465_v46 = vpop.f32.mrf.mxu0 }
 0x46c   : > { %6475 = vmatmul.mubr.bf16.gmra.mxu1 %v17616_v17  ;;  %v5815_v46 = vpack.c.bf16 %v5691_v29, %v5690_v32 }
 0x46d   : > { %v4467_v63 = vpop.f32.mrf.mxu0 }
 0x46e   : > { %v5821_v63 = vpack.c.bf16 %v5729_v19, %v5728_v5 }
 0x46f   : > { %v4471_v47 = vpop.f32.mrf.mxu0  ;;  %6628 = vmatmul.mubr.bf16.gmra.mxu0 %v5795_v42  ;;  %v15659_v42 = vld [vmem:[#allocation10 + $0x730] ss:$8 sps:$4 sm:$0xff]  }
 0x470   : > { %6637 = vmatprep.mubr.bf16.mxu0 %v5801_v7  ;;  %v15661_v7 = vld [vmem:[#allocation10 + $0x734] ss:$8 sps:$4 sm:$0xff]  }
 0x471   : > { %v4473_v2 = vpop.f32.mrf.mxu0  ;;  %6806 = vmatprep.subr.bf16.mxu1 %v15661_v7 }
 0x472   : > { %6807 = vmatpush1.bf16.msra.mxu1 %v15659_v42 }
 0x473   : > { %v4475_v30 = vpop.f32.mrf.mxu0  ;;  %6808 = vmatprep.subr.bf16.mxu1 %v15664_v16 }
 0x475   : > { %v4477_v11 = vpop.f32.mrf.mxu0 }
 0x477   : > { %v4481_v45 = vpop.f32.mrf.mxu0  ;;  %6638 = vmatmul.mubr.bf16.gmra.mxu0 %v5800_v6 }
 0x478   : > { %6647 = vmatprep.mubr.bf16.mxu0 %v5806_v52  ;;  %v15662_v45 = vld [vmem:[#allocation10 + $0x720] ss:$8 sps:$4 sm:$0xff]  }
 0x479   : > { %v4483_v61 = vpop.f32.mrf.mxu0  ;;  %6809 = vmatpush1.bf16.msra.mxu1 %v15662_v45 }
 0x47a   : > { %6810 = vmatprep.subr.bf16.mxu1 %v15667_v56 }
 0x47b   : > { %v4485_v1 = vpop.f32.mrf.mxu0 }
 0x47d   : > { %v4487_v34 = vpop.f32.mrf.mxu0 }
 0x47f   : > { %v4491_v33 = vpop.f32.mrf.mxu0  ;;  %6648 = vmatmul.mubr.bf16.gmra.mxu0 %v5805_v58  ;;  %v15665_v58 = vld [vmem:[#allocation10 + $0x710] ss:$8 sps:$4 sm:$0xff]  }
 0x480   : > { %6657 = vmatprep.mubr.bf16.mxu0 %v5811_v31  ;;  %6811 = vmatpush1.bf16.msra.mxu1 %v15665_v58  ;;  %v17644_v58 = vld [vmem:[#allocation2] sm:$0xff] }
 0x481   : > { %v4493_v48 = vpop.f32.mrf.mxu0  ;;  %6812 = vmatprep.subr.bf16.mxu1 %v15670_v53 }
 0x483   : > { %v4495_v12 = vpop.f32.mrf.mxu0 }
 0x484   : > { %6813 = vmatpush1.bf16.msra.mxu1 %v15668_v13 }
 0x485   : > { %v4497_v24 = vpop.f32.mrf.mxu0 }
 0x487   : > { %v4767_v28 = vpop.f32.mrf.mxu0  ;;  %6658 = vmatmul.mubr.bf16.gmra.mxu0 %v5810_v54 }
 0x488   : > { %6667 = vmatprep.mubr.bf16.mxu0 %v5816_v50 }
 0x489   : > { %v4769_v57 = vpop.f32.mrf.mxu0 }
 0x48b   : > { %v4771_v21 = vpop.f32.mrf.mxu0 }
 0x48d   : > { %v4773_v47 = vpop.f32.mrf.mxu0 }
 0x48f   : > { %v4777_v22 = vpop.f32.mrf.mxu0  ;;  %6668 = vmatmul.mubr.bf16.gmra.mxu0 %v5815_v46 }
 0x490   : > { %6677 = vmatprep.mubr.bf16.mxu0 %v5821_v63 }
 0x491   : > { %v4779_v26 = vpop.f32.mrf.mxu0 }
 0x493   : > { %v4781_v2 = vpop.f32.mrf.mxu0  ;;  %v4644_v49 = vpop.f32.mrf.mxu1 }
 0x494   : > { %v4631_v2 = vadd.f32 %v17597_v43, %v4398_v4 }
 0x495   : > { %v4783_v10 = vpop.f32.mrf.mxu0  ;;  %v4646_v48 = vpop.f32.mrf.mxu1 }
 0x496   : > { %v17649_v48 = vld [vmem:[#allocation2 + $0x64] sm:$0xff] }
 0x497   : > { %v4787_v44 = vpop.f32.mrf.mxu0  ;;  %6678 = vmatmul.mubr.bf16.gmra.mxu0 %v5820_v0  ;;  %v4648_v12 = vpop.f32.mrf.mxu1 }
 0x499   : > { %v4789_v30 = vpop.f32.mrf.mxu0  ;;  %v4650_v55 = vpop.f32.mrf.mxu1 }
 0x49b   : > { %v4791_v6 = vpop.f32.mrf.mxu0  ;;  %v4654_v24 = vpop.f32.mrf.mxu1 }
 0x49d   : > { %v4793_v52 = vpop.f32.mrf.mxu0  ;;  %v4656_v32 = vpop.f32.mrf.mxu1 }
 0x49e   : > { %v17653_v32 = vld [vmem:[#allocation2 + $0x6c] sm:$0xff] }
 0x49f   : > { %v4797_v11 = vpop.f32.mrf.mxu0  ;;  %v4658_v57 = vpop.f32.mrf.mxu1  ;;  %9012 = vst [vmem:[#allocation2 + $0x68] sm:$0xff] %v17644_v58 }
 0x4a1   : > { %v4799_v41 = vpop.f32.mrf.mxu0  ;;  %v4660_v19 = vpop.f32.mrf.mxu1 }
 0x4a3   : > { %v4801_v37 = vpop.f32.mrf.mxu0  ;;  %v4664_v46 = vpop.f32.mrf.mxu1 }
 0x4a5   : > { %v4803_v3 = vpop.f32.mrf.mxu0  ;;  %v4666_v7 = vpop.f32.mrf.mxu1 }
 0x4a7   : > { %v4807_v61 = vpop.f32.mrf.mxu0  ;;  %v4668_v47 = vpop.f32.mrf.mxu1 }
 0x4a9   : > { %v4809_v9 = vpop.f32.mrf.mxu0  ;;  %v4670_v62 = vpop.f32.mrf.mxu1 }
 0x4aa   : > { %v17660_v62 = vld [vmem:[#allocation2 + $0x7c] sm:$0xff] }
 0x4ab   : > { %v4811_v8 = vpop.f32.mrf.mxu0  ;;  %v4674_v0 = vpop.f32.mrf.mxu1 }
 0x4ac   : > { %v17640_v8 = vld [vmem:[#allocation2 + $0x4c] sm:$0xff] }
 0x4ad   : > { %v4813_v20 = vpop.f32.mrf.mxu0  ;;  %v4676_v30 = vpop.f32.mrf.mxu1 }
 0x4ae   : > { %v17642_v20 = vld [vmem:[#allocation2 + $0x54] sm:$0xff] }
 0x4af   : > { %v4817_v1 = vpop.f32.mrf.mxu0  ;;  %v4678_v11 = vpop.f32.mrf.mxu1  ;;  %9009 = vst [vmem:[#allocation2 + $0x50] sm:$0xff] %v17644_v58 }
 0x4b1   : > { %v4819_v15 = vpop.f32.mrf.mxu0  ;;  %v4680_v41 = vpop.f32.mrf.mxu1 }
 0x4b3   : > { %v4821_v31 = vpop.f32.mrf.mxu0  ;;  %v4684_v25 = vpop.f32.mrf.mxu1 }
 0x4b4   : > { %v5660_v25 = vld [vmem:[#allocation2 + $0x91] sm:$0xff] }
 0x4b5   : > { %v4823_v34 = vpop.f32.mrf.mxu0  ;;  %v4686_v61 = vpop.f32.mrf.mxu1 }
 0x4b6   : > { %v5694_v61 = vld [vmem:[#allocation2 + $0x8a] sm:$0xff] }
 0x4b7   : > { %v4827_v33 = vpop.f32.mrf.mxu0  ;;  %v4688_v9 = vpop.f32.mrf.mxu1 }
 0x4b9   : > { %v4829_v35 = vpop.f32.mrf.mxu0  ;;  %v4690_v56 = vpop.f32.mrf.mxu1 }
 0x4bb   : > { %v4831_v38 = vpop.f32.mrf.mxu0 }
 0x4bd   : > { %v4833_v40 = vpop.f32.mrf.mxu0 }
 0x4be   : > { %v17647_v40 = vld [vmem:[#allocation2 + $0x5c] sm:$0xff] }
 0x4bf   : > { %v4837_v27 = vpop.f32.mrf.mxu0  ;;  %9010 = vst [vmem:[#allocation2 + $0x58] sm:$0xff] %v17644_v58  ;;  %9011 = vst [vmem:[#allocation2 + $0x60] sm:$0xff] %v17644_v58 }
 0x4c1   : > { %v4839_v54 = vpop.f32.mrf.mxu0 }
 0x4c2   : > { %v4694_v15 = vpop.f32.mrf.mxu1 }
 0x4c3   : > { %v4841_v50 = vpop.f32.mrf.mxu0 }
 0x4c4   : > { %v4696_v34 = vpop.f32.mrf.mxu1 }
 0x4c5   : > { %v4843_v28 = vpop.f32.mrf.mxu0 }
 0x4c6   : > { %v4698_v49 = vpop.f32.mrf.mxu1 }
 0x4c7   : > { %v4847_v29 = vpop.f32.mrf.mxu0 }
 0x4c8   : > { %v4700_v13 = vpop.f32.mrf.mxu1  ;;  %v17655_v29 = vld [vmem:[#allocation2 + $0x74] sm:$0xff] }
 0x4c9   : > { %v4849_v5 = vpop.f32.mrf.mxu0  ;;  %9013 = vst [vmem:[#allocation2 + $0x70] sm:$0xff] %v17644_v58  ;;  %9014 = vst [vmem:[#allocation2 + $0x78] sm:$0xff] %v17644_v58 }
 0x4ca   : > { %v4704_v50 = vpop.f32.mrf.mxu1 }
 0x4cb   : > { %v4851_v21 = vpop.f32.mrf.mxu0 }
 0x4cc   : > { %v4706_v28 = vpop.f32.mrf.mxu1 }
 0x4cd   : > { %v4853_v42 = vpop.f32.mrf.mxu0  ;;  %v5699_v28 = vld [vmem:[#allocation2 + $0xb2] sm:$0xff] }
 0x4ce   : > { %v4708_v5 = vpop.f32.mrf.mxu1 }
 0x4cf   : > { %v4857_v63 = vpop.f32.mrf.mxu0 }
 0x4d0   : > { %v4710_v21 = vpop.f32.mrf.mxu1 }
 0x4d1   : > { %v4859_v22 = vpop.f32.mrf.mxu0 }
 0x4d2   : > { %v4714_v42 = vpop.f32.mrf.mxu1 }
 0x4d3   : > { %v4861_v26 = vpop.f32.mrf.mxu0  ;;  %v5665_v42 = vld [vmem:[#allocation2 + $0xb9] sm:$0xff] }
 0x4d4   : > { %v4862_v7 = vadd.f32 %v4861_v26, %v17595_v36  ;;  %v4716_v22 = vpop.f32.mrf.mxu1 }
 0x4d5   : > { %v4863_v10 = vpop.f32.mrf.mxu0 }
 0x4d6   : > { %v4864_v44 = vadd.f32 %v4863_v10, %v4631_v2  ;;  %v17662_v2 = vld [vmem:[#allocation2 + $0x84] sm:$0xff]  ;;  %v4718_v10 = vpop.f32.mrf.mxu1 }
 0x4d7   : > { %v17637_v6 = vpop.f32.mrf.mxu0  ;;  %9015 = vst [vmem:[#allocation2 + $0x80] sm:$0xff] %v17644_v58 }
 0x4d8   : > { %v14366_v52 = vmul.f32 -1.442695, %v4864_v44  ;;  %v16381_v44 = vld [vmem:[#allocation3 + $0xa0] sm:$0xff]  ;;  %v4868_v36 = vadd.f32 %v17637_v6, %v17605_v59  ;;  %v4720_v11 = vpop.f32.mrf.mxu1 }
 0x4d9   : > { %v4869_v45 = vpop.f32.mrf.mxu0  ;;  %v17674_v59 = vld [vmem:[#allocation2 + $0x8c] sm:$0xff]  ;;  %v17676_v6 = vld [vmem:[#allocation2 + $0x94] sm:$0xff] }
 0x4da   : > { %16307 = vpow2.f32 %v14366_v52  ;;  %v4870_v16 = vadd.f32 %v4869_v45, %v17607_v60  ;;  %v4724_v41 = vpop.f32.mrf.mxu1  ;;  %9016 = vst [vmem:[#allocation2 + $0x88] sm:$0xff] %v17644_v58 }
 0x4db   : > { %v4871_v37 = vpop.f32.mrf.mxu0 }
 0x4dc   : > { %v14367_v3 = vmul.f32 -1.442695, %v4870_v16  ;;  %v16382_v37 = vld [vmem:[#allocation3 + $0xa8] sm:$0xff]  ;;  %v4726_v9 = vpop.f32.mrf.mxu1 }
 0x4dd   : > { %v4873_v23 = vpop.f32.mrf.mxu0 }
 0x4de   : > { %16309 = vpow2.f32 %v14367_v3  ;;  %v5730_v23 = vld [vmem:[#allocation2 + $0x93] sm:$0xff] }
 0x4df   : > { %v4877_v43 = vpop.f32.mrf.mxu0 }
 0x4e1   : > { %v4879_v1 = vpop.f32.mrf.mxu0 }
 0x4e2   : > { %v5695_v1 = vld [vmem:[#allocation2 + $0x92] sm:$0xff] }
 0x4e3   : > { %v4881_v60 = vpop.f32.mrf.mxu0  ;;  %9017 = vst [vmem:[#allocation2 + $0x90] sm:$0xff] %v17644_v58  ;;  %v5825_v34 = vpack.c.bf16 %v5695_v1, %v5694_v61  ;;  %v5666_v61 = vld [vmem:[#allocation2 + $0xc1] sm:$0xff] }
 0x4e4   : > { %v4728_v60 = vpop.f32.mrf.mxu1 }
 0x4e5   : > { %v4883_v31 = vpop.f32.mrf.mxu0 }
 0x4e7   : > { %v16308_v33 = vpop.eup %16307  ;;  %v4887_v35 = vpop.f32.mrf.mxu0 }
 0x4e8   : > { %v5105_v38 = vadd.f32 1.0, %v16308_v33  ;;  %v4730_v35 = vpop.f32.mrf.mxu1 }
 0x4e9   : > { %v4889_v27 = vpop.f32.mrf.mxu0 }
 0x4ea   : > { %16311 = vrcp.f32 %v5105_v38 }
 0x4eb   : > { %v16310_v53 = vpop.eup %16309  ;;  %v4891_v12 = vpop.f32.mrf.mxu0 }
 0x4ec   : > { %v5106_v54 = vadd.f32 1.0, %v16310_v53 }
 0x4ed   : > { %v4893_v55 = vpop.f32.mrf.mxu0 }
 0x4ee   : > { %16313 = vrcp.f32 %v5106_v54 }
 0x4ef   : > { %v4897_v24 = vpop.f32.mrf.mxu0 }
 0x4f0   : > { %v5664_v24 = vld [vmem:[#allocation2 + $0xb1] sm:$0xff] }
 0x4f1   : > { %v4899_v57 = vpop.f32.mrf.mxu0 }
 0x4f3   : > { %v4901_v19 = vpop.f32.mrf.mxu0 }
 0x4f4   : > { %v6406_v12 = vpop.f32.mrf.mxu1  ;;  %v17686_v19 = vld [vmem:[#allocation2 + $0xb4] sm:$0xff] }
 0x4f5   : > { %v4903_v46 = vpop.f32.mrf.mxu0 }
 0x4f6   : > { %v6408_v5 = vpop.f32.mrf.mxu1 }
 0x4f7   : > { %v16312_v63 = vpop.eup %16311  ;;  %v4907_v47 = vpop.f32.mrf.mxu0 }
 0x4f8   : > { %v5225_v4 = vmul.f32 %v16312_v63, %v4862_v7  ;;  %v5734_v7 = vld [vmem:[#allocation2 + $0xb3] sm:$0xff]  ;;  %v5735_v47 = vld [vmem:[#allocation2 + $0xbb] sm:$0xff] }
 0x4f9   : > { %v4909_v0 = vpop.f32.mrf.mxu0  ;;  %v5836_v11 = vpack.c.bf16 %v5735_v47, %v5734_v7 }
 0x4fa   : > { %v17666_v30 = vadd.f32 %v16381_v44, %v5225_v4  ;;  %v6410_v0 = vpop.f32.mrf.mxu1 }
 0x4fb   : > { %v16314_v26 = vpop.eup %16313  ;;  %v4911_v52 = vpop.f32.mrf.mxu0 }
 0x4fc   : > { %5587 = vst [vmem:[#allocation2 + $0xa0] sm:$0xff] %v17666_v30  ;;  %v5226_v45 = vmul.f32 %v16314_v26, %v4868_v36  ;;  %v6412_v26 = vpop.f32.mrf.mxu1  ;;  %v5839_v52 = vpack.c.bf16 %v5665_v42, %v5664_v24 }
 0x4fd   : > { %v4913_v16 = vpop.f32.mrf.mxu0 }
 0x4fe   : > { %v17671_v3 = vadd.f32 %v16382_v37, %v5226_v45  ;;  %v5833_v45 = vpack.c.bf16 %v17666_v30, %v17644_v58  ;;  %v6416_v37 = vpop.f32.mrf.mxu1 }
 0x4ff   : > { %v4917_v43 = vpop.f32.mrf.mxu0 }
 0x500   : > { %5588 = vst [vmem:[#allocation2 + $0xa8] sm:$0xff] %v17671_v3  ;;  %v5667_v43 = vld [vmem:[#allocation2 + $0xc9] sm:$0xff]  ;;  %v5838_v30 = vpack.c.bf16 %v17644_v58, %v17671_v3 }
 0x501   : > { %v4919_v56 = vpop.f32.mrf.mxu0 }
 0x503   : > { %v5661_v15 = vld [vmem:[#allocation2 + $0x99] sm:$0xff]  ;;  %v4921_v33 = vpop.f32.mrf.mxu0 }
 0x504   : > { %v5731_v31 = vld [vmem:[#allocation2 + $0x9b] sm:$0xff]  ;;  %v5829_v38 = vpack.c.bf16 %v5661_v15, %v5660_v25  ;;  %v5844_v15 = vpack.c.bf16 %v5667_v43, %v5666_v61 }
 0x505   : > { %v5826_v49 = vpack.c.bf16 %v5731_v31, %v5730_v23  ;;  %v17680_v27 = vld [vmem:[#allocation2 + $0x9a] sm:$0xff]  ;;  %v4923_v53 = vpop.f32.mrf.mxu0  ;;  %v6418_v23 = vpop.f32.mrf.mxu1 }
 0x506   : > { %v17682_v13 = vld [vmem:[#allocation2 + $0x9c] sm:$0xff]  ;;  %6484 = vmatprep.mubr.bf16.mxu1 %v5829_v38 }
 0x507   : > { %9018 = vst [vmem:[#allocation2 + $0x98] sm:$0xff] %v17644_v58  ;;  %6687 = vmatprep.mubr.bf16.mxu0 %v5826_v49  ;;  %6485 = vmatmul.mubr.bf16.gmra.mxu1 %v17616_v17  ;;  %v5662_v54 = vld [vmem:[#allocation2 + $0xa1] sm:$0xff]  ;;  %v5663_v55 = vld [vmem:[#allocation2 + $0xa9] sm:$0xff]  ;;  %v4927_v57 = vpop.f32.mrf.mxu0  ;;  %v6420_v1 = vpop.f32.mrf.mxu1  ;;  %v5668_v49 = vld [vmem:[#allocation2 + $0xd1] sm:$0xff] }
 0x508   : > { %6688 = vmatmul.mubr.bf16.gmra.mxu0 %v5825_v34  ;;  %v5732_v50 = vld [vmem:[#allocation2 + $0xa3] sm:$0xff]  ;;  %v5834_v21 = vpack.c.bf16 %v5663_v55, %v5662_v54  ;;  %v5733_v46 = vld [vmem:[#allocation2 + $0xab] sm:$0xff]  ;;  %v5669_v53 = vld [vmem:[#allocation2 + $0xd9] sm:$0xff] }
 0x509   : > { %v5831_v63 = vpack.c.bf16 %v5733_v46, %v5732_v50  ;;  %v17688_v22 = vld [vmem:[#allocation2 + $0xaa] sm:$0xff]  ;;  %v4929_v4 = vpop.f32.mrf.mxu0  ;;  %v5697_v44 = vld [vmem:[#allocation2 + $0xa2] sm:$0xff]  ;;  %v6422_v60 = vpop.f32.mrf.mxu1  ;;  %v5849_v24 = vpack.c.bf16 %v5669_v53, %v5668_v49 }
 0x50a   : > { %v17690_v10 = vld [vmem:[#allocation2 + $0xac] sm:$0xff]  ;;  %6494 = vmatprep.mubr.bf16.mxu1 %v5834_v21  ;;  %v5830_v16 = vpack.c.bf16 %v5697_v44, %v17680_v27  ;;  %v5835_v31 = vpack.c.bf16 %v5699_v28, %v17688_v22  ;;  %v5670_v21 = vld [vmem:[#allocation2 + $0xe1] sm:$0xff] }
 0x50b   : > { %9021 = vst [vmem:[#allocation2 + $0xb0] sm:$0xff] %v17644_v58  ;;  %6697 = vmatprep.mubr.bf16.mxu0 %v5831_v63  ;;  %v4931_v36 = vpop.f32.mrf.mxu0  ;;  %v6426_v33 = vpop.f32.mrf.mxu1  ;;  %v5671_v46 = vld [vmem:[#allocation2 + $0xe9] sm:$0xff]  ;;  %v5674_v1 = vld [vmem:[#allocation2 + $0x101] sm:$0xff]  ;;  %v5676_v53 = vld [vmem:[#allocation2 + $0x111] sm:$0xff] }
 0x50c   : > { %v5854_v4 = vpack.c.bf16 %v5671_v46, %v5670_v21  ;;  %v5678_v46 = vld [vmem:[#allocation2 + $0x121] sm:$0xff] }
 0x50d   : > { %v4933_v41 = vpop.f32.mrf.mxu0  ;;  %v6428_v38 = vpop.f32.mrf.mxu1 }
 0x50f   : > { %6495 = vmatmul.mubr.bf16.gmra.mxu1 %v5833_v45  ;;  %v4937_v25 = vpop.f32.mrf.mxu0  ;;  %v6430_v54 = vpop.f32.mrf.mxu1 }
 0x510   : > { %6698 = vmatmul.mubr.bf16.gmra.mxu0 %v5830_v16  ;;  %6504 = vmatprep.mubr.bf16.mxu1 %v5839_v52  ;;  %v5672_v52 = vld [vmem:[#allocation2 + $0xf1] sm:$0xff] }
 0x511   : > { %6707 = vmatprep.mubr.bf16.mxu0 %v5836_v11  ;;  %v4939_v9 = vpop.f32.mrf.mxu0  ;;  %v6432_v50 = vpop.f32.mrf.mxu1  ;;  %v5673_v11 = vld [vmem:[#allocation2 + $0xf9] sm:$0xff] }
 0x512   : > { %v5859_v25 = vpack.c.bf16 %v5673_v11, %v5672_v52 }
 0x513   : > { %v4941_v56 = vpop.f32.mrf.mxu0  ;;  %v6436_v5 = vpop.f32.mrf.mxu1 }
 0x514   : > { %v5675_v56 = vld [vmem:[#allocation2 + $0x109] sm:$0xff] }
 0x515   : > { %v4943_v34 = vpop.f32.mrf.mxu0  ;;  %v6438_v28 = vpop.f32.mrf.mxu1 }
 0x516   : > { %v5864_v34 = vpack.c.bf16 %v5675_v56, %v5674_v1  ;;  %v5754_v56 = vld [vmem:[#allocation2 + $0x3c] sm:$0xff] }
 0x517   : > { %6505 = vmatmul.mubr.bf16.gmra.mxu1 %v5838_v30  ;;  %v4947_v35 = vpop.f32.mrf.mxu0  ;;  %v6440_v7 = vpop.f32.mrf.mxu1 }
 0x518   : > { %6708 = vmatmul.mubr.bf16.gmra.mxu0 %v5835_v31  ;;  %6514 = vmatprep.mubr.bf16.mxu1 %v5844_v15 }
 0x519   : > { %v4949_v12 = vpop.f32.mrf.mxu0  ;;  %v6442_v47 = vpop.f32.mrf.mxu1 }
 0x51a   : > { %v5677_v12 = vld [vmem:[#allocation2 + $0x119] sm:$0xff] }
 0x51b   : > { %v4951_v55 = vpop.f32.mrf.mxu0  ;;  %v6446_v44 = vpop.f32.mrf.mxu1 }
 0x51d   : > { %v4953_v57 = vpop.f32.mrf.mxu0  ;;  %v6448_v26 = vpop.f32.mrf.mxu1 }
 0x51e   : > { %v5869_v57 = vpack.c.bf16 %v5677_v12, %v5676_v53  ;;  %v5643_v26 = vld [vmem:[#allocation2 + $0x120] sm:$0xf]  ;;  %v15679_v53 = vld [vmem:[#allocation10 + $0x7d4] ss:$8 sps:$4 sm:$0xff]   ;;  %v5802_v12 = vpack.c.bf16 %v17642_v20, %v17640_v8  ;;  %v5817_v8 = vpack.c.bf16 %v17662_v2, %v17660_v62  ;;  %v15686_v20 = vld [vmem:[#allocation10 + $0x7a0] ss:$8 sps:$4 sm:$0xff]  }
 0x51f   : > { %6515 = vmatmul.mubr.bf16.gmra.mxu1 %v17616_v17  ;;  %v4957_v3 = vpop.f32.mrf.mxu0  ;;  %v6450_v16 = vpop.f32.mrf.mxu1  ;;  %v5873_v11 = vpack.c.bf16 %v5643_v26, %v17644_v58  ;;  %v15692_v2 = vld [vmem:[#allocation10 + $0x780] ss:$8 sps:$4 sm:$0xff]  }
 0x520   : > { %6524 = vmatprep.mubr.bf16.mxu1 %v5849_v24  ;;  %v5739_v26 = vld [vmem:[#allocation2 + $0xdb] sm:$0xff] }
 0x521   : > { %v4959_v42 = vpop.f32.mrf.mxu0  ;;  %v6452_v37 = vpop.f32.mrf.mxu1 }
 0x522   : > { %v5679_v42 = vld [vmem:[#allocation2 + $0x129] sm:$0xf] }
 0x523   : > { %v4961_v63 = vpop.f32.mrf.mxu0  ;;  %v6456_v61 = vpop.f32.mrf.mxu1  ;;  %v15673_v37 = vld [vmem:[#allocation10 + $0x7f4] ss:$8 sps:$4 sm:$0xff]  }
 0x524   : > { %v5753_v61 = vld [vmem:[#allocation2 + $0x34] sm:$0xff]  ;;  %8248 = vmatprep.subr.bf16.mxu0 %v15673_v37  ;;  %v15703_v37 = vld [vmem:[#allocation10 + $0x8f4] ss:$8 sps:$4 sm:$0xff]  }
 0x525   : > { %v4963_v0 = vpop.f32.mrf.mxu0  ;;  %v6458_v9 = vpop.f32.mrf.mxu1  ;;  %8391 = vmatprep.subr.bf16.mxu1 %v15703_v37 }
 0x526   : > { %v5874_v0 = vpack.c.bf16 %v5679_v42, %v5678_v46  ;;  %v5770_v46 = vld [vmem:[#allocation2 + $0xbc] sm:$0xff] }
 0x527   : > { %6525 = vmatmul.mubr.bf16.gmra.mxu1 %v17616_v17  ;;  %v6619_v36 = vpop.f32.mrf.mxu0  ;;  %v6460_v15 = vpop.f32.mrf.mxu1  ;;  %v5736_v42 = vld [vmem:[#allocation2 + $0xc3] sm:$0xff] }
 0x528   : > { %6534 = vmatprep.mubr.bf16.mxu1 %v5854_v4  ;;  %v5755_v15 = vld [vmem:[#allocation2 + $0x44] sm:$0xff] }
 0x529   : > { %v6621_v45 = vpop.f32.mrf.mxu0  ;;  %v6462_v31 = vpop.f32.mrf.mxu1 }
 0x52a   : > { %v15676_v31 = vld [vmem:[#allocation10 + $0x7e4] ss:$8 sps:$4 sm:$0xff]  }
 0x52b   : > { %v6623_v41 = vpop.f32.mrf.mxu0  ;;  %v6466_v35 = vpop.f32.mrf.mxu1 }
 0x52c   : > { %v15671_v41 = vld [vmem:[#allocation10 + $0x7f0] ss:$8 sps:$4 sm:$0xff]  }
 0x52d   : > { %v6625_v23 = vpop.f32.mrf.mxu0  ;;  %v6468_v49 = vpop.f32.mrf.mxu1  ;;  %8249 = vmatpush1.bf16.msra.mxu0 %v15671_v41  ;;  %v15701_v41 = vld [vmem:[#allocation10 + $0x8f0] ss:$8 sps:$4 sm:$0xff]  }
 0x52e   : > { %v5752_v23 = vld [vmem:[#allocation2 + $0x2c] sm:$0xff]  ;;  %8250 = vmatprep.subr.bf16.mxu0 %v15676_v31  ;;  %v5743_v31 = vld [vmem:[#allocation2 + $0xfb] sm:$0xff] }
 0x52f   : > { %6535 = vmatmul.mubr.bf16.gmra.mxu1 %v17616_v17  ;;  %v6629_v43 = vpop.f32.mrf.mxu0  ;;  %v6470_v55 = vpop.f32.mrf.mxu1  ;;  %v15677_v49 = vld [vmem:[#allocation10 + $0x7d0] ss:$8 sps:$4 sm:$0xff]  }
 0x530   : > { %6544 = vmatprep.mubr.bf16.mxu1 %v5859_v25  ;;  %v15682_v55 = vld [vmem:[#allocation10 + $0x7c4] ss:$8 sps:$4 sm:$0xff]  }
 0x531   : > { %v6631_v60 = vpop.f32.mrf.mxu0  ;;  %v6472_v24 = vpop.f32.mrf.mxu1 }
 0x532   : > { %v15683_v24 = vld [vmem:[#allocation10 + $0x7b0] ss:$8 sps:$4 sm:$0xff]  }
 0x533   : > { %v6633_v30 = vpop.f32.mrf.mxu0  ;;  %v6476_v3 = vpop.f32.mrf.mxu1 }
 0x534   : > { %v15674_v30 = vld [vmem:[#allocation10 + $0x7e0] ss:$8 sps:$4 sm:$0xff]   ;;  %v15689_v3 = vld [vmem:[#allocation10 + $0x790] ss:$8 sps:$4 sm:$0xff]  }
 0x535   : > { %v6635_v33 = vpop.f32.mrf.mxu0  ;;  %v6478_v21 = vpop.f32.mrf.mxu1  ;;  %8251 = vmatpush1.bf16.msra.mxu0 %v15674_v30  ;;  %v5742_v30 = vld [vmem:[#allocation2 + $0xf3] sm:$0xff] }
 0x536   : > { %v5797_v33 = vpack.c.bf16 %v5755_v15, %v5754_v56  ;;  %8252 = vmatprep.subr.bf16.mxu0 %v15679_v53  ;;  %v15697_v21 = vld [vmem:[#allocation10 + $0x874] ss:$8 sps:$4 sm:$0xff]   ;;  %v15709_v15 = vld [vmem:[#allocation10 + $0x8e4] ss:$8 sps:$4 sm:$0xff]  }
 0x537   : > { %6545 = vmatmul.mubr.bf16.gmra.mxu1 %v17616_v17  ;;  %v6639_v38 = vpop.f32.mrf.mxu0  ;;  %v6480_v63 = vpop.f32.mrf.mxu1  ;;  %v15712_v53 = vld [vmem:[#allocation10 + $0x844] ss:$8 sps:$4 sm:$0xff]  }
 0x538   : > { %6554 = vmatprep.mubr.bf16.mxu1 %v5864_v34  ;;  %v5700_v63 = vld [vmem:[#allocation2 + $0xba] sm:$0xff] }
 0x539   : > { %v6641_v54 = vpop.f32.mrf.mxu0  ;;  %v6482_v4 = vpop.f32.mrf.mxu1  ;;  %8253 = vmatpush1.bf16.msra.mxu0 %v15677_v49  ;;  %9022 = vst [vmem:[#allocation2 + $0xb8] sm:$0xff] %v17644_v58  ;;  %v15710_v49 = vld [vmem:[#allocation10 + $0x840] ss:$8 sps:$4 sm:$0xff]  }
 0x53a   : > { %v15680_v54 = vld [vmem:[#allocation10 + $0x7c0] ss:$8 sps:$4 sm:$0xff]   ;;  %8254 = vmatprep.subr.bf16.mxu0 %v15682_v55  ;;  %v5701_v4 = vld [vmem:[#allocation2 + $0xc2] sm:$0xff] }
 0x53b   : > { %v6643_v50 = vpop.f32.mrf.mxu0  ;;  %v5744_v55 = vld [vmem:[#allocation2 + $0x103] sm:$0xff] }
 0x53c   : > { %v5807_v50 = vpack.c.bf16 %v17649_v48, %v17647_v40  ;;  %v15688_v40 = vld [vmem:[#allocation10 + $0x7a4] ss:$8 sps:$4 sm:$0xff]   ;;  %v5822_v48 = vpack.c.bf16 %v17676_v6, %v17674_v59  ;;  %v5832_v59 = vpack.c.bf16 %v17686_v19, %v17690_v10  ;;  %v15695_v6 = vld [vmem:[#allocation10 + $0x870] ss:$8 sps:$4 sm:$0xff]   ;;  %v15698_v10 = vld [vmem:[#allocation10 + $0x860] ss:$8 sps:$4 sm:$0xff]  }
 0x53d   : > { %v6645_v5 = vpop.f32.mrf.mxu0  ;;  %8255 = vmatpush1.bf16.msra.mxu0 %v15680_v54  ;;  %v15715_v54 = vld [vmem:[#allocation10 + $0x8d4] ss:$8 sps:$4 sm:$0xff]  }
 0x53e   : > { %v5812_v5 = vpack.c.bf16 %v17655_v29, %v17653_v32  ;;  %v15691_v32 = vld [vmem:[#allocation10 + $0x794] ss:$8 sps:$4 sm:$0xff]  }
 0x53f   : > { %6555 = vmatmul.mubr.bf16.gmra.mxu1 %v17616_v17  ;;  %v6649_v28 = vpop.f32.mrf.mxu0  ;;  %v5767_v29 = vld [vmem:[#allocation2 + $0xa4] sm:$0xff] }
 0x540   : > { %6564 = vmatprep.mubr.bf16.mxu1 %v5869_v57  ;;  %v15685_v57 = vld [vmem:[#allocation10 + $0x7b4] ss:$8 sps:$4 sm:$0xff]   ;;  %v5827_v62 = vpack.c.bf16 %v5767_v29, %v17682_v13  ;;  %v15694_v28 = vld [vmem:[#allocation10 + $0x784] ss:$8 sps:$4 sm:$0xff]   ;;  %v15719_v29 = vld [vmem:[#allocation10 + $0x8c0] ss:$8 sps:$4 sm:$0xff]  }
 0x541   : > { %v6651_v7 = vpop.f32.mrf.mxu0  ;;  %8256 = vmatprep.subr.bf16.mxu0 %v15685_v57  ;;  %v5771_v13 = vld [vmem:[#allocation2 + $0xc4] sm:$0xff] }
 0x542   : > { %8257 = vmatpush1.bf16.msra.mxu0 %v15683_v24  ;;  %v5737_v7 = vld [vmem:[#allocation2 + $0xcb] sm:$0xff]  ;;  %9023 = vst [vmem:[#allocation2 + $0xc0] sm:$0xff] %v17644_v58  ;;  %v5837_v19 = vpack.c.bf16 %v5771_v13, %v5770_v46  ;;  %v5708_v24 = vld [vmem:[#allocation2 + $0xfa] sm:$0xff] }
 0x543   : > { %v6653_v47 = vpop.f32.mrf.mxu0  ;;  %8258 = vmatprep.subr.bf16.mxu0 %v15688_v40  ;;  %v15718_v40 = vld [vmem:[#allocation10 + $0x834] ss:$8 sps:$4 sm:$0xff]  }
 0x544   : > { %v5841_v47 = vpack.c.bf16 %v5737_v7, %v5736_v42  ;;  %v15722_v42 = vld [vmem:[#allocation10 + $0x820] ss:$8 sps:$4 sm:$0xff]   ;;  %v15724_v7 = vld [vmem:[#allocation10 + $0x824] ss:$8 sps:$4 sm:$0xff]   ;;  %v5775_v13 = vld [vmem:[#allocation2 + $0xe4] sm:$0xff] }
 0x545   : > { %v6655_v44 = vpop.f32.mrf.mxu0 }
 0x546   : > { %8259 = vmatpush1.bf16.msra.mxu0 %v15686_v20  ;;  %6717 = vmatprep.mubr.bf16.mxu0 %v5841_v47  ;;  %v15700_v44 = vld [vmem:[#allocation10 + $0x864] ss:$8 sps:$4 sm:$0xff]   ;;  %v15716_v20 = vld [vmem:[#allocation10 + $0x830] ss:$8 sps:$4 sm:$0xff]  }
 0x547   : > { %6565 = vmatmul.mubr.bf16.gmra.mxu1 %v17616_v17  ;;  %v6659_v36 = vpop.f32.mrf.mxu0  ;;  %v5792_v17 = vpack.c.bf16 %v5753_v61, %v5752_v23  ;;  %8260 = vmatprep.subr.bf16.mxu0 %v15691_v32  ;;  %v5741_v23 = vld [vmem:[#allocation2 + $0xeb] sm:$0xff] }
 0x548   : > { %6574 = vmatprep.mubr.bf16.mxu1 %v5874_v0  ;;  %v5840_v0 = vpack.c.bf16 %v5701_v4, %v5700_v63  ;;  %v5738_v36 = vld [vmem:[#allocation2 + $0xd3] sm:$0xff]  ;;  %v15704_v61 = vld [vmem:[#allocation10 + $0x850] ss:$8 sps:$4 sm:$0xff]  }
 0x549   : > { %v6661_v52 = vpop.f32.mrf.mxu0  ;;  %v5774_v63 = vld [vmem:[#allocation2 + $0xdc] sm:$0xff]  ;;  %v5960_v4 = vld [vmem:[#allocation12 + $0x4] sm:$0x3] }
 0x54a   : > { %8261 = vmatpush1.bf16.msra.mxu0 %v15689_v3  ;;  %v5702_v52 = vld [vmem:[#allocation2 + $0xca] sm:$0xff]  ;;  %v5773_v3 = vld [vmem:[#allocation2 + $0xd4] sm:$0xff]  ;;  %v5847_v47 = vpack.c.bf16 %v5775_v13, %v5774_v63 }
 0x54b   : > { %v6663_v45 = vpop.f32.mrf.mxu0  ;;  %8262 = vmatprep.subr.bf16.mxu0 %v15694_v28  ;;  %6718 = vmatmul.mubr.bf16.gmra.mxu0 %v5840_v0  ;;  %v5747_v28 = vld [vmem:[#allocation2 + $0x11b] sm:$0xff] }
 0x54c   : > { %v5846_v45 = vpack.c.bf16 %v5739_v26, %v5738_v36  ;;  %v15725_v36 = vld [vmem:[#allocation10 + $0x8b0] ss:$8 sps:$4 sm:$0xff]  }
 0x54d   : > { %v6665_v16 = vpop.f32.mrf.mxu0 }
 0x54e   : > { %8263 = vmatpush1.bf16.msra.mxu0 %v15692_v2  ;;  %6727 = vmatprep.mubr.bf16.mxu0 %v5846_v45  ;;  %v5746_v2 = vld [vmem:[#allocation2 + $0x113] sm:$0xff]  ;;  %v5713_v45 = vld [vmem:[#allocation2 + $0x122] sm:$0xff] }
 0x54f   : > { %6575 = vmatmul.mubr.bf16.gmra.mxu1 %v5873_v11  ;;  %v6669_v25 = vpop.f32.mrf.mxu0  ;;  %8264 = vmatprep.subr.bf16.mxu0 %v15697_v21  ;;  %v5703_v11 = vld [vmem:[#allocation2 + $0xd2] sm:$0xff]  ;;  %v5866_v21 = vpack.c.bf16 %v5747_v28, %v5746_v2  ;;  %v15734_v28 = vld [vmem:[#allocation10 + $0x890] ss:$8 sps:$4 sm:$0xff]  }
 0x550   : > { %6830 = vmatprep.mubr.bf16.mxu1 %v16730_v51  ;;  %v5845_v16 = vpack.c.bf16 %v5703_v11, %v5702_v52  ;;  %v5740_v25 = vld [vmem:[#allocation2 + $0xe3] sm:$0xff]  ;;  %v5712_v11 = vld [vmem:[#allocation2 + $0x11a] sm:$0xff] }
 0x551   : > { %v6671_v43 = vpop.f32.mrf.mxu0  ;;  %v15727_v52 = vld [vmem:[#allocation10 + $0x8b4] ss:$8 sps:$4 sm:$0xff]   ;;  %v5870_v37 = vpack.c.bf16 %v5713_v45, %v5712_v11  ;;  %v17765_v45 = vpack.c.bf16 %v17644_v58, %v17644_v58 }
 0x552   : > { %8265 = vmatpush2.bf16.msra.mxu0 %v15695_v6  ;;  %v5851_v43 = vpack.c.bf16 %v5741_v23, %v5740_v25  ;;  %v5711_v6 = vld [vmem:[#allocation2 + $0x112] sm:$0xff]  ;;  %v5965_v25 = vrot.slane %v5960_v4, %v17299_v39 }
 0x553   : > { %v6673_v9 = vpop.f32.mrf.mxu0  ;;  %8266 = vmatprep.subr.bf16.mxu0 %v15700_v44  ;;  %6728 = vmatmul.mubr.bf16.gmra.mxu0 %v5845_v16  ;;  %v5749_v44 = vld [vmem:[#allocation2 + $0x12b] sm:$0xff] }
 0x554   : > { %v5704_v9 = vld [vmem:[#allocation2 + $0xda] sm:$0xff]  ;;  %6737 = vmatprep.mubr.bf16.mxu0 %v5851_v43  ;;  %v5776_v43 = vld [vmem:[#allocation2 + $0xec] sm:$0xff] }
 0x555   : > { %v6675_v1 = vpop.f32.mrf.mxu0  ;;  %9026 = vst [vmem:[#allocation2 + $0xd8] sm:$0xff] %v17644_v58 }
 0x556   : > { %8267 = vmatpush2.bf16.msra.mxu0 %v15698_v10  ;;  %v5705_v1 = vld [vmem:[#allocation2 + $0xe2] sm:$0xff] }
 0x557   : > { %6831 = vmatmul.mubr.bf16.vlgmr.msra.gmra.mxu1 %v5792_v17  ;;  %v6679_v60 = vpop.f32.mrf.mxu0  ;;  %v15706_v17 = vld [vmem:[#allocation10 + $0x854] ss:$8 sps:$4 sm:$0xff]   ;;  %v5850_v56 = vpack.c.bf16 %v5705_v1, %v5704_v9  ;;  %9027 = vst [vmem:[#allocation2 + $0xe0] sm:$0xff] %v17644_v58  ;;  %v15728_v9 = vld [vmem:[#allocation10 + $0x810] ss:$8 sps:$4 sm:$0xff]   ;;  %v17740_v1 = vrot.slane %v5960_v4, %v17381_v18 }
 0x558   : > { %6840 = vmatprep.mubr.bf16.mxu1 %v16730_v51  ;;  %8392 = vmatpush1.bf16.msra.mxu1 %v15701_v41  ;;  %v15707_v60 = vld [vmem:[#allocation10 + $0x8e0] ss:$8 sps:$4 sm:$0xff]   ;;  %v5748_v10 = vld [vmem:[#allocation2 + $0x123] sm:$0xff] }
 0x559   : > { %v6681_v34 = vpop.f32.mrf.mxu0  ;;  %8268 = vmatprep.subr.bf16.mxu0 %v15706_v17  ;;  %8393 = vmatprep.subr.bf16.mxu1 %v15709_v15  ;;  %v5871_v26 = vpack.c.bf16 %v5749_v44, %v5748_v10  ;;  %v5777_v17 = vld [vmem:[#allocation2 + $0xf4] sm:$0xff] }
 0x55a   : > { %8269 = vmatpush2.bf16.msra.mxu0 %v15704_v61  ;;  %v5706_v34 = vld [vmem:[#allocation2 + $0xea] sm:$0xff]  ;;  %v15740_v10 = vld [vmem:[#allocation10 + $0x880] ss:$8 sps:$4 sm:$0xff]  }
 0x55b   : > { %v6683_v35 = vpop.f32.mrf.mxu0  ;;  %6738 = vmatmul.mubr.bf16.gmra.mxu0 %v5850_v56  ;;  %8270 = vmatprep.subr.bf16.mxu0 %v15712_v53  ;;  %v5852_v56 = vpack.c.bf16 %v5777_v17, %v5776_v43  ;;  %9028 = vst [vmem:[#allocation2 + $0xe8] sm:$0xff] %v17644_v58  ;;  %v15745_v17 = vld [vmem:[#allocation10 + $0x974] ss:$8 sps:$4 sm:$0xff]  }
 0x55c   : > { %8394 = vmatpush1.bf16.msra.mxu1 %v15707_v60  ;;  %v5707_v35 = vld [vmem:[#allocation2 + $0xf2] sm:$0xff]  ;;  %v15730_v60 = vld [vmem:[#allocation10 + $0x814] ss:$8 sps:$4 sm:$0xff]  }
 0x55d   : > { %v6685_v38 = vpop.f32.mrf.mxu0  ;;  %8395 = vmatprep.subr.bf16.mxu1 %v15715_v54  ;;  %9029 = vst [vmem:[#allocation2 + $0xf0] sm:$0xff] %v17644_v58 }
 0x55e   : > { %v5855_v38 = vpack.c.bf16 %v5707_v35, %v5706_v34  ;;  %8271 = vmatpush2.bf16.msra.mxu0 %v15710_v49  ;;  %v5750_v35 = vld [vmem:[#allocation2 + $0x133] sm:$0xff] }
 0x55f   : > { %6841 = vmatmul.mubr.bf16.gmra.mxu1 %v5797_v33  ;;  %v5856_v33 = vpack.c.bf16 %v5743_v31, %v5742_v30  ;;  %8272 = vmatprep.subr.bf16.mxu0 %v15718_v40  ;;  %v15731_v49 = vld [vmem:[#allocation10 + $0x8a0] ss:$8 sps:$4 sm:$0xff]  }
 0x560   : > { %6850 = vmatprep.mubr.bf16.mxu1 %v16730_v51 }
 0x561   : > { %6747 = vmatprep.mubr.bf16.mxu0 %v5856_v33 }
 0x562   : > { %8273 = vmatpush2.bf16.msra.mxu0 %v15716_v20 }
 0x563   : > { %6748 = vmatmul.mubr.bf16.gmra.mxu0 %v5855_v38  ;;  %8274 = vmatprep.subr.bf16.mxu0 %v15724_v7  ;;  %v5751_v38 = vld [vmem:[#allocation2 + $0x13b] sm:$0xf] }
 0x564   : > { %v5876_v54 = vpack.c.bf16 %v5751_v38, %v5750_v35  ;;  %v5782_v38 = vld [vmem:[#allocation2 + $0x11c] sm:$0xff] }
 0x566   : > { %8275 = vmatpush2.bf16.msra.mxu0 %v15722_v42  ;;  %v15739_v42 = vld [vmem:[#allocation10 + $0x804] ss:$8 sps:$4 sm:$0xff]  }
 0x567   : > { %6851 = vmatmul.mubr.bf16.gmra.mxu1 %v5802_v12  ;;  %v15713_v12 = vld [vmem:[#allocation10 + $0x8d0] ss:$8 sps:$4 sm:$0xff]   ;;  %8276 = vmatprep.subr.bf16.mxu0 %v15730_v60 }
 0x568   : > { %6860 = vmatprep.mubr.bf16.mxu1 %v16730_v51  ;;  %8396 = vmatpush1.bf16.msra.mxu1 %v15713_v12  ;;  %v7614_v60 = vld [vmem:[#allocation3 + $0x4d] sm:$0xff] }
 0x56a   : > { %8277 = vmatpush2.bf16.msra.mxu0 %v15728_v9  ;;  %v15743_v9 = vld [vmem:[#allocation10 + $0x970] ss:$8 sps:$4 sm:$0xff]  }
 0x56b   : > { %8278 = vmatprep.subr.bf16.mxu0 %v15739_v42 }
 0x56f   : > { %6861 = vmatmul.mubr.bf16.gmra.mxu1 %v5807_v50  ;;  %v5745_v50 = vld [vmem:[#allocation2 + $0x10b] sm:$0xff] }
 0x570   : > { %6870 = vmatprep.mubr.bf16.mxu1 %v16730_v51  ;;  %v5861_v57 = vpack.c.bf16 %v5745_v50, %v5744_v55  ;;  %v15733_v55 = vld [vmem:[#allocation10 + $0x8a4] ss:$8 sps:$4 sm:$0xff]   ;;  %v5714_v50 = vld [vmem:[#allocation2 + $0x12a] sm:$0xff] }
 0x572   : > { %6757 = vmatprep.mubr.bf16.mxu0 %v5861_v57 }
 0x577   : > { %6871 = vmatmul.mubr.bf16.gmra.mxu1 %v5812_v5  ;;  %v5709_v5 = vld [vmem:[#allocation2 + $0x102] sm:$0xff] }
 0x578   : > { %6880 = vmatprep.mubr.bf16.mxu1 %v16730_v51 }
 0x57f   : > { %6881 = vmatmul.mubr.bf16.gmra.mxu1 %v5817_v8  ;;  %v5860_v8 = vpack.c.bf16 %v5709_v5, %v5708_v24  ;;  %v5715_v24 = vld [vmem:[#allocation2 + $0x132] sm:$0xf] }
 0x580   : > { %6890 = vmatprep.mubr.bf16.mxu1 %v16730_v51 }
 0x581   : > { %6758 = vmatmul.mubr.bf16.gmra.mxu0 %v5860_v8  ;;  %v5875_v8 = vpack.c.bf16 %v5715_v24, %v5714_v50  ;;  %v15752_v50 = vld [vmem:[#allocation10 + $0x950] ss:$8 sps:$4 sm:$0xff]  }
 0x582   : > { %6767 = vmatprep.mubr.bf16.mxu0 %v5866_v21 }
 0x587   : > { %6891 = vmatmul.mubr.bf16.gmra.mxu1 %v5822_v48  ;;  %v5772_v48 = vld [vmem:[#allocation2 + $0xcc] sm:$0xff] }
 0x588   : > { %6900 = vmatprep.mubr.bf16.mxu1 %v16730_v51  ;;  %v5842_v32 = vpack.c.bf16 %v5773_v3, %v5772_v48  ;;  %9024 = vst [vmem:[#allocation2 + $0xc8] sm:$0xff] %v17644_v58  ;;  %9025 = vst [vmem:[#allocation2 + $0xd0] sm:$0xff] %v17644_v58 }
 0x58f   : > { %6901 = vmatmul.mubr.bf16.gmra.mxu1 %v5827_v62  ;;  %v15721_v62 = vld [vmem:[#allocation10 + $0x8c4] ss:$8 sps:$4 sm:$0xff]  }
 0x590   : > { %6910 = vmatprep.mubr.bf16.mxu1 %v16730_v51  ;;  %8397 = vmatprep.subr.bf16.mxu1 %v15721_v62 }
 0x591   : > { %8398 = vmatpush1.bf16.msra.mxu1 %v15719_v29  ;;  %v5779_v29 = vld [vmem:[#allocation2 + $0x104] sm:$0xff] }
 0x592   : > { %8399 = vmatprep.subr.bf16.mxu1 %v15727_v52  ;;  %v15742_v52 = vld [vmem:[#allocation10 + $0x884] ss:$8 sps:$4 sm:$0xff]  }
 0x595   : > { %8400 = vmatpush1.bf16.msra.mxu1 %v15725_v36 }
 0x596   : > { %8401 = vmatprep.subr.bf16.mxu1 %v15733_v55  ;;  %v15754_v55 = vld [vmem:[#allocation10 + $0x954] ss:$8 sps:$4 sm:$0xff]  }
 0x597   : > { %6911 = vmatmul.mubr.bf16.gmra.mxu1 %v5832_v59  ;;  %v5710_v59 = vld [vmem:[#allocation2 + $0x10a] sm:$0xff] }
 0x598   : > { %6920 = vmatprep.mubr.bf16.mxu1 %v16730_v51  ;;  %v5865_v46 = vpack.c.bf16 %v5711_v6, %v5710_v59  ;;  %v15736_v59 = vld [vmem:[#allocation10 + $0x894] ss:$8 sps:$4 sm:$0xff]  }
 0x599   : > { %8402 = vmatpush1.bf16.msra.mxu1 %v15731_v49  ;;  %v5783_v49 = vld [vmem:[#allocation2 + $0x124] sm:$0xff] }
 0x59a   : > { %6768 = vmatmul.mubr.bf16.gmra.mxu0 %v5865_v46  ;;  %v15737_v46 = vld [vmem:[#allocation10 + $0x800] ss:$8 sps:$4 sm:$0xff]   ;;  %8403 = vmatprep.subr.bf16.mxu1 %v15736_v59 }
 0x59b   : > { %6777 = vmatprep.mubr.bf16.mxu0 %v5871_v26  ;;  %8279 = vmatpush2.bf16.msra.mxu0 %v15737_v46  ;;  %v15761_v46 = vld [vmem:[#allocation10 + $0x930] ss:$8 sps:$4 sm:$0xff]  }
 0x59d   : > { %8404 = vmatpush1.bf16.msra.mxu1 %v15734_v28 }
 0x59e   : > { %8405 = vmatprep.subr.bf16.mxu1 %v15742_v52 }
 0x59f   : > { %6921 = vmatmul.mubr.bf16.gmra.mxu1 %v5837_v19 }
 0x5a0   : > { %6930 = vmatprep.mubr.bf16.mxu1 %v16730_v51 }
 0x5a1   : > { %8406 = vmatpush1.bf16.msra.mxu1 %v15740_v10 }
 0x5a2   : > { %6778 = vmatmul.mubr.bf16.gmra.mxu0 %v5870_v37  ;;  %v5780_v37 = vld [vmem:[#allocation2 + $0x10c] sm:$0xff]  ;;  %8407 = vmatprep.subr.bf16.mxu1 %v15745_v17  ;;  %v15775_v17 = vld [vmem:[#allocation10 + $0x904] ss:$8 sps:$4 sm:$0xff]  }
 0x5a3   : > { %6787 = vmatprep.mubr.bf16.mxu0 %v5876_v54  ;;  %v5867_v54 = vpack.c.bf16 %v5783_v49, %v5782_v38  ;;  %v17775_v38 = vld [vmem:[#allocation2] sm:$0xff] }
 0x5a5   : > { %8408 = vmatpush2.bf16.msra.mxu1 %v15743_v9  ;;  %v15773_v9 = vld [vmem:[#allocation10 + $0x900] ss:$8 sps:$4 sm:$0xff]  }
 0x5a7   : > { %6931 = vmatmul.mubr.bf16.gmra.mxu1 %v5842_v32  ;;  %v5778_v32 = vld [vmem:[#allocation2 + $0xfc] sm:$0xff] }
 0x5a8   : > { %6940 = vmatprep.mubr.bf16.mxu1 %v16730_v51  ;;  %v5857_v2 = vpack.c.bf16 %v5779_v29, %v5778_v32  ;;  %9030 = vst [vmem:[#allocation2 + $0xf8] sm:$0xff] %v17644_v58  ;;  %v7613_v58 = vld [vmem:[#allocation3 + $0x45] sm:$0xff]  ;;  %v5784_v29 = vld [vmem:[#allocation2 + $0x12c] sm:$0xff] }
 0x5aa   : > { %6788 = vmatmul.mubr.bf16.gmra.mxu0 %v5875_v8 }
 0x5af   : > { %6941 = vmatmul.mubr.bf16.gmra.mxu1 %v5847_v47 }
 0x5b0   : > { %6950 = vmatprep.mubr.bf16.mxu1 %v16730_v51 }
 0x5b7   : > { %6951 = vmatmul.mubr.bf16.gmra.mxu1 %v5852_v56 }
 0x5b8   : > { %6960 = vmatprep.mubr.bf16.mxu1 %v16730_v51 }
 0x5bf   : > { %6961 = vmatmul.mubr.bf16.gmra.mxu1 %v5857_v2  ;;  %v5785_v2 = vld [vmem:[#allocation2 + $0x134] sm:$0xff] }
 0x5c0   : > { %6970 = vmatprep.mubr.bf16.mxu1 %v16730_v51  ;;  %v5872_v59 = vpack.c.bf16 %v5785_v2, %v5784_v29  ;;  %v7636_v29 = vld [vmem:[#allocation3 + $0x68] sm:$0xff] }
 0x5c7   : > { %v6486_v0 = vpop.f32.mrf.mxu1 }
 0x5c8   : > { %v6689_v19 = vpop.f32.mrf.mxu0  ;;  %v6487_v31 = vadd.f32 %v6486_v0, %v5965_v25  ;;  %v7611_v0 = vld [vmem:[#allocation3 + $0x35] sm:$0xff] }
 0x5c9   : > { %v6488_v16 = vpop.f32.mrf.mxu1  ;;  %v7612_v19 = vld [vmem:[#allocation3 + $0x3d] sm:$0xff] }
 0x5ca   : > { %v6691_v41 = vpop.f32.mrf.mxu0  ;;  %v6489_v53 = vadd.f32 %v6488_v16, %v17740_v1  ;;  %v7700_v26 = vpack.c.bf16 %v7612_v19, %v7611_v0  ;;  %v15766_v0 = vld [vmem:[#allocation10 + $0x924] ss:$8 sps:$4 sm:$0xff]   ;;  %v15764_v19 = vld [vmem:[#allocation10 + $0x920] ss:$8 sps:$4 sm:$0xff]  }
 0x5cb   : > { %v6490_v23 = vpop.f32.mrf.mxu1 }
 0x5cc   : > { %v6693_v61 = vpop.f32.mrf.mxu0  ;;  %v6491_v20 = vadd.f32 %v6490_v23, %v5965_v25  ;;  %8280 = vmatprep.mubr.bf16.mxu0 %v7700_v26 }
 0x5cd   : > { %v17744_v15 = vpop.f32.mrf.mxu1  ;;  %8281 = vmatmul.mubr.bf16.vlgmr.msra.gmra.mxu0 %v17765_v45 }
 0x5ce   : > { %v6695_v30 = vpop.f32.mrf.mxu0 }
 0x5cf   : > { %v6496_v34 = vpop.f32.mrf.mxu1 }
 0x5d0   : > { %v6699_v33 = vpop.f32.mrf.mxu0  ;;  %v6497_v7 = vadd.f32 %v6496_v34, %v5965_v25  ;;  %v5781_v25 = vld [vmem:[#allocation2 + $0x114] sm:$0xff] }
 0x5d1   : > { %v17747_v12 = vadd.f32 %v6699_v33, %v6487_v31  ;;  %v6498_v57 = vpop.f32.mrf.mxu1  ;;  %v5862_v43 = vpack.c.bf16 %v5781_v25, %v5780_v37  ;;  %v7705_v31 = vpack.c.bf16 %v7614_v60, %v7613_v58  ;;  %v15751_v34 = vld [vmem:[#allocation10 + $0x964] ss:$8 sps:$4 sm:$0xff]   ;;  %v15749_v33 = vld [vmem:[#allocation10 + $0x960] ss:$8 sps:$4 sm:$0xff]   ;;  %v7619_v25 = vld [vmem:[#allocation3 + $0x75] sm:$0xff] }
 0x5d2   : > { %v6701_v5 = vpop.f32.mrf.mxu0  ;;  %v6499_v47 = vadd.f32 %v6498_v57, %v17740_v1  ;;  %8409 = vmatprep.subr.bf16.mxu1 %v15751_v34  ;;  %v7615_v57 = vld [vmem:[#allocation3 + $0x55] sm:$0xff]  ;;  %v7655_v58 = vld [vmem:[#allocation3 + $0x6b] sm:$0xff] }
 0x5d3   : > { %v17750_v40 = vadd.f32 %v6701_v5, %v6489_v53  ;;  %v6500_v48 = vpop.f32.mrf.mxu1  ;;  %6971 = vmatmul.mubr.bf16.gmra.mxu1 %v5862_v43  ;;  %8290 = vmatprep.mubr.bf16.mxu0 %v7705_v31  ;;  %v7616_v5 = vld [vmem:[#allocation3 + $0x5d] sm:$0xff]  ;;  %v7656_v60 = vld [vmem:[#allocation3 + $0x73] sm:$0xff] }
 0x5d4   : > { %v6703_v3 = vpop.f32.mrf.mxu0  ;;  %6980 = vmatprep.mubr.bf16.mxu1 %v16730_v51  ;;  %8410 = vmatpush2.bf16.msra.mxu1 %v15749_v33  ;;  %v15757_v48 = vld [vmem:[#allocation10 + $0x944] ss:$8 sps:$4 sm:$0xff]   ;;  %v7634_v34 = vld [vmem:[#allocation3 + $0x58] sm:$0xff] }
 0x5d5   : > { %v17752_v62 = vadd.f32 %v6703_v3, %v6491_v20  ;;  %v6502_v6 = vpop.f32.mrf.mxu1  ;;  %8291 = vmatmul.mubr.bf16.gmra.mxu0 %v17765_v45  ;;  %8411 = vmatprep.subr.bf16.mxu1 %v15754_v55  ;;  %v7710_v20 = vpack.c.bf16 %v7616_v5, %v7615_v57  ;;  %v15755_v3 = vld [vmem:[#allocation10 + $0x940] ss:$8 sps:$4 sm:$0xff]   ;;  %v7633_v31 = vld [vmem:[#allocation3 + $0x50] sm:$0xff] }
 0x5d6   : > { %v17755_v21 = vpop.f32.mrf.mxu0  ;;  %v15763_v6 = vld [vmem:[#allocation10 + $0x934] ss:$8 sps:$4 sm:$0xff]   ;;  %10451 = vst [vmem:[#allocation3 + $0x52] sm:$0xff] %v17775_v38  ;;  %v7658_v5 = vld [vmem:[#allocation3 + $0x83] sm:$0xff] }
 0x5d7   : > { %v6506_v63 = vpop.f32.mrf.mxu1  ;;  %8300 = vmatprep.mubr.bf16.mxu0 %v7710_v20  ;;  %v7657_v57 = vld [vmem:[#allocation3 + $0x7b] sm:$0xff] }
 0x5d8   : > { %v6709_v13 = vpop.f32.mrf.mxu0  ;;  %8412 = vmatpush2.bf16.msra.mxu1 %v15752_v50  ;;  %v7618_v63 = vld [vmem:[#allocation3 + $0x6d] sm:$0xff]  ;;  %v15748_v20 = vld [vmem:[#allocation10 + $0x9f4] ss:$8 sps:$4 sm:$0xff]  }
 0x5d9   : > { %v17758_v4 = vadd.f32 %v6709_v13, %v6497_v7  ;;  %v6508_v44 = vpop.f32.mrf.mxu1  ;;  %8413 = vmatprep.subr.bf16.mxu1 %v15757_v48  ;;  %v7617_v7 = vld [vmem:[#allocation3 + $0x65] sm:$0xff]  ;;  %v7707_v48 = vpack.c.bf16 %v7658_v5, %v7657_v57  ;;  %8534 = vmatprep.subr.bf16.mxu0 %v15748_v20  ;;  %v17792_v57 = vld [vmem:[#allocation3 + $0x90] sm:$0xff] }
 0x5da   : > { %v6711_v36 = vpop.f32.mrf.mxu0  ;;  %v5786_v44 = vld [vmem:[#allocation2 + $0x13c] sm:$0xff] }
 0x5db   : > { %v17761_v11 = vadd.f32 %v6711_v36, %v6499_v47  ;;  %v6510_v16 = vpop.f32.mrf.mxu1  ;;  %6981 = vmatmul.mubr.bf16.gmra.mxu1 %v5867_v54  ;;  %v7715_v47 = vpack.c.bf16 %v7618_v63, %v7617_v7  ;;  %v5787_v36 = vld [vmem:[#allocation2 + $0x144] sm:$0xf]  ;;  %v17794_v5 = vld [vmem:[#allocation3 + $0x88] sm:$0xff] }
 0x5dc   : > { %v6713_v41 = vpop.f32.mrf.mxu0  ;;  %6990 = vmatprep.mubr.bf16.mxu1 %v16730_v51  ;;  %8414 = vmatpush2.bf16.msra.mxu1 %v15755_v3  ;;  %v5877_v52 = vpack.c.bf16 %v5787_v36, %v5786_v44  ;;  %v15769_v16 = vld [vmem:[#allocation10 + $0x914] ss:$8 sps:$4 sm:$0xff]   ;;  %v7622_v54 = vld [vmem:[#allocation3 + $0x8d] sm:$0xff] }
 0x5dd   : > { %v6512_v23 = vpop.f32.mrf.mxu1  ;;  %8301 = vmatmul.mubr.bf16.gmra.mxu0 %v17765_v45  ;;  %8415 = vmatprep.subr.bf16.mxu1 %v15763_v6  ;;  %v15767_v41 = vld [vmem:[#allocation10 + $0x910] ss:$8 sps:$4 sm:$0xff]   ;;  %v7635_v3 = vld [vmem:[#allocation3 + $0x60] sm:$0xff] }
 0x5de   : > { %v6715_v61 = vpop.f32.mrf.mxu0  ;;  %8310 = vmatprep.mubr.bf16.mxu0 %v7715_v47  ;;  %v7620_v23 = vld [vmem:[#allocation3 + $0x7d] sm:$0xff]  ;;  %10452 = vst [vmem:[#allocation3 + $0x5a] sm:$0xff] %v17775_v38  ;;  %v7706_v2 = vpack.c.bf16 %v7636_v29, %v7635_v3  ;;  %10453 = vst [vmem:[#allocation3 + $0x62] sm:$0xff] %v17775_v38  ;;  %v17798_v20 = vld [vmem:[#allocation3 + $0x8e] sm:$0xff] }
 0x5df   : > { %v6516_v56 = vpop.f32.mrf.mxu1  ;;  %v7720_v43 = vpack.c.bf16 %v7620_v23, %v7619_v25  ;;  %v15758_v6 = vld [vmem:[#allocation10 + $0x9e0] ss:$8 sps:$4 sm:$0xff]   ;;  %v15770_v63 = vld [vmem:[#allocation10 + $0x9d0] ss:$8 sps:$4 sm:$0xff]   ;;  %v15784_v25 = vld [vmem:[#allocation10 + $0x9a4] ss:$8 sps:$4 sm:$0xff]  }
 0x5e0   : > { %8416 = vmatpush2.bf16.msra.mxu1 %v15761_v46  ;;  %v15760_v46 = vld [vmem:[#allocation10 + $0x9e4] ss:$8 sps:$4 sm:$0xff]   ;;  %v17783_v47 = vld [vmem:[#allocation3 + $0x78] sm:$0xff]  ;;  %v15776_v44 = vld [vmem:[#allocation10 + $0x9c0] ss:$8 sps:$4 sm:$0xff]  }
 0x5e1   : > { %v6518_v30 = vpop.f32.mrf.mxu1  ;;  %8417 = vmatprep.subr.bf16.mxu1 %v15766_v0 }
 0x5e2   : > { %v7702_v30 = vpack.c.bf16 %v7656_v60, %v7655_v58  ;;  %v15785_v58 = vld [vmem:[#allocation10 + $0x990] ss:$8 sps:$4 sm:$0xff]   ;;  %v15787_v60 = vld [vmem:[#allocation10 + $0x994] ss:$8 sps:$4 sm:$0xff]  }
 0x5e3   : > { %v6520_v35 = vpop.f32.mrf.mxu1  ;;  %6991 = vmatmul.mubr.bf16.gmra.mxu1 %v5872_v59 }
 0x5e4   : > { %7000 = vmatprep.mubr.bf16.mxu1 %v16730_v51  ;;  %8418 = vmatpush2.bf16.msra.mxu1 %v15764_v19  ;;  %v7701_v35 = vpack.c.bf16 %v7634_v34, %v7633_v31  ;;  %v15778_v19 = vld [vmem:[#allocation10 + $0x9c4] ss:$8 sps:$4 sm:$0xff]  }
 0x5e5   : > { %v6522_v53 = vpop.f32.mrf.mxu1  ;;  %8311 = vmatmul.mubr.bf16.gmra.mxu0 %v17765_v45  ;;  %8419 = vmatprep.subr.bf16.mxu1 %v15769_v16  ;;  %v17787_v16 = vld [vmem:[#allocation3 + $0x80] sm:$0xff] }
 0x5e6   : > { %8320 = vmatprep.mubr.bf16.mxu0 %v7720_v43  ;;  %v7621_v53 = vld [vmem:[#allocation3 + $0x85] sm:$0xff]  ;;  %10456 = vst [vmem:[#allocation3 + $0x7a] sm:$0xff] %v17775_v38 }
 0x5e7   : > { %v6526_v24 = vpop.f32.mrf.mxu1  ;;  %v7725_v50 = vpack.c.bf16 %v7622_v54, %v7621_v53 }
 0x5e8   : > { %8420 = vmatpush2.bf16.msra.mxu1 %v15767_v41  ;;  %v15779_v41 = vld [vmem:[#allocation10 + $0x9b0] ss:$8 sps:$4 sm:$0xff]  }
 0x5e9   : > { %v6528_v8 = vpop.f32.mrf.mxu1  ;;  %8421 = vmatprep.subr.bf16.mxu1 %v15775_v17 }
 0x5ea   : > { %v15746_v8 = vld [vmem:[#allocation10 + $0x9f0] ss:$8 sps:$4 sm:$0xff]  }
 0x5eb   : > { %v6530_v32 = vpop.f32.mrf.mxu1  ;;  %7001 = vmatmul.mubr.bf16.gmra.mxu1 %v5877_v52  ;;  %8535 = vmatpush1.bf16.msra.mxu0 %v15746_v8  ;;  %v17796_v8 = vld [vmem:[#allocation3 + $0x86] sm:$0xff] }
 0x5ec   : > { %8422 = vmatpush2.bf16.msra.mxu1 %v15773_v9  ;;  %8423 = vmatprep.mubr.bf16.mxu1 %v7702_v30  ;;  %10457 = vst [vmem:[#allocation3 + $0x82] sm:$0xff] %v17775_v38 }
 0x5ed   : > { %v6532_v28 = vpop.f32.mrf.mxu1  ;;  %8321 = vmatmul.mubr.bf16.gmra.mxu0 %v17765_v45  ;;  %8536 = vmatprep.subr.bf16.mxu0 %v15760_v46 }
 0x5ee   : > { %8330 = vmatprep.mubr.bf16.mxu0 %v7725_v50 }
 0x5ef   : > { %v6536_v42 = vpop.f32.mrf.mxu1  ;;  %8537 = vmatpush1.bf16.msra.mxu0 %v15758_v6 }
 0x5f0   : > { %v15772_v42 = vld [vmem:[#allocation10 + $0x9d4] ss:$8 sps:$4 sm:$0xff]  }
 0x5f1   : > { %v6538_v13 = vpop.f32.mrf.mxu1  ;;  %8538 = vmatprep.subr.bf16.mxu0 %v15772_v42 }
 0x5f2   : > { %v17781_v13 = vld [vmem:[#allocation3 + $0x70] sm:$0xff] }
 0x5f3   : > { %v6540_v10 = vpop.f32.mrf.mxu1  ;;  %8424 = vmatmul.mubr.bf16.vlgmr.msra.gmra.mxu1 %v7701_v35  ;;  %10454 = vst [vmem:[#allocation3 + $0x6a] sm:$0xff] %v17775_v38  ;;  %10455 = vst [vmem:[#allocation3 + $0x72] sm:$0xff] %v17775_v38  ;;  %8539 = vmatpush1.bf16.msra.mxu0 %v15770_v63  ;;  %v15788_v35 = vld [vmem:[#allocation10 + $0x980] ss:$8 sps:$4 sm:$0xff]  }
 0x5f4   : > { %8433 = vmatprep.mubr.bf16.mxu1 %v7707_v48  ;;  %8540 = vmatprep.subr.bf16.mxu0 %v15778_v19 }
 0x5f5   : > { %v6542_v26 = vpop.f32.mrf.mxu1  ;;  %8331 = vmatmul.mubr.bf16.gmra.mxu0 %v17765_v45 }
 0x5f6   : > { %v15781_v26 = vld [vmem:[#allocation10 + $0x9b4] ss:$8 sps:$4 sm:$0xff]  }
 0x5f7   : > { %v6546_v37 = vpop.f32.mrf.mxu1  ;;  %8541 = vmatpush1.bf16.msra.mxu0 %v15776_v44 }
 0x5f8   : > { %8542 = vmatprep.subr.bf16.mxu0 %v15781_v26 }
 0x5f9   : > { %v6548_v61 = vpop.f32.mrf.mxu1 }
 0x5fa   : > { %v15782_v61 = vld [vmem:[#allocation10 + $0x9a0] ss:$8 sps:$4 sm:$0xff]  }
 0x5fb   : > { %v6550_v56 = vpop.f32.mrf.mxu1  ;;  %8434 = vmatmul.mubr.bf16.gmra.mxu1 %v7706_v2  ;;  %8543 = vmatpush1.bf16.msra.mxu0 %v15779_v41 }
 0x5fc   : > { %8544 = vmatprep.subr.bf16.mxu0 %v15784_v25  ;;  %v6493_v25 = vadd.f32 %v17744_v15, %v17740_v1 }
 0x5fd   : > { %v6552_v33 = vpop.f32.mrf.mxu1 }
 0x5ff   : > { %v6556_v49 = vpop.f32.mrf.mxu1  ;;  %8545 = vmatpush1.bf16.msra.mxu0 %v15782_v61 }
 0x600   : > { %8546 = vmatprep.subr.bf16.mxu0 %v15787_v60  ;;  %v15790_v49 = vld [vmem:[#allocation10 + $0x984] ss:$8 sps:$4 sm:$0xff]  }
 0x601   : > { %v6558_v55 = vpop.f32.mrf.mxu1 }
 0x603   : > { %v6560_v24 = vpop.f32.mrf.mxu1  ;;  %8547 = vmatpush1.bf16.msra.mxu0 %v15785_v58 }
 0x604   : > { %8548 = vmatprep.subr.bf16.mxu0 %v15790_v49  ;;  %v17790_v24 = vld [vmem:[#allocation3 + $0x8b] sm:$0xff] }
 0x605   : > { %v6562_v32 = vpop.f32.mrf.mxu1  ;;  %10458 = vst [vmem:[#allocation3 + $0x8a] sm:$0xff] %v17775_v38 }
 0x607   : > { %v6566_v28 = vpop.f32.mrf.mxu1  ;;  %8549 = vmatpush1.bf16.msra.mxu0 %v15788_v35 }
 0x609   : > { %v6568_v59 = vpop.f32.mrf.mxu1 }
 0x60b   : > { %v6570_v7 = vpop.f32.mrf.mxu1 }
 0x60d   : > { %v6572_v0 = vpop.f32.mrf.mxu1 }
 0x60f   : > { %v6576_v10 = vpop.f32.mrf.mxu1 }
 0x611   : > { %v6578_v36 = vpop.f32.mrf.mxu1 }
 0x613   : > { %v6580_v52 = vpop.f32.mrf.mxu1 }
 0x615   : > { %v6582_v37 = vpop.f32.mrf.mxu1 }
 0x617   : > { %v6832_v23 = vpop.f32.mrf.mxu1 }
 0x619   : > { %v6834_v43 = vpop.f32.mrf.mxu1 }
 0x61a   : > { %v6719_v43 = vpop.f32.mrf.mxu0 }
 0x61b   : > { %v6836_v17 = vpop.f32.mrf.mxu1 }
 0x61c   : > { %v6706_v17 = vadd.f32 %v17755_v21, %v6493_v25  ;;  %v6721_v58 = vpop.f32.mrf.mxu0 }
 0x61d   : > { %v6838_v9 = vpop.f32.mrf.mxu1 }
 0x61f   : > { %v6842_v56 = vpop.f32.mrf.mxu1 }
 0x621   : > { %v6844_v30 = vpop.f32.mrf.mxu1 }
 0x623   : > { %v6846_v31 = vpop.f32.mrf.mxu1 }
 0x624   : > { %v6723_v31 = vpop.f32.mrf.mxu0 }
 0x625   : > { %v6848_v34 = vpop.f32.mrf.mxu1 }
 0x626   : > { %v6725_v35 = vpop.f32.mrf.mxu0 }
 0x627   : > { %v6852_v33 = vpop.f32.mrf.mxu1 }
 0x629   : > { %v6854_v53 = vpop.f32.mrf.mxu1 }
 0x62b   : > { %v6856_v54 = vpop.f32.mrf.mxu1 }
 0x62d   : > { %v6858_v55 = vpop.f32.mrf.mxu1 }
 0x62f   : > { %v6862_v50 = vpop.f32.mrf.mxu1 }
 0x631   : > { %v6864_v48 = vpop.f32.mrf.mxu1 }
 0x633   : > { %v6866_v3 = vpop.f32.mrf.mxu1 }
 0x635   : > { %v6868_v32 = vpop.f32.mrf.mxu1 }
 0x637   : > { %v6872_v29 = vpop.f32.mrf.mxu1 }
 0x639   : > { %v6874_v2 = vpop.f32.mrf.mxu1 }
 0x63b   : > { %v6876_v28 = vpop.f32.mrf.mxu1 }
 0x63d   : > { %v6878_v59 = vpop.f32.mrf.mxu1 }
 0x63f   : > { %v6882_v6 = vpop.f32.mrf.mxu1 }
 0x641   : > { %v6884_v46 = vpop.f32.mrf.mxu1 }
 0x643   : > { %v6886_v42 = vpop.f32.mrf.mxu1 }
 0x644   : > { %v899_v42 = vadd.s32 128, %v17289_v14 }
 0x645   : > { %v6888_v7 = vpop.f32.mrf.mxu1 }
 0x647   : > { %v6892_v63 = vpop.f32.mrf.mxu1 }
 0x649   : > { %v6894_v0 = vpop.f32.mrf.mxu1 }
 0x64a   : > { %v17808_v0 = vadd.s32 4294967162, %v899_v42 }
 0x64b   : > { %v6896_v19 = vpop.f32.mrf.mxu1 }
 0x64c   : > { %vm7353_vm6 = vcmp.ge.s32.totalorder %v17808_v0, 0 }
 0x64d   : > { %v6898_v10 = vpop.f32.mrf.mxu1  ;;  %vm16394_vm8 = vmpackc.low %vm16731_vm3, %vm7353_vm6 }
 0x64f   : > { %v6902_v44 = vpop.f32.mrf.mxu1 }
 0x651   : > { %v6904_v36 = vpop.f32.mrf.mxu1 }
 0x653   : > { %v6906_v26 = vpop.f32.mrf.mxu1 }
 0x655   : > { %v6908_v52 = vpop.f32.mrf.mxu1 }
 0x656   : > { %v901_v52 = vadd.s32 144, %v17289_v14 }
 0x657   : > { %v6912_v41 = vpop.f32.mrf.mxu1 }
 0x658   : > { %v6913_v19 = vadd.f32 %v6912_v41, %v17747_v12  ;;  %v17820_v58 = vadd.s32 4294967162, %v901_v52  ;;  %v7628_v52 = vld [vmem:[#allocation3 + $0xbd] sm:$0xff] }
 0x659   : > { %v6914_v37 = vpop.f32.mrf.mxu1 }
 0x65a   : > { %v6915_v23 = vadd.f32 %v6914_v37, %v17750_v40  ;;  %v6729_v40 = vpop.f32.mrf.mxu0  ;;  %vm7391_vm7 = vcmp.lt.s32.totalorder %v17820_v58, 16 }
 0x65b   : > { %v6916_v61 = vpop.f32.mrf.mxu1  ;;  %vm16397_vm9 = vmpackc.low %vm16731_vm3, %vm7391_vm7 }
 0x65c   : > { %v14483_v9 = vmul.f32 -1.442695, %v6915_v23  ;;  %v6731_v54 = vpop.f32.mrf.mxu0  ;;  %v6917_v25 = vadd.f32 %v6916_v61, %v17752_v62 }
 0x65d   : > { %v6918_v56 = vpop.f32.mrf.mxu1 }
 0x65e   : > { %16315 = vpow2.f32 %v14483_v9  ;;  %v6919_v60 = vadd.f32 %v6918_v56, %v6706_v17  ;;  %v6733_v21 = vpop.f32.mrf.mxu0 }
 0x65f   : > { %v6922_v30 = vpop.f32.mrf.mxu1 }
 0x660   : > { %v14484_v34 = vmul.f32 -1.442695, %v6919_v60  ;;  %v6735_v55 = vpop.f32.mrf.mxu0  ;;  %v16384_v60 = vld [vmem:[#allocation2 + $0xa2] sm:$0xff] }
 0x661   : > { %v6924_v33 = vpop.f32.mrf.mxu1 }
 0x662   : > { %16317 = vpow2.f32 %v14484_v34  ;;  %v6925_v49 = vadd.f32 %v6924_v33, %v17761_v11  ;;  %v6739_v3 = vpop.f32.mrf.mxu0 }
 0x663   : > { %v6926_v1 = vpop.f32.mrf.mxu1 }
 0x664   : > { %v14485_v15 = vmul.f32 -1.442695, %v6925_v49  ;;  %v6741_v32 = vpop.f32.mrf.mxu0 }
 0x665   : > { %v6928_v53 = vpop.f32.mrf.mxu1 }
 0x666   : > { %16319 = vpow2.f32 %v14485_v15  ;;  %v6743_v28 = vpop.f32.mrf.mxu0 }
 0x667   : > { %v6932_v43 = vpop.f32.mrf.mxu1 }
 0x668   : > { %v6745_v59 = vpop.f32.mrf.mxu0 }
 0x669   : > { %v6934_v56 = vpop.f32.mrf.mxu1 }
 0x66a   : > { %v6749_v46 = vpop.f32.mrf.mxu0 }
 0x66b   : > { %v16316_v50 = vpop.eup %16315  ;;  %v6936_v62 = vpop.f32.mrf.mxu1 }
 0x66c   : > { %v7135_v48 = vadd.f32 1.0, %v16316_v50  ;;  %v6751_v7 = vpop.f32.mrf.mxu0 }
 0x66d   : > { %v6938_v49 = vpop.f32.mrf.mxu1  ;;  %v7716_v7 = vpack.c.bf16 %v17794_v5, %v17787_v16 }
 0x66e   : > { %16321 = vrcp.f32 %v7135_v48  ;;  %v6753_v63 = vpop.f32.mrf.mxu0  ;;  %v7630_v49 = vld [vmem:[#allocation3 + $0xcd] sm:$0xff] }
 0x66f   : > { %v16318_v29 = vpop.eup %16317  ;;  %v6942_v40 = vpop.f32.mrf.mxu1  ;;  %v17842_v63 = vld [vmem:[#allocation3 + $0xb8] sm:$0xff] }
 0x670   : > { %v7136_v2 = vadd.f32 1.0, %v16318_v29  ;;  %v6755_v10 = vpop.f32.mrf.mxu0 }
 0x672   : > { %16323 = vrcp.f32 %v7136_v2  ;;  %v6759_v26 = vpop.f32.mrf.mxu0 }
 0x673   : > { %v16320_v6 = vpop.eup %16319  ;;  %v7627_v26 = vld [vmem:[#allocation3 + $0xb5] sm:$0xff] }
 0x674   : > { %v7137_v11 = vadd.f32 1.0, %v16320_v6  ;;  %v6761_v23 = vpop.f32.mrf.mxu0  ;;  %v7740_v5 = vpack.c.bf16 %v7628_v52, %v7627_v26 }
 0x676   : > { %16325 = vrcp.f32 %v7137_v11  ;;  %v6763_v9 = vpop.f32.mrf.mxu0 }
 0x678   : > { %v6765_v34 = vpop.f32.mrf.mxu0 }
 0x67a   : > { %v6769_v35 = vpop.f32.mrf.mxu0 }
 0x67b   : > { %v16322_v44 = vpop.eup %16321  ;;  %v7629_v35 = vld [vmem:[#allocation3 + $0xc5] sm:$0xff] }
 0x67c   : > { %v7243_v36 = vmul.f32 %v16322_v44, %v6913_v19  ;;  %v6771_v15 = vpop.f32.mrf.mxu0 }
 0x67e   : > { %v17814_v37 = vadd.f32 %v7243_v36, %v17680_v27  ;;  %v6923_v27 = vadd.f32 %v6922_v30, %v17758_v4  ;;  %v7711_v30 = vpack.c.bf16 %v17783_v47, %v17781_v13  ;;  %v6773_v54 = vpop.f32.mrf.mxu0 }
 0x67f   : > { %v16324_v17 = vpop.eup %16323 }
 0x680   : > { %v7533_v12 = vsel %vm7353_vm6, %v17814_v37, 0.0  ;;  %v7244_v41 = vmul.f32 %v16324_v17, %v6917_v25  ;;  %v6775_v3 = vpop.f32.mrf.mxu0  ;;  %v17848_v17 = vld [vmem:[#allocation3 + $0xb6] sm:$0xff] }
 0x681   : > { %7569 = vst [vmem:[#allocation3 + $0x9a] sm:$0xff] %v7533_v12 }
 0x682   : > { %v17822_v31 = vadd.f32 %v16384_v60, %v7244_v41  ;;  %v6779_v28 = vpop.f32.mrf.mxu0  ;;  %v7665_v60 = vld [vmem:[#allocation3 + $0xbb] sm:$0xff] }
 0x683   : > { %v16326_v61 = vpop.eup %16325 }
 0x684   : > { %7570 = vst [vmem:[#allocation3 + $0xa2] sm:$0xff] %v17822_v31  ;;  %v7245_v33 = vmul.f32 %v16326_v61, %v6923_v27  ;;  %v6781_v13 = vpop.f32.mrf.mxu0  ;;  %v7666_v27 = vld [vmem:[#allocation3 + $0xc3] sm:$0xff] }
 0x685   : > { %v7632_v13 = vld [vmem:[#allocation3 + $0xdd] sm:$0xff] }
 0x686   : > { %v17828_v1 = vadd.f32 %v7245_v33, %v17688_v22  ;;  %v6944_v22 = vpop.f32.mrf.mxu1  ;;  %v6783_v19 = vpop.f32.mrf.mxu0  ;;  %v7727_v33 = vpack.c.bf16 %v7666_v27, %v7665_v60 }
 0x687   : > { %v7668_v22 = vld [vmem:[#allocation3 + $0xd3] sm:$0xff] }
 0x688   : > { %v7535_v53 = vsel %vm7391_vm7, %v17828_v1, 0.0  ;;  %v7660_v4 = vld [vmem:[#allocation3 + $0x93] sm:$0xff]  ;;  %v6946_v29 = vpop.f32.mrf.mxu1  ;;  %v6785_v12 = vpop.f32.mrf.mxu0 }
 0x689   : > { %7571 = vst [vmem:[#allocation3 + $0xaa] sm:$0xff] %v7535_v53  ;;  %v7712_v21 = vpack.c.bf16 %v7660_v4, %v17790_v24  ;;  %v7623_v55 = vld [vmem:[#allocation3 + $0x95] sm:$0xff] }
 0x68a   : > { %v7642_v50 = vld [vmem:[#allocation3 + $0x98] sm:$0xff]  ;;  %v6948_v59 = vpop.f32.mrf.mxu1  ;;  %v6789_v9 = vpop.f32.mrf.mxu0 }
 0x68b   : > { %v17836_v48 = vld [vmem:[#allocation3 + $0x96] sm:$0xff]  ;;  %8443 = vmatprep.mubr.bf16.mxu1 %v7712_v21  ;;  %v7721_v40 = vpack.c.bf16 %v7642_v50, %v17792_v57 }
 0x68c   : > { %10459 = vst [vmem:[#allocation3 + $0x92] sm:$0xff] %v17775_v38  ;;  %v7624_v32 = vld [vmem:[#allocation3 + $0x9d] sm:$0xff]  ;;  %8444 = vmatmul.mubr.bf16.gmra.mxu1 %v7711_v30  ;;  %v7664_v24 = vld [vmem:[#allocation3 + $0xb3] sm:$0xff]  ;;  %v6952_v6 = vpop.f32.mrf.mxu1  ;;  %v6791_v34 = vpop.f32.mrf.mxu0  ;;  %v7745_v30 = vpack.c.bf16 %v7630_v49, %v7629_v35 }
 0x68d   : > { %v7730_v2 = vpack.c.bf16 %v7624_v32, %v7623_v55  ;;  %v7661_v47 = vld [vmem:[#allocation3 + $0x9b] sm:$0xff]  ;;  %v7667_v55 = vld [vmem:[#allocation3 + $0xcb] sm:$0xff]  ;;  %v16395_v32 = vpack.c.bf16 %v17822_v31, %v17814_v37 }
 0x68e   : > { %v6954_v25 = vpop.f32.mrf.mxu1  ;;  %v6793_v61 = vpop.f32.mrf.mxu0  ;;  %v7732_v28 = vpack.c.bf16 %v7668_v22, %v7667_v55  ;;  %v7631_v59 = vld [vmem:[#allocation3 + $0xd5] sm:$0xff]  ;;  %v7684_v55 = vld [vmem:[#allocation3 + $0xbe] sm:$0xff] }
 0x68f   : > { %8340 = vmatprep.mubr.bf16.mxu0 %v7730_v2  ;;  %v17860_v2 = vld [vmem:[#allocation3 + $0xa0] sm:$0xff] }
 0x690   : > { %8341 = vmatmul.mubr.bf16.gmra.mxu0 %v17765_v45  ;;  %v7625_v11 = vld [vmem:[#allocation3 + $0xa5] sm:$0xff]  ;;  %v7626_v46 = vld [vmem:[#allocation3 + $0xad] sm:$0xff]  ;;  %v6956_v16 = vpop.f32.mrf.mxu1  ;;  %v6795_v53 = vpop.f32.mrf.mxu0 }
 0x691   : > { %v7662_v42 = vld [vmem:[#allocation3 + $0xa3] sm:$0xff]  ;;  %v7735_v10 = vpack.c.bf16 %v7626_v46, %v7625_v11  ;;  %v7663_v36 = vld [vmem:[#allocation3 + $0xab] sm:$0xff]  ;;  %v7750_v11 = vpack.c.bf16 %v7632_v13, %v7631_v59 }
 0x692   : > { %v7717_v44 = vpack.c.bf16 %v7662_v42, %v7661_v47  ;;  %v17844_v23 = vld [vmem:[#allocation3 + $0xb0] sm:$0xff]  ;;  %v7722_v41 = vpack.c.bf16 %v7664_v24, %v7663_v36  ;;  %v6958_v56 = vpop.f32.mrf.mxu1  ;;  %v8282_v54 = vpop.f32.mrf.mxu0  ;;  %v17858_v29 = vld [vmem:[#allocation3 + $0xa8] sm:$0xff]  ;;  %v16398_v42 = vpack.c.bf16 %v17775_v38, %v17828_v1  ;;  %v7688_v13 = vld [vmem:[#allocation3 + $0xde] sm:$0xff] }
 0x693   : > { %v17846_v43 = vld [vmem:[#allocation3 + $0xae] sm:$0xff]  ;;  %8350 = vmatprep.mubr.bf16.mxu0 %v7735_v10  ;;  %v7726_v0 = vpack.c.bf16 %v17858_v29, %v17860_v2  ;;  %v7681_v53 = vld [vmem:[#allocation3 + $0xa6] sm:$0xff] }
 0x694   : > { %8453 = vmatprep.mubr.bf16.mxu1 %v7717_v44  ;;  %10463 = vst [vmem:[#allocation3 + $0xb2] sm:$0xff] %v17775_v38  ;;  %v6962_v62 = vpop.f32.mrf.mxu1  ;;  %v8284_v3 = vpop.f32.mrf.mxu0  ;;  %v7731_v44 = vpack.c.bf16 %v17842_v63, %v17844_v23  ;;  %v7713_v54 = vpack.c.bf16 %v17846_v43, %v7681_v53  ;;  %v7687_v43 = vld [vmem:[#allocation3 + $0xd6] sm:$0xff]  ;;  %v7647_v53 = vld [vmem:[#allocation3 + $0xc0] sm:$0xff] }
 0x695   : > { %8454 = vmatmul.mubr.bf16.gmra.mxu1 %v7716_v7  ;;  %v7718_v3 = vpack.c.bf16 %v7684_v55, %v17848_v17  ;;  %v15794_v17 = vld [vmem:[#allocation10 + $0xa60] ss:$8 sps:$4 sm:$0xff]   ;;  %10464 = vst [vmem:[#allocation3 + $0xba] sm:$0xff] %v17775_v38  ;;  %v15845_v55 = vld [vmem:[#allocation10 + $0xad0] ss:$8 sps:$4 sm:$0xff]  }
 0x696   : > { %8463 = vmatprep.mubr.bf16.mxu1 %v7722_v41  ;;  %v6964_v15 = vpop.f32.mrf.mxu1  ;;  %v8286_v50 = vpop.f32.mrf.mxu0 }
 0x697   : > { %v7685_v50 = vld [vmem:[#allocation3 + $0xc6] sm:$0xff] }
 0x698   : > { %8351 = vmatmul.mubr.bf16.gmra.mxu0 %v17765_v45  ;;  %v6966_v4 = vpop.f32.mrf.mxu1  ;;  %v8288_v24 = vpop.f32.mrf.mxu0 }
 0x699   : > { %8360 = vmatprep.mubr.bf16.mxu0 %v7740_v5  ;;  %v7703_v5 = vpack.c.bf16 %v17798_v20, %v17796_v8  ;;  %v7728_v24 = vpack.c.bf16 %v7688_v13, %v7687_v43  ;;  %v7649_v13 = vld [vmem:[#allocation3 + $0xd0] sm:$0xff] }
 0x69a   : > { %v6968_v21 = vpop.f32.mrf.mxu1  ;;  %v8292_v37 = vpop.f32.mrf.mxu0 }
 0x69b   : > { %v15799_v37 = vld [vmem:[#allocation10 + $0xa54] ss:$8 sps:$4 sm:$0xff]  }
 0x69c   : > { %v6972_v57 = vpop.f32.mrf.mxu1  ;;  %v8294_v46 = vpop.f32.mrf.mxu0 }
 0x69d   : > { %8464 = vmatmul.mubr.bf16.gmra.mxu1 %v7721_v40  ;;  %v15802_v46 = vld [vmem:[#allocation10 + $0xa44] ss:$8 sps:$4 sm:$0xff]  }
 0x69e   : > { %8473 = vmatprep.mubr.bf16.mxu1 %v7727_v33  ;;  %v6974_v47 = vpop.f32.mrf.mxu1  ;;  %v8296_v19 = vpop.f32.mrf.mxu0 }
 0x69f   : > { %v15791_v47 = vld [vmem:[#allocation10 + $0xa70] ss:$8 sps:$4 sm:$0xff]  }
 0x6a0   : > { %16396 = vmatmul.mubr.msk.bf16.gmra.mxu0 %vm16394_vm8, %v16395_v32  ;;  %v6976_v6 = vpop.f32.mrf.mxu1  ;;  %v8298_v36 = vpop.f32.mrf.mxu0  ;;  %v15806_v19 = vld [vmem:[#allocation10 + $0xb70] ss:$8 sps:$4 sm:$0xff]  }
 0x6a1   : > { %8370 = vmatprep.mubr.bf16.mxu0 %v7745_v30  ;;  %v15796_v6 = vld [vmem:[#allocation10 + $0xa64] ss:$8 sps:$4 sm:$0xff]  }
 0x6a2   : > { %v6978_v31 = vpop.f32.mrf.mxu1  ;;  %v8302_v52 = vpop.f32.mrf.mxu0  ;;  %v15811_v36 = vld [vmem:[#allocation10 + $0xa24] ss:$8 sps:$4 sm:$0xff]  }
 0x6a3   : > { %v15800_v31 = vld [vmem:[#allocation10 + $0xa40] ss:$8 sps:$4 sm:$0xff]   ;;  %v15814_v52 = vld [vmem:[#allocation10 + $0xb64] ss:$8 sps:$4 sm:$0xff]  }
 0x6a4   : > { %v6982_v7 = vpop.f32.mrf.mxu1  ;;  %v8304_v12 = vpop.f32.mrf.mxu0 }
 0x6a5   : > { %8474 = vmatmul.mubr.bf16.gmra.mxu1 %v7726_v0  ;;  %v15793_v0 = vld [vmem:[#allocation10 + $0xa74] ss:$8 sps:$4 sm:$0xff]  }
 0x6a6   : > { %8483 = vmatprep.mubr.bf16.mxu1 %v7732_v28  ;;  %v6984_v10 = vpop.f32.mrf.mxu1  ;;  %v8306_v1 = vpop.f32.mrf.mxu0  ;;  %v7686_v28 = vld [vmem:[#allocation3 + $0xce] sm:$0xff]  ;;  %9690 = vmatprep.subr.bf16.mxu1 %v15793_v0  ;;  %v15805_v7 = vld [vmem:[#allocation10 + $0xa34] ss:$8 sps:$4 sm:$0xff]  }
 0x6a7   : > { %v7723_v59 = vpack.c.bf16 %v7686_v28, %v7685_v50  ;;  %9691 = vmatpush1.bf16.msra.mxu1 %v15791_v47  ;;  %v15808_v10 = vld [vmem:[#allocation10 + $0xb74] ss:$8 sps:$4 sm:$0xff]   ;;  %v7671_v28 = vld [vmem:[#allocation3 + $0xeb] sm:$0xff] }
 0x6a8   : > { %16399 = vmatmul.mubr.msk.bf16.gmra.mxu0 %vm16397_vm9, %v16398_v42  ;;  %v6986_v26 = vpop.f32.mrf.mxu1  ;;  %v8308_v16 = vpop.f32.mrf.mxu0  ;;  %9692 = vmatprep.subr.bf16.mxu1 %v15796_v6  ;;  %v15803_v42 = vld [vmem:[#allocation10 + $0xa30] ss:$8 sps:$4 sm:$0xff]   ;;  %v15817_v12 = vld [vmem:[#allocation10 + $0xa14] ss:$8 sps:$4 sm:$0xff]   ;;  %v15854_v6 = vld [vmem:[#allocation10 + $0xbe0] ss:$8 sps:$4 sm:$0xff]  }
 0x6a9   : > { %8380 = vmatprep.mubr.bf16.mxu0 %v7750_v11  ;;  %v15797_v11 = vld [vmem:[#allocation10 + $0xa50] ss:$8 sps:$4 sm:$0xff]   ;;  %9833 = vmatprep.subr.bf16.mxu0 %v15808_v10  ;;  %v15812_v26 = vld [vmem:[#allocation10 + $0xb60] ss:$8 sps:$4 sm:$0xff]   ;;  %v15820_v1 = vld [vmem:[#allocation10 + $0xb54] ss:$8 sps:$4 sm:$0xff]  }
 0x6aa   : > { %v6988_v25 = vpop.f32.mrf.mxu1  ;;  %v8312_v56 = vpop.f32.mrf.mxu0  ;;  %v15823_v16 = vld [vmem:[#allocation10 + $0xb44] ss:$8 sps:$4 sm:$0xff]   ;;  %v15850_v50 = vld [vmem:[#allocation10 + $0xbf4] ss:$8 sps:$4 sm:$0xff]  }
 0x6ab   : > { %9693 = vmatpush1.bf16.msra.mxu1 %v15794_v17  ;;  %v15815_v25 = vld [vmem:[#allocation10 + $0xa10] ss:$8 sps:$4 sm:$0xff]   ;;  %v15853_v17 = vld [vmem:[#allocation10 + $0xac4] ss:$8 sps:$4 sm:$0xff]  }
 0x6ac   : > { %v6992_v58 = vpop.f32.mrf.mxu1  ;;  %v8314_v23 = vpop.f32.mrf.mxu0  ;;  %9694 = vmatprep.subr.bf16.mxu1 %v15799_v37  ;;  %v15827_v56 = vld [vmem:[#allocation10 + $0xb30] ss:$8 sps:$4 sm:$0xff]   ;;  %v7693_v37 = vld [vmem:[#allocation3 + $0x106] sm:$0xff] }
 0x6ad   : > { %8484 = vmatmul.mubr.bf16.gmra.mxu1 %v7731_v44  ;;  %v15809_v44 = vld [vmem:[#allocation10 + $0xa20] ss:$8 sps:$4 sm:$0xff]   ;;  %v15818_v58 = vld [vmem:[#allocation10 + $0xb50] ss:$8 sps:$4 sm:$0xff]  }
 0x6ae   : > { %v6994_v41 = vpop.f32.mrf.mxu1  ;;  %v8316_v27 = vpop.f32.mrf.mxu0  ;;  %v15830_v23 = vld [vmem:[#allocation10 + $0xaf0] ss:$8 sps:$4 sm:$0xff]   ;;  %v7674_v10 = vld [vmem:[#allocation3 + $0x103] sm:$0xff] }
 0x6af   : > { %9695 = vmatpush1.bf16.msra.mxu1 %v15797_v11  ;;  %v15821_v41 = vld [vmem:[#allocation10 + $0xb40] ss:$8 sps:$4 sm:$0xff]   ;;  %v7650_v47 = vld [vmem:[#allocation3 + $0xd8] sm:$0xff]  ;;  %v15856_v11 = vld [vmem:[#allocation10 + $0xbe4] ss:$8 sps:$4 sm:$0xff]  }
 0x6b0   : > { %8381 = vmatmul.mubr.bf16.gmra.mxu0 %v17765_v45  ;;  %v6996_v9 = vpop.f32.mrf.mxu1  ;;  %v7680_v45 = vld [vmem:[#allocation3 + $0x9e] sm:$0xff]  ;;  %v8318_v62 = vpop.f32.mrf.mxu0  ;;  %9696 = vmatprep.subr.bf16.mxu1 %v15802_v46  ;;  %v7741_v0 = vpack.c.bf16 %v7650_v47, %v7649_v13  ;;  %10467 = vst [vmem:[#allocation3 + $0xd2] sm:$0xff] %v17775_v38  ;;  %v15857_v46 = vld [vmem:[#allocation10 + $0xbd0] ss:$8 sps:$4 sm:$0xff]  }
 0x6b1   : > { %8566 = vmatprep.mubr.bf16.mxu0 %v16730_v51  ;;  %v7708_v35 = vpack.c.bf16 %v7680_v45, %v17836_v48  ;;  %v15826_v9 = vld [vmem:[#allocation10 + $0xa04] ss:$8 sps:$4 sm:$0xff]   ;;  %v15833_v27 = vld [vmem:[#allocation10 + $0xb20] ss:$8 sps:$4 sm:$0xff]  }
 0x6b2   : > { %v6998_v63 = vpop.f32.mrf.mxu1  ;;  %v8322_v33 = vpop.f32.mrf.mxu0  ;;  %v7689_v45 = vld [vmem:[#allocation3 + $0xe6] sm:$0xff]  ;;  %v7690_v62 = vld [vmem:[#allocation3 + $0xee] sm:$0xff] }
 0x6b3   : > { %9697 = vmatpush1.bf16.msra.mxu1 %v15800_v31  ;;  %v15829_v63 = vld [vmem:[#allocation10 + $0xb34] ss:$8 sps:$4 sm:$0xff]   ;;  %v7733_v33 = vpack.c.bf16 %v7690_v62, %v7689_v45  ;;  %v7694_v31 = vld [vmem:[#allocation3 + $0x10e] sm:$0xff] }
 0x6b4   : > { %v7002_v60 = vpop.f32.mrf.mxu1  ;;  %v8324_v15 = vpop.f32.mrf.mxu0  ;;  %9698 = vmatprep.subr.bf16.mxu1 %v15805_v7  ;;  %v15859_v7 = vld [vmem:[#allocation10 + $0xbd4] ss:$8 sps:$4 sm:$0xff]  }
 0x6b5   : > { %v15832_v60 = vld [vmem:[#allocation10 + $0xaf4] ss:$8 sps:$4 sm:$0xff]   ;;  %v7670_v15 = vld [vmem:[#allocation3 + $0xe3] sm:$0xff] }
 0x6b6   : > { %v7004_v34 = vpop.f32.mrf.mxu1  ;;  %v8326_v20 = vpop.f32.mrf.mxu0  ;;  %v7653_v45 = vld [vmem:[#allocation3 + $0xf0] sm:$0xff]  ;;  %v7654_v62 = vld [vmem:[#allocation3 + $0xf8] sm:$0xff] }
 0x6b7   : > { %9699 = vmatpush1.bf16.msra.mxu1 %v15803_v42  ;;  %v15835_v34 = vld [vmem:[#allocation10 + $0xb24] ss:$8 sps:$4 sm:$0xff]   ;;  %v15839_v20 = vld [vmem:[#allocation10 + $0xae0] ss:$8 sps:$4 sm:$0xff]   ;;  %v7743_v42 = vpack.c.bf16 %v7694_v31, %v7693_v37  ;;  %v9077_v37 = vld [vmem:[#allocation2 + $0x62] sm:$0xff] }
 0x6b8   : > { %8567 = vmatmul.mubr.bf16.vlgmr.msra.gmra.mxu0 %v7703_v5  ;;  %v7006_v61 = vpop.f32.mrf.mxu1  ;;  %v8328_v4 = vpop.f32.mrf.mxu0  ;;  %9700 = vmatprep.subr.bf16.mxu1 %v15811_v36  ;;  %v15824_v5 = vld [vmem:[#allocation10 + $0xa00] ss:$8 sps:$4 sm:$0xff]   ;;  %v15860_v36 = vld [vmem:[#allocation10 + $0xab0] ss:$8 sps:$4 sm:$0xff]  }
 0x6b9   : > { %8576 = vmatprep.mubr.bf16.mxu0 %v16730_v51  ;;  %9834 = vmatpush1.bf16.msra.mxu0 %v15806_v19  ;;  %v15836_v61 = vld [vmem:[#allocation10 + $0xb10] ss:$8 sps:$4 sm:$0xff]   ;;  %v7648_v4 = vld [vmem:[#allocation3 + $0xc8] sm:$0xff] }
 0x6ba   : > { %v7008_v49 = vpop.f32.mrf.mxu1  ;;  %9835 = vmatprep.subr.bf16.mxu0 %v15814_v52  ;;  %10465 = vst [vmem:[#allocation3 + $0xc2] sm:$0xff] %v17775_v38  ;;  %10466 = vst [vmem:[#allocation3 + $0xca] sm:$0xff] %v17775_v38  ;;  %v7673_v19 = vld [vmem:[#allocation3 + $0xfb] sm:$0xff]  ;;  %v9055_v47 = vld [vmem:[#allocation2 + $0x61] sm:$0xff] }
 0x6bb   : > { %9701 = vmatpush1.bf16.msra.mxu1 %v15809_v44  ;;  %v7669_v49 = vld [vmem:[#allocation3 + $0xdb] sm:$0xff]  ;;  %v7747_v44 = vpack.c.bf16 %v7674_v10, %v7673_v19  ;;  %v17905_v10 = vpop.f32.mrf.mxu0 }
 0x6bc   : > { %v8425_v8 = vpop.f32.mrf.mxu1  ;;  %9702 = vmatprep.subr.bf16.mxu1 %v15817_v12  ;;  %v7651_v52 = vld [vmem:[#allocation3 + $0xe0] sm:$0xff] }
 0x6bd   : > { %9836 = vmatpush1.bf16.msra.mxu0 %v15812_v26  ;;  %v7737_v8 = vpack.c.bf16 %v7670_v15, %v7669_v49  ;;  %v15862_v26 = vld [vmem:[#allocation10 + $0xab4] ss:$8 sps:$4 sm:$0xff]   ;;  %10468 = vst [vmem:[#allocation3 + $0xda] sm:$0xff] %v17775_v38  ;;  %v15877_v49 = vld [vmem:[#allocation10 + $0xba4] ss:$8 sps:$4 sm:$0xff]  }
 0x6be   : > { %v8427_v40 = vpop.f32.mrf.mxu1  ;;  %9837 = vmatprep.subr.bf16.mxu0 %v15820_v1  ;;  %v15865_v1 = vld [vmem:[#allocation10 + $0xbc4] ss:$8 sps:$4 sm:$0xff]   ;;  %v15875_v15 = vld [vmem:[#allocation10 + $0xba0] ss:$8 sps:$4 sm:$0xff]   ;;  %v9078_v31 = vld [vmem:[#allocation2 + $0x6a] sm:$0xff] }
 0x6bf   : > { %9703 = vmatpush1.bf16.msra.mxu1 %v15815_v25  ;;  %v15841_v40 = vld [vmem:[#allocation10 + $0xae4] ss:$8 sps:$4 sm:$0xff]   ;;  %8493 = vmatprep.mubr.bf16.mxu1 %v7737_v8 }
 0x6c0   : > { %8577 = vmatmul.mubr.bf16.gmra.mxu0 %v7708_v35  ;;  %v8429_v30 = vpop.f32.mrf.mxu1  ;;  %9704 = vmatprep.subr.bf16.mxu1 %v15826_v9  ;;  %v15838_v35 = vld [vmem:[#allocation10 + $0xb14] ss:$8 sps:$4 sm:$0xff]   ;;  %v7652_v25 = vld [vmem:[#allocation3 + $0xe8] sm:$0xff] }
 0x6c1   : > { %8586 = vmatprep.mubr.bf16.mxu0 %v16730_v51  ;;  %9838 = vmatpush1.bf16.msra.mxu0 %v15818_v58  ;;  %v7736_v30 = vpack.c.bf16 %v7648_v4, %v7647_v53  ;;  %v7746_v12 = vpack.c.bf16 %v7652_v25, %v7651_v52  ;;  %10469 = vst [vmem:[#allocation3 + $0xe2] sm:$0xff] %v17775_v38  ;;  %v15863_v58 = vld [vmem:[#allocation10 + $0xbc0] ss:$8 sps:$4 sm:$0xff]   ;;  %10470 = vst [vmem:[#allocation3 + $0xea] sm:$0xff] %v17775_v38  ;;  %v15880_v8 = vld [vmem:[#allocation10 + $0xa84] ss:$8 sps:$4 sm:$0xff]  }
 0x6c2   : > { %v8431_v21 = vpop.f32.mrf.mxu1  ;;  %9839 = vmatprep.subr.bf16.mxu0 %v15823_v16  ;;  %v15866_v16 = vld [vmem:[#allocation10 + $0xaa0] ss:$8 sps:$4 sm:$0xff]   ;;  %v7698_v53 = vld [vmem:[#allocation3 + $0x12e] sm:$0xff] }
 0x6c3   : > { %9705 = vmatpush1.bf16.msra.mxu1 %v15824_v5  ;;  %v15842_v21 = vld [vmem:[#allocation10 + $0xb00] ss:$8 sps:$4 sm:$0xff]   ;;  %v7695_v5 = vld [vmem:[#allocation3 + $0x116] sm:$0xff] }
 0x6c4   : > { %v8435_v22 = vpop.f32.mrf.mxu1  ;;  %9706 = vmatprep.subr.bf16.mxu1 %v15832_v60  ;;  %8494 = vmatmul.mubr.bf16.gmra.mxu1 %v7736_v30  ;;  %v7696_v9 = vld [vmem:[#allocation3 + $0x11e] sm:$0xff]  ;;  %v7676_v60 = vld [vmem:[#allocation3 + $0x113] sm:$0xff]  ;;  %v9080_v25 = vld [vmem:[#allocation2 + $0x7a] sm:$0xff] }
 0x6c5   : > { %9840 = vmatpush1.bf16.msra.mxu0 %v15821_v41  ;;  %v15847_v22 = vld [vmem:[#allocation10 + $0xad4] ss:$8 sps:$4 sm:$0xff]   ;;  %v15868_v41 = vld [vmem:[#allocation10 + $0xaa4] ss:$8 sps:$4 sm:$0xff]  }
 0x6c6   : > { %v8437_v48 = vpop.f32.mrf.mxu1  ;;  %9841 = vmatprep.subr.bf16.mxu0 %v15829_v63  ;;  %v15871_v63 = vld [vmem:[#allocation10 + $0xbb4] ss:$8 sps:$4 sm:$0xff]   ;;  %v9079_v52 = vld [vmem:[#allocation2 + $0x72] sm:$0xff] }
 0x6c7   : > { %9707 = vmatpush2.bf16.msra.mxu1 %v15830_v23  ;;  %v7691_v48 = vld [vmem:[#allocation3 + $0xf6] sm:$0xff]  ;;  %v7675_v23 = vld [vmem:[#allocation3 + $0x10b] sm:$0xff]  ;;  %v9053_v30 = vld [vmem:[#allocation2 + $0x51] sm:$0xff] }
 0x6c8   : > { %8587 = vmatmul.mubr.bf16.gmra.mxu0 %v7713_v54  ;;  %v8439_v32 = vpop.f32.mrf.mxu1  ;;  %9708 = vmatprep.subr.bf16.mxu1 %v15841_v40  ;;  %v15844_v54 = vld [vmem:[#allocation10 + $0xb04] ss:$8 sps:$4 sm:$0xff]  }
 0x6c9   : > { %8596 = vmatprep.mubr.bf16.mxu0 %v16730_v51  ;;  %9842 = vmatpush1.bf16.msra.mxu0 %v15827_v56  ;;  %v15848_v32 = vld [vmem:[#allocation10 + $0xbf0] ss:$8 sps:$4 sm:$0xff]   ;;  %v7748_v56 = vpack.c.bf16 %v7696_v9, %v7695_v5  ;;  %v7697_v40 = vld [vmem:[#allocation3 + $0x126] sm:$0xff] }
 0x6ca   : > { %v8441_v57 = vpop.f32.mrf.mxu1  ;;  %9843 = vmatprep.subr.bf16.mxu0 %v15835_v34  ;;  %v7752_v34 = vpack.c.bf16 %v7676_v60, %v7675_v23  ;;  %v7753_v4 = vpack.c.bf16 %v7698_v53, %v7697_v40  ;;  %v9103_v9 = vld [vmem:[#allocation2 + $0x83] sm:$0xff] }
 0x6cb   : > { %9709 = vmatpush2.bf16.msra.mxu1 %v15839_v20  ;;  %v15878_v20 = vld [vmem:[#allocation10 + $0xa80] ss:$8 sps:$4 sm:$0xff]   ;;  %v9081_v23 = vld [vmem:[#allocation2 + $0x82] sm:$0xff]  ;;  %v9082_v60 = vld [vmem:[#allocation2 + $0x8a] sm:$0xff] }
 0x6cc   : > { %9710 = vmatprep.subr.bf16.mxu1 %v15847_v22  ;;  %v17897_v22 = vld [vmem:[#allocation2] sm:$0xff] }
 0x6cd   : > { %9844 = vmatpush1.bf16.msra.mxu0 %v15833_v27  ;;  %v15869_v27 = vld [vmem:[#allocation10 + $0xbb0] ss:$8 sps:$4 sm:$0xff]  }
 0x6ce   : > { %9845 = vmatprep.subr.bf16.mxu0 %v15838_v35  ;;  %v15872_v35 = vld [vmem:[#allocation10 + $0xa90] ss:$8 sps:$4 sm:$0xff]  }
 0x6cf   : > { %9711 = vmatpush2.bf16.msra.mxu1 %v15845_v55 }
 0x6d0   : > { %8597 = vmatmul.mubr.bf16.gmra.mxu0 %v7718_v3  ;;  %v7692_v3 = vld [vmem:[#allocation3 + $0xfe] sm:$0xff]  ;;  %9712 = vmatprep.subr.bf16.mxu1 %v15853_v17  ;;  %v9099_v17 = vld [vmem:[#allocation2 + $0x63] sm:$0xff] }
 0x6d1   : > { %8606 = vmatprep.mubr.bf16.mxu0 %v16730_v51  ;;  %9846 = vmatpush1.bf16.msra.mxu0 %v15836_v61  ;;  %v7738_v57 = vpack.c.bf16 %v7692_v3, %v7691_v48  ;;  %v7751_v61 = vpack.c.bf16 %v7654_v62, %v7653_v45  ;;  %v17901_v48 = vpack.c.bf16 %v17897_v22, %v17897_v22  ;;  %v15886_v3 = vld [vmem:[#allocation10 + $0xb84] ss:$8 sps:$4 sm:$0xff]   ;;  %v15889_v45 = vld [vmem:[#allocation10 + $0xc74] ss:$8 sps:$4 sm:$0xff]  }
 0x6d2   : > { %9847 = vmatprep.subr.bf16.mxu0 %v15844_v54  ;;  %v9054_v54 = vld [vmem:[#allocation2 + $0x59] sm:$0xff]  ;;  %v9158_v62 = vpack.c.bf16 %v9082_v60, %v9081_v23 }
 0x6d3   : > { %v9142_v55 = vpack.c.bf16 %v9054_v54, %v9053_v30  ;;  %v15898_v54 = vld [vmem:[#allocation10 + $0xc44] ss:$8 sps:$4 sm:$0xff]  }
 0x6d5   : > { %9848 = vmatpush1.bf16.msra.mxu0 %v15842_v21  ;;  %v15881_v21 = vld [vmem:[#allocation10 + $0xb90] ss:$8 sps:$4 sm:$0xff]  }
 0x6d6   : > { %9849 = vmatprep.subr.bf16.mxu0 %v15850_v50  ;;  %v9098_v50 = vld [vmem:[#allocation2 + $0x5b] sm:$0xff] }
 0x6d8   : > { %8607 = vmatmul.mubr.bf16.gmra.mxu0 %v7723_v59  ;;  %v7672_v59 = vld [vmem:[#allocation3 + $0xf3] sm:$0xff] }
 0x6d9   : > { %8616 = vmatprep.mubr.bf16.mxu0 %v16730_v51  ;;  %v7742_v43 = vpack.c.bf16 %v7672_v59, %v7671_v28  ;;  %9850 = vmatpush2.bf16.msra.mxu0 %v15848_v32  ;;  %10471 = vst [vmem:[#allocation3 + $0xf2] sm:$0xff] %v17775_v38  ;;  %10472 = vst [vmem:[#allocation3 + $0xfa] sm:$0xf] %v17775_v38  ;;  %v15883_v38 = vld [vmem:[#allocation10 + $0xb94] ss:$8 sps:$4 sm:$0xff]   ;;  %v9075_v59 = vld [vmem:[#allocation2 + $0x52] sm:$0xff] }
 0x6da   : > { %9851 = vmatprep.subr.bf16.mxu0 %v15856_v11  ;;  %v15884_v32 = vld [vmem:[#allocation10 + $0xb80] ss:$8 sps:$4 sm:$0xff]  }
 0x6db   : > { %8503 = vmatprep.mubr.bf16.mxu1 %v7742_v43  ;;  %v9076_v43 = vld [vmem:[#allocation2 + $0x5a] sm:$0xff] }
 0x6dc   : > { %8504 = vmatmul.mubr.bf16.gmra.mxu1 %v7741_v0  ;;  %v9143_v13 = vpack.c.bf16 %v9076_v43, %v9075_v59  ;;  %v9056_v0 = vld [vmem:[#allocation2 + $0x69] sm:$0xff] }
 0x6dd   : > { %9852 = vmatpush2.bf16.msra.mxu0 %v15854_v6  ;;  %8513 = vmatprep.mubr.bf16.mxu1 %v7747_v44  ;;  %v9100_v6 = vld [vmem:[#allocation2 + $0x6b] sm:$0xff]  ;;  %v9101_v44 = vld [vmem:[#allocation2 + $0x73] sm:$0xff] }
 0x6de   : > { %9853 = vmatprep.subr.bf16.mxu0 %v15859_v7  ;;  %v9149_v11 = vpack.c.bf16 %v9100_v6, %v9099_v17  ;;  %v9058_v7 = vld [vmem:[#allocation2 + $0x79] sm:$0xff]  ;;  %v15899_v43 = vld [vmem:[#allocation10 + $0xc30] ss:$8 sps:$4 sm:$0xff]  }
 0x6e0   : > { %8617 = vmatmul.mubr.bf16.gmra.mxu0 %v7728_v24  ;;  %v15851_v24 = vld [vmem:[#allocation10 + $0xac0] ss:$8 sps:$4 sm:$0xff]  }
 0x6e1   : > { %8626 = vmatprep.mubr.bf16.mxu0 %v16730_v51  ;;  %9713 = vmatpush2.bf16.msra.mxu1 %v15851_v24  ;;  %v9147_v24 = vpack.c.bf16 %v9056_v0, %v9055_v47  ;;  %v17915_v47 = vld [vmem:[#allocation12 + $0x6] sm:$0x3] }
 0x6e2   : > { %9714 = vmatprep.subr.bf16.mxu1 %v15862_v26  ;;  %9854 = vmatpush2.bf16.msra.mxu0 %v15857_v46  ;;  %v9148_v46 = vpack.c.bf16 %v9078_v31, %v9077_v37  ;;  %v7841_v6 = vrot.slane %v17915_v47, %v17299_v39 }
 0x6e3   : > { %9855 = vmatprep.subr.bf16.mxu0 %v15865_v1  ;;  %v9060_v1 = vld [vmem:[#allocation2 + $0x89] sm:$0xff] }
 0x6e4   : > { %8514 = vmatmul.mubr.bf16.gmra.mxu1 %v7746_v12  ;;  %v9153_v12 = vpack.c.bf16 %v9080_v25, %v9079_v52 }
 0x6e5   : > { %9715 = vmatpush2.bf16.msra.mxu1 %v15860_v36  ;;  %8523 = vmatprep.mubr.bf16.mxu1 %v7752_v34  ;;  %v9102_v36 = vld [vmem:[#allocation2 + $0x7b] sm:$0xff] }
 0x6e6   : > { %9856 = vmatpush2.bf16.msra.mxu0 %v15863_v58  ;;  %9716 = vmatprep.subr.bf16.mxu1 %v15868_v41  ;;  %v9154_v26 = vpack.c.bf16 %v9102_v36, %v9101_v44  ;;  %v9059_v58 = vld [vmem:[#allocation2 + $0x81] sm:$0xff]  ;;  %v17908_v41 = vpop.f32.mrf.mxu0 }
 0x6e7   : > { %9857 = vmatprep.subr.bf16.mxu0 %v15871_v63  ;;  %v15887_v34 = vld [vmem:[#allocation10 + $0xc70] ss:$8 sps:$4 sm:$0xff]   ;;  %v15904_v44 = vld [vmem:[#allocation10 + $0xc24] ss:$8 sps:$4 sm:$0xff]  }
 0x6e8   : > { %8627 = vmatmul.mubr.bf16.gmra.mxu0 %v7733_v33  ;;  %v15874_v33 = vld [vmem:[#allocation10 + $0xa94] ss:$8 sps:$4 sm:$0xff]   ;;  %v17910_v5 = vpop.f32.mrf.mxu0 }
 0x6e9   : > { %8636 = vmatprep.mubr.bf16.mxu0 %v16730_v51  ;;  %9717 = vmatpush2.bf16.msra.mxu1 %v15866_v16  ;;  %v9157_v16 = vpack.c.bf16 %v9060_v1, %v9059_v58 }
 0x6ea   : > { %9858 = vmatpush2.bf16.msra.mxu0 %v15869_v27  ;;  %9718 = vmatprep.subr.bf16.mxu1 %v15874_v33  ;;  %v15892_v33 = vld [vmem:[#allocation10 + $0xc64] ss:$8 sps:$4 sm:$0xff]  }
 0x6eb   : > { %9859 = vmatprep.subr.bf16.mxu0 %v15877_v49 }
 0x6ec   : > { %8524 = vmatmul.mubr.bf16.gmra.mxu1 %v7751_v61  ;;  %v17913_v61 = vpop.f32.mrf.mxu0 }
 0x6ed   : > { %9719 = vmatpush2.bf16.msra.mxu1 %v15872_v35  ;;  %9722 = vmatprep.mubr.bf16.mxu1 %v9142_v55 }
 0x6ee   : > { %9860 = vmatpush2.bf16.msra.mxu0 %v15875_v15  ;;  %9720 = vmatprep.subr.bf16.mxu1 %v15880_v8  ;;  %v15890_v15 = vld [vmem:[#allocation10 + $0xc60] ss:$8 sps:$4 sm:$0xff]  }
 0x6ef   : > { %9861 = vmatprep.subr.bf16.mxu0 %v15883_v38  ;;  %v15893_v38 = vld [vmem:[#allocation10 + $0xc50] ss:$8 sps:$4 sm:$0xff]  }
 0x6f0   : > { %8637 = vmatmul.mubr.bf16.gmra.mxu0 %v7738_v57  ;;  %v9097_v57 = vld [vmem:[#allocation2 + $0x53] sm:$0xff] }
 0x6f1   : > { %8646 = vmatprep.mubr.bf16.mxu0 %v16730_v51  ;;  %9721 = vmatpush2.bf16.msra.mxu1 %v15878_v20  ;;  %v9144_v28 = vpack.c.bf16 %v9098_v50, %v9097_v57  ;;  %v15895_v20 = vld [vmem:[#allocation10 + $0xc54] ss:$8 sps:$4 sm:$0xff]  }
 0x6f2   : > { %9862 = vmatpush2.bf16.msra.mxu0 %v15881_v21  ;;  %9976 = vmatprep.subr.bf16.mxu1 %v15889_v45 }
 0x6f3   : > { %9863 = vmatprep.subr.bf16.mxu0 %v15886_v3 }
 0x6f4   : > { %9723 = vmatmul.mubr.bf16.vlgmr.msra.gmra.mxu1 %v17901_v48 }
 0x6f5   : > { %9732 = vmatprep.mubr.bf16.mxu1 %v9147_v24  ;;  %9977 = vmatpush1.bf16.msra.mxu1 %v15887_v34 }
 0x6f6   : > { %9864 = vmatpush2.bf16.msra.mxu0 %v15884_v32  ;;  %9978 = vmatprep.subr.bf16.mxu1 %v15892_v33  ;;  %v15896_v32 = vld [vmem:[#allocation10 + $0xc40] ss:$8 sps:$4 sm:$0xff]  }
 0x6f8   : > { %8647 = vmatmul.mubr.bf16.gmra.mxu0 %v7743_v42  ;;  %v9057_v42 = vld [vmem:[#allocation2 + $0x71] sm:$0xff] }
 0x6f9   : > { %8656 = vmatprep.mubr.bf16.mxu0 %v16730_v51  ;;  %v9152_v19 = vpack.c.bf16 %v9058_v7, %v9057_v42  ;;  %9979 = vmatpush1.bf16.msra.mxu1 %v15890_v15  ;;  %v8333_v42 = vadd.f32 %v17905_v10, %v7841_v6 }
 0x6fa   : > { %9980 = vmatprep.subr.bf16.mxu1 %v15895_v20 }
 0x6fc   : > { %9733 = vmatmul.mubr.bf16.gmra.mxu1 %v17901_v48 }
 0x6fd   : > { %9742 = vmatprep.mubr.bf16.mxu1 %v9152_v19  ;;  %9981 = vmatpush1.bf16.msra.mxu1 %v15893_v38  ;;  %v15902_v19 = vld [vmem:[#allocation10 + $0xc20] ss:$8 sps:$4 sm:$0xff]  }
 0x6fe   : > { %9982 = vmatprep.subr.bf16.mxu1 %v15898_v54 }
 0x700   : > { %8657 = vmatmul.mubr.bf16.gmra.mxu0 %v7748_v56  ;;  %v9104_v56 = vld [vmem:[#allocation2 + $0x8b] sm:$0xff] }
 0x701   : > { %8666 = vmatprep.mubr.bf16.mxu0 %v16730_v51  ;;  %v9159_v63 = vpack.c.bf16 %v9104_v56, %v9103_v9  ;;  %9983 = vmatpush1.bf16.msra.mxu1 %v15896_v32 }
 0x704   : > { %9743 = vmatmul.mubr.bf16.gmra.mxu1 %v17901_v48 }
 0x705   : > { %9752 = vmatprep.mubr.bf16.mxu1 %v9157_v16 }
 0x708   : > { %8667 = vmatmul.mubr.bf16.gmra.mxu0 %v7753_v4 }
 0x709   : > { %9865 = vmatprep.mubr.bf16.mxu0 %v9144_v28 }
 0x70c   : > { %9753 = vmatmul.mubr.bf16.gmra.mxu1 %v17901_v48 }
 0x710   : > { %9866 = vmatmul.mubr.bf16.vlgmr.msra.gmra.mxu0 %v9143_v13  ;;  %v15901_v13 = vld [vmem:[#allocation10 + $0xc34] ss:$8 sps:$4 sm:$0xff]  }
 0x711   : > { %9875 = vmatprep.mubr.bf16.mxu0 %v9149_v11  ;;  %9984 = vmatprep.subr.bf16.mxu1 %v15901_v13 }
 0x712   : > { %9985 = vmatpush1.bf16.msra.mxu1 %v15899_v43  ;;  %v17938_v43 = vld [vmem:[#allocation2 + $0x6c] sm:$0xff] }
 0x713   : > { %9986 = vmatprep.subr.bf16.mxu1 %v15904_v44 }
 0x716   : > { %9987 = vmatpush1.bf16.msra.mxu1 %v15902_v19  ;;  %v7845_v19 = vrot.slane %v17915_v47, %v17381_v18 }
 0x718   : > { %9876 = vmatmul.mubr.bf16.gmra.mxu0 %v9148_v46  ;;  %v8335_v47 = vadd.f32 %v17908_v41, %v7845_v19 }
 0x719   : > { %9885 = vmatprep.mubr.bf16.mxu0 %v9154_v26 }
 0x720   : > { %9886 = vmatmul.mubr.bf16.gmra.mxu0 %v9153_v12  ;;  %v8337_v12 = vadd.f32 %v17910_v5, %v7841_v6 }
 0x721   : > { %9895 = vmatprep.mubr.bf16.mxu0 %v9159_v63 }
 0x728   : > { %9896 = vmatmul.mubr.bf16.gmra.mxu0 %v9158_v62 }
 0x74c   : > { %v8445_v27 = vpop.f32.mrf.mxu1 }
 0x74e   : > { %v8447_v35 = vpop.f32.mrf.mxu1 }
 0x74f   : > { %v15905_v35 = vld [vmem:[#allocation10 + $0xc10] ss:$8 sps:$4 sm:$0xff]  }
 0x750   : > { %v8342_v49 = vpop.f32.mrf.mxu0  ;;  %v8449_v8 = vpop.f32.mrf.mxu1 }
 0x751   : > { %v15907_v49 = vld [vmem:[#allocation10 + $0xc14] ss:$8 sps:$4 sm:$0xff]  }
 0x752   : > { %v8344_v40 = vpop.f32.mrf.mxu0  ;;  %v8451_v53 = vpop.f32.mrf.mxu1  ;;  %9988 = vmatprep.subr.bf16.mxu1 %v15907_v49 }
 0x753   : > { %9989 = vmatpush1.bf16.msra.mxu1 %v15905_v35  ;;  %v15908_v40 = vld [vmem:[#allocation10 + $0xc00] ss:$8 sps:$4 sm:$0xff]   ;;  %v15910_v53 = vld [vmem:[#allocation10 + $0xc04] ss:$8 sps:$4 sm:$0xff]  }
 0x754   : > { %v8346_v4 = vpop.f32.mrf.mxu0  ;;  %9990 = vmatprep.subr.bf16.mxu1 %v15910_v53 }
 0x755   : > { %v8455_v30 = vpop.f32.mrf.mxu1 }
 0x756   : > { %v8348_v21 = vpop.f32.mrf.mxu0 }
 0x757   : > { %v8457_v55 = vpop.f32.mrf.mxu1  ;;  %9991 = vmatpush1.bf16.msra.mxu1 %v15908_v40  ;;  %v17929_v21 = vld [vmem:[#allocation2 + $0x54] sm:$0xff] }
 0x758   : > { %v8352_v3 = vpop.f32.mrf.mxu0  ;;  %v17931_v55 = vld [vmem:[#allocation2 + $0x5c] sm:$0xff] }
 0x759   : > { %v8459_v57 = vpop.f32.mrf.mxu1  ;;  %v9145_v32 = vpack.c.bf16 %v17931_v55, %v17929_v21  ;;  %11818 = vst [vmem:[#allocation2 + $0x58] sm:$0xff] %v17897_v22  ;;  %v15911_v55 = vld [vmem:[#allocation10 + $0xcf0] ss:$8 sps:$4 sm:$0xff]  }
 0x75a   : > { %v8354_v50 = vpop.f32.mrf.mxu0 }
 0x75b   : > { %v8461_v28 = vpop.f32.mrf.mxu1 }
 0x75c   : > { %v8356_v59 = vpop.f32.mrf.mxu0 }
 0x75d   : > { %v8465_v0 = vpop.f32.mrf.mxu1  ;;  %v17936_v59 = vld [vmem:[#allocation2 + $0x64] sm:$0xff] }
 0x75e   : > { %v8358_v24 = vpop.f32.mrf.mxu0  ;;  %v9150_v0 = vpack.c.bf16 %v17938_v43, %v17936_v59  ;;  %11819 = vst [vmem:[#allocation2 + $0x60] sm:$0xff] %v17897_v22  ;;  %11820 = vst [vmem:[#allocation2 + $0x68] sm:$0xff] %v17897_v22 }
 0x75f   : > { %v8467_v17 = vpop.f32.mrf.mxu1 }
 0x760   : > { %v8362_v11 = vpop.f32.mrf.mxu0 }
 0x761   : > { %v8469_v37 = vpop.f32.mrf.mxu1  ;;  %v17944_v11 = vld [vmem:[#allocation2 + $0x74] sm:$0xff] }
 0x762   : > { %v8364_v31 = vpop.f32.mrf.mxu0  ;;  %v17946_v37 = vld [vmem:[#allocation2 + $0x7c] sm:$0xff]  ;;  %11821 = vst [vmem:[#allocation2 + $0x70] sm:$0xff] %v17897_v22 }
 0x763   : > { %v8471_v46 = vpop.f32.mrf.mxu1  ;;  %11822 = vst [vmem:[#allocation2 + $0x78] sm:$0xff] %v17897_v22 }
 0x764   : > { %v8366_v7 = vpop.f32.mrf.mxu0  ;;  %v9155_v46 = vpack.c.bf16 %v17946_v37, %v17944_v11  ;;  %v15914_v11 = vld [vmem:[#allocation10 + $0xce0] ss:$8 sps:$4 sm:$0xff]   ;;  %v15916_v37 = vld [vmem:[#allocation10 + $0xce4] ss:$8 sps:$4 sm:$0xff]  }
 0x765   : > { %v8475_v36 = vpop.f32.mrf.mxu1 }
 0x766   : > { %v17920_v26 = vadd.f32 %v8475_v36, %v8333_v42  ;;  %v8368_v52 = vpop.f32.mrf.mxu0  ;;  %v9061_v36 = vld [vmem:[#allocation2 + $0x91] sm:$0xff] }
 0x767   : > { %v17922_v25 = vpop.f32.mrf.mxu1  ;;  %v9105_v52 = vld [vmem:[#allocation2 + $0x93] sm:$0xff] }
 0x768   : > { %v8372_v58 = vpop.f32.mrf.mxu0 }
 0x769   : > { %v8479_v1 = vpop.f32.mrf.mxu1  ;;  %v17954_v58 = vld [vmem:[#allocation2 + $0x84] sm:$0xff] }
 0x76a   : > { %v17925_v16 = vadd.f32 %v8479_v1, %v8337_v12  ;;  %v8374_v9 = vpop.f32.mrf.mxu0  ;;  %v9083_v12 = vld [vmem:[#allocation2 + $0x92] sm:$0xff]  ;;  %11823 = vst [vmem:[#allocation2 + $0x80] sm:$0xff] %v17897_v22 }
 0x76b   : > { %v17927_v56 = vpop.f32.mrf.mxu1  ;;  %v17956_v1 = vld [vmem:[#allocation2 + $0x8c] sm:$0xff]  ;;  %v17958_v9 = vld [vmem:[#allocation2 + $0x94] sm:$0xff] }
 0x76c   : > { %v8376_v10 = vpop.f32.mrf.mxu0  ;;  %11824 = vst [vmem:[#allocation2 + $0x88] sm:$0xff] %v17897_v22  ;;  %11825 = vst [vmem:[#allocation2 + $0x90] sm:$0xff] %v17897_v22 }
 0x76d   : > { %v8485_v63 = vpop.f32.mrf.mxu1 }
 0x76e   : > { %v8378_v23 = vpop.f32.mrf.mxu0  ;;  %v9160_v63 = vpack.c.bf16 %v17956_v1, %v17954_v58  ;;  %v15919_v58 = vld [vmem:[#allocation10 + $0xcd4] ss:$8 sps:$4 sm:$0xff]   ;;  %v15920_v1 = vld [vmem:[#allocation10 + $0xcc0] ss:$8 sps:$4 sm:$0xff]  }
 0x76f   : > { %v8487_v60 = vpop.f32.mrf.mxu1 }
 0x770   : > { %v8382_v27 = vpop.f32.mrf.mxu0  ;;  %v8478_v60 = vadd.f32 %v17922_v25, %v8335_v47  ;;  %v9066_v47 = vld [vmem:[#allocation2 + $0xb9] sm:$0xff] }
 0x771   : > { %v8489_v34 = vpop.f32.mrf.mxu1 }
 0x772   : > { %v8384_v45 = vpop.f32.mrf.mxu0  ;;  %v8339_v34 = vadd.f32 %v17913_v61, %v7845_v19 }
 0x773   : > { %v8491_v62 = vpop.f32.mrf.mxu1 }
 0x774   : > { %v8386_v33 = vpop.f32.mrf.mxu0 }
 0x775   : > { %v8482_v33 = vadd.f32 %v17927_v56, %v8339_v34 }
 0x776   : > { %v8388_v15 = vpop.f32.mrf.mxu0 }
 0x778   : > { %v8568_v5 = vpop.f32.mrf.mxu0 }
 0x77a   : > { %v8570_v8 = vpop.f32.mrf.mxu0 }
 0x77c   : > { %v8572_v20 = vpop.f32.mrf.mxu0 }
 0x77e   : > { %v8574_v4 = vpop.f32.mrf.mxu0 }
 0x780   : > { %v8578_v38 = vpop.f32.mrf.mxu0 }
 0x782   : > { %v8580_v30 = vpop.f32.mrf.mxu0 }
 0x784   : > { %v8582_v54 = vpop.f32.mrf.mxu0 }
 0x786   : > { %v8584_v3 = vpop.f32.mrf.mxu0 }
 0x788   : > { %v8588_v57 = vpop.f32.mrf.mxu0 }
 0x78a   : > { %v8590_v50 = vpop.f32.mrf.mxu0 }
 0x78c   : > { %v8592_v28 = vpop.f32.mrf.mxu0 }
 0x78e   : > { %v8594_v13 = vpop.f32.mrf.mxu0 }
 0x790   : > { %v8598_v24 = vpop.f32.mrf.mxu0 }
 0x792   : > { %v8600_v17 = vpop.f32.mrf.mxu0 }
 0x794   : > { %v8602_v6 = vpop.f32.mrf.mxu0 }
 0x796   : > { %v8604_v31 = vpop.f32.mrf.mxu0 }
 0x798   : > { %v8608_v42 = vpop.f32.mrf.mxu0 }
 0x79a   : > { %v8610_v7 = vpop.f32.mrf.mxu0 }
 0x79c   : > { %v8612_v44 = vpop.f32.mrf.mxu0 }
 0x79e   : > { %v8614_v10 = vpop.f32.mrf.mxu0 }
 0x79f   : > { %v9065_v10 = vld [vmem:[#allocation2 + $0xb1] sm:$0xff] }
 0x7a0   : > { %v8618_v23 = vpop.f32.mrf.mxu0 }
 0x7a1   : > { %v8619_v25 = vadd.f32 %v8618_v23, %v17920_v26 }
 0x7a2   : > { %v8620_v27 = vpop.f32.mrf.mxu0 }
 0x7a3   : > { %v8621_v45 = vadd.f32 %v8620_v27, %v8478_v60 }
 0x7a4   : > { %v8622_v62 = vpop.f32.mrf.mxu0 }
 0x7a5   : > { %v14593_v35 = vmul.f32 -1.442695, %v8621_v45  ;;  %v8623_v56 = vadd.f32 %v8622_v62, %v17925_v16  ;;  %v8495_v16 = vpop.f32.mrf.mxu1  ;;  %v9172_v62 = vpack.c.bf16 %v9066_v47, %v9065_v10 }
 0x7a6   : > { %v8624_v49 = vpop.f32.mrf.mxu0 }
 0x7a7   : > { %16327 = vpow2.f32 %v14593_v35  ;;  %v8625_v15 = vadd.f32 %v8624_v49, %v8482_v33  ;;  %v8497_v19 = vpop.f32.mrf.mxu1 }
 0x7a8   : > { %v8628_v57 = vpop.f32.mrf.mxu0 }
 0x7a9   : > { %v14594_v5 = vmul.f32 -1.442695, %v8625_v15  ;;  %v8499_v23 = vpop.f32.mrf.mxu1  ;;  %v9069_v57 = vld [vmem:[#allocation2 + $0xd1] sm:$0xff] }
 0x7ab   : > { %16329 = vpow2.f32 %v14594_v5  ;;  %v8501_v45 = vpop.f32.mrf.mxu1 }
 0x7ac   : > { %v9073_v45 = vld [vmem:[#allocation2 + $0xf1] sm:$0xff] }
 0x7ad   : > { %v8505_v49 = vpop.f32.mrf.mxu1 }
 0x7af   : > { %v8507_v5 = vpop.f32.mrf.mxu1 }
 0x7b4   : > { %v16328_v8 = vpop.eup %16327 }
 0x7b5   : > { %v8753_v20 = vadd.f32 1.0, %v16328_v8 }
 0x7b7   : > { %16331 = vrcp.f32 %v8753_v20  ;;  %v9067_v20 = vld [vmem:[#allocation2 + $0xc1] sm:$0xff] }
 0x7b8   : > { %v16330_v41 = vpop.eup %16329 }
 0x7b9   : > { %v8754_v40 = vadd.f32 1.0, %v16330_v41  ;;  %v9068_v41 = vld [vmem:[#allocation2 + $0xc9] sm:$0xff] }
 0x7bb   : > { %16333 = vrcp.f32 %v8754_v40  ;;  %v8509_v40 = vpop.f32.mrf.mxu1 }
 0x7bc   : > { %v9052_v40 = vld [vmem:[#allocation2 + $0xf8] sm:$0xf] }
 0x7c4   : > { %v16332_v53 = vpop.eup %16331 }
 0x7c5   : > { %v8819_v61 = vmul.f32 %v16332_v53, %v8619_v25  ;;  %v8511_v53 = vpop.f32.mrf.mxu1 }
 0x7c7   : > { %v8841_v4 = vadd.f32 %v8819_v61, %v17860_v2  ;;  %v8630_v2 = vpop.f32.mrf.mxu0  ;;  %v9177_v61 = vpack.c.bf16 %v9068_v41, %v9067_v20 }
 0x7c8   : > { %v16334_v38 = vpop.eup %16333 }
 0x7c9   : > { %9019 = vst [vmem:[#allocation2 + $0xa0] sm:$0xff] %v8841_v4  ;;  %v8820_v30 = vmul.f32 %v16334_v38, %v8623_v56  ;;  %v8515_v56 = vpop.f32.mrf.mxu1 }
 0x7cb   : > { %v8842_v54 = vadd.f32 %v8820_v30, %v17858_v29  ;;  %v8632_v29 = vpop.f32.mrf.mxu0  ;;  %v8517_v30 = vpop.f32.mrf.mxu1 }
 0x7cd   : > { %9020 = vst [vmem:[#allocation2 + $0xa8] sm:$0xff] %v8842_v54  ;;  %v9166_v3 = vpack.c.bf16 %v8842_v54, %v8841_v4 }
 0x7d0   : > { %v9062_v50 = vld [vmem:[#allocation2 + $0x99] sm:$0xff] }
 0x7d1   : > { %v9106_v28 = vld [vmem:[#allocation2 + $0x9b] sm:$0xff]  ;;  %v9162_v24 = vpack.c.bf16 %v9062_v50, %v9061_v36  ;;  %v8519_v50 = vpop.f32.mrf.mxu1 }
 0x7d2   : > { %v17973_v13 = vld [vmem:[#allocation2 + $0x9a] sm:$0xff]  ;;  %v9164_v26 = vpack.c.bf16 %v9106_v28, %v9105_v52  ;;  %v8634_v52 = vpop.f32.mrf.mxu0 }
 0x7d3   : > { %v9163_v17 = vpack.c.bf16 %v17973_v13, %v9083_v12  ;;  %v17976_v6 = vld [vmem:[#allocation2 + $0x9c] sm:$0xff]  ;;  %9762 = vmatprep.mubr.bf16.mxu1 %v9162_v24  ;;  %v8521_v24 = vpop.f32.mrf.mxu1 }
 0x7d4   : > { %11826 = vst [vmem:[#allocation2 + $0x98] sm:$0xff] %v17897_v22  ;;  %9905 = vmatprep.mubr.bf16.mxu0 %v9164_v26  ;;  %9763 = vmatmul.mubr.bf16.gmra.mxu1 %v17901_v48  ;;  %v9063_v31 = vld [vmem:[#allocation2 + $0xa1] sm:$0xff]  ;;  %v9064_v42 = vld [vmem:[#allocation2 + $0xa9] sm:$0xff]  ;;  %v8638_v34 = vpop.f32.mrf.mxu0  ;;  %v9165_v21 = vpack.c.bf16 %v17976_v6, %v17958_v9 }
 0x7d5   : > { %9906 = vmatmul.mubr.bf16.gmra.mxu0 %v9163_v17  ;;  %v9107_v7 = vld [vmem:[#allocation2 + $0xa3] sm:$0xff]  ;;  %v9167_v44 = vpack.c.bf16 %v9064_v42, %v9063_v31  ;;  %v9108_v36 = vld [vmem:[#allocation2 + $0xab] sm:$0xff]  ;;  %v8525_v2 = vpop.f32.mrf.mxu1  ;;  %v15922_v9 = vld [vmem:[#allocation10 + $0xcc4] ss:$8 sps:$4 sm:$0xff]  }
 0x7d6   : > { %v9169_v12 = vpack.c.bf16 %v9108_v36, %v9107_v7  ;;  %v17980_v60 = vld [vmem:[#allocation2 + $0xa2] sm:$0xff]  ;;  %v17982_v27 = vld [vmem:[#allocation2 + $0xaa] sm:$0xff]  ;;  %v8640_v33 = vpop.f32.mrf.mxu0 }
 0x7d7   : > { %9772 = vmatprep.mubr.bf16.mxu1 %v9167_v44  ;;  %v9168_v35 = vpack.c.bf16 %v17982_v27, %v17980_v60  ;;  %v8527_v29 = vpop.f32.mrf.mxu1  ;;  %v9071_v42 = vld [vmem:[#allocation2 + $0xe1] sm:$0xff]  ;;  %v9072_v7 = vld [vmem:[#allocation2 + $0xe9] sm:$0xff] }
 0x7d8   : > { %9915 = vmatprep.mubr.bf16.mxu0 %v9169_v12  ;;  %v8642_v15 = vpop.f32.mrf.mxu0  ;;  %v9187_v52 = vpack.c.bf16 %v9072_v7, %v9071_v42  ;;  %v9129_v59 = vld [vmem:[#allocation2 + $0xa4] sm:$0xff]  ;;  %v9130_v43 = vld [vmem:[#allocation2 + $0xac] sm:$0xff] }
 0x7d9   : > { %v8529_v19 = vpop.f32.mrf.mxu1  ;;  %v15925_v6 = vld [vmem:[#allocation10 + $0xcb4] ss:$8 sps:$4 sm:$0xff]  }
 0x7da   : > { %v8644_v8 = vpop.f32.mrf.mxu0 }
 0x7db   : > { %v8531_v36 = vpop.f32.mrf.mxu1 }
 0x7dc   : > { %9773 = vmatmul.mubr.bf16.gmra.mxu1 %v9166_v3  ;;  %v8648_v25 = vpop.f32.mrf.mxu0  ;;  %v9070_v3 = vld [vmem:[#allocation2 + $0xd9] sm:$0xff] }
 0x7dd   : > { %9916 = vmatmul.mubr.bf16.gmra.mxu0 %v9168_v35  ;;  %9782 = vmatprep.mubr.bf16.mxu1 %v9172_v62  ;;  %v9182_v26 = vpack.c.bf16 %v9070_v3, %v9069_v57  ;;  %v9724_v10 = vpop.f32.mrf.mxu1  ;;  %v9074_v62 = vld [vmem:[#allocation2 + $0xf9] sm:$0xf] }
 0x7de   : > { %v8650_v4 = vpop.f32.mrf.mxu0  ;;  %v9192_v15 = vpack.c.bf16 %v9074_v62, %v9073_v45  ;;  %v15926_v36 = vld [vmem:[#allocation10 + $0xca0] ss:$8 sps:$4 sm:$0xff]   ;;  %v15931_v10 = vld [vmem:[#allocation10 + $0xdf4] ss:$8 sps:$4 sm:$0xff]   ;;  %v15937_v45 = vld [vmem:[#allocation10 + $0xde4] ss:$8 sps:$4 sm:$0xff]  }
 0x7df   : > { %v9726_v23 = vpop.f32.mrf.mxu1  ;;  %11250 = vmatprep.subr.bf16.mxu1 %v15931_v10  ;;  %v15938_v62 = vld [vmem:[#allocation10 + $0xdd0] ss:$8 sps:$4 sm:$0xff]  }
 0x7e0   : > { %v8652_v38 = vpop.f32.mrf.mxu0  ;;  %v15934_v23 = vld [vmem:[#allocation10 + $0xc94] ss:$8 sps:$4 sm:$0xff]  }
 0x7e1   : > { %v9728_v33 = vpop.f32.mrf.mxu1 }
 0x7e2   : > { %v8654_v54 = vpop.f32.mrf.mxu0  ;;  %v15940_v33 = vld [vmem:[#allocation10 + $0xdd4] ss:$8 sps:$4 sm:$0xff]  }
 0x7e3   : > { %v9730_v35 = vpop.f32.mrf.mxu1 }
 0x7e4   : > { %9783 = vmatmul.mubr.bf16.gmra.mxu1 %v17901_v48  ;;  %v8658_v28 = vpop.f32.mrf.mxu0  ;;  %v15941_v35 = vld [vmem:[#allocation10 + $0xc80] ss:$8 sps:$4 sm:$0xff]  }
 0x7e5   : > { %9792 = vmatprep.mubr.bf16.mxu1 %v9177_v61  ;;  %v9734_v5 = vpop.f32.mrf.mxu1  ;;  %v9191_v61 = vpack.c.bf16 %v9052_v40, %v17897_v22  ;;  %v9087_v40 = vld [vmem:[#allocation2 + $0xb2] sm:$0xff] }
 0x7e6   : > { %v8660_v17 = vpop.f32.mrf.mxu0  ;;  %v9110_v5 = vld [vmem:[#allocation2 + $0xbb] sm:$0xff] }
 0x7e7   : > { %v9736_v20 = vpop.f32.mrf.mxu1 }
 0x7e8   : > { %v8662_v16 = vpop.f32.mrf.mxu0 }
 0x7e9   : > { %v9738_v25 = vpop.f32.mrf.mxu1 }
 0x7ea   : > { %v8664_v31 = vpop.f32.mrf.mxu0  ;;  %v9088_v25 = vld [vmem:[#allocation2 + $0xba] sm:$0xff] }
 0x7eb   : > { %v9740_v4 = vpop.f32.mrf.mxu1 }
 0x7ec   : > { %9793 = vmatmul.mubr.bf16.gmra.mxu1 %v17901_v48  ;;  %v8668_v44 = vpop.f32.mrf.mxu0  ;;  %v15949_v4 = vld [vmem:[#allocation10 + $0xd74] ss:$8 sps:$4 sm:$0xff]  }
 0x7ed   : > { %9802 = vmatprep.mubr.bf16.mxu1 %v9182_v26  ;;  %v9744_v38 = vpop.f32.mrf.mxu1 }
 0x7ee   : > { %v8670_v12 = vpop.f32.mrf.mxu0  ;;  %v15952_v38 = vld [vmem:[#allocation10 + $0xdb4] ss:$8 sps:$4 sm:$0xff]  }
 0x7ef   : > { %v9746_v54 = vpop.f32.mrf.mxu1  ;;  %v15929_v12 = vld [vmem:[#allocation10 + $0xdf0] ss:$8 sps:$4 sm:$0xff]  }
 0x7f0   : > { %v8672_v47 = vpop.f32.mrf.mxu0  ;;  %v9112_v54 = vld [vmem:[#allocation2 + $0xcb] sm:$0xff] }
 0x7f1   : > { %v9748_v3 = vpop.f32.mrf.mxu1  ;;  %v15932_v47 = vld [vmem:[#allocation10 + $0xc90] ss:$8 sps:$4 sm:$0xff]  }
 0x7f2   : > { %v8674_v34 = vpop.f32.mrf.mxu0 }
 0x7f3   : > { %v15935_v34 = vld [vmem:[#allocation10 + $0xde0] ss:$8 sps:$4 sm:$0xff]  }
 0x7f4   : > { %9803 = vmatmul.mubr.bf16.gmra.mxu1 %v17901_v48  ;;  %v9867_v49 = vpop.f32.mrf.mxu0 }
 0x7f5   : > { %9812 = vmatprep.mubr.bf16.mxu1 %v9187_v52  ;;  %v15928_v52 = vld [vmem:[#allocation10 + $0xca4] ss:$8 sps:$4 sm:$0xff]  }
 0x7f6   : > { %v9869_v8 = vpop.f32.mrf.mxu0  ;;  %v15943_v49 = vld [vmem:[#allocation10 + $0xc84] ss:$8 sps:$4 sm:$0xff]  }
 0x7f7   : > { %v15944_v8 = vld [vmem:[#allocation10 + $0xdc0] ss:$8 sps:$4 sm:$0xff]  }
 0x7f8   : > { %v9871_v41 = vpop.f32.mrf.mxu0 }
 0x7f9   : > { %v15946_v41 = vld [vmem:[#allocation10 + $0xdc4] ss:$8 sps:$4 sm:$0xff]  }
 0x7fa   : > { %v9873_v53 = vpop.f32.mrf.mxu0 }
 0x7fb   : > { %v9173_v53 = vpack.c.bf16 %v9088_v25, %v9087_v40  ;;  %v9117_v40 = vld [vmem:[#allocation2 + $0xf3] sm:$0xff]  ;;  %v9118_v25 = vld [vmem:[#allocation2 + $0xfb] sm:$0xf] }
 0x7fc   : > { %9813 = vmatmul.mubr.bf16.gmra.mxu1 %v17901_v48  ;;  %v9877_v56 = vpop.f32.mrf.mxu0  ;;  %v9750_v48 = vpop.f32.mrf.mxu1 }
 0x7fd   : > { %9822 = vmatprep.mubr.bf16.mxu1 %v9192_v15  ;;  %v9109_v15 = vld [vmem:[#allocation2 + $0xb3] sm:$0xff]  ;;  %v15950_v56 = vld [vmem:[#allocation10 + $0xdb0] ss:$8 sps:$4 sm:$0xff]  }
 0x7fe   : > { %v9879_v30 = vpop.f32.mrf.mxu0  ;;  %v9754_v24 = vpop.f32.mrf.mxu1  ;;  %v9174_v20 = vpack.c.bf16 %v9110_v5, %v9109_v15  ;;  %v15956_v48 = vld [vmem:[#allocation10 + $0xda0] ss:$8 sps:$4 sm:$0xff]   ;;  %v15982_v5 = vld [vmem:[#allocation10 + $0xe54] ss:$8 sps:$4 sm:$0xff]  }
 0x7ff   : > { %v9111_v30 = vld [vmem:[#allocation2 + $0xc3] sm:$0xff] }
 0x800   : > { %v9881_v57 = vpop.f32.mrf.mxu0  ;;  %v9756_v17 = vpop.f32.mrf.mxu1  ;;  %9925 = vmatprep.mubr.bf16.mxu0 %v9174_v20  ;;  %v9179_v3 = vpack.c.bf16 %v9112_v54, %v9111_v30  ;;  %v9089_v24 = vld [vmem:[#allocation2 + $0xc2] sm:$0xff]  ;;  %v15985_v20 = vld [vmem:[#allocation10 + $0xd24] ss:$8 sps:$4 sm:$0xff]  }
 0x801   : > { %9926 = vmatmul.mubr.bf16.gmra.mxu0 %v9173_v53  ;;  %v15953_v57 = vld [vmem:[#allocation10 + $0xd60] ss:$8 sps:$4 sm:$0xff]   ;;  %v9194_v53 = vpack.c.bf16 %v9118_v25, %v9117_v40  ;;  %v15989_v54 = vld [vmem:[#allocation10 + $0xd10] ss:$8 sps:$4 sm:$0xff]  }
 0x802   : > { %v9883_v50 = vpop.f32.mrf.mxu0  ;;  %v9758_v16 = vpop.f32.mrf.mxu1  ;;  %9935 = vmatprep.mubr.bf16.mxu0 %v9179_v3  ;;  %v9138_v3 = vld [vmem:[#allocation2 + $0xec] sm:$0xff] }
 0x803   : > { %v15955_v50 = vld [vmem:[#allocation10 + $0xd64] ss:$8 sps:$4 sm:$0xff]  }
 0x804   : > { %9823 = vmatmul.mubr.bf16.gmra.mxu1 %v9191_v61  ;;  %v9887_v28 = vpop.f32.mrf.mxu0  ;;  %v9760_v31 = vpop.f32.mrf.mxu1  ;;  %v15947_v61 = vld [vmem:[#allocation10 + $0xd70] ss:$8 sps:$4 sm:$0xff]  }
 0x805   : > { %10008 = vmatprep.mubr.bf16.mxu1 %v16730_v51  ;;  %v15958_v28 = vld [vmem:[#allocation10 + $0xda4] ss:$8 sps:$4 sm:$0xff]   ;;  %v15959_v31 = vld [vmem:[#allocation10 + $0xd90] ss:$8 sps:$4 sm:$0xff]  }
 0x806   : > { %v9889_v26 = vpop.f32.mrf.mxu0  ;;  %v9132_v16 = vld [vmem:[#allocation2 + $0xbc] sm:$0xff] }
 0x807   : > { %v9090_v26 = vld [vmem:[#allocation2 + $0xca] sm:$0xff] }
 0x808   : > { %v9891_v2 = vpop.f32.mrf.mxu0  ;;  %v9178_v17 = vpack.c.bf16 %v9090_v26, %v9089_v24  ;;  %v15992_v24 = vld [vmem:[#allocation10 + $0xe30] ss:$8 sps:$4 sm:$0xff]   ;;  %v15997_v26 = vld [vmem:[#allocation10 + $0xd04] ss:$8 sps:$4 sm:$0xff]  }
 0x809   : > { %v9131_v2 = vld [vmem:[#allocation2 + $0xb4] sm:$0xff] }
 0x80a   : > { %v9893_v29 = vpop.f32.mrf.mxu0  ;;  %9936 = vmatmul.mubr.bf16.gmra.mxu0 %v9178_v17  ;;  %11829 = vst [vmem:[#allocation2 + $0xb0] sm:$0xff] %v17897_v22  ;;  %11830 = vst [vmem:[#allocation2 + $0xb8] sm:$0xff] %v17897_v22  ;;  %v15995_v17 = vld [vmem:[#allocation10 + $0xd00] ss:$8 sps:$4 sm:$0xff]  }
 0x80b   : > { %v9175_v29 = vpack.c.bf16 %v9132_v16, %v9131_v2  ;;  %v10493_v2 = vld [vmem:[#allocation3 + $0x55] sm:$0xff]  ;;  %v10494_v16 = vld [vmem:[#allocation3 + $0x5d] sm:$0xff] }
 0x80c   : > { %10009 = vmatmul.mubr.bf16.vlgmr.msra.gmra.mxu1 %v9145_v32  ;;  %v9897_v42 = vpop.f32.mrf.mxu0  ;;  %v15913_v32 = vld [vmem:[#allocation10 + $0xcf4] ss:$8 sps:$4 sm:$0xff]  }
 0x80d   : > { %10018 = vmatprep.mubr.bf16.mxu1 %v16730_v51  ;;  %11117 = vmatprep.subr.bf16.mxu0 %v15913_v32  ;;  %v15961_v42 = vld [vmem:[#allocation10 + $0xd94] ss:$8 sps:$4 sm:$0xff]  }
 0x80e   : > { %v9899_v7 = vpop.f32.mrf.mxu0  ;;  %11118 = vmatpush1.bf16.msra.mxu0 %v15911_v55  ;;  %11251 = vmatpush1.bf16.msra.mxu1 %v15929_v12  ;;  %v15965_v55 = vld [vmem:[#allocation10 + $0xd80] ss:$8 sps:$4 sm:$0xff]   ;;  %v15974_v12 = vld [vmem:[#allocation10 + $0xd30] ss:$8 sps:$4 sm:$0xff]  }
 0x80f   : > { %11119 = vmatprep.subr.bf16.mxu0 %v15916_v37  ;;  %11252 = vmatprep.subr.bf16.mxu1 %v15937_v45  ;;  %v15962_v7 = vld [vmem:[#allocation10 + $0xd50] ss:$8 sps:$4 sm:$0xff]   ;;  %v15968_v37 = vld [vmem:[#allocation10 + $0xd40] ss:$8 sps:$4 sm:$0xff]  }
 0x810   : > { %v9901_v19 = vpop.f32.mrf.mxu0  ;;  %v9093_v45 = vld [vmem:[#allocation2 + $0xe2] sm:$0xff] }
 0x811   : > { %v15964_v19 = vld [vmem:[#allocation10 + $0xd54] ss:$8 sps:$4 sm:$0xff]  }
 0x812   : > { %v9903_v44 = vpop.f32.mrf.mxu0  ;;  %11120 = vmatpush1.bf16.msra.mxu0 %v15914_v11  ;;  %11253 = vmatpush1.bf16.msra.mxu1 %v15935_v34  ;;  %v15979_v34 = vld [vmem:[#allocation10 + $0xe64] ss:$8 sps:$4 sm:$0xff]  }
 0x813   : > { %11121 = vmatprep.subr.bf16.mxu0 %v15919_v58  ;;  %11254 = vmatprep.subr.bf16.mxu1 %v15940_v33  ;;  %v9113_v44 = vld [vmem:[#allocation2 + $0xd3] sm:$0xff]  ;;  %v9133_v58 = vld [vmem:[#allocation2 + $0xc4] sm:$0xff] }
 0x814   : > { %10019 = vmatmul.mubr.bf16.gmra.mxu1 %v9150_v0  ;;  %v9170_v0 = vpack.c.bf16 %v9130_v43, %v9129_v59  ;;  %v15967_v59 = vld [vmem:[#allocation10 + $0xd84] ss:$8 sps:$4 sm:$0xff]   ;;  %11831 = vst [vmem:[#allocation2 + $0xc0] sm:$0xff] %v17897_v22 }
 0x815   : > { %10028 = vmatprep.mubr.bf16.mxu1 %v16730_v51  ;;  %v9091_v43 = vld [vmem:[#allocation2 + $0xd2] sm:$0xff] }
 0x816   : > { %11255 = vmatpush1.bf16.msra.mxu1 %v15938_v62  ;;  %v9094_v62 = vld [vmem:[#allocation2 + $0xea] sm:$0xff] }
 0x817   : > { %11256 = vmatprep.subr.bf16.mxu1 %v15946_v41  ;;  %v9188_v33 = vpack.c.bf16 %v9094_v62, %v9093_v45  ;;  %v15983_v41 = vld [vmem:[#allocation10 + $0xd20] ss:$8 sps:$4 sm:$0xff]  }
 0x818   : > { %v10515_v62 = vld [vmem:[#allocation3 + $0x68] sm:$0xff] }
 0x81a   : > { %11257 = vmatpush1.bf16.msra.mxu1 %v15944_v8  ;;  %v15980_v8 = vld [vmem:[#allocation10 + $0xe50] ss:$8 sps:$4 sm:$0xff]  }
 0x81b   : > { %11258 = vmatprep.subr.bf16.mxu1 %v15952_v38  ;;  %v15986_v38 = vld [vmem:[#allocation10 + $0xe40] ss:$8 sps:$4 sm:$0xff]  }
 0x81c   : > { %10029 = vmatmul.mubr.bf16.gmra.mxu1 %v9155_v46  ;;  %v15917_v46 = vld [vmem:[#allocation10 + $0xcd0] ss:$8 sps:$4 sm:$0xff]  }
 0x81d   : > { %10038 = vmatprep.mubr.bf16.mxu1 %v16730_v51  ;;  %11122 = vmatpush1.bf16.msra.mxu0 %v15917_v46  ;;  %v15970_v46 = vld [vmem:[#allocation10 + $0xd44] ss:$8 sps:$4 sm:$0xff]  }
 0x81e   : > { %11123 = vmatprep.subr.bf16.mxu0 %v15922_v9  ;;  %11259 = vmatpush1.bf16.msra.mxu1 %v15950_v56  ;;  %v15971_v9 = vld [vmem:[#allocation10 + $0xe70] ss:$8 sps:$4 sm:$0xff]   ;;  %v9096_v56 = vld [vmem:[#allocation2 + $0xfa] sm:$0xf] }
 0x81f   : > { %11260 = vmatprep.subr.bf16.mxu1 %v15958_v28  ;;  %v15994_v28 = vld [vmem:[#allocation10 + $0xe34] ss:$8 sps:$4 sm:$0xff]  }
 0x821   : > { %11124 = vmatpush1.bf16.msra.mxu0 %v15920_v1  ;;  %v9134_v1 = vld [vmem:[#allocation2 + $0xcc] sm:$0xff] }
 0x822   : > { %11125 = vmatprep.subr.bf16.mxu0 %v15925_v6  ;;  %11261 = vmatpush1.bf16.msra.mxu1 %v15956_v48  ;;  %v9180_v6 = vpack.c.bf16 %v9134_v1, %v9133_v58  ;;  %11832 = vst [vmem:[#allocation2 + $0xc8] sm:$0xff] %v17897_v22  ;;  %v18021_v48 = vld [vmem:[#allocation2] sm:$0xff]  ;;  %v10534_v58 = vld [vmem:[#allocation3 + $0x63] sm:$0xff] }
 0x823   : > { %11262 = vmatprep.subr.bf16.mxu1 %v15961_v42  ;;  %v15998_v42 = vld [vmem:[#allocation10 + $0xe20] ss:$8 sps:$4 sm:$0xff]  }
 0x824   : > { %10039 = vmatmul.mubr.bf16.gmra.mxu1 %v9160_v63  ;;  %v15923_v63 = vld [vmem:[#allocation10 + $0xcb0] ss:$8 sps:$4 sm:$0xff]  }
 0x825   : > { %10048 = vmatprep.mubr.bf16.mxu1 %v16730_v51  ;;  %11126 = vmatpush1.bf16.msra.mxu0 %v15923_v63  ;;  %v15973_v63 = vld [vmem:[#allocation10 + $0xe74] ss:$8 sps:$4 sm:$0xff]  }
 0x826   : > { %11127 = vmatprep.subr.bf16.mxu0 %v15928_v52  ;;  %11263 = vmatpush1.bf16.msra.mxu1 %v15959_v31  ;;  %v9116_v52 = vld [vmem:[#allocation2 + $0xeb] sm:$0xff]  ;;  %v16000_v31 = vld [vmem:[#allocation10 + $0xe24] ss:$8 sps:$4 sm:$0xff]  }
 0x827   : > { %11264 = vmatprep.subr.bf16.mxu1 %v15967_v59  ;;  %v10495_v59 = vld [vmem:[#allocation3 + $0x65] sm:$0xff] }
 0x829   : > { %11128 = vmatpush1.bf16.msra.mxu0 %v15926_v36  ;;  %v9115_v36 = vld [vmem:[#allocation2 + $0xe3] sm:$0xff] }
 0x82a   : > { %11129 = vmatprep.subr.bf16.mxu0 %v15934_v23  ;;  %11265 = vmatpush1.bf16.msra.mxu1 %v15965_v55  ;;  %v9189_v10 = vpack.c.bf16 %v9116_v52, %v9115_v36  ;;  %v15977_v23 = vld [vmem:[#allocation10 + $0xe60] ss:$8 sps:$4 sm:$0xff]   ;;  %v16003_v55 = vld [vmem:[#allocation10 + $0xe14] ss:$8 sps:$4 sm:$0xff]  }
 0x82b   : > { %11266 = vmatprep.subr.bf16.mxu1 %v15973_v63  ;;  %v10514_v63 = vld [vmem:[#allocation3 + $0x60] sm:$0xff]  ;;  %v10497_v36 = vld [vmem:[#allocation3 + $0x75] sm:$0xff] }
 0x82c   : > { %10049 = vmatmul.mubr.bf16.gmra.mxu1 %v9165_v21  ;;  %v9114_v21 = vld [vmem:[#allocation2 + $0xdb] sm:$0xff]  ;;  %v10498_v52 = vld [vmem:[#allocation3 + $0x7d] sm:$0xff] }
 0x82d   : > { %10058 = vmatprep.mubr.bf16.mxu1 %v16730_v51  ;;  %11130 = vmatpush1.bf16.msra.mxu0 %v15932_v47  ;;  %v9184_v32 = vpack.c.bf16 %v9114_v21, %v9113_v44  ;;  %v15976_v47 = vld [vmem:[#allocation10 + $0xd34] ss:$8 sps:$4 sm:$0xff]   ;;  %v9140_v44 = vld [vmem:[#allocation2 + $0xfc] sm:$0xf] }
 0x82e   : > { %11131 = vmatprep.subr.bf16.mxu0 %v15943_v49  ;;  %11267 = vmatpush2.bf16.msra.mxu1 %v15971_v9  ;;  %v9136_v49 = vld [vmem:[#allocation2 + $0xdc] sm:$0xff]  ;;  %v10513_v9 = vld [vmem:[#allocation3 + $0x58] sm:$0xff] }
 0x82f   : > { %9945 = vmatprep.mubr.bf16.mxu0 %v9184_v32  ;;  %11268 = vmatprep.subr.bf16.mxu1 %v15979_v34  ;;  %v16001_v32 = vld [vmem:[#allocation10 + $0xe10] ss:$8 sps:$4 sm:$0xff]  }
 0x830   : > { %v10536_v34 = vld [vmem:[#allocation3 + $0x73] sm:$0xff] }
 0x831   : > { %11132 = vmatpush1.bf16.msra.mxu0 %v15941_v35  ;;  %v9135_v35 = vld [vmem:[#allocation2 + $0xd4] sm:$0xff] }
 0x832   : > { %11133 = vmatprep.subr.bf16.mxu0 %v15949_v4  ;;  %11269 = vmatpush2.bf16.msra.mxu1 %v15977_v23  ;;  %v9185_v15 = vpack.c.bf16 %v9136_v49, %v9135_v35  ;;  %11833 = vst [vmem:[#allocation2 + $0xd0] sm:$0xff] %v17897_v22  ;;  %v9095_v4 = vld [vmem:[#allocation2 + $0xf2] sm:$0xff]  ;;  %v10535_v23 = vld [vmem:[#allocation3 + $0x6b] sm:$0xff] }
 0x833   : > { %11270 = vmatprep.subr.bf16.mxu1 %v15982_v5  ;;  %v9193_v30 = vpack.c.bf16 %v9096_v56, %v9095_v4  ;;  %v10581_v45 = vpack.c.bf16 %v10536_v34, %v10535_v23  ;;  %v10517_v56 = vld [vmem:[#allocation3 + $0x78] sm:$0xff]  ;;  %v16028_v34 = vld [vmem:[#allocation10 + $0xe80] ss:$8 sps:$4 sm:$0xff]  }
 0x834   : > { %10059 = vmatmul.mubr.bf16.gmra.mxu1 %v9170_v0  ;;  %v9092_v0 = vld [vmem:[#allocation2 + $0xda] sm:$0xff] }
 0x835   : > { %10068 = vmatprep.mubr.bf16.mxu1 %v16730_v51  ;;  %11134 = vmatpush2.bf16.msra.mxu0 %v15947_v61  ;;  %v9183_v11 = vpack.c.bf16 %v9092_v0, %v9091_v43  ;;  %11834 = vst [vmem:[#allocation2 + $0xd8] sm:$0xff] %v17897_v22  ;;  %v15988_v61 = vld [vmem:[#allocation10 + $0xe44] ss:$8 sps:$4 sm:$0xff]   ;;  %v15991_v22 = vld [vmem:[#allocation10 + $0xd14] ss:$8 sps:$4 sm:$0xff]  }
 0x836   : > { %11135 = vmatprep.subr.bf16.mxu0 %v15955_v50  ;;  %11271 = vmatpush2.bf16.msra.mxu1 %v15980_v8  ;;  %v10496_v43 = vld [vmem:[#allocation3 + $0x6d] sm:$0xff]  ;;  %v10499_v8 = vld [vmem:[#allocation3 + $0x85] sm:$0xff] }
 0x837   : > { %9946 = vmatmul.mubr.bf16.gmra.mxu0 %v9183_v11  ;;  %11272 = vmatprep.subr.bf16.mxu1 %v15988_v61  ;;  %v10579_v0 = vpack.c.bf16 %v10496_v43, %v10495_v59  ;;  %v16009_v11 = vld [vmem:[#allocation10 + $0xe04] ss:$8 sps:$4 sm:$0xff]   ;;  %v16019_v59 = vld [vmem:[#allocation10 + $0xeb0] ss:$8 sps:$4 sm:$0xff]  }
 0x838   : > { %9955 = vmatprep.mubr.bf16.mxu0 %v9189_v10  ;;  %v10538_v61 = vld [vmem:[#allocation3 + $0x83] sm:$0xff] }
 0x839   : > { %11136 = vmatpush2.bf16.msra.mxu0 %v15953_v57  ;;  %v9137_v57 = vld [vmem:[#allocation2 + $0xe4] sm:$0xff] }
 0x83a   : > { %11137 = vmatprep.subr.bf16.mxu0 %v15964_v19  ;;  %11273 = vmatpush2.bf16.msra.mxu1 %v15986_v38  ;;  %v9190_v50 = vpack.c.bf16 %v9138_v3, %v9137_v57  ;;  %11835 = vst [vmem:[#allocation2 + $0xe0] sm:$0xff] %v18021_v48  ;;  %11836 = vst [vmem:[#allocation2 + $0xe8] sm:$0xff] %v18021_v48  ;;  %v9139_v19 = vld [vmem:[#allocation2 + $0xf4] sm:$0xff]  ;;  %v16004_v3 = vld [vmem:[#allocation10 + $0xef0] ss:$8 sps:$4 sm:$0xff]  }
 0x83b   : > { %11274 = vmatprep.subr.bf16.mxu1 %v15994_v28  ;;  %v9195_v21 = vpack.c.bf16 %v9140_v44, %v9139_v19  ;;  %11837 = vst [vmem:[#allocation2 + $0xf0] sm:$0xff] %v18021_v48  ;;  %v10518_v38 = vld [vmem:[#allocation3 + $0x80] sm:$0xff] }
 0x83c   : > { %10069 = vmatmul.mubr.bf16.gmra.mxu1 %v9175_v29  ;;  %v10574_v29 = vpack.c.bf16 %v10494_v16, %v10493_v2  ;;  %v16012_v28 = vld [vmem:[#allocation10 + $0xee4] ss:$8 sps:$4 sm:$0xff]   ;;  %v16015_v2 = vld [vmem:[#allocation10 + $0xed4] ss:$8 sps:$4 sm:$0xff]   ;;  %v16016_v44 = vld [vmem:[#allocation10 + $0xec0] ss:$8 sps:$4 sm:$0xff]  }
 0x83d   : > { %10078 = vmatprep.mubr.bf16.mxu1 %v16730_v51  ;;  %11138 = vmatpush2.bf16.msra.mxu0 %v15962_v7  ;;  %v18028_v7 = vpack.c.bf16 %v18021_v48, %v18021_v48 }
 0x83e   : > { %11139 = vmatprep.subr.bf16.mxu0 %v15970_v46  ;;  %11275 = vmatpush2.bf16.msra.mxu1 %v15992_v24  ;;  %v10533_v46 = vld [vmem:[#allocation3 + $0x5b] sm:$0xff] }
 0x83f   : > { %9956 = vmatmul.mubr.bf16.gmra.mxu0 %v9188_v33  ;;  %11276 = vmatprep.subr.bf16.mxu1 %v16000_v31  ;;  %v10576_v1 = vpack.c.bf16 %v10534_v58, %v10533_v46  ;;  %v10516_v33 = vld [vmem:[#allocation3 + $0x70] sm:$0xff]  ;;  %v16022_v46 = vld [vmem:[#allocation10 + $0xea0] ss:$8 sps:$4 sm:$0xff]  }
 0x840   : > { %9965 = vmatprep.mubr.bf16.mxu0 %v9194_v53  ;;  %v10537_v53 = vld [vmem:[#allocation3 + $0x7b] sm:$0xff]  ;;  %v16024_v58 = vld [vmem:[#allocation10 + $0xea4] ss:$8 sps:$4 sm:$0xff]  }
 0x841   : > { %11140 = vmatpush2.bf16.msra.mxu0 %v15968_v37  ;;  %v16007_v37 = vld [vmem:[#allocation10 + $0xe00] ss:$8 sps:$4 sm:$0xff]   ;;  %v10586_v4 = vpack.c.bf16 %v10538_v61, %v10537_v53  ;;  %v18049_v61 = vld [vmem:[#allocation3 + $0x6e] sm:$0xff] }
 0x842   : > { %11141 = vmatprep.subr.bf16.mxu0 %v15976_v47  ;;  %11277 = vmatpush2.bf16.msra.mxu1 %v15998_v42  ;;  %v16018_v42 = vld [vmem:[#allocation10 + $0xec4] ss:$8 sps:$4 sm:$0xff]  }
 0x843   : > { %11278 = vmatprep.subr.bf16.mxu1 %v16003_v55  ;;  %v16021_v55 = vld [vmem:[#allocation10 + $0xeb4] ss:$8 sps:$4 sm:$0xff]   ;;  %v18047_v53 = vld [vmem:[#allocation3 + $0x66] sm:$0xff] }
 0x844   : > { %10079 = vmatmul.mubr.bf16.gmra.mxu1 %v9180_v6  ;;  %v10575_v6 = vpack.c.bf16 %v10514_v63, %v10513_v9  ;;  %13033 = vst [vmem:[#allocation3 + $0x6a] sm:$0xff] %v18021_v48 }
 0x845   : > { %10088 = vmatprep.mubr.bf16.mxu1 %v16730_v51  ;;  %11142 = vmatpush2.bf16.msra.mxu0 %v15974_v12  ;;  %v10584_v12 = vpack.c.bf16 %v10498_v52, %v10497_v36  ;;  %v16025_v36 = vld [vmem:[#allocation10 + $0xe90] ss:$8 sps:$4 sm:$0xff]   ;;  %v16027_v52 = vld [vmem:[#allocation10 + $0xe94] ss:$8 sps:$4 sm:$0xff]  }
 0x846   : > { %11143 = vmatprep.subr.bf16.mxu0 %v15985_v20  ;;  %11279 = vmatpush2.bf16.msra.mxu1 %v16001_v32  ;;  %v10500_v20 = vld [vmem:[#allocation3 + $0x8d] sm:$0xff] }
 0x847   : > { %9966 = vmatmul.mubr.bf16.gmra.mxu0 %v9193_v30  ;;  %11280 = vmatprep.subr.bf16.mxu1 %v16009_v11  ;;  %v10589_v40 = vpack.c.bf16 %v10500_v20, %v10499_v8 }
 0x848   : > { %11149 = vmatprep.mubr.bf16.mxu0 %v10574_v29  ;;  %v16013_v29 = vld [vmem:[#allocation10 + $0xed0] ss:$8 sps:$4 sm:$0xff]  }
 0x849   : > { %11144 = vmatpush2.bf16.msra.mxu0 %v15983_v41 }
 0x84a   : > { %11145 = vmatprep.subr.bf16.mxu0 %v15991_v22  ;;  %11281 = vmatpush2.bf16.msra.mxu1 %v16007_v37  ;;  %v10585_v22 = vpack.c.bf16 %v10518_v38, %v10517_v56 }
 0x84c   : > { %10089 = vmatmul.mubr.bf16.gmra.mxu1 %v9185_v15  ;;  %v10580_v15 = vpack.c.bf16 %v10516_v33, %v10515_v62 }
 0x84d   : > { %10098 = vmatprep.mubr.bf16.mxu1 %v16730_v51  ;;  %11146 = vmatpush2.bf16.msra.mxu0 %v15989_v54 }
 0x84e   : > { %11147 = vmatprep.subr.bf16.mxu0 %v15997_v26  ;;  %v16010_v26 = vld [vmem:[#allocation10 + $0xee0] ss:$8 sps:$4 sm:$0xff]  }
 0x851   : > { %11148 = vmatpush2.bf16.msra.mxu0 %v15995_v17 }
 0x854   : > { %10099 = vmatmul.mubr.bf16.gmra.mxu1 %v9190_v50  ;;  %11150 = vmatmul.mubr.bf16.vlgmr.msra.gmra.mxu0 %v18028_v7  ;;  %v16006_v50 = vld [vmem:[#allocation10 + $0xef4] ss:$8 sps:$4 sm:$0xff]  }
 0x855   : > { %10108 = vmatprep.mubr.bf16.mxu1 %v16730_v51  ;;  %11159 = vmatprep.mubr.bf16.mxu0 %v10579_v0 }
 0x856   : > { %11383 = vmatprep.subr.bf16.mxu0 %v16006_v50 }
 0x857   : > { %11384 = vmatpush1.bf16.msra.mxu0 %v16004_v3 }
 0x858   : > { %11385 = vmatprep.subr.bf16.mxu0 %v16012_v28  ;;  %v18057_v28 = vld [vmem:[#allocation3 + $0x8b] sm:$0xff] }
 0x85b   : > { %11386 = vmatpush1.bf16.msra.mxu0 %v16010_v26  ;;  %v18061_v26 = vld [vmem:[#allocation3 + $0x90] sm:$0xff] }
 0x85c   : > { %10109 = vmatmul.mubr.bf16.gmra.mxu1 %v9195_v21  ;;  %11160 = vmatmul.mubr.bf16.gmra.mxu0 %v18028_v7 }
 0x85d   : > { %11282 = vmatprep.mubr.bf16.mxu1 %v10576_v1  ;;  %11169 = vmatprep.mubr.bf16.mxu0 %v10584_v12 }
 0x85e   : > { %11387 = vmatprep.subr.bf16.mxu0 %v16015_v2  ;;  %v18065_v2 = vld [vmem:[#allocation3 + $0x86] sm:$0xff] }
 0x85f   : > { %11388 = vmatpush1.bf16.msra.mxu0 %v16013_v29 }
 0x860   : > { %11389 = vmatprep.subr.bf16.mxu0 %v16018_v42 }
 0x863   : > { %11390 = vmatpush1.bf16.msra.mxu0 %v16016_v44 }
 0x864   : > { %11283 = vmatmul.mubr.bf16.vlgmr.msra.gmra.mxu1 %v10575_v6  ;;  %11170 = vmatmul.mubr.bf16.gmra.mxu0 %v18028_v7 }
 0x865   : > { %11292 = vmatprep.mubr.bf16.mxu1 %v10581_v45  ;;  %11179 = vmatprep.mubr.bf16.mxu0 %v10589_v40  ;;  %v16030_v45 = vld [vmem:[#allocation10 + $0xe84] ss:$8 sps:$4 sm:$0xff]  }
 0x866   : > { %11391 = vmatprep.subr.bf16.mxu0 %v16021_v55 }
 0x867   : > { %11392 = vmatpush1.bf16.msra.mxu0 %v16019_v59 }
 0x868   : > { %11393 = vmatprep.subr.bf16.mxu0 %v16024_v58 }
 0x86b   : > { %11394 = vmatpush1.bf16.msra.mxu0 %v16022_v46 }
 0x86c   : > { %11293 = vmatmul.mubr.bf16.gmra.mxu1 %v10580_v15  ;;  %11180 = vmatmul.mubr.bf16.gmra.mxu0 %v18028_v7 }
 0x86d   : > { %11302 = vmatprep.mubr.bf16.mxu1 %v10586_v4  ;;  %11395 = vmatprep.subr.bf16.mxu0 %v16027_v52  ;;  %v18051_v4 = vld [vmem:[#allocation3 + $0x76] sm:$0xff] }
 0x86e   : > { %v10582_v38 = vpack.c.bf16 %v18051_v4, %v18049_v61  ;;  %13034 = vst [vmem:[#allocation3 + $0x72] sm:$0xff] %v18021_v48 }
 0x86f   : > { %11396 = vmatpush1.bf16.msra.mxu0 %v16025_v36 }
 0x870   : > { %11397 = vmatprep.subr.bf16.mxu0 %v16030_v45 }
 0x873   : > { %11398 = vmatpush1.bf16.msra.mxu0 %v16028_v34 }
 0x874   : > { %11303 = vmatmul.mubr.bf16.gmra.mxu1 %v10585_v22 }
 0x894   : > { %v9764_v10 = vpop.f32.mrf.mxu1 }
 0x895   : > { %v9907_v47 = vpop.f32.mrf.mxu0 }
 0x896   : > { %v9766_v35 = vpop.f32.mrf.mxu1 }
 0x897   : > { %v9909_v49 = vpop.f32.mrf.mxu0 }
 0x898   : > { %v18034_v5 = vpop.f32.mrf.mxu1 }
 0x899   : > { %v9911_v42 = vpop.f32.mrf.mxu0 }
 0x89a   : > { %v18036_v41 = vpop.f32.mrf.mxu1 }
 0x89b   : > { %v9913_v55 = vpop.f32.mrf.mxu0 }
 0x89c   : > { %v18038_v25 = vpop.f32.mrf.mxu1 }
 0x89e   : > { %v18040_v30 = vpop.f32.mrf.mxu1 }
 0x8a0   : > { %v18043_v54 = vpop.f32.mrf.mxu1 }
 0x8a2   : > { %v18045_v57 = vpop.f32.mrf.mxu1 }
 0x8a4   : > { %v9784_v24 = vpop.f32.mrf.mxu1 }
 0x8a5   : > { %v18059_v24 = vld [vmem:[#allocation3 + $0x88] sm:$0xff] }
 0x8a6   : > { %v9786_v17 = vpop.f32.mrf.mxu1 }
 0x8a7   : > { %v18063_v17 = vld [vmem:[#allocation3 + $0x7e] sm:$0xff] }
 0x8a8   : > { %v9788_v16 = vpop.f32.mrf.mxu1  ;;  %13035 = vst [vmem:[#allocation3 + $0x7a] sm:$0xff] %v18021_v48  ;;  %13036 = vst [vmem:[#allocation3 + $0x82] sm:$0xff] %v18021_v48 }
 0x8a9   : > { %v18067_v16 = vld [vmem:[#allocation3 + $0x8e] sm:$0xff] }
 0x8aa   : > { %v9790_v31 = vpop.f32.mrf.mxu1  ;;  %13037 = vst [vmem:[#allocation3 + $0x8a] sm:$0xff] %v18021_v48 }
 0x8ab   : > { %v10587_v31 = vpack.c.bf16 %v18065_v2, %v18063_v17  ;;  %v16031_v17 = vld [vmem:[#allocation10 + $0xf70] ss:$8 sps:$4 sm:$0xff]   ;;  %v16033_v2 = vld [vmem:[#allocation10 + $0xf74] ss:$8 sps:$4 sm:$0xff]  }
 0x8ac   : > { %v9794_v19 = vpop.f32.mrf.mxu1  ;;  %12452 = vmatprep.subr.bf16.mxu1 %v16033_v2  ;;  %v16091_v2 = vld [vmem:[#allocation10 + $0x10f0] ss:$8 sps:$4 sm:$0xff]  }
 0x8ad   : > { %12453 = vmatpush1.bf16.msra.mxu1 %v16031_v17  ;;  %v10550_v17 = vld [vmem:[#allocation3 + $0xe3] sm:$0xff] }
 0x8ae   : > { %v9796_v21 = vpop.f32.mrf.mxu1 }
 0x8af   : > { %v9278_v21 = vld [vmem:[#allocation12 + $0x8] sm:$0x3] }
 0x8b0   : > { %v9798_v32 = vpop.f32.mrf.mxu1  ;;  %v9287_v59 = vrot.slane %v9278_v21, %v17381_v18 }
 0x8b2   : > { %v9800_v43 = vpop.f32.mrf.mxu1 }
 0x8b4   : > { %v9804_v0 = vpop.f32.mrf.mxu1 }
 0x8b5   : > { %v9917_v0 = vpop.f32.mrf.mxu0 }
 0x8b6   : > { %v9806_v11 = vpop.f32.mrf.mxu1 }
 0x8b7   : > { %v9919_v58 = vpop.f32.mrf.mxu0 }
 0x8b8   : > { %v9808_v37 = vpop.f32.mrf.mxu1 }
 0x8b9   : > { %v9771_v37 = vadd.f32 %v18036_v41, %v9287_v59  ;;  %v9921_v52 = vpop.f32.mrf.mxu0 }
 0x8ba   : > { %v9810_v1 = vpop.f32.mrf.mxu1 }
 0x8bc   : > { %v9814_v9 = vpop.f32.mrf.mxu1 }
 0x8bd   : > { %v9914_v9 = vadd.f32 %v9913_v55, %v9771_v37 }
 0x8be   : > { %v9816_v63 = vpop.f32.mrf.mxu1 }
 0x8bf   : > { %v9777_v63 = vadd.f32 %v18040_v30, %v9287_v59 }
 0x8c0   : > { %v9818_v6 = vpop.f32.mrf.mxu1 }
 0x8c2   : > { %v9820_v12 = vpop.f32.mrf.mxu1 }
 0x8c4   : > { %v9824_v10 = vpop.f32.mrf.mxu1 }
 0x8c5   : > { %v9920_v10 = vadd.f32 %v9919_v58, %v9777_v63 }
 0x8c6   : > { %v9826_v47 = vpop.f32.mrf.mxu1 }
 0x8c7   : > { %v9781_v47 = vadd.f32 %v18045_v57, %v9287_v59 }
 0x8c8   : > { %v9828_v23 = vpop.f32.mrf.mxu1 }
 0x8ca   : > { %v9830_v62 = vpop.f32.mrf.mxu1 }
 0x8cb   : > { %v9923_v62 = vpop.f32.mrf.mxu0 }
 0x8cc   : > { %v10010_v33 = vpop.f32.mrf.mxu1  ;;  %v9924_v41 = vadd.f32 %v9923_v62, %v9781_v47 }
 0x8ce   : > { %v10012_v35 = vpop.f32.mrf.mxu1 }
 0x8d0   : > { %v10014_v49 = vpop.f32.mrf.mxu1 }
 0x8d2   : > { %v10016_v15 = vpop.f32.mrf.mxu1 }
 0x8d4   : > { %v10020_v8 = vpop.f32.mrf.mxu1 }
 0x8d6   : > { %v10022_v20 = vpop.f32.mrf.mxu1 }
 0x8d8   : > { %v10024_v40 = vpop.f32.mrf.mxu1 }
 0x8da   : > { %v10026_v56 = vpop.f32.mrf.mxu1 }
 0x8db   : > { %v9283_v56 = vrot.slane %v9278_v21, %v17299_v39  ;;  %v894_v21 = vadd.s32 88, %v17289_v14 }
 0x8dc   : > { %v10030_v22 = vpop.f32.mrf.mxu1 }
 0x8de   : > { %v10032_v3 = vpop.f32.mrf.mxu1 }
 0x8df   : > { %v9769_v3 = vadd.f32 %v18034_v5, %v9283_v56 }
 0x8e0   : > { %v10034_v50 = vpop.f32.mrf.mxu1 }
 0x8e2   : > { %v10036_v29 = vpop.f32.mrf.mxu1 }
 0x8e3   : > { %v892_v29 = vadd.s32 72, %v17289_v14 }
 0x8e4   : > { %v10040_v19 = vpop.f32.mrf.mxu1 }
 0x8e5   : > { %v9912_v19 = vadd.f32 %v9911_v42, %v9769_v3  ;;  %v10306_v55 = vadd.s32 4294967218, %v892_v29  ;;  %v10505_v29 = vld [vmem:[#allocation3 + $0xb5] sm:$0xff] }
 0x8e6   : > { %v10042_v44 = vpop.f32.mrf.mxu1 }
 0x8e7   : > { %v9775_v44 = vadd.f32 %v18038_v25, %v9283_v56  ;;  %vm10328_vm10 = vcmp.ge.s32.totalorder %v10306_v55, 0  ;;  %v10308_v25 = vadd.s32 4294967218, %v894_v21 }
 0x8e8   : > { %v10044_v32 = vpop.f32.mrf.mxu1  ;;  %vm16400_vm12 = vmpackc.low %vm10328_vm10, %vm16731_vm3 }
 0x8e9   : > { %vm10352_vm11 = vcmp.lt.s32.totalorder %v10308_v25, 16 }
 0x8ea   : > { %v10046_v43 = vpop.f32.mrf.mxu1  ;;  %vm16403_vm13 = vmpackc.low %vm10352_vm11, %vm16731_vm3 }
 0x8eb   : > { %v9918_v43 = vadd.f32 %v9917_v0, %v9775_v44 }
 0x8ec   : > { %v10050_v11 = vpop.f32.mrf.mxu1 }
 0x8ed   : > { %v9779_v11 = vadd.f32 %v18043_v54, %v9283_v56 }
 0x8ee   : > { %v10052_v46 = vpop.f32.mrf.mxu1 }
 0x8f0   : > { %v10054_v1 = vpop.f32.mrf.mxu1 }
 0x8f1   : > { %v10055_v32 = vadd.f32 %v10054_v1, %v9912_v19  ;;  %v10506_v19 = vld [vmem:[#allocation3 + $0xbd] sm:$0xff] }
 0x8f2   : > { %v10056_v6 = vpop.f32.mrf.mxu1 }
 0x8f3   : > { %v10057_v36 = vadd.f32 %v10056_v6, %v9914_v9  ;;  %v9922_v9 = vadd.f32 %v9921_v52, %v9779_v11 }
 0x8f4   : > { %v10060_v12 = vpop.f32.mrf.mxu1 }
 0x8f5   : > { %v14694_v23 = vmul.f32 -1.442695, %v10057_v36  ;;  %v10061_v5 = vadd.f32 %v10060_v12, %v9918_v43  ;;  %v9927_v36 = vpop.f32.mrf.mxu0  ;;  %v10604_v43 = vpack.c.bf16 %v10506_v19, %v10505_v29 }
 0x8f6   : > { %v10062_v34 = vpop.f32.mrf.mxu1 }
 0x8f7   : > { %16335 = vpow2.f32 %v14694_v23  ;;  %v10063_v45 = vadd.f32 %v10062_v34, %v9920_v10  ;;  %v9929_v10 = vpop.f32.mrf.mxu0  ;;  %v10590_v23 = vpack.c.bf16 %v18061_v26, %v18059_v24 }
 0x8f8   : > { %v10064_v33 = vpop.f32.mrf.mxu1 }
 0x8f9   : > { %v14695_v35 = vmul.f32 -1.442695, %v10063_v45  ;;  %v10065_v6 = vadd.f32 %v10064_v33, %v9922_v9 }
 0x8fa   : > { %v10066_v49 = vpop.f32.mrf.mxu1 }
 0x8fb   : > { %16337 = vpow2.f32 %v14695_v35  ;;  %v10067_v15 = vadd.f32 %v10066_v49, %v9924_v41 }
 0x8fd   : > { %v14696_v8 = vmul.f32 -1.442695, %v10067_v15  ;;  %v10070_v15 = vpop.f32.mrf.mxu1 }
 0x8ff   : > { %16339 = vpow2.f32 %v14696_v8  ;;  %v10544_v8 = vld [vmem:[#allocation3 + $0xb3] sm:$0xff] }
 0x904   : > { %v16336_v30 = vpop.eup %16335 }
 0x905   : > { %v10194_v20 = vadd.f32 1.0, %v16336_v30 }
 0x907   : > { %16341 = vrcp.f32 %v10194_v20 }
 0x908   : > { %v16338_v40 = vpop.eup %16337 }
 0x909   : > { %v10195_v57 = vadd.f32 1.0, %v16338_v40 }
 0x90b   : > { %16343 = vrcp.f32 %v10195_v57  ;;  %v10072_v57 = vpop.f32.mrf.mxu1 }
 0x90c   : > { %v16340_v22 = vpop.eup %16339 }
 0x90d   : > { %v10196_v50 = vadd.f32 1.0, %v16340_v22 }
 0x90f   : > { %16345 = vrcp.f32 %v10196_v50 }
 0x914   : > { %v16342_v59 = vpop.eup %16341 }
 0x915   : > { %v10260_v37 = vmul.f32 %v16342_v59, %v10055_v32  ;;  %v10074_v32 = vpop.f32.mrf.mxu1 }
 0x917   : > { %v10282_v46 = vadd.f32 %v10260_v37, %v17973_v13  ;;  %v9931_v13 = vpop.f32.mrf.mxu0  ;;  %v10076_v37 = vpop.f32.mrf.mxu1 }
 0x918   : > { %v16344_v58 = vpop.eup %16343 }
 0x919   : > { %v10438_v63 = vsel %vm10328_vm10, %v10282_v46, 0.0  ;;  %v10261_v42 = vmul.f32 %v16344_v58, %v10061_v5  ;;  %v9933_v33 = vpop.f32.mrf.mxu0  ;;  %v10080_v9 = vpop.f32.mrf.mxu1 }
 0x91a   : > { %10460 = vst [vmem:[#allocation3 + $0x9a] sm:$0xff] %v10438_v63 }
 0x91b   : > { %v10283_v1 = vadd.f32 %v10261_v42, %v17980_v60  ;;  %v9937_v35 = vpop.f32.mrf.mxu0  ;;  %v10507_v42 = vld [vmem:[#allocation3 + $0xc5] sm:$0xff] }
 0x91c   : > { %v16346_v0 = vpop.eup %16345 }
 0x91d   : > { %10461 = vst [vmem:[#allocation3 + $0xa2] sm:$0xff] %v10283_v1  ;;  %v10262_v54 = vmul.f32 %v16346_v0, %v10065_v6  ;;  %v9939_v49 = vpop.f32.mrf.mxu0  ;;  %v10508_v6 = vld [vmem:[#allocation3 + $0xcd] sm:$0xff]  ;;  %v10082_v0 = vpop.f32.mrf.mxu1 }
 0x91e   : > { %v10609_v13 = vpack.c.bf16 %v10508_v6, %v10507_v42 }
 0x91f   : > { %v10284_v47 = vadd.f32 %v10262_v54, %v17982_v27  ;;  %v9941_v56 = vpop.f32.mrf.mxu0  ;;  %v10084_v10 = vpop.f32.mrf.mxu1 }
 0x921   : > { %v10440_v12 = vsel %vm10352_vm11, %v10284_v47, 0.0  ;;  %v10540_v52 = vld [vmem:[#allocation3 + $0x93] sm:$0xff]  ;;  %v9943_v55 = vpop.f32.mrf.mxu0  ;;  %v10086_v25 = vpop.f32.mrf.mxu1 }
 0x922   : > { %10462 = vst [vmem:[#allocation3 + $0xaa] sm:$0xff] %v10440_v12  ;;  %v10591_v34 = vpack.c.bf16 %v10540_v52, %v18057_v28  ;;  %v10501_v60 = vld [vmem:[#allocation3 + $0x95] sm:$0xff]  ;;  %v16401_v28 = vpack.c.bf16 %v10282_v46, %v18021_v48  ;;  %v16404_v46 = vpack.c.bf16 %v10284_v47, %v10283_v1 }
 0x923   : > { %v10521_v45 = vld [vmem:[#allocation3 + $0x98] sm:$0xff]  ;;  %v9947_v11 = vpop.f32.mrf.mxu0  ;;  %v10090_v47 = vpop.f32.mrf.mxu1 }
 0x924   : > { %v18092_v62 = vld [vmem:[#allocation3 + $0x96] sm:$0xff]  ;;  %11312 = vmatprep.mubr.bf16.mxu1 %v10591_v34  ;;  %v18098_v26 = vld [vmem:[#allocation3 + $0xa0] sm:$0xff] }
 0x925   : > { %13038 = vst [vmem:[#allocation3 + $0x92] sm:$0xff] %v18021_v48  ;;  %v10502_v41 = vld [vmem:[#allocation3 + $0x9d] sm:$0xff]  ;;  %11313 = vmatmul.mubr.bf16.gmra.mxu1 %v10590_v23  ;;  %v10595_v44 = vpack.c.bf16 %v18098_v26, %v10521_v45  ;;  %v9949_v21 = vpop.f32.mrf.mxu0  ;;  %v10509_v52 = vld [vmem:[#allocation3 + $0xd5] sm:$0xff] }
 0x926   : > { %v10594_v27 = vpack.c.bf16 %v10502_v41, %v10501_v60  ;;  %v10541_v24 = vld [vmem:[#allocation3 + $0x9b] sm:$0xff]  ;;  %v10092_v60 = vpop.f32.mrf.mxu1 }
 0x927   : > { %v9951_v63 = vpop.f32.mrf.mxu0  ;;  %v10510_v23 = vld [vmem:[#allocation3 + $0xdd] sm:$0xff] }
 0x928   : > { %11189 = vmatprep.mubr.bf16.mxu0 %v10594_v27  ;;  %v10094_v33 = vpop.f32.mrf.mxu1  ;;  %v10614_v41 = vpack.c.bf16 %v10510_v23, %v10509_v52  ;;  %v10553_v11 = vld [vmem:[#allocation3 + $0x5e] sm:$0xff] }
 0x929   : > { %16402 = vmatmul.mubr.msk.bf16.gmra.mxu0 %vm16400_vm12, %v16401_v28  ;;  %v10503_v30 = vld [vmem:[#allocation3 + $0xa5] sm:$0xff]  ;;  %v10504_v20 = vld [vmem:[#allocation3 + $0xad] sm:$0xff]  ;;  %v9953_v54 = vpop.f32.mrf.mxu0 }
 0x92a   : > { %v10542_v40 = vld [vmem:[#allocation3 + $0xa3] sm:$0xff]  ;;  %v10599_v22 = vpack.c.bf16 %v10504_v20, %v10503_v30  ;;  %v10543_v50 = vld [vmem:[#allocation3 + $0xab] sm:$0xff]  ;;  %v10096_v35 = vpop.f32.mrf.mxu1 }
 0x92b   : > { %v10596_v3 = vpack.c.bf16 %v10542_v40, %v10541_v24  ;;  %v10601_v59 = vpack.c.bf16 %v10544_v8, %v10543_v50  ;;  %v18103_v5 = vld [vmem:[#allocation3 + $0xa8] sm:$0xff]  ;;  %v10524_v58 = vld [vmem:[#allocation3 + $0xb0] sm:$0xff]  ;;  %v9957_v12 = vpop.f32.mrf.mxu0  ;;  %v10561_v4 = vld [vmem:[#allocation3 + $0x9e] sm:$0xff] }
 0x92c   : > { %11199 = vmatprep.mubr.bf16.mxu0 %v10599_v22  ;;  %v10600_v36 = vpack.c.bf16 %v10524_v58, %v18103_v5  ;;  %v10100_v15 = vpop.f32.mrf.mxu1  ;;  %v10511_v28 = vld [vmem:[#allocation3 + $0xe5] sm:$0xff]  ;;  %v10512_v24 = vld [vmem:[#allocation3 + $0xed] sm:$0xff]  ;;  %v10577_v58 = vpack.c.bf16 %v18047_v53, %v10553_v11  ;;  %v16039_v35 = vld [vmem:[#allocation10 + $0xf54] ss:$8 sps:$4 sm:$0xff]  }
 0x92d   : > { %11322 = vmatprep.mubr.bf16.mxu1 %v10596_v3  ;;  %v9959_v1 = vpop.f32.mrf.mxu0  ;;  %v10619_v56 = vpack.c.bf16 %v10512_v24, %v10511_v28  ;;  %v10562_v61 = vld [vmem:[#allocation3 + $0xa6] sm:$0xff]  ;;  %v10563_v33 = vld [vmem:[#allocation3 + $0xae] sm:$0xff]  ;;  %v16045_v24 = vld [vmem:[#allocation10 + $0xf34] ss:$8 sps:$4 sm:$0xff]  }
 0x92e   : > { %11323 = vmatmul.mubr.bf16.gmra.mxu1 %v10595_v44  ;;  %v10102_v30 = vpop.f32.mrf.mxu1  ;;  %v16042_v15 = vld [vmem:[#allocation10 + $0xf44] ss:$8 sps:$4 sm:$0xff]   ;;  %v16043_v28 = vld [vmem:[#allocation10 + $0xf30] ss:$8 sps:$4 sm:$0xff]  }
 0x92f   : > { %11332 = vmatprep.mubr.bf16.mxu1 %v10601_v59  ;;  %v9961_v34 = vpop.f32.mrf.mxu0  ;;  %v16048_v30 = vld [vmem:[#allocation10 + $0xf24] ss:$8 sps:$4 sm:$0xff]   ;;  %v16070_v11 = vld [vmem:[#allocation10 + $0x1030] ss:$8 sps:$4 sm:$0xff]  }
 0x930   : > { %v10104_v40 = vpop.f32.mrf.mxu1 }
 0x931   : > { %16405 = vmatmul.mubr.msk.bf16.gmra.mxu0 %vm16403_vm13, %v16404_v46  ;;  %v9963_v45 = vpop.f32.mrf.mxu0  ;;  %v16051_v40 = vld [vmem:[#allocation10 + $0x1074] ss:$8 sps:$4 sm:$0xff]  }
 0x932   : > { %11209 = vmatprep.mubr.bf16.mxu0 %v10604_v43  ;;  %v10106_v22 = vpop.f32.mrf.mxu1  ;;  %v10592_v45 = vpack.c.bf16 %v18092_v62, %v18067_v16  ;;  %v16034_v16 = vld [vmem:[#allocation10 + $0xf60] ss:$8 sps:$4 sm:$0xff]   ;;  %v16037_v62 = vld [vmem:[#allocation10 + $0xf50] ss:$8 sps:$4 sm:$0xff]   ;;  %12565 = vmatprep.subr.bf16.mxu0 %v16051_v40 }
 0x933   : > { %v9967_v27 = vpop.f32.mrf.mxu0  ;;  %v16055_v22 = vld [vmem:[#allocation10 + $0xf10] ss:$8 sps:$4 sm:$0xff]  }
 0x934   : > { %v10110_v50 = vpop.f32.mrf.mxu1 }
 0x935   : > { %v9969_v49 = vpop.f32.mrf.mxu0  ;;  %v16058_v50 = vld [vmem:[#allocation10 + $0x1050] ss:$8 sps:$4 sm:$0xff]  }
 0x936   : > { %11333 = vmatmul.mubr.bf16.gmra.mxu1 %v10600_v36  ;;  %v10112_v19 = vpop.f32.mrf.mxu1  ;;  %v16040_v49 = vld [vmem:[#allocation10 + $0xf40] ss:$8 sps:$4 sm:$0xff]  }
 0x937   : > { %v9971_v8 = vpop.f32.mrf.mxu0  ;;  %v16061_v19 = vld [vmem:[#allocation10 + $0xf00] ss:$8 sps:$4 sm:$0xff]  }
 0x938   : > { %v10114_v55 = vpop.f32.mrf.mxu1  ;;  %v16046_v8 = vld [vmem:[#allocation10 + $0xf20] ss:$8 sps:$4 sm:$0xff]  }
 0x939   : > { %11210 = vmatmul.mubr.bf16.gmra.mxu0 %v18028_v7  ;;  %v9973_v20 = vpop.f32.mrf.mxu0  ;;  %v16064_v55 = vld [vmem:[#allocation10 + $0x1040] ss:$8 sps:$4 sm:$0xff]  }
 0x93a   : > { %11219 = vmatprep.mubr.bf16.mxu0 %v10609_v13  ;;  %v10116_v59 = vpop.f32.mrf.mxu1  ;;  %v16049_v20 = vld [vmem:[#allocation10 + $0x1070] ss:$8 sps:$4 sm:$0xff]  }
 0x93b   : > { %v11151_v57 = vpop.f32.mrf.mxu0  ;;  %v16067_v59 = vld [vmem:[#allocation10 + $0xff0] ss:$8 sps:$4 sm:$0xff]  }
 0x93c   : > { %v11284_v37 = vpop.f32.mrf.mxu1  ;;  %v16054_v57 = vld [vmem:[#allocation10 + $0x1064] ss:$8 sps:$4 sm:$0xff]  }
 0x93d   : > { %v11153_v3 = vpop.f32.mrf.mxu0  ;;  %v16072_v37 = vld [vmem:[#allocation10 + $0x1034] ss:$8 sps:$4 sm:$0xff]  }
 0x93e   : > { %v11286_v46 = vpop.f32.mrf.mxu1  ;;  %v16057_v3 = vld [vmem:[#allocation10 + $0xf14] ss:$8 sps:$4 sm:$0xff]  }
 0x93f   : > { %v11155_v29 = vpop.f32.mrf.mxu0  ;;  %v10546_v46 = vld [vmem:[#allocation3 + $0xc3] sm:$0xff] }
 0x940   : > { %v11288_v63 = vpop.f32.mrf.mxu1  ;;  %v16060_v29 = vld [vmem:[#allocation10 + $0x1054] ss:$8 sps:$4 sm:$0xff]  }
 0x941   : > { %11220 = vmatmul.mubr.bf16.gmra.mxu0 %v18028_v7  ;;  %v11157_v44 = vpop.f32.mrf.mxu0 }
 0x942   : > { %11229 = vmatprep.mubr.bf16.mxu0 %v10614_v41  ;;  %v11290_v6 = vpop.f32.mrf.mxu1  ;;  %v10564_v41 = vld [vmem:[#allocation3 + $0xb6] sm:$0xff]  ;;  %v16063_v44 = vld [vmem:[#allocation10 + $0xf04] ss:$8 sps:$4 sm:$0xff]  }
 0x943   : > { %v11161_v32 = vpop.f32.mrf.mxu0  ;;  %v10602_v27 = vpack.c.bf16 %v10564_v41, %v10563_v33  ;;  %v16073_v6 = vld [vmem:[#allocation10 + $0xfe0] ss:$8 sps:$4 sm:$0xff]   ;;  %v16093_v41 = vld [vmem:[#allocation10 + $0x10f4] ss:$8 sps:$4 sm:$0xff]  }
 0x944   : > { %v11294_v36 = vpop.f32.mrf.mxu1  ;;  %v16066_v32 = vld [vmem:[#allocation10 + $0x1044] ss:$8 sps:$4 sm:$0xff]  }
 0x945   : > { %v11163_v43 = vpop.f32.mrf.mxu0  ;;  %v16076_v36 = vld [vmem:[#allocation10 + $0x1020] ss:$8 sps:$4 sm:$0xff]  }
 0x946   : > { %v16069_v43 = vld [vmem:[#allocation10 + $0xff4] ss:$8 sps:$4 sm:$0xff]  }
 0x947   : > { %v11165_v21 = vpop.f32.mrf.mxu0 }
 0x948   : > { %v10545_v21 = vld [vmem:[#allocation3 + $0xbb] sm:$0xff] }
 0x949   : > { %11230 = vmatmul.mubr.bf16.gmra.mxu0 %v18028_v7  ;;  %v11167_v9 = vpop.f32.mrf.mxu0  ;;  %v10606_v63 = vpack.c.bf16 %v10546_v46, %v10545_v21  ;;  %v16112_v21 = vld [vmem:[#allocation10 + $0xf80] ss:$8 sps:$4 sm:$0xff]  }
 0x94a   : > { %11239 = vmatprep.mubr.bf16.mxu0 %v10619_v56  ;;  %v16052_v56 = vld [vmem:[#allocation10 + $0x1060] ss:$8 sps:$4 sm:$0xff]  }
 0x94b   : > { %v11171_v42 = vpop.f32.mrf.mxu0  ;;  %v10526_v9 = vld [vmem:[#allocation3 + $0xc0] sm:$0xff]  ;;  %11342 = vmatprep.mubr.bf16.mxu1 %v10606_v63 }
 0x94c   : > { %v10569_v46 = vld [vmem:[#allocation3 + $0xde] sm:$0xff] }
 0x94d   : > { %v11173_v0 = vpop.f32.mrf.mxu0  ;;  %v16117_v63 = vld [vmem:[#allocation10 + $0x10b4] ss:$8 sps:$4 sm:$0xff]  }
 0x94e   : > { %v16075_v0 = vld [vmem:[#allocation10 + $0xfe4] ss:$8 sps:$4 sm:$0xff]  }
 0x94f   : > { %v11175_v54 = vpop.f32.mrf.mxu0 }
 0x950   : > { %v16078_v54 = vld [vmem:[#allocation10 + $0x1024] ss:$8 sps:$4 sm:$0xff]  }
 0x951   : > { %11240 = vmatmul.mubr.bf16.gmra.mxu0 %v18028_v7  ;;  %v11296_v7 = vpop.f32.mrf.mxu1  ;;  %v11177_v10 = vpop.f32.mrf.mxu0 }
 0x952   : > { %11415 = vmatprep.mubr.bf16.mxu0 %v16730_v51  ;;  %v16079_v7 = vld [vmem:[#allocation10 + $0x1010] ss:$8 sps:$4 sm:$0xff]   ;;  %v16081_v10 = vld [vmem:[#allocation10 + $0x1014] ss:$8 sps:$4 sm:$0xff]  }
 0x953   : > { %v11298_v13 = vpop.f32.mrf.mxu1  ;;  %v11181_v12 = vpop.f32.mrf.mxu0 }
 0x954   : > { %v10547_v13 = vld [vmem:[#allocation3 + $0xcb] sm:$0xff]  ;;  %v10548_v12 = vld [vmem:[#allocation3 + $0xd3] sm:$0xff] }
 0x955   : > { %v11300_v25 = vpop.f32.mrf.mxu1  ;;  %v11183_v53 = vpop.f32.mrf.mxu0 }
 0x956   : > { %v16084_v25 = vld [vmem:[#allocation10 + $0xfd4] ss:$8 sps:$4 sm:$0xff]   ;;  %v10611_v53 = vpack.c.bf16 %v10548_v12, %v10547_v13  ;;  %v10571_v13 = vld [vmem:[#allocation3 + $0xee] sm:$0xff] }
 0x957   : > { %v11304_v1 = vpop.f32.mrf.mxu1  ;;  %v11185_v47 = vpop.f32.mrf.mxu0  ;;  %v10572_v12 = vld [vmem:[#allocation3 + $0xf6] sm:$0xff] }
 0x958   : > { %v16082_v1 = vld [vmem:[#allocation10 + $0xfd0] ss:$8 sps:$4 sm:$0xff]   ;;  %v10527_v47 = vld [vmem:[#allocation3 + $0xc8] sm:$0xff] }
 0x959   : > { %11416 = vmatmul.mubr.bf16.vlgmr.msra.gmra.mxu0 %v10577_v58  ;;  %v11306_v52 = vpop.f32.mrf.mxu1  ;;  %v11187_v23 = vpop.f32.mrf.mxu0  ;;  %v10525_v58 = vld [vmem:[#allocation3 + $0xb8] sm:$0xff] }
 0x95a   : > { %11425 = vmatprep.mubr.bf16.mxu0 %v16730_v51  ;;  %12566 = vmatpush1.bf16.msra.mxu0 %v16049_v20  ;;  %v10605_v42 = vpack.c.bf16 %v10526_v9, %v10525_v58  ;;  %13042 = vst [vmem:[#allocation3 + $0xb2] sm:$0xff] %v18021_v48  ;;  %v10528_v52 = vld [vmem:[#allocation3 + $0xd0] sm:$0xff]  ;;  %v10570_v58 = vld [vmem:[#allocation3 + $0xe6] sm:$0xff] }
 0x95b   : > { %v11308_v34 = vpop.f32.mrf.mxu1  ;;  %12567 = vmatprep.subr.bf16.mxu0 %v16054_v57  ;;  %v10610_v23 = vpack.c.bf16 %v10528_v52, %v10527_v47  ;;  %v10568_v20 = vld [vmem:[#allocation3 + $0xd6] sm:$0xff]  ;;  %v10617_v9 = vpack.c.bf16 %v10570_v58, %v10569_v46  ;;  %v11857_v47 = vld [vmem:[#allocation2 + $0x79] sm:$0xff] }
 0x95c   : > { %11343 = vmatmul.mubr.bf16.gmra.mxu1 %v10605_v42  ;;  %v16085_v34 = vld [vmem:[#allocation10 + $0x1000] ss:$8 sps:$4 sm:$0xff]   ;;  %v16105_v57 = vld [vmem:[#allocation10 + $0x10d4] ss:$8 sps:$4 sm:$0xff]   ;;  %v16124_v52 = vld [vmem:[#allocation10 + $0x1090] ss:$8 sps:$4 sm:$0xff]  }
 0x95d   : > { %v11310_v60 = vpop.f32.mrf.mxu1  ;;  %11352 = vmatprep.mubr.bf16.mxu1 %v10611_v53  ;;  %v11854_v42 = vld [vmem:[#allocation2 + $0x61] sm:$0xff] }
 0x95e   : > { %12568 = vmatpush1.bf16.msra.mxu0 %v16052_v56  ;;  %v16087_v60 = vld [vmem:[#allocation10 + $0x1004] ss:$8 sps:$4 sm:$0xff]   ;;  %v16126_v53 = vld [vmem:[#allocation10 + $0x1094] ss:$8 sps:$4 sm:$0xff]  }
 0x95f   : > { %12569 = vmatprep.subr.bf16.mxu0 %v16060_v29  ;;  %v18130_v56 = vld [vmem:[#allocation2] sm:$0xff] }
 0x960   : > { %v16138_v58 = vld [vmem:[#allocation10 + $0x1144] ss:$8 sps:$4 sm:$0xff]  }
 0x961   : > { %11426 = vmatmul.mubr.bf16.gmra.mxu0 %v10582_v38  ;;  %v10597_v38 = vpack.c.bf16 %v10562_v61, %v10561_v4  ;;  %v16088_v61 = vld [vmem:[#allocation10 + $0xfc0] ss:$8 sps:$4 sm:$0xff]  }
 0x962   : > { %11435 = vmatprep.mubr.bf16.mxu0 %v16730_v51  ;;  %12570 = vmatpush1.bf16.msra.mxu0 %v16058_v50  ;;  %v10565_v4 = vld [vmem:[#allocation3 + $0xbe] sm:$0xff]  ;;  %v16103_v50 = vld [vmem:[#allocation10 + $0x10d0] ss:$8 sps:$4 sm:$0xff]  }
 0x963   : > { %12571 = vmatprep.subr.bf16.mxu0 %v16066_v32  ;;  %13043 = vst [vmem:[#allocation3 + $0xba] sm:$0xff] %v18021_v48  ;;  %v16108_v32 = vld [vmem:[#allocation10 + $0xf94] ss:$8 sps:$4 sm:$0xff]  }
 0x964   : > { %11353 = vmatmul.mubr.bf16.gmra.mxu1 %v10610_v23 }
 0x966   : > { %12572 = vmatpush1.bf16.msra.mxu0 %v16064_v55 }
 0x967   : > { %12573 = vmatprep.subr.bf16.mxu0 %v16072_v37  ;;  %v16114_v37 = vld [vmem:[#allocation10 + $0xf84] ss:$8 sps:$4 sm:$0xff]  }
 0x969   : > { %11436 = vmatmul.mubr.bf16.gmra.mxu0 %v10587_v31  ;;  %v16036_v31 = vld [vmem:[#allocation10 + $0xf64] ss:$8 sps:$4 sm:$0xff]  }
 0x96a   : > { %11445 = vmatprep.mubr.bf16.mxu0 %v16730_v51  ;;  %12454 = vmatprep.subr.bf16.mxu1 %v16036_v31  ;;  %v10529_v31 = vld [vmem:[#allocation3 + $0xd8] sm:$0xff] }
 0x96b   : > { %12455 = vmatpush1.bf16.msra.mxu1 %v16034_v16  ;;  %12574 = vmatpush1.bf16.msra.mxu0 %v16070_v11  ;;  %v16109_v11 = vld [vmem:[#allocation10 + $0x10c0] ss:$8 sps:$4 sm:$0xff]  }
 0x96c   : > { %12456 = vmatprep.subr.bf16.mxu1 %v16039_v35  ;;  %12575 = vmatprep.subr.bf16.mxu0 %v16078_v54  ;;  %v18139_v54 = vpack.c.bf16 %v18130_v56, %v18130_v56 }
 0x96f   : > { %12457 = vmatpush1.bf16.msra.mxu1 %v16037_v62  ;;  %12576 = vmatpush1.bf16.msra.mxu0 %v16076_v36  ;;  %v10530_v62 = vld [vmem:[#allocation3 + $0xe0] sm:$0xff] }
 0x970   : > { %12458 = vmatprep.subr.bf16.mxu1 %v16042_v15  ;;  %12577 = vmatprep.subr.bf16.mxu0 %v16081_v10  ;;  %v10615_v35 = vpack.c.bf16 %v10530_v62, %v10529_v31  ;;  %v16094_v15 = vld [vmem:[#allocation10 + $0xfb0] ss:$8 sps:$4 sm:$0xff]   ;;  %v16118_v10 = vld [vmem:[#allocation10 + $0x10a0] ss:$8 sps:$4 sm:$0xff]  }
 0x971   : > { %11446 = vmatmul.mubr.bf16.gmra.mxu0 %v10592_v45  ;;  %v16090_v45 = vld [vmem:[#allocation10 + $0xfc4] ss:$8 sps:$4 sm:$0xff]   ;;  %v11888_v62 = vld [vmem:[#allocation2 + $0x83] sm:$0xff] }
 0x972   : > { %11455 = vmatprep.mubr.bf16.mxu0 %v16730_v51 }
 0x973   : > { %12459 = vmatpush1.bf16.msra.mxu1 %v16040_v49  ;;  %12578 = vmatpush1.bf16.msra.mxu0 %v16079_v7  ;;  %v16096_v49 = vld [vmem:[#allocation10 + $0xfb4] ss:$8 sps:$4 sm:$0xff]   ;;  %v16120_v7 = vld [vmem:[#allocation10 + $0x10a4] ss:$8 sps:$4 sm:$0xff]  }
 0x974   : > { %12460 = vmatprep.subr.bf16.mxu1 %v16045_v24  ;;  %12579 = vmatprep.subr.bf16.mxu0 %v16087_v60  ;;  %v16102_v24 = vld [vmem:[#allocation10 + $0xfa4] ss:$8 sps:$4 sm:$0xff]   ;;  %v16127_v60 = vld [vmem:[#allocation10 + $0x1080] ss:$8 sps:$4 sm:$0xff]  }
 0x977   : > { %12461 = vmatpush1.bf16.msra.mxu1 %v16043_v28  ;;  %12580 = vmatpush1.bf16.msra.mxu0 %v16085_v34  ;;  %v16099_v28 = vld [vmem:[#allocation10 + $0x10e4] ss:$8 sps:$4 sm:$0xff]  }
 0x978   : > { %12462 = vmatprep.subr.bf16.mxu1 %v16048_v30  ;;  %12581 = vmatprep.subr.bf16.mxu0 %v16093_v41  ;;  %v10567_v30 = vld [vmem:[#allocation3 + $0xce] sm:$0xff] }
 0x979   : > { %11456 = vmatmul.mubr.bf16.gmra.mxu0 %v10597_v38  ;;  %v10566_v38 = vld [vmem:[#allocation3 + $0xc6] sm:$0xff]  ;;  %v10612_v40 = vpack.c.bf16 %v10568_v20, %v10567_v30  ;;  %13046 = vst [vmem:[#allocation3 + $0xd2] sm:$0xff] %v18130_v56  ;;  %v16121_v30 = vld [vmem:[#allocation10 + $0x1170] ss:$8 sps:$4 sm:$0xff]   ;;  %v16123_v20 = vld [vmem:[#allocation10 + $0x1174] ss:$8 sps:$4 sm:$0xff]  }
 0x97a   : > { %11465 = vmatprep.mubr.bf16.mxu0 %v16730_v51  ;;  %v10607_v33 = vpack.c.bf16 %v10566_v38, %v10565_v4  ;;  %13044 = vst [vmem:[#allocation3 + $0xc2] sm:$0xff] %v18021_v48  ;;  %v16097_v48 = vld [vmem:[#allocation10 + $0x10e0] ss:$8 sps:$4 sm:$0xff]   ;;  %13045 = vst [vmem:[#allocation3 + $0xca] sm:$0xff] %v18130_v56  ;;  %v16129_v34 = vld [vmem:[#allocation10 + $0x1084] ss:$8 sps:$4 sm:$0xff]  }
 0x97b   : > { %12463 = vmatpush1.bf16.msra.mxu1 %v16046_v8  ;;  %12582 = vmatpush2.bf16.msra.mxu0 %v16091_v2  ;;  %v16100_v8 = vld [vmem:[#allocation10 + $0xfa0] ss:$8 sps:$4 sm:$0xff]   ;;  %v11870_v38 = vld [vmem:[#allocation2 + $0x6a] sm:$0xff] }
 0x97c   : > { %12464 = vmatprep.subr.bf16.mxu1 %v16057_v3  ;;  %12583 = vmatprep.subr.bf16.mxu0 %v16099_v28  ;;  %v10552_v3 = vld [vmem:[#allocation3 + $0xf3] sm:$0xff]  ;;  %v11872_v28 = vld [vmem:[#allocation2 + $0x7a] sm:$0xff] }
 0x97f   : > { %12465 = vmatpush1.bf16.msra.mxu1 %v16055_v22  ;;  %12584 = vmatpush2.bf16.msra.mxu0 %v16097_v48  ;;  %v10551_v22 = vld [vmem:[#allocation3 + $0xeb] sm:$0xff] }
 0x980   : > { %12466 = vmatprep.subr.bf16.mxu1 %v16063_v44  ;;  %v10621_v29 = vpack.c.bf16 %v10552_v3, %v10551_v22  ;;  %v10532_v44 = vld [vmem:[#allocation3 + $0xf0] sm:$0xff]  ;;  %12585 = vmatprep.subr.bf16.mxu0 %v16105_v57 }
 0x981   : > { %11466 = vmatmul.mubr.bf16.gmra.mxu0 %v10602_v27  ;;  %v10549_v27 = vld [vmem:[#allocation3 + $0xdb] sm:$0xff]  ;;  %v11873_v48 = vld [vmem:[#allocation2 + $0x82] sm:$0xff]  ;;  %v16132_v22 = vld [vmem:[#allocation10 + $0x1164] ss:$8 sps:$4 sm:$0xff]  }
 0x982   : > { %11475 = vmatprep.mubr.bf16.mxu0 %v16730_v51  ;;  %v10616_v16 = vpack.c.bf16 %v10550_v17, %v10549_v27  ;;  %13047 = vst [vmem:[#allocation3 + $0xda] sm:$0xff] %v18130_v56  ;;  %13048 = vst [vmem:[#allocation3 + $0xe2] sm:$0xf] %v18130_v56  ;;  %v11858_v27 = vld [vmem:[#allocation2 + $0x81] sm:$0xff]  ;;  %v11859_v17 = vld [vmem:[#allocation2 + $0x89] sm:$0xff] }
 0x983   : > { %12467 = vmatpush1.bf16.msra.mxu1 %v16061_v19  ;;  %v10531_v19 = vld [vmem:[#allocation3 + $0xe8] sm:$0xff]  ;;  %12586 = vmatpush2.bf16.msra.mxu0 %v16103_v50  ;;  %v11929_v2 = vpack.c.bf16 %v11859_v17, %v11858_v27  ;;  %v16145_v17 = vld [vmem:[#allocation10 + $0x1110] ss:$8 sps:$4 sm:$0xff]  }
 0x984   : > { %12468 = vmatprep.subr.bf16.mxu1 %v16069_v43  ;;  %11362 = vmatprep.mubr.bf16.mxu1 %v10616_v16  ;;  %v10620_v55 = vpack.c.bf16 %v10532_v44, %v10531_v19  ;;  %v16111_v43 = vld [vmem:[#allocation10 + $0x10c4] ss:$8 sps:$4 sm:$0xff]   ;;  %v16130_v19 = vld [vmem:[#allocation10 + $0x1160] ss:$8 sps:$4 sm:$0xff]  }
 0x985   : > { %11363 = vmatmul.mubr.bf16.gmra.mxu1 %v10615_v35  ;;  %12587 = vmatprep.subr.bf16.mxu0 %v16111_v43  ;;  %v11889_v35 = vld [vmem:[#allocation2 + $0x8b] sm:$0xff] }
 0x986   : > { %11372 = vmatprep.mubr.bf16.mxu1 %v10621_v29 }
 0x987   : > { %12469 = vmatpush2.bf16.msra.mxu1 %v16067_v59  ;;  %v16106_v59 = vld [vmem:[#allocation10 + $0xf90] ss:$8 sps:$4 sm:$0xff]   ;;  %12588 = vmatpush2.bf16.msra.mxu0 %v16109_v11 }
 0x988   : > { %12470 = vmatprep.subr.bf16.mxu1 %v16075_v0  ;;  %v16115_v0 = vld [vmem:[#allocation10 + $0x10b0] ss:$8 sps:$4 sm:$0xff]   ;;  %12589 = vmatprep.subr.bf16.mxu0 %v16117_v63 }
 0x989   : > { %11476 = vmatmul.mubr.bf16.gmra.mxu0 %v10607_v33  ;;  %v11871_v33 = vld [vmem:[#allocation2 + $0x72] sm:$0xff] }
 0x98a   : > { %11485 = vmatprep.mubr.bf16.mxu0 %v16730_v51  ;;  %v11920_v41 = vpack.c.bf16 %v11871_v33, %v11870_v38  ;;  %v16142_v33 = vld [vmem:[#allocation10 + $0x1120] ss:$8 sps:$4 sm:$0xff]  }
 0x98b   : > { %12471 = vmatpush2.bf16.msra.mxu1 %v16073_v6  ;;  %v11855_v6 = vld [vmem:[#allocation2 + $0x69] sm:$0xff]  ;;  %12590 = vmatpush2.bf16.msra.mxu0 %v16115_v0 }
 0x98c   : > { %12472 = vmatprep.subr.bf16.mxu1 %v16084_v25  ;;  %v11919_v36 = vpack.c.bf16 %v11855_v6, %v11854_v42  ;;  %12591 = vmatprep.subr.bf16.mxu0 %v16120_v7  ;;  %v10622_v25 = vpack.c.bf16 %v10572_v12, %v10571_v13  ;;  %v16141_v12 = vld [vmem:[#allocation10 + $0x1134] ss:$8 sps:$4 sm:$0xff]  }
 0x98d   : > { %11373 = vmatmul.mubr.bf16.gmra.mxu1 %v10620_v55  ;;  %v16135_v55 = vld [vmem:[#allocation10 + $0x1154] ss:$8 sps:$4 sm:$0xff]  }
 0x98e   : > { %12484 = vmatprep.mubr.bf16.mxu1 %v11919_v36 }
 0x98f   : > { %12473 = vmatpush2.bf16.msra.mxu1 %v16082_v1  ;;  %12592 = vmatpush2.bf16.msra.mxu0 %v16118_v10  ;;  %v11856_v1 = vld [vmem:[#allocation2 + $0x71] sm:$0xff] }
 0x990   : > { %12474 = vmatprep.subr.bf16.mxu1 %v16090_v45  ;;  %v11924_v23 = vpack.c.bf16 %v11857_v47, %v11856_v1  ;;  %12593 = vmatprep.subr.bf16.mxu0 %v16126_v53  ;;  %v11886_v45 = vld [vmem:[#allocation2 + $0x73] sm:$0xff] }
 0x991   : > { %11486 = vmatmul.mubr.bf16.gmra.mxu0 %v10612_v40  ;;  %v11925_v40 = vpack.c.bf16 %v11873_v48, %v11872_v28  ;;  %v16136_v10 = vld [vmem:[#allocation10 + $0x1140] ss:$8 sps:$4 sm:$0xff]  }
 0x992   : > { %11495 = vmatprep.mubr.bf16.mxu0 %v16730_v51 }
 0x993   : > { %12475 = vmatpush2.bf16.msra.mxu1 %v16088_v61  ;;  %12594 = vmatpush2.bf16.msra.mxu0 %v16124_v52  ;;  %v11887_v61 = vld [vmem:[#allocation2 + $0x7b] sm:$0xff] }
 0x994   : > { %12476 = vmatprep.subr.bf16.mxu1 %v16096_v49  ;;  %12595 = vmatprep.subr.bf16.mxu0 %v16129_v34  ;;  %v11921_v4 = vpack.c.bf16 %v11887_v61, %v11886_v45  ;;  %v16139_v34 = vld [vmem:[#allocation10 + $0x1130] ss:$8 sps:$4 sm:$0xff]   ;;  %v16144_v61 = vld [vmem:[#allocation10 + $0x1124] ss:$8 sps:$4 sm:$0xff]  }
 0x997   : > { %12477 = vmatpush2.bf16.msra.mxu1 %v16094_v15  ;;  %12596 = vmatpush2.bf16.msra.mxu0 %v16127_v60  ;;  %v11926_v15 = vpack.c.bf16 %v11889_v35, %v11888_v62 }
 0x998   : > { %12478 = vmatprep.subr.bf16.mxu1 %v16102_v24 }
 0x999   : > { %11496 = vmatmul.mubr.bf16.gmra.mxu0 %v10617_v9 }
 0x99a   : > { %11505 = vmatprep.mubr.bf16.mxu0 %v16730_v51 }
 0x99b   : > { %12479 = vmatpush2.bf16.msra.mxu1 %v16100_v8  ;;  %v10705_v8 = vld [vmem:[#allocation12 + $0xa] sm:$0x3] }
 0x99c   : > { %12480 = vmatprep.subr.bf16.mxu1 %v16108_v32  ;;  %v10710_v50 = vrot.slane %v10705_v8, %v17299_v39  ;;  %v10714_v32 = vrot.slane %v10705_v8, %v17381_v18 }
 0x99f   : > { %12481 = vmatpush2.bf16.msra.mxu1 %v16106_v59 }
 0x9a0   : > { %12482 = vmatprep.subr.bf16.mxu1 %v16114_v37 }
 0x9a1   : > { %11506 = vmatmul.mubr.bf16.gmra.mxu0 %v10622_v25 }
 0x9a2   : > { %12597 = vmatprep.mubr.bf16.mxu0 %v11921_v4 }
 0x9a3   : > { %12483 = vmatpush2.bf16.msra.mxu1 %v16112_v21  ;;  %v16133_v21 = vld [vmem:[#allocation10 + $0x1150] ss:$8 sps:$4 sm:$0xff]  }
 0x9a4   : > { %12678 = vmatprep.subr.bf16.mxu1 %v16123_v20 }
 0x9a6   : > { %12485 = vmatmul.mubr.bf16.vlgmr.msra.gmra.mxu1 %v18139_v54 }
 0x9a7   : > { %12494 = vmatprep.mubr.bf16.mxu1 %v11924_v23  ;;  %12679 = vmatpush1.bf16.msra.mxu1 %v16121_v30 }
 0x9a8   : > { %12680 = vmatprep.subr.bf16.mxu1 %v16132_v22 }
 0x9a9   : > { %12598 = vmatmul.mubr.bf16.vlgmr.msra.gmra.mxu0 %v11920_v41 }
 0x9aa   : > { %12607 = vmatprep.mubr.bf16.mxu0 %v11926_v15  ;;  %v16150_v15 = vld [vmem:[#allocation10 + $0x1104] ss:$8 sps:$4 sm:$0xff]  }
 0x9ab   : > { %12681 = vmatpush1.bf16.msra.mxu1 %v16130_v19 }
 0x9ac   : > { %12682 = vmatprep.subr.bf16.mxu1 %v16135_v55 }
 0x9ae   : > { %12495 = vmatmul.mubr.bf16.gmra.mxu1 %v18139_v54 }
 0x9af   : > { %12504 = vmatprep.mubr.bf16.mxu1 %v11929_v2  ;;  %12683 = vmatpush1.bf16.msra.mxu1 %v16133_v21  ;;  %v16147_v2 = vld [vmem:[#allocation10 + $0x1114] ss:$8 sps:$4 sm:$0xff]  }
 0x9b0   : > { %12684 = vmatprep.subr.bf16.mxu1 %v16138_v58 }
 0x9b1   : > { %12608 = vmatmul.mubr.bf16.gmra.mxu0 %v11925_v40 }
 0x9b3   : > { %12685 = vmatpush1.bf16.msra.mxu1 %v16136_v10 }
 0x9b4   : > { %12686 = vmatprep.subr.bf16.mxu1 %v16141_v12 }
 0x9b6   : > { %12505 = vmatmul.mubr.bf16.gmra.mxu1 %v18139_v54 }
 0x9b7   : > { %12687 = vmatpush1.bf16.msra.mxu1 %v16139_v34 }
 0x9b8   : > { %12688 = vmatprep.subr.bf16.mxu1 %v16144_v61 }
 0x9bb   : > { %12689 = vmatpush1.bf16.msra.mxu1 %v16142_v33 }
 0x9bc   : > { %12690 = vmatprep.subr.bf16.mxu1 %v16147_v2  ;;  %v11874_v2 = vld [vmem:[#allocation2 + $0x8a] sm:$0xff] }
 0x9bf   : > { %12691 = vmatpush1.bf16.msra.mxu1 %v16145_v17 }
 0x9c0   : > { %12692 = vmatprep.subr.bf16.mxu1 %v16150_v15 }
 0x9e5   : > { %v11314_v16 = vpop.f32.mrf.mxu1 }
 0x9e7   : > { %v11316_v31 = vpop.f32.mrf.mxu1 }
 0x9e9   : > { %v11191_v49 = vpop.f32.mrf.mxu0  ;;  %v11318_v24 = vpop.f32.mrf.mxu1 }
 0x9ea   : > { %v16148_v49 = vld [vmem:[#allocation10 + $0x1100] ss:$8 sps:$4 sm:$0xff]  }
 0x9eb   : > { %v11193_v57 = vpop.f32.mrf.mxu0  ;;  %v11320_v3 = vpop.f32.mrf.mxu1  ;;  %12693 = vmatpush1.bf16.msra.mxu1 %v16148_v49 }
 0x9ed   : > { %v11195_v29 = vpop.f32.mrf.mxu0 }
 0x9ee   : > { %v11324_v44 = vpop.f32.mrf.mxu1  ;;  %v11196_v11 = vadd.f32 %v11195_v29, %v10710_v50 }
 0x9ef   : > { %v11197_v59 = vpop.f32.mrf.mxu0 }
 0x9f0   : > { %v11326_v43 = vpop.f32.mrf.mxu1  ;;  %v11198_v9 = vadd.f32 %v11197_v59, %v10714_v32 }
 0x9f1   : > { %v11201_v37 = vpop.f32.mrf.mxu0 }
 0x9f2   : > { %v11328_v46 = vpop.f32.mrf.mxu1  ;;  %v11202_v0 = vadd.f32 %v11201_v37, %v10710_v50 }
 0x9f3   : > { %v18147_v63 = vadd.f32 %v11328_v46, %v11196_v11  ;;  %v11203_v42 = vpop.f32.mrf.mxu0 }
 0x9f4   : > { %v11330_v6 = vpop.f32.mrf.mxu1  ;;  %v11204_v25 = vadd.f32 %v11203_v42, %v10714_v32 }
 0x9f5   : > { %v18149_v36 = vadd.f32 %v11330_v6, %v11198_v9  ;;  %v11205_v7 = vpop.f32.mrf.mxu0 }
 0x9f6   : > { %v11334_v13 = vpop.f32.mrf.mxu1 }
 0x9f7   : > { %v18151_v53 = vadd.f32 %v11334_v13, %v11202_v0  ;;  %v11207_v1 = vpop.f32.mrf.mxu0 }
 0x9f8   : > { %v11336_v47 = vpop.f32.mrf.mxu1 }
 0x9f9   : > { %v11337_v52 = vadd.f32 %v11336_v47, %v11204_v25  ;;  %v11211_v23 = vpop.f32.mrf.mxu0 }
 0x9fa   : > { %v11338_v60 = vpop.f32.mrf.mxu1 }
 0x9fb   : > { %v11213_v45 = vpop.f32.mrf.mxu0 }
 0x9fc   : > { %v11340_v4 = vpop.f32.mrf.mxu1 }
 0x9fd   : > { %v11215_v38 = vpop.f32.mrf.mxu0 }
 0x9ff   : > { %v11217_v41 = vpop.f32.mrf.mxu0 }
 0xa01   : > { %v11221_v27 = vpop.f32.mrf.mxu0 }
 0xa03   : > { %v11223_v16 = vpop.f32.mrf.mxu0 }
 0xa04   : > { %v11875_v16 = vld [vmem:[#allocation2 + $0x92] sm:$0xff] }
 0xa05   : > { %v11225_v31 = vpop.f32.mrf.mxu0  ;;  %v11930_v15 = vpack.c.bf16 %v11875_v16, %v11874_v2  ;;  %v11902_v2 = vld [vmem:[#allocation2 + $0x7c] sm:$0xff]  ;;  %v11903_v16 = vld [vmem:[#allocation2 + $0x84] sm:$0xff] }
 0xa06   : > { %v11860_v31 = vld [vmem:[#allocation2 + $0x91] sm:$0xff] }
 0xa07   : > { %v11227_v62 = vpop.f32.mrf.mxu0 }
 0xa08   : > { %v11890_v62 = vld [vmem:[#allocation2 + $0x93] sm:$0xff] }
 0xa09   : > { %v11231_v35 = vpop.f32.mrf.mxu0 }
 0xa0b   : > { %v11233_v28 = vpop.f32.mrf.mxu0 }
 0xa0d   : > { %v11235_v48 = vpop.f32.mrf.mxu0 }
 0xa0f   : > { %v11237_v24 = vpop.f32.mrf.mxu0 }
 0xa11   : > { %v11241_v8 = vpop.f32.mrf.mxu0 }
 0xa12   : > { %v11864_v8 = vld [vmem:[#allocation2 + $0xb1] sm:$0xff] }
 0xa13   : > { %v11243_v30 = vpop.f32.mrf.mxu0 }
 0xa15   : > { %v11245_v20 = vpop.f32.mrf.mxu0 }
 0xa16   : > { %v11865_v20 = vld [vmem:[#allocation2 + $0xb9] sm:$0xff] }
 0xa17   : > { %v11247_v40 = vpop.f32.mrf.mxu0 }
 0xa18   : > { %v11894_v40 = vld [vmem:[#allocation2 + $0xb3] sm:$0xff] }
 0xa19   : > { %v11417_v57 = vpop.f32.mrf.mxu0 }
 0xa1a   : > { %v11895_v57 = vld [vmem:[#allocation2 + $0xbb] sm:$0xff] }
 0xa1b   : > { %v11419_v22 = vpop.f32.mrf.mxu0 }
 0xa1d   : > { %v11421_v3 = vpop.f32.mrf.mxu0 }
 0xa1f   : > { %v11423_v50 = vpop.f32.mrf.mxu0 }
 0xa20   : > { %v11944_v50 = vpack.c.bf16 %v11865_v20, %v11864_v8 }
 0xa21   : > { %v11427_v29 = vpop.f32.mrf.mxu0 }
 0xa22   : > { %v11941_v29 = vpack.c.bf16 %v11895_v57, %v11894_v40 }
 0xa23   : > { %v11429_v19 = vpop.f32.mrf.mxu0 }
 0xa24   : > { %v11344_v19 = vpop.f32.mrf.mxu1 }
 0xa25   : > { %v11431_v44 = vpop.f32.mrf.mxu0 }
 0xa27   : > { %v11433_v55 = vpop.f32.mrf.mxu0 }
 0xa29   : > { %v11437_v32 = vpop.f32.mrf.mxu0 }
 0xa2a   : > { %v11346_v32 = vpop.f32.mrf.mxu1 }
 0xa2b   : > { %v11439_v59 = vpop.f32.mrf.mxu0 }
 0xa2c   : > { %v11348_v59 = vpop.f32.mrf.mxu1 }
 0xa2d   : > { %v11441_v43 = vpop.f32.mrf.mxu0 }
 0xa2e   : > { %v11866_v43 = vld [vmem:[#allocation2 + $0xc1] sm:$0xff] }
 0xa2f   : > { %v11443_v11 = vpop.f32.mrf.mxu0 }
 0xa30   : > { %v11867_v11 = vld [vmem:[#allocation2 + $0xc9] sm:$0xff] }
 0xa31   : > { %v11447_v37 = vpop.f32.mrf.mxu0 }
 0xa33   : > { %v11449_v21 = vpop.f32.mrf.mxu0 }
 0xa34   : > { %v11879_v21 = vld [vmem:[#allocation2 + $0xb2] sm:$0xff] }
 0xa35   : > { %v11451_v46 = vpop.f32.mrf.mxu0 }
 0xa36   : > { %v11350_v46 = vpop.f32.mrf.mxu1 }
 0xa37   : > { %v11453_v58 = vpop.f32.mrf.mxu0 }
 0xa38   : > { %v11949_v58 = vpack.c.bf16 %v11867_v11, %v11866_v43 }
 0xa39   : > { %v11457_v9 = vpop.f32.mrf.mxu0 }
 0xa3a   : > { %v11354_v9 = vpop.f32.mrf.mxu1 }
 0xa3b   : > { %v11459_v42 = vpop.f32.mrf.mxu0 }
 0xa3d   : > { %v11461_v6 = vpop.f32.mrf.mxu0 }
 0xa3e   : > { %v11462_v4 = vadd.f32 %v11461_v6, %v18147_v63 }
 0xa3f   : > { %v11463_v0 = vpop.f32.mrf.mxu0 }
 0xa40   : > { %v11464_v7 = vadd.f32 %v11463_v0, %v18149_v36  ;;  %v11356_v0 = vpop.f32.mrf.mxu1 }
 0xa41   : > { %v11467_v10 = vpop.f32.mrf.mxu0 }
 0xa42   : > { %v14796_v13 = vmul.f32 -1.442695, %v11464_v7  ;;  %v11468_v41 = vadd.f32 %v11467_v10, %v18151_v53  ;;  %v11358_v7 = vpop.f32.mrf.mxu1  ;;  %v11868_v10 = vld [vmem:[#allocation2 + $0xd1] sm:$0xff] }
 0xa43   : > { %v11469_v12 = vpop.f32.mrf.mxu0  ;;  %v11909_v7 = vld [vmem:[#allocation2 + $0xb4] sm:$0xff] }
 0xa44   : > { %16347 = vpow2.f32 %v14796_v13  ;;  %v11470_v25 = vadd.f32 %v11469_v12, %v11337_v52  ;;  %v11869_v13 = vld [vmem:[#allocation2 + $0xd9] sm:$0xf]  ;;  %v11360_v12 = vpop.f32.mrf.mxu1 }
 0xa45   : > { %v11471_v1 = vpop.f32.mrf.mxu0 }
 0xa46   : > { %v14797_v47 = vmul.f32 -1.442695, %v11470_v25  ;;  %v11954_v1 = vpack.c.bf16 %v11869_v13, %v11868_v10 }
 0xa47   : > { %v11473_v23 = vpop.f32.mrf.mxu0 }
 0xa48   : > { %16349 = vpow2.f32 %v14797_v47  ;;  %v11364_v47 = vpop.f32.mrf.mxu1 }
 0xa49   : > { %v11477_v25 = vpop.f32.mrf.mxu0  ;;  %v11910_v47 = vld [vmem:[#allocation2 + $0xbc] sm:$0xff] }
 0xa4b   : > { %v11479_v23 = vpop.f32.mrf.mxu0 }
 0xa4c   : > { %v11911_v23 = vld [vmem:[#allocation2 + $0xc4] sm:$0xff] }
 0xa51   : > { %v16348_v34 = vpop.eup %16347 }
 0xa52   : > { %v11585_v60 = vadd.f32 1.0, %v16348_v34  ;;  %v11366_v34 = vpop.f32.mrf.mxu1 }
 0xa54   : > { %16351 = vrcp.f32 %v11585_v60  ;;  %v11481_v60 = vpop.f32.mrf.mxu0 }
 0xa55   : > { %v16350_v45 = vpop.eup %16349  ;;  %v11942_v60 = vpack.c.bf16 %v11911_v23, %v11910_v47  ;;  %v16210_v47 = vld [vmem:[#allocation10 + $0x12a4] ss:$8 sps:$4 sm:$0xff]  }
 0xa56   : > { %v11586_v61 = vadd.f32 1.0, %v16350_v45  ;;  %v11853_v45 = vld [vmem:[#allocation2 + $0xd0] sm:$0xf] }
 0xa58   : > { %16353 = vrcp.f32 %v11586_v61  ;;  %v11368_v61 = vpop.f32.mrf.mxu1 }
 0xa59   : > { %v16153_v61 = vld [vmem:[#allocation10 + $0x11f4] ss:$8 sps:$4 sm:$0xff]  }
 0xa5a   : > { %13558 = vmatprep.subr.bf16.mxu0 %v16153_v61  ;;  %v16211_v61 = vld [vmem:[#allocation10 + $0x1210] ss:$8 sps:$4 sm:$0xff]  }
 0xa61   : > { %v16352_v38 = vpop.eup %16351 }
 0xa62   : > { %v11645_v33 = vmul.f32 %v16352_v38, %v11462_v4  ;;  %v11483_v4 = vpop.f32.mrf.mxu0  ;;  %v11370_v38 = vpop.f32.mrf.mxu1 }
 0xa63   : > { %v16154_v4 = vld [vmem:[#allocation10 + $0x11e0] ss:$8 sps:$4 sm:$0xff]   ;;  %v16156_v38 = vld [vmem:[#allocation10 + $0x11e4] ss:$8 sps:$4 sm:$0xff]  }
 0xa64   : > { %v11665_v36 = vadd.f32 %v11645_v33, %v18098_v26  ;;  %v11487_v33 = vpop.f32.mrf.mxu0 }
 0xa65   : > { %v16354_v27 = vpop.eup %16353  ;;  %v16157_v33 = vld [vmem:[#allocation10 + $0x11d0] ss:$8 sps:$4 sm:$0xff]  }
 0xa66   : > { %11827 = vst [vmem:[#allocation2 + $0xa0] sm:$0xff] %v11665_v36  ;;  %v11646_v52 = vmul.f32 %v16354_v27, %v11468_v41  ;;  %v11938_v44 = vpack.c.bf16 %v11665_v36, %v18130_v56  ;;  %v11953_v36 = vpack.c.bf16 %v11853_v45, %v18130_v56  ;;  %v11374_v41 = vpop.f32.mrf.mxu1  ;;  %v11489_v27 = vpop.f32.mrf.mxu0  ;;  %v16151_v45 = vld [vmem:[#allocation10 + $0x11f0] ss:$8 sps:$4 sm:$0xff]  }
 0xa67   : > { %13559 = vmatpush1.bf16.msra.mxu0 %v16151_v45  ;;  %v16160_v41 = vld [vmem:[#allocation10 + $0x11c0] ss:$8 sps:$4 sm:$0xff]   ;;  %v16162_v27 = vld [vmem:[#allocation10 + $0x11c4] ss:$8 sps:$4 sm:$0xff]  }
 0xa68   : > { %v11666_v17 = vadd.f32 %v11646_v52, %v18103_v5  ;;  %v11376_v52 = vpop.f32.mrf.mxu1  ;;  %13560 = vmatprep.subr.bf16.mxu0 %v16156_v38  ;;  %v16208_v45 = vld [vmem:[#allocation10 + $0x12a0] ss:$8 sps:$4 sm:$0xff]  }
 0xa69   : > { %v16163_v52 = vld [vmem:[#allocation10 + $0x11b0] ss:$8 sps:$4 sm:$0xff]  }
 0xa6a   : > { %11828 = vst [vmem:[#allocation2 + $0xa8] sm:$0xff] %v11666_v17  ;;  %v11943_v42 = vpack.c.bf16 %v18130_v56, %v11666_v17  ;;  %v11491_v17 = vpop.f32.mrf.mxu0  ;;  %v11904_v56 = vld [vmem:[#allocation2 + $0x8c] sm:$0xff] }
 0xa6b   : > { %13561 = vmatpush1.bf16.msra.mxu0 %v16154_v4  ;;  %v16165_v17 = vld [vmem:[#allocation10 + $0x11b4] ss:$8 sps:$4 sm:$0xff]   ;;  %v11885_v4 = vld [vmem:[#allocation2 + $0xe2] sm:$0xf] }
 0xa6d   : > { %v11861_v35 = vld [vmem:[#allocation2 + $0x99] sm:$0xff] }
 0xa6e   : > { %v11891_v49 = vld [vmem:[#allocation2 + $0x9b] sm:$0xff]  ;;  %v11934_v63 = vpack.c.bf16 %v11861_v35, %v11860_v31  ;;  %v11378_v31 = vpop.f32.mrf.mxu1 }
 0xa6f   : > { %v11931_v28 = vpack.c.bf16 %v11891_v49, %v11890_v62  ;;  %v18161_v3 = vld [vmem:[#allocation2 + $0x9a] sm:$0xff]  ;;  %v11493_v62 = vpop.f32.mrf.mxu0  ;;  %v16169_v31 = vld [vmem:[#allocation10 + $0x1190] ss:$8 sps:$4 sm:$0xff]  }
 0xa70   : > { %12514 = vmatprep.mubr.bf16.mxu1 %v11934_v63  ;;  %v11380_v35 = vpop.f32.mrf.mxu1  ;;  %v11906_v43 = vld [vmem:[#allocation2 + $0x9c] sm:$0xff]  ;;  %v16171_v62 = vld [vmem:[#allocation10 + $0x1194] ss:$8 sps:$4 sm:$0xff]  }
 0xa71   : > { %12617 = vmatprep.mubr.bf16.mxu0 %v11931_v28  ;;  %12515 = vmatmul.mubr.bf16.gmra.mxu1 %v18139_v54  ;;  %v11862_v26 = vld [vmem:[#allocation2 + $0xa1] sm:$0xff]  ;;  %v11863_v53 = vld [vmem:[#allocation2 + $0xa9] sm:$0xff]  ;;  %v11497_v49 = vpop.f32.mrf.mxu0  ;;  %v16172_v35 = vld [vmem:[#allocation10 + $0x1180] ss:$8 sps:$4 sm:$0xff]  }
 0xa72   : > { %12618 = vmatmul.mubr.bf16.gmra.mxu0 %v11930_v15  ;;  %v11892_v48 = vld [vmem:[#allocation2 + $0xa3] sm:$0xff]  ;;  %v11939_v24 = vpack.c.bf16 %v11863_v53, %v11862_v26  ;;  %v11893_v5 = vld [vmem:[#allocation2 + $0xab] sm:$0xff]  ;;  %v11922_v15 = vpack.c.bf16 %v11903_v16, %v11902_v2  ;;  %v12486_v28 = vpop.f32.mrf.mxu1  ;;  %v16168_v16 = vld [vmem:[#allocation10 + $0x11a4] ss:$8 sps:$4 sm:$0xff]  }
 0xa73   : > { %v11936_v30 = vpack.c.bf16 %v11893_v5, %v11892_v48  ;;  %v18159_v22 = vld [vmem:[#allocation2 + $0xa2] sm:$0xff]  ;;  %v18166_v37 = vld [vmem:[#allocation2 + $0xaa] sm:$0xff]  ;;  %v11499_v63 = vpop.f32.mrf.mxu0  ;;  %v11905_v48 = vld [vmem:[#allocation2 + $0x94] sm:$0xff] }
 0xa74   : > { %12524 = vmatprep.mubr.bf16.mxu1 %v11939_v24  ;;  %v11935_v55 = vpack.c.bf16 %v18159_v22, %v18161_v3  ;;  %v11940_v6 = vpack.c.bf16 %v11879_v21, %v18166_v37  ;;  %v12488_v53 = vpop.f32.mrf.mxu1  ;;  %v11927_v20 = vpack.c.bf16 %v11905_v48, %v11904_v56  ;;  %v11908_v0 = vld [vmem:[#allocation2 + $0xac] sm:$0xff]  ;;  %v16174_v49 = vld [vmem:[#allocation10 + $0x1184] ss:$8 sps:$4 sm:$0xff]  }
 0xa75   : > { %12627 = vmatprep.mubr.bf16.mxu0 %v11936_v30  ;;  %v11501_v26 = vpop.f32.mrf.mxu0  ;;  %v11937_v25 = vpack.c.bf16 %v11909_v7, %v11908_v0  ;;  %v16166_v2 = vld [vmem:[#allocation10 + $0x11a0] ss:$8 sps:$4 sm:$0xff]   ;;  %v16177_v63 = vld [vmem:[#allocation10 + $0x1274] ss:$8 sps:$4 sm:$0xff]   ;;  %v16178_v28 = vld [vmem:[#allocation10 + $0x12f0] ss:$8 sps:$4 sm:$0xff]  }
 0xa76   : > { %v12490_v5 = vpop.f32.mrf.mxu1  ;;  %v16180_v26 = vld [vmem:[#allocation10 + $0x12f4] ss:$8 sps:$4 sm:$0xff]   ;;  %v16181_v53 = vld [vmem:[#allocation10 + $0x1260] ss:$8 sps:$4 sm:$0xff]   ;;  %v16183_v56 = vld [vmem:[#allocation10 + $0x1264] ss:$8 sps:$4 sm:$0xff]  }
 0xa77   : > { %v11503_v24 = vpop.f32.mrf.mxu0  ;;  %13601 = vmatprep.subr.bf16.mxu1 %v16180_v26  ;;  %v16184_v48 = vld [vmem:[#allocation10 + $0x12e0] ss:$8 sps:$4 sm:$0xff]   ;;  %v11896_v5 = vld [vmem:[#allocation2 + $0xc3] sm:$0xff] }
 0xa78   : > { %v12492_v30 = vpop.f32.mrf.mxu1  ;;  %v16186_v24 = vld [vmem:[#allocation10 + $0x12e4] ss:$8 sps:$4 sm:$0xff]   ;;  %v16204_v7 = vld [vmem:[#allocation10 + $0x12b4] ss:$8 sps:$4 sm:$0xff]  }
 0xa79   : > { %12525 = vmatmul.mubr.bf16.gmra.mxu1 %v11938_v44  ;;  %v11507_v8 = vpop.f32.mrf.mxu0  ;;  %v11912_v26 = vld [vmem:[#allocation2 + $0xcc] sm:$0xff] }
 0xa7a   : > { %12628 = vmatmul.mubr.bf16.gmra.mxu0 %v11935_v55  ;;  %12534 = vmatprep.mubr.bf16.mxu1 %v11944_v50  ;;  %v12496_v57 = vpop.f32.mrf.mxu1  ;;  %v11907_v55 = vld [vmem:[#allocation2 + $0xa4] sm:$0xff] }
 0xa7b   : > { %12637 = vmatprep.mubr.bf16.mxu0 %v11941_v29  ;;  %v11509_v40 = vpop.f32.mrf.mxu0  ;;  %v11932_v46 = vpack.c.bf16 %v11907_v55, %v11906_v43  ;;  %v11897_v8 = vld [vmem:[#allocation2 + $0xcb] sm:$0xff]  ;;  %v11880_v57 = vld [vmem:[#allocation2 + $0xba] sm:$0xff] }
 0xa7c   : > { %v12498_v29 = vpop.f32.mrf.mxu1  ;;  %v11946_v30 = vpack.c.bf16 %v11897_v8, %v11896_v5  ;;  %v16189_v40 = vld [vmem:[#allocation10 + $0x1254] ss:$8 sps:$4 sm:$0xff]   ;;  %v16190_v55 = vld [vmem:[#allocation10 + $0x12d0] ss:$8 sps:$4 sm:$0xff]   ;;  %v16232_v5 = vld [vmem:[#allocation10 + $0x1360] ss:$8 sps:$4 sm:$0xff]  }
 0xa7d   : > { %v11511_v50 = vpop.f32.mrf.mxu0  ;;  %v11899_v43 = vld [vmem:[#allocation2 + $0xdb] sm:$0xff] }
 0xa7e   : > { %v12500_v44 = vpop.f32.mrf.mxu1  ;;  %v11881_v50 = vld [vmem:[#allocation2 + $0xc2] sm:$0xff] }
 0xa7f   : > { %v11513_v19 = vpop.f32.mrf.mxu0  ;;  %v11945_v29 = vpack.c.bf16 %v11881_v50, %v11880_v57  ;;  %v16195_v44 = vld [vmem:[#allocation10 + $0x1244] ss:$8 sps:$4 sm:$0xff]   ;;  %v16235_v8 = vld [vmem:[#allocation10 + $0x13d0] ss:$8 sps:$4 sm:$0xff]  }
 0xa80   : > { %v12502_v32 = vpop.f32.mrf.mxu1  ;;  %v16192_v19 = vld [vmem:[#allocation10 + $0x12d4] ss:$8 sps:$4 sm:$0xff]   ;;  %v11914_v57 = vld [vmem:[#allocation2 + $0xdc] sm:$0xff] }
 0xa81   : > { %12535 = vmatmul.mubr.bf16.gmra.mxu1 %v11943_v42  ;;  %v12599_v59 = vpop.f32.mrf.mxu0  ;;  %v16193_v32 = vld [vmem:[#allocation10 + $0x1240] ss:$8 sps:$4 sm:$0xff]   ;;  %v11915_v50 = vld [vmem:[#allocation2 + $0xe4] sm:$0xff] }
 0xa82   : > { %12638 = vmatmul.mubr.bf16.gmra.mxu0 %v11940_v6  ;;  %12544 = vmatprep.mubr.bf16.mxu1 %v11949_v58  ;;  %v12506_v11 = vpop.f32.mrf.mxu1  ;;  %v11898_v59 = vld [vmem:[#allocation2 + $0xd3] sm:$0xff] }
 0xa83   : > { %v12601_v21 = vpop.f32.mrf.mxu0  ;;  %12647 = vmatprep.mubr.bf16.mxu0 %v11946_v30  ;;  %v16198_v11 = vld [vmem:[#allocation10 + $0x12c4] ss:$8 sps:$4 sm:$0xff]  }
 0xa84   : > { %v12508_v58 = vpop.f32.mrf.mxu1  ;;  %v11951_v21 = vpack.c.bf16 %v11899_v43, %v11898_v59  ;;  %v16243_v30 = vld [vmem:[#allocation10 + $0x13c4] ss:$8 sps:$4 sm:$0xff]   ;;  %v16252_v59 = vld [vmem:[#allocation10 + $0x1334] ss:$8 sps:$4 sm:$0xff]  }
 0xa85   : > { %v12603_v9 = vpop.f32.mrf.mxu0  ;;  %v11882_v58 = vld [vmem:[#allocation2 + $0xca] sm:$0xff]  ;;  %v16255_v43 = vld [vmem:[#allocation10 + $0x13a4] ss:$8 sps:$4 sm:$0xff]  }
 0xa86   : > { %v12510_v42 = vpop.f32.mrf.mxu1  ;;  %v16196_v9 = vld [vmem:[#allocation10 + $0x12c0] ss:$8 sps:$4 sm:$0xff]  }
 0xa87   : > { %v12605_v6 = vpop.f32.mrf.mxu0  ;;  %v16199_v42 = vld [vmem:[#allocation10 + $0x1230] ss:$8 sps:$4 sm:$0xff]  }
 0xa88   : > { %v12512_v10 = vpop.f32.mrf.mxu1  ;;  %v11883_v6 = vld [vmem:[#allocation2 + $0xd2] sm:$0xff] }
 0xa89   : > { %12545 = vmatmul.mubr.bf16.gmra.mxu1 %v18139_v54  ;;  %v12609_v13 = vpop.f32.mrf.mxu0  ;;  %v11950_v0 = vpack.c.bf16 %v11883_v6, %v11882_v58  ;;  %v16207_v10 = vld [vmem:[#allocation10 + $0x1224] ss:$8 sps:$4 sm:$0xff]   ;;  %v16261_v6 = vld [vmem:[#allocation10 + $0x1394] ss:$8 sps:$4 sm:$0xff]  }
 0xa8a   : > { %12554 = vmatprep.mubr.bf16.mxu1 %v11954_v1  ;;  %12648 = vmatmul.mubr.bf16.gmra.mxu0 %v11945_v29  ;;  %v16202_v13 = vld [vmem:[#allocation10 + $0x12b0] ss:$8 sps:$4 sm:$0xff]   ;;  %v11952_v29 = vpack.c.bf16 %v11915_v50, %v11914_v57  ;;  %v11917_v58 = vld [vmem:[#allocation2 + $0xf4] sm:$0xf] }
 0xa8b   : > { %v12611_v12 = vpop.f32.mrf.mxu0  ;;  %12657 = vmatprep.mubr.bf16.mxu0 %v11951_v21  ;;  %v16253_v21 = vld [vmem:[#allocation10 + $0x13a0] ss:$8 sps:$4 sm:$0xff]  }
 0xa8c   : > { %v16205_v12 = vld [vmem:[#allocation10 + $0x1220] ss:$8 sps:$4 sm:$0xff]  }
 0xa8d   : > { %v12613_v1 = vpop.f32.mrf.mxu0 }
 0xa8e   : > { %v11901_v1 = vld [vmem:[#allocation2 + $0xeb] sm:$0xf] }
 0xa8f   : > { %v12615_v34 = vpop.f32.mrf.mxu0 }
 0xa90   : > { %v16213_v34 = vld [vmem:[#allocation10 + $0x1214] ss:$8 sps:$4 sm:$0xff]  }
 0xa91   : > { %12555 = vmatmul.mubr.bf16.gmra.mxu1 %v11953_v36  ;;  %v16159_v36 = vld [vmem:[#allocation10 + $0x11d4] ss:$8 sps:$4 sm:$0xff]  }
 0xa92   : > { %12710 = vmatprep.mubr.bf16.mxu1 %v16730_v51  ;;  %13562 = vmatprep.subr.bf16.mxu0 %v16159_v36  ;;  %v16219_v36 = vld [vmem:[#allocation10 + $0x1204] ss:$8 sps:$4 sm:$0xff]  }
 0xa93   : > { %13563 = vmatpush1.bf16.msra.mxu0 %v16157_v33  ;;  %v16216_v33 = vld [vmem:[#allocation10 + $0x1294] ss:$8 sps:$4 sm:$0xff]  }
 0xa94   : > { %13564 = vmatprep.subr.bf16.mxu0 %v16162_v27  ;;  %12658 = vmatmul.mubr.bf16.gmra.mxu0 %v11950_v0  ;;  %v16217_v27 = vld [vmem:[#allocation10 + $0x1200] ss:$8 sps:$4 sm:$0xff]  }
 0xa95   : > { %v16256_v0 = vld [vmem:[#allocation10 + $0x1320] ss:$8 sps:$4 sm:$0xff]  }
 0xa97   : > { %13565 = vmatpush1.bf16.msra.mxu0 %v16160_v41  ;;  %v16214_v41 = vld [vmem:[#allocation10 + $0x1290] ss:$8 sps:$4 sm:$0xff]  }
 0xa98   : > { %13566 = vmatprep.subr.bf16.mxu0 %v16165_v17  ;;  %v13052_v17 = vld [vmem:[#allocation3 + $0x8d] sm:$0xff] }
 0xa99   : > { %12711 = vmatmul.mubr.bf16.vlgmr.msra.gmra.mxu1 %v11922_v15  ;;  %v16175_v15 = vld [vmem:[#allocation10 + $0x1270] ss:$8 sps:$4 sm:$0xff]  }
 0xa9a   : > { %12720 = vmatprep.mubr.bf16.mxu1 %v16730_v51  ;;  %13602 = vmatpush1.bf16.msra.mxu1 %v16178_v28  ;;  %v16229_v28 = vld [vmem:[#allocation10 + $0x13e0] ss:$8 sps:$4 sm:$0xff]  }
 0xa9b   : > { %13567 = vmatpush1.bf16.msra.mxu0 %v16163_v52  ;;  %13603 = vmatprep.subr.bf16.mxu1 %v16186_v24  ;;  %v13051_v52 = vld [vmem:[#allocation3 + $0x85] sm:$0xff]  ;;  %v16237_v24 = vld [vmem:[#allocation10 + $0x13d4] ss:$8 sps:$4 sm:$0xff]  }
 0xa9c   : > { %13568 = vmatprep.subr.bf16.mxu0 %v16168_v16  ;;  %v13060_v16 = vpack.c.bf16 %v13052_v17, %v13051_v52 }
 0xa9e   : > { %13604 = vmatpush1.bf16.msra.mxu1 %v16184_v48  ;;  %v16234_v48 = vld [vmem:[#allocation10 + $0x1364] ss:$8 sps:$4 sm:$0xff]  }
 0xa9f   : > { %13569 = vmatpush1.bf16.msra.mxu0 %v16166_v2  ;;  %13605 = vmatprep.subr.bf16.mxu1 %v16192_v19  ;;  %v16222_v2 = vld [vmem:[#allocation10 + $0x1284] ss:$8 sps:$4 sm:$0xff]  }
 0xaa0   : > { %13570 = vmatprep.subr.bf16.mxu0 %v16171_v62  ;;  %v16220_v62 = vld [vmem:[#allocation10 + $0x1280] ss:$8 sps:$4 sm:$0xff]   ;;  %v16246_v19 = vld [vmem:[#allocation10 + $0x1344] ss:$8 sps:$4 sm:$0xff]  }
 0xaa1   : > { %12721 = vmatmul.mubr.bf16.gmra.mxu1 %v11927_v20  ;;  %v16187_v20 = vld [vmem:[#allocation10 + $0x1250] ss:$8 sps:$4 sm:$0xff]  }
 0xaa2   : > { %12730 = vmatprep.mubr.bf16.mxu1 %v16730_v51  ;;  %13606 = vmatpush1.bf16.msra.mxu1 %v16190_v55  ;;  %v16244_v55 = vld [vmem:[#allocation10 + $0x1340] ss:$8 sps:$4 sm:$0xff]  }
 0xaa3   : > { %13571 = vmatpush1.bf16.msra.mxu0 %v16169_v31  ;;  %13607 = vmatprep.subr.bf16.mxu1 %v16198_v11  ;;  %v16225_v31 = vld [vmem:[#allocation10 + $0x13f4] ss:$8 sps:$4 sm:$0xff]   ;;  %v16250_v11 = vld [vmem:[#allocation10 + $0x1330] ss:$8 sps:$4 sm:$0xff]  }
 0xaa4   : > { %13572 = vmatprep.subr.bf16.mxu0 %v16174_v49  ;;  %v16228_v49 = vld [vmem:[#allocation10 + $0x1374] ss:$8 sps:$4 sm:$0xff]  }
 0xaa6   : > { %13608 = vmatpush1.bf16.msra.mxu1 %v16196_v9 }
 0xaa7   : > { %13573 = vmatpush1.bf16.msra.mxu0 %v16172_v35  ;;  %13609 = vmatprep.subr.bf16.mxu1 %v16204_v7  ;;  %v16223_v35 = vld [vmem:[#allocation10 + $0x13f0] ss:$8 sps:$4 sm:$0xff]  }
 0xaa8   : > { %13574 = vmatprep.subr.bf16.mxu0 %v16177_v63  ;;  %v16226_v63 = vld [vmem:[#allocation10 + $0x1370] ss:$8 sps:$4 sm:$0xff]  }
 0xaa9   : > { %12731 = vmatmul.mubr.bf16.gmra.mxu1 %v11932_v46  ;;  %v16201_v46 = vld [vmem:[#allocation10 + $0x1234] ss:$8 sps:$4 sm:$0xff]   ;;  %v16259_v7 = vld [vmem:[#allocation10 + $0x1390] ss:$8 sps:$4 sm:$0xff]  }
 0xaaa   : > { %12740 = vmatprep.mubr.bf16.mxu1 %v16730_v51  ;;  %13610 = vmatpush1.bf16.msra.mxu1 %v16202_v13  ;;  %v16267_v13 = vld [vmem:[#allocation10 + $0x1384] ss:$8 sps:$4 sm:$0xff]  }
 0xaab   : > { %13575 = vmatpush2.bf16.msra.mxu0 %v16175_v15  ;;  %13611 = vmatprep.subr.bf16.mxu1 %v16210_v47  ;;  %v16231_v15 = vld [vmem:[#allocation10 + $0x13e4] ss:$8 sps:$4 sm:$0xff]  }
 0xaac   : > { %13576 = vmatprep.subr.bf16.mxu0 %v16183_v56  ;;  %v13056_v47 = vld [vmem:[#allocation3 + $0xc3] sm:$0xff] }
 0xaae   : > { %13612 = vmatpush1.bf16.msra.mxu1 %v16208_v45 }
 0xaaf   : > { %13577 = vmatpush2.bf16.msra.mxu0 %v16181_v53  ;;  %13613 = vmatprep.subr.bf16.mxu1 %v16216_v33  ;;  %v11913_v53 = vld [vmem:[#allocation2 + $0xd4] sm:$0xff] }
 0xab0   : > { %13578 = vmatprep.subr.bf16.mxu0 %v16189_v40  ;;  %v11947_v56 = vpack.c.bf16 %v11913_v53, %v11912_v26  ;;  %v16241_v40 = vld [vmem:[#allocation10 + $0x13c0] ss:$8 sps:$4 sm:$0xff]  }
 0xab1   : > { %12741 = vmatmul.mubr.bf16.gmra.mxu1 %v11937_v25  ;;  %v11900_v25 = vld [vmem:[#allocation2 + $0xe3] sm:$0xff] }
 0xab2   : > { %12750 = vmatprep.mubr.bf16.mxu1 %v16730_v51  ;;  %v11956_v23 = vpack.c.bf16 %v11901_v1, %v11900_v25  ;;  %13614 = vmatpush1.bf16.msra.mxu1 %v16214_v41  ;;  %v16270_v25 = vld [vmem:[#allocation10 + $0x1304] ss:$8 sps:$4 sm:$0xff]   ;;  %v13055_v1 = vld [vmem:[#allocation3 + $0xbb] sm:$0xff] }
 0xab3   : > { %13579 = vmatpush2.bf16.msra.mxu0 %v16187_v20  ;;  %13615 = vmatprep.subr.bf16.mxu1 %v16222_v2  ;;  %v16238_v20 = vld [vmem:[#allocation10 + $0x1350] ss:$8 sps:$4 sm:$0xff]   ;;  %v13062_v45 = vpack.c.bf16 %v13056_v47, %v13055_v1 }
 0xab4   : > { %13580 = vmatprep.subr.bf16.mxu0 %v16195_v44  ;;  %12667 = vmatprep.mubr.bf16.mxu0 %v11956_v23  ;;  %v16249_v44 = vld [vmem:[#allocation10 + $0x13b4] ss:$8 sps:$4 sm:$0xff]   ;;  %v16265_v23 = vld [vmem:[#allocation10 + $0x1380] ss:$8 sps:$4 sm:$0xff]  }
 0xab6   : > { %13616 = vmatpush1.bf16.msra.mxu1 %v16220_v62 }
 0xab7   : > { %13581 = vmatpush2.bf16.msra.mxu0 %v16193_v32  ;;  %13617 = vmatprep.subr.bf16.mxu1 %v16228_v49  ;;  %v16247_v32 = vld [vmem:[#allocation10 + $0x13b0] ss:$8 sps:$4 sm:$0xff]  }
 0xab8   : > { %13582 = vmatprep.subr.bf16.mxu0 %v16201_v46  ;;  %v11916_v46 = vld [vmem:[#allocation2 + $0xec] sm:$0xff] }
 0xab9   : > { %12751 = vmatmul.mubr.bf16.gmra.mxu1 %v11942_v60  ;;  %v11884_v60 = vld [vmem:[#allocation2 + $0xda] sm:$0xff]  ;;  %v11957_v9 = vpack.c.bf16 %v11917_v58, %v11916_v46 }
 0xaba   : > { %12760 = vmatprep.mubr.bf16.mxu1 %v16730_v51  ;;  %v11955_v38 = vpack.c.bf16 %v11885_v4, %v11884_v60  ;;  %13618 = vmatpush2.bf16.msra.mxu1 %v16226_v63  ;;  %v13058_v60 = vld [vmem:[#allocation3 + $0xde] sm:$0xff] }
 0xabb   : > { %13583 = vmatpush2.bf16.msra.mxu0 %v16199_v42  ;;  %13619 = vmatprep.subr.bf16.mxu1 %v16234_v48  ;;  %v16258_v42 = vld [vmem:[#allocation10 + $0x1324] ss:$8 sps:$4 sm:$0xff]  }
 0xabc   : > { %13584 = vmatprep.subr.bf16.mxu0 %v16207_v10  ;;  %12668 = vmatmul.mubr.bf16.gmra.mxu0 %v11955_v38  ;;  %v16264_v10 = vld [vmem:[#allocation10 + $0x1314] ss:$8 sps:$4 sm:$0xff]   ;;  %v12040_v38 = vld [vmem:[#allocation12 + $0xc] sm:$0x3] }
 0xabd   : > { %13590 = vmatprep.mubr.bf16.mxu0 %v13060_v16  ;;  %v12045_v52 = vrot.slane %v12040_v38, %v17299_v39  ;;  %v12049_v47 = vrot.slane %v12040_v38, %v17381_v18 }
 0xabe   : > { %13620 = vmatpush2.bf16.msra.mxu1 %v16232_v5 }
 0xabf   : > { %13585 = vmatpush2.bf16.msra.mxu0 %v16205_v12  ;;  %v16262_v12 = vld [vmem:[#allocation10 + $0x1310] ss:$8 sps:$4 sm:$0xff]  }
 0xac0   : > { %13586 = vmatprep.subr.bf16.mxu0 %v16213_v34  ;;  %v13057_v34 = vld [vmem:[#allocation3 + $0xd6] sm:$0xff] }
 0xac1   : > { %12761 = vmatmul.mubr.bf16.gmra.mxu1 %v11947_v56  ;;  %v13063_v4 = vpack.c.bf16 %v13058_v60, %v13057_v34 }
 0xac2   : > { %12770 = vmatprep.mubr.bf16.mxu1 %v16730_v51 }
 0xac3   : > { %13587 = vmatpush2.bf16.msra.mxu0 %v16211_v61  ;;  %v16268_v61 = vld [vmem:[#allocation10 + $0x1300] ss:$8 sps:$4 sm:$0xff]  }
 0xac4   : > { %13588 = vmatprep.subr.bf16.mxu0 %v16219_v36 }
 0xac7   : > { %13589 = vmatpush2.bf16.msra.mxu0 %v16217_v27 }
 0xac8   : > { %13644 = vmatprep.subr.bf16.mxu0 %v16225_v31 }
 0xac9   : > { %12771 = vmatmul.mubr.bf16.gmra.mxu1 %v11952_v29 }
 0xaca   : > { %13591 = vmatmul.mubr.bf16.vlgmr.msra.gmra.mxu0 %v18139_v54  ;;  %v16240_v54 = vld [vmem:[#allocation10 + $0x1354] ss:$8 sps:$4 sm:$0xff]   ;;  %12780 = vmatprep.mubr.bf16.mxu1 %v16730_v51 }
 0xacb   : > { %13645 = vmatpush1.bf16.msra.mxu0 %v16223_v35  ;;  %13676 = vmatprep.mubr.bf16.mxu0 %v16730_v51 }
 0xacc   : > { %13646 = vmatprep.subr.bf16.mxu0 %v16231_v15  ;;  %13621 = vmatprep.subr.bf16.mxu1 %v16240_v54 }
 0xacd   : > { %13622 = vmatpush2.bf16.msra.mxu1 %v16238_v20 }
 0xace   : > { %13623 = vmatprep.subr.bf16.mxu1 %v16246_v19 }
 0xacf   : > { %13647 = vmatpush1.bf16.msra.mxu0 %v16229_v28 }
 0xad0   : > { %13648 = vmatprep.subr.bf16.mxu0 %v16237_v24 }
 0xad1   : > { %13624 = vmatpush2.bf16.msra.mxu1 %v16244_v55 }
 0xad2   : > { %13625 = vmatprep.subr.bf16.mxu1 %v16252_v59  ;;  %12781 = vmatmul.mubr.bf16.gmra.mxu1 %v11957_v9 }
 0xad3   : > { %13649 = vmatpush1.bf16.msra.mxu0 %v16235_v8  ;;  %13633 = vmatprep.mubr.bf16.mxu1 %v13062_v45 }
 0xad4   : > { %13650 = vmatprep.subr.bf16.mxu0 %v16243_v30 }
 0xad5   : > { %13626 = vmatpush2.bf16.msra.mxu1 %v16250_v11 }
 0xad6   : > { %13627 = vmatprep.subr.bf16.mxu1 %v16258_v42 }
 0xad7   : > { %13651 = vmatpush1.bf16.msra.mxu0 %v16241_v40 }
 0xad8   : > { %13652 = vmatprep.subr.bf16.mxu0 %v16249_v44 }
 0xad9   : > { %13628 = vmatpush2.bf16.msra.mxu1 %v16256_v0 }
 0xada   : > { %13629 = vmatprep.subr.bf16.mxu1 %v16264_v10 }
 0xadb   : > { %13653 = vmatpush1.bf16.msra.mxu0 %v16247_v32 }
 0xadc   : > { %13654 = vmatprep.subr.bf16.mxu0 %v16255_v43 }
 0xadd   : > { %13630 = vmatpush2.bf16.msra.mxu1 %v16262_v12 }
 0xade   : > { %13631 = vmatprep.subr.bf16.mxu1 %v16270_v25 }
 0xadf   : > { %13655 = vmatpush1.bf16.msra.mxu0 %v16253_v21 }
 0xae0   : > { %13656 = vmatprep.subr.bf16.mxu0 %v16261_v6 }
 0xae1   : > { %13632 = vmatpush2.bf16.msra.mxu1 %v16268_v61 }
 0xae3   : > { %13657 = vmatpush1.bf16.msra.mxu0 %v16259_v7 }
 0xae4   : > { %13658 = vmatprep.subr.bf16.mxu0 %v16267_v13 }
 0xae7   : > { %13659 = vmatpush1.bf16.msra.mxu0 %v16265_v23 }
 0xaea   : > { %13677 = vmatmul.mubr.bf16.vlgmr.msra.gmra.mxu0 %v13063_v4 }
 0xb31   : > { %v12516_v33 = vpop.f32.mrf.mxu1 }
 0xb32   : > { %v12619_v36 = vpop.f32.mrf.mxu0  ;;  %v12517_v62 = vadd.f32 %v12516_v33, %v12045_v52 }
 0xb33   : > { %v12518_v41 = vpop.f32.mrf.mxu1 }
 0xb34   : > { %v12621_v27 = vpop.f32.mrf.mxu0  ;;  %v12519_v60 = vadd.f32 %v12518_v41, %v12049_v47 }
 0xb35   : > { %v12520_v17 = vpop.f32.mrf.mxu1 }
 0xb36   : > { %v12623_v2 = vpop.f32.mrf.mxu0  ;;  %v12521_v26 = vadd.f32 %v12520_v17, %v12045_v52 }
 0xb37   : > { %v12522_v16 = vpop.f32.mrf.mxu1 }
 0xb38   : > { %v12625_v31 = vpop.f32.mrf.mxu0  ;;  %v12523_v33 = vadd.f32 %v12522_v16, %v12049_v47 }
 0xb39   : > { %v12526_v35 = vpop.f32.mrf.mxu1 }
 0xb3a   : > { %v12629_v49 = vpop.f32.mrf.mxu0  ;;  %v12527_v8 = vadd.f32 %v12526_v35, %v12045_v52 }
 0xb3b   : > { %v18183_v15 = vadd.f32 %v12629_v49, %v12517_v62  ;;  %v12528_v63 = vpop.f32.mrf.mxu1 }
 0xb3c   : > { %v12631_v28 = vpop.f32.mrf.mxu0  ;;  %v12529_v31 = vadd.f32 %v12528_v63, %v12049_v47 }
 0xb3d   : > { %v12530_v53 = vpop.f32.mrf.mxu1  ;;  %v12632_v61 = vadd.f32 %v12631_v28, %v12519_v60 }
 0xb3e   : > { %v12633_v56 = vpop.f32.mrf.mxu0 }
 0xb3f   : > { %v18185_v48 = vadd.f32 %v12633_v56, %v12521_v26  ;;  %v12532_v24 = vpop.f32.mrf.mxu1 }
 0xb40   : > { %v12635_v5 = vpop.f32.mrf.mxu0 }
 0xb41   : > { %v12536_v54 = vpop.f32.mrf.mxu1  ;;  %v12636_v52 = vadd.f32 %v12635_v5, %v12523_v33 }
 0xb42   : > { %v12639_v30 = vpop.f32.mrf.mxu0 }
 0xb43   : > { %v18187_v20 = vadd.f32 %v12639_v30, %v12527_v8  ;;  %v12538_v40 = vpop.f32.mrf.mxu1  ;;  %v889_v30 = vadd.s32 48, %v17289_v14 }
 0xb44   : > { %v12641_v57 = vpop.f32.mrf.mxu0 }
 0xb45   : > { %v12540_v50 = vpop.f32.mrf.mxu1  ;;  %v12642_v49 = vadd.f32 %v12641_v57, %v12529_v31  ;;  %v12927_v40 = vadd.s32 4294967242, %v889_v30  ;;  %v16271_v31 = vld [vmem:[#allocation13 + $0x70] ss:$8 sps:$4 sm:$0xff]  }
 0xb46   : > { %v12643_v29 = vpop.f32.mrf.mxu0 }
 0xb47   : > { %v12542_v19 = vpop.f32.mrf.mxu1  ;;  %vm12943_vm14 = vcmp.ge.s32.totalorder %v12927_v40, 0 }
 0xb48   : > { %v12645_v44 = vpop.f32.mrf.mxu0  ;;  %v891_v19 = vadd.s32 64, %v17289_v14 }
 0xb49   : > { %v12546_v55 = vpop.f32.mrf.mxu1 }
 0xb4b   : > { %v12548_v32 = vpop.f32.mrf.mxu1 }
 0xb4d   : > { %v12550_v59 = vpop.f32.mrf.mxu1 }
 0xb4f   : > { %v12552_v43 = vpop.f32.mrf.mxu1 }
 0xb51   : > { %v12556_v11 = vpop.f32.mrf.mxu1 }
 0xb52   : > { %v12929_v11 = vadd.s32 4294967242, %v891_v19 }
 0xb53   : > { %v12558_v21 = vpop.f32.mrf.mxu1 }
 0xb54   : > { %vm12961_vm15 = vcmp.lt.s32.totalorder %v12929_v11, 16 }
 0xb55   : > { %v12560_v46 = vpop.f32.mrf.mxu1 }
 0xb57   : > { %v12562_v58 = vpop.f32.mrf.mxu1 }
 0xb59   : > { %v12712_v9 = vpop.f32.mrf.mxu1 }
 0xb5b   : > { %v12714_v42 = vpop.f32.mrf.mxu1 }
 0xb5d   : > { %v12716_v6 = vpop.f32.mrf.mxu1 }
 0xb5f   : > { %v12718_v0 = vpop.f32.mrf.mxu1 }
 0xb61   : > { %v12722_v7 = vpop.f32.mrf.mxu1 }
 0xb63   : > { %v12724_v10 = vpop.f32.mrf.mxu1 }
 0xb65   : > { %v12726_v13 = vpop.f32.mrf.mxu1 }
 0xb67   : > { %v12728_v12 = vpop.f32.mrf.mxu1 }
 0xb69   : > { %v12732_v25 = vpop.f32.mrf.mxu1 }
 0xb6b   : > { %v12734_v1 = vpop.f32.mrf.mxu1 }
 0xb6d   : > { %v12736_v23 = vpop.f32.mrf.mxu1 }
 0xb6f   : > { %v12738_v34 = vpop.f32.mrf.mxu1 }
 0xb71   : > { %v12742_v45 = vpop.f32.mrf.mxu1 }
 0xb72   : > { %v12743_v57 = vadd.f32 %v12742_v45, %v18183_v15 }
 0xb73   : > { %v12744_v4 = vpop.f32.mrf.mxu1 }
 0xb74   : > { %v12745_v36 = vadd.f32 %v12744_v4, %v12632_v61 }
 0xb75   : > { %v12746_v27 = vpop.f32.mrf.mxu1 }
 0xb76   : > { %v14893_v17 = vmul.f32 -1.442695, %v12745_v36  ;;  %v12747_v55 = vadd.f32 %v12746_v27, %v18185_v48 }
 0xb77   : > { %v12748_v2 = vpop.f32.mrf.mxu1 }
 0xb78   : > { %16355 = vpow2.f32 %v14893_v17  ;;  %v12749_v62 = vadd.f32 %v12748_v2, %v12636_v52  ;;  %v16273_v2 = vld [vmem:[#allocation13 + $0x74] ss:$8 sps:$4 sm:$0xff]  }
 0xb79   : > { %v12752_v35 = vpop.f32.mrf.mxu1  ;;  %13831 = vmatprep.subr.bf16.mxu1 %v16273_v2 }
 0xb7a   : > { %v14894_v26 = vmul.f32 -1.442695, %v12749_v62  ;;  %v12753_v46 = vadd.f32 %v12752_v35, %v18187_v20  ;;  %v16276_v62 = vld [vmem:[#allocation13 + $0x64] ss:$8 sps:$4 sm:$0xff]   ;;  %v16274_v35 = vld [vmem:[#allocation13 + $0x60] ss:$8 sps:$4 sm:$0xff]  }
 0xb7b   : > { %v12754_v53 = vpop.f32.mrf.mxu1 }
 0xb7c   : > { %16357 = vpow2.f32 %v14894_v26  ;;  %v12755_v38 = vadd.f32 %v12754_v53, %v12642_v49  ;;  %v16279_v49 = vld [vmem:[#allocation13 + $0x54] ss:$8 sps:$4 sm:$0xff]   ;;  %v16277_v26 = vld [vmem:[#allocation13 + $0x50] ss:$8 sps:$4 sm:$0xff]   ;;  %v16282_v53 = vld [vmem:[#allocation13 + $0x44] ss:$8 sps:$4 sm:$0xff]  }
 0xb7d   : > { %v12756_v56 = vpop.f32.mrf.mxu1 }
 0xb7e   : > { %v14895_v41 = vmul.f32 -1.442695, %v12755_v38  ;;  %v16280_v38 = vld [vmem:[#allocation13 + $0x40] ss:$8 sps:$4 sm:$0xff]   ;;  %v16285_v56 = vld [vmem:[#allocation13 + $0x34] ss:$8 sps:$4 sm:$0xff]  }
 0xb7f   : > { %v12758_v24 = vpop.f32.mrf.mxu1 }
 0xb80   : > { %16359 = vpow2.f32 %v14895_v41  ;;  %v16283_v41 = vld [vmem:[#allocation13 + $0x30] ss:$8 sps:$4 sm:$0xff]   ;;  %v16288_v24 = vld [vmem:[#allocation13 + $0x24] ss:$8 sps:$4 sm:$0xff]  }
 0xb81   : > { %v12762_v23 = vpop.f32.mrf.mxu1 }
 0xb83   : > { %v12764_v34 = vpop.f32.mrf.mxu1 }
 0xb85   : > { %v16356_v28 = vpop.eup %16355  ;;  %v12766_v60 = vpop.f32.mrf.mxu1 }
 0xb86   : > { %v12845_v16 = vadd.f32 1.0, %v16356_v28  ;;  %v16286_v28 = vld [vmem:[#allocation13 + $0x20] ss:$8 sps:$4 sm:$0xff]  }
 0xb87   : > { %v12768_v45 = vpop.f32.mrf.mxu1 }
 0xb88   : > { %16361 = vrcp.f32 %v12845_v16  ;;  %v16291_v16 = vld [vmem:[#allocation13 + $0x14] ss:$8 sps:$4 sm:$0xff]  }
 0xb89   : > { %v16358_v8 = vpop.eup %16357  ;;  %v12772_v61 = vpop.f32.mrf.mxu1 }
 0xb8a   : > { %v12846_v5 = vadd.f32 1.0, %v16358_v8  ;;  %v16289_v8 = vld [vmem:[#allocation13 + $0x10] ss:$8 sps:$4 sm:$0xff]  }
 0xb8b   : > { %v12774_v4 = vpop.f32.mrf.mxu1 }
 0xb8c   : > { %16363 = vrcp.f32 %v12846_v5  ;;  %v16294_v5 = vld [vmem:[#allocation13 + $0x4] ss:$8 sps:$4 sm:$0xff]  }
 0xb8d   : > { %v16360_v54 = vpop.eup %16359  ;;  %v12776_v33 = vpop.f32.mrf.mxu1 }
 0xb8e   : > { %v12847_v63 = vadd.f32 1.0, %v16360_v54  ;;  %v16292_v54 = vld [vmem:[#allocation13] ss:$8 sps:$4 sm:$0xff]  }
 0xb90   : > { %16365 = vrcp.f32 %v12847_v63 }
 0xb95   : > { %v16362_v50 = vpop.eup %16361 }
 0xb96   : > { %v12893_v29 = vmul.f32 %v16362_v50, %v12743_v57  ;;  %v13146_v57 = vld [vmem:[#allocation12 + $0xe] sm:$0x3] }
 0xb97   : > { %v13155_v19 = vrot.slane %v13146_v57, %v17381_v18 }
 0xb98   : > { %v12909_v44 = vadd.f32 %v12893_v29, %v18161_v3 }
 0xb99   : > { %v16364_v32 = vpop.eup %16363 }
 0xb9a   : > { %v13023_v59 = vsel %vm12943_vm14, %v12909_v44, 0.0  ;;  %v12894_v43 = vmul.f32 %v16364_v32, %v12747_v55 }
 0xb9b   : > { %13039 = vst [vmem:[#allocation3 + $0x9a] sm:$0xff] %v13023_v59 }
 0xb9c   : > { %v12910_v21 = vadd.f32 %v12894_v43, %v18159_v22  ;;  %v12649_v22 = vpop.f32.mrf.mxu0 }
 0xb9d   : > { %v16366_v58 = vpop.eup %16365 }
 0xb9e   : > { %13040 = vst [vmem:[#allocation3 + $0xa2] sm:$0xff] %v12910_v21  ;;  %v12895_v15 = vmul.f32 %v16366_v58, %v12753_v46  ;;  %v12651_v20 = vpop.f32.mrf.mxu0 }
 0xba0   : > { %v12911_v9 = vadd.f32 %v12895_v15, %v18166_v37  ;;  %v12653_v6 = vpop.f32.mrf.mxu0 }
 0xba2   : > { %v13025_v14 = vsel %vm12961_vm15, %v12911_v9, 0.0  ;;  %v12655_v0 = vpop.f32.mrf.mxu0 }
 0xba3   : > { %13041 = vst [vmem:[#allocation3 + $0xaa] sm:$0xff] %v13025_v14 }
 0xba4   : > { %v12659_v7 = vpop.f32.mrf.mxu0 }
 0xba5   : > { %v18198_v3 = vld [vmem:[#allocation3 + $0xa0] sm:$0xff] }
 0xba6   : > { %v12661_v10 = vpop.f32.mrf.mxu0 }
 0xba7   : > { %v13151_v10 = vrot.slane %v13146_v57, %v17299_v39 }
 0xba8   : > { %v12663_v13 = vpop.f32.mrf.mxu0 }
 0xbaa   : > { %v18200_v48 = vld [vmem:[#allocation3 + $0xa8] sm:$0xff]  ;;  %v12665_v37 = vpop.f32.mrf.mxu0 }
 0xbab   : > { %v13061_v42 = vpack.c.bf16 %v18200_v48, %v18198_v3 }
 0xbac   : > { %v12669_v12 = vpop.f32.mrf.mxu0 }
 0xbad   : > { %13634 = vmatmul.mubr.bf16.vlgmr.msra.gmra.mxu1 %v13061_v42 }
 0xbae   : > { %13863 = vmatprep.mubr.bf16.mxu1 %v16730_v51  ;;  %v12671_v25 = vpop.f32.mrf.mxu0  ;;  %v12778_v51 = vpop.f32.mrf.mxu1  ;;  %13832 = vmatpush1.bf16.msra.mxu1 %v16271_v31 }
 0xbaf   : > { %13833 = vmatprep.subr.bf16.mxu1 %v16276_v62 }
 0xbb0   : > { %v12673_v1 = vpop.f32.mrf.mxu0  ;;  %v12782_v36 = vpop.f32.mrf.mxu1 }
 0xbb1   : > { %v13739_v36 = vld [vmem:[#allocation15] sm:$0x3] }
 0xbb2   : > { %v12675_v47 = vpop.f32.mrf.mxu0  ;;  %v12784_v27 = vpop.f32.mrf.mxu1  ;;  %13834 = vmatpush1.bf16.msra.mxu1 %v16274_v35 }
 0xbb3   : > { %13835 = vmatprep.subr.bf16.mxu1 %v16279_v49  ;;  %v13744_v27 = vrot.slane %v13739_v36, %v17299_v39 }
 0xbb4   : > { %v12786_v52 = vpop.f32.mrf.mxu1  ;;  %v13592_v63 = vpop.f32.mrf.mxu0 }
 0xbb5   : > { %v13593_v37 = vadd.f32 %v13592_v63, %v13151_v10  ;;  %v13748_v52 = vrot.slane %v13739_v36, %v17381_v18 }
 0xbb6   : > { %v12788_v17 = vpop.f32.mrf.mxu1  ;;  %13836 = vmatpush1.bf16.msra.mxu1 %v16277_v26  ;;  %v13594_v30 = vpop.f32.mrf.mxu0 }
 0xbb7   : > { %13837 = vmatprep.subr.bf16.mxu1 %v16282_v53  ;;  %v13595_v32 = vadd.f32 %v13594_v30, %v13155_v19 }
 0xbb8   : > { %v13596_v40 = vpop.f32.mrf.mxu0 }
 0xbb9   : > { %v13597_v25 = vadd.f32 %v13596_v40, %v13151_v10 }
 0xbba   : > { %13838 = vmatpush1.bf16.msra.mxu1 %v16280_v38  ;;  %v13598_v50 = vpop.f32.mrf.mxu0 }
 0xbbb   : > { %13839 = vmatprep.subr.bf16.mxu1 %v16285_v56  ;;  %v13599_v46 = vadd.f32 %v13598_v50, %v13155_v19 }
 0xbbc   : > { %v13678_v29 = vpop.f32.mrf.mxu0 }
 0xbbe   : > { %13840 = vmatpush1.bf16.msra.mxu1 %v16283_v41  ;;  %v13680_v44 = vpop.f32.mrf.mxu0 }
 0xbbf   : > { %13841 = vmatprep.subr.bf16.mxu1 %v16288_v24 }
 0xbc0   : > { %v13682_v11 = vpop.f32.mrf.mxu0 }
 0xbc2   : > { %13842 = vmatpush1.bf16.msra.mxu1 %v16286_v28  ;;  %v13684_v42 = vpop.f32.mrf.mxu0 }
 0xbc3   : > { %13843 = vmatprep.subr.bf16.mxu1 %v16291_v16 }
 0xbc6   : > { %13844 = vmatpush1.bf16.msra.mxu1 %v16289_v8 }
 0xbc7   : > { %13845 = vmatprep.subr.bf16.mxu1 %v16294_v5 }
 0xbca   : > { %13846 = vmatpush1.bf16.msra.mxu1 %v16292_v54 }
 0xc6d   : > { %v13635_v55 = vpop.f32.mrf.mxu1 }
 0xc6e   : > { %v13636_v12 = vadd.f32 %v13635_v55, %v13593_v37 }
 0xc6f   : > { %v13637_v59 = vpop.f32.mrf.mxu1 }
 0xc70   : > { %v13638_v43 = vadd.f32 %v13637_v59, %v13595_v32  ;;  %v13679_v1 = vadd.f32 %v13678_v29, %v13636_v12 }
 0xc71   : > { %v13639_v21 = vpop.f32.mrf.mxu1 }
 0xc72   : > { %v13681_v58 = vadd.f32 %v13680_v44, %v13638_v43  ;;  %v13640_v47 = vadd.f32 %v13639_v21, %v13597_v25 }
 0xc73   : > { %v13641_v15 = vpop.f32.mrf.mxu1 }
 0xc74   : > { %v14983_v9 = vmul.f32 -1.442695, %v13681_v58  ;;  %v13642_v14 = vadd.f32 %v13641_v15, %v13599_v46  ;;  %v13683_v45 = vadd.f32 %v13682_v11, %v13640_v47 }
 0xc76   : > { %16367 = vpow2.f32 %v14983_v9  ;;  %v13685_v22 = vadd.f32 %v13684_v42, %v13642_v14 }
 0xc78   : > { %v14984_v20 = vmul.f32 -1.442695, %v13685_v22 }
 0xc7a   : > { %16369 = vpow2.f32 %v14984_v20 }
 0xc83   : > { %v16368_v6 = vpop.eup %16367 }
 0xc84   : > { %v13693_v0 = vadd.f32 1.0, %v16368_v6 }
 0xc86   : > { %16371 = vrcp.f32 %v13693_v0 }
 0xc87   : > { %v16370_v7 = vpop.eup %16369 }
 0xc88   : > { %v13694_v13 = vadd.f32 1.0, %v16370_v7 }
 0xc8a   : > { %16373 = vrcp.f32 %v13694_v13 }
 0xc93   : > { %v16372_v23 = vpop.eup %16371 }
 0xc94   : > { %v13699_v34 = vmul.f32 %v16372_v23, %v13679_v1 }
 0xc96   : > { %v13701_v60 = vadd.f32 %v13699_v34, %v18198_v3 }
 0xc97   : > { %v16374_v61 = vpop.eup %16373 }
 0xc98   : > { %13718 = vst [vmem:[#allocation2 + $0xa0] sm:$0xff] %v13701_v60  ;;  %v13700_v4 = vmul.f32 %v16374_v61, %v13683_v45 }
 0xc9a   : > { %v13702_v33 = vadd.f32 %v13700_v4, %v18200_v48 }
 0xc9c   : > { %13719 = vst [vmem:[#allocation2 + $0xa8] sm:$0xff] %v13702_v33  ;;  %v13722_v51 = vpack.c.bf16 %v13702_v33, %v13701_v60 }
 0xc9e   : > { %13864 = vmatmul.mubr.bf16.vlgmr.msra.gmra.mxu1 %v13722_v51 }
 0xd5e   : > { %v13865_v17 = vpop.f32.mrf.mxu1 }
 0xd5f   : > { %v13866_v3 = vadd.f32 %v13865_v17, %v13744_v27 }
 0xd60   : > { %v13867_v2 = vpop.f32.mrf.mxu1 }
 0xd61   : > { %13874 = vst [vmem:[%s426_s2] sm:$0xff] %v13866_v3  ;;  %v13868_v48 = vadd.f32 %v13867_v2, %v13748_v52 }
 0xd62   : > { %v13869_v39 = vpop.f32.mrf.mxu1 }
 0xd63   : > { %13876 = vst [vmem:[%s18215_s25] sm:$0xff] %v13868_v48  ;;  %v13870_v18 = vadd.f32 %v13869_v39, %v13744_v27 }
 0xd64   : > { %v13871_v31 = vpop.f32.mrf.mxu1 }
 0xd65   : > { %13875 = vst [vmem:[%s426_s2 + $0x8] sm:$0xff] %v13870_v18  ;;  %v13872_v62 = vadd.f32 %v13871_v31, %v13748_v52 }
 0xd66   : > { %16603 = shalt.err (!%p16600_p10)
}
 0xd67   : > { %s16604_s1 = scalar_lea.hbm %s18221_s19, 256  ;;  %s16608_s24 = scalar_lea.hbm %s18312_s7, 512 }
 0xd68   : > { %p16605_p6 = scmp.ne.s32.totalorder %s18221_s19, %s16604_s1  ;;  %p16609_p13 = scmp.lt.s32.totalorder %s18221_s19, %s18312_s7 }
 0xd69   : > { %p16610_p2 = scmp.lt.s32.totalorder %s16608_s24, %s16604_s1 }
 0xd6a   : > { %p16606_p3 = pnand %p16605_p6, %p16908_p12 }
 0xd6b   : > { %p16611_p5 = por %p16610_p2, %p16609_p13 }
 0xd6c   : > { %p16607_p1 = pneg %p16606_p3 }
 0xd6e   : > { %p16612_p4 = pnand %p16611_p5, %p16607_p1 }
 0xd70   : > { %16615 = shalt.err (!%p16612_p4)
}
 0xd71   : > { %s16733_s16 = smov 128   ;;  %s16734_s22 = smov 8   ;;  %13877 = vst [vmem:[%s18215_s25 + $0x8] sm:$0xff] %v13872_v62 }
 0xd72   : > { %15169 = dma.vmem_to_hbm [thread:$0]  (%p16908_p12), %s18213_s12, 256, %s18221_s19, %s13879_s11, %s16733_s16, %s16733_s16, %s16734_s22  }
 0xd73   : > { %s13884_s4 = scalar_lea.sflag [#allocation18], %s16941_s20  ;;  %s16616_s3 = scalar_lea.vmem %s18224_s15, 256 }
 0xd74   : > { %p16617_p7 = scmp.ne.s32.totalorder %s18224_s15, %s16616_s3  ;;  %s16735_s5 = smov [#allocation17]  }
 0xd75   : > { %s16620_s1 = sshll.u32 %s16735_s5, 4  ;;  %s16621_s1 = int_to_ptr.vmem [resolvable:$false] %s16620_s1 }
 0xd76   : > { %p16618_p8 = pnand %p16617_p7, %p16908_p12  ;;  %s16622_s2 = scalar_lea.vmem %s16621_s1, 512 }
 0xd77   : > { %p16623_p11 = scmp.lt.s32.totalorder %s18224_s15, %s16621_s1  ;;  %p16624_p10 = scmp.lt.s32.totalorder %s16622_s2, %s16616_s3 }
 0xd78   : > { %p16619_p9 = pneg %p16618_p8 }
 0xd79   : > { %p16625_p6 = por %p16624_p10, %p16623_p11 }
 0xd7b   : > { %p16626_p3 = pnand %p16625_p6, %p16619_p9 }
 0xd7d   : > { %16629 = shalt.err (!%p16626_p3)
}
 0xd7e   : > { %s16630_s12 = scalar_lea.hbm %s18229_s14, 256  ;;  %s16634_s19 = scalar_lea.hbm %s18313_s8, 512 }
 0xd7f   : > { %p16631_p1 = scmp.ne.s32.totalorder %s18229_s14, %s16630_s12  ;;  %p16635_p5 = scmp.lt.s32.totalorder %s18229_s14, %s18313_s8 }
 0xd80   : > { %p16636_p4 = scmp.lt.s32.totalorder %s16634_s19, %s16630_s12 }
 0xd81   : > { %p16632_p13 = pnand %p16631_p1, %p16908_p12 }
 0xd82   : > { %p16637_p7 = por %p16636_p4, %p16635_p5 }
 0xd83   : > { %p16633_p2 = pneg %p16632_p13 }
 0xd85   : > { %p16638_p8 = pnand %p16637_p7, %p16633_p2 }
 0xd87   : > { %16641 = shalt.err (!%p16638_p8)
}
 0xd88   : > { %15170 = dma.vmem_to_hbm [thread:$0]  (%p16908_p12), %s18224_s15, 256, %s18229_s14, %s13884_s4, %s16733_s16, %s16733_s16, %s16734_s22  }
 0xd89 PF: > { %s13932_s24 = sand.u32 1, %s16692_s27   ;;  %p18343_p9 = scmp.ge.s32.totalorder %s16712_s10, 2 }
 0xd8a   : > { %s13933_s23 = scalar_lea.sflag [#allocation6], %s13932_s24 }
 0xd8b   : > { %p15197_p11 = pnand %p18343_p9, %p16915_p0 }
 0xd8d   : > { %p15198_p10 = pneg %p15197_p11 }
 0xd8f   : > { %16683 = dma.done.wait (%p15198_p10), %s13933_s23, 256  }
 0xd90   : > { %16685 = vsyncadd (%p15198_p10), %s13933_s23, 4294967040  ;;  %s13942_s30 = scalar_lea.sflag [#allocation18], %s13932_s24 }
 0xd91   : > { %16687 = dma.done.wait (%p15198_p10), %s13942_s30, 256  }
 0xd92   : > { %16689 = vsyncadd (%p15198_p10), %s13942_s30, 4294967040  ;;  %s31_s10 = sadd.s32 1, %s16712_s10   ;;  %s18344_s27 = smov %s16696_s28 }
 0xd93   : > { %p28_p6 = scmp.ge.s32.totalorder %s31_s10, 4   ;;  %s18345_s28 = smov %s16700_s29 }
 0xd94   : > { %s18346_s29 = smov %s16913_s21  ;;  %s18347_s30 = smov %s16708_s9 }
 0xd95   : > { %s18348_s9 = smov %s18350_s26  ;;  %30 = sbr.rel (!%p28_p6) target bundleno = 17 (0x11), region = 149 }
 0xd9a   :  { %13947 = vsyncpa [#allocation5], 1 }
 0xd9b   :  { %13949 = vsyncpa [#allocation5 + $0x1], 1 }
 0xd9c   :  { %13950 = vsyncpa [#allocation8], 1 }
 0xd9d   :  { %13951 = vsyncpa [#allocation11], 1 }
 0xd9e   :  { %13952 = vsyncpa [#allocation14], 1 }
 0xd9f   :  { %13953 = vsyncpa [#allocation6], 1 }
 0xda0   :  { %13955 = vsyncpa [#allocation6 + $0x1], 1 }
 0xda1   :  { %13956 = vsyncpa [#allocation18], 1 }
 0xda2   :  { %13958 = vsyncpa [#allocation18 + $0x1], 1 }

</bundles_post_ra>
